<compile_context>
chip_gen: v7x
topology: tpu7x:2x2x1
jax: 0.10.0
libtpu: 0.0.40
codegen_flags: <defaults>
</compile_context>

<pallas_src>
import functools

import jax
import jax.numpy as jnp
from jax.experimental import pallas as pl
from jax.experimental.pallas import tpu as pltpu

CNN_FEAT = 192 * 5 * 5          # 4800
SIFT_FEAT = 1152
IN_FEAT = CNN_FEAT + SIFT_FEAT  # 5952  (divisible by 16 -> no K padding needed)
H1 = 2976
H2 = 1000
NUM_CLASSES = 10

# Padded ("hardware friendly") sizes.
H1_PAD = 3072    # 2976 -> 24 * 128
H2_PAD = 1024    # 1000 ->  8 * 128
OUT_PAD = 128    # 10   ->  1 * 128

L1_TN = 512                     # w1 tile 5952x512 bf16 = 6.1 MB / buffer
VMEM_LIMIT = 40 * 1024 * 1024   # headroom on v5e/v6e (128 MiB) and v7x (64 MiB)


def _pad2d(x, rows, cols, fill=0.0):
    r, c = x.shape
    return jnp.pad(x, ((0, rows - r), (0, cols - c)), constant_values=fill)


def _pad1d(x, n, fill=0.0):
    return jnp.pad(x, (0, n - x.shape[0]), constant_values=fill)


def _round_up(n, m):
    return ((n + m - 1) // m) * m


# ----------------------------------------------------------------------------
# Fused 3-layer MLP head kernel.
# Grid: (H1_PAD // L1_TN,)  -- one step per tile of the hidden-1 dimension.
#   step j:  h1_j = relu(x @ w1[:, jT:(j+1)T] + b1_j)        (bf16 in, fp32 acc)
#            acc += h1_j(bf16) @ w2[jT:(j+1)T, :]            (fp32 scratch)
#   last j:  h2 = relu(acc + b2);  out = h2(bf16) @ w3 + b3
# x, w3, b2, b3 and the output are resident across the grid; w1/w2 tiles are
# streamed and double-buffered by the BlockSpec pipeline.
# ----------------------------------------------------------------------------
def _fused_mlp_kernel(x_ref, w1_ref, b1_ref, w2_ref, b2_ref, w3_ref, b3_ref,
                      o_ref, acc_ref):
    j = pl.program_id(0)

    @pl.when(j == 0)
    def _():
        acc_ref[...] = jnp.zeros_like(acc_ref)

    h1 = jnp.dot(x_ref[...], w1_ref[...],
                 preferred_element_type=jnp.float32) + b1_ref[...]
    h1 = jnp.maximum(h1, 0.0)
    acc_ref[...] += jnp.dot(h1.astype(jnp.bfloat16), w2_ref[...],
                            preferred_element_type=jnp.float32)

    @pl.when(j == pl.num_programs(0) - 1)
    def _():
        h2 = jnp.maximum(acc_ref[...] + b2_ref[...], 0.0)
        o_ref[...] = (
            jnp.dot(h2.astype(jnp.bfloat16), w3_ref[...],
                    preferred_element_type=jnp.float32) + b3_ref[...]
        ).astype(o_ref.dtype)


def fused_mlp(x_bf16, w1, b1, w2, b2, w3, b3, *, tn=L1_TN):
    M, K = x_bf16.shape
    assert K == IN_FEAT and w1.shape == (IN_FEAT, H1_PAD)
    assert H1_PAD % tn == 0
    n_steps = H1_PAD // tn
    return pl.pallas_call(
        _fused_mlp_kernel,
        out_shape=jax.ShapeDtypeStruct((M, OUT_PAD), jnp.float32),
        grid_spec=pltpu.PrefetchScalarGridSpec(
            num_scalar_prefetch=0,
            grid=(n_steps,),
            in_specs=[
                pl.BlockSpec((M, K), lambda j: (0, 0)),        # x: resident
                pl.BlockSpec((K, tn), lambda j: (0, j)),       # w1 column tile
                pl.BlockSpec((1, tn), lambda j: (0, j)),       # b1 tile
                pl.BlockSpec((tn, H2_PAD), lambda j: (j, 0)),  # w2 row tile
                pl.BlockSpec((1, H2_PAD), lambda j: (0, 0)),   # b2: resident
                pl.BlockSpec((H2_PAD, OUT_PAD), lambda j: (0, 0)),  # w3: resident
                pl.BlockSpec((1, OUT_PAD), lambda j: (0, 0)),  # b3: resident
            ],
            out_specs=pl.BlockSpec((M, OUT_PAD), lambda j: (0, 0)),
            scratch_shapes=[pltpu.VMEM((M, H2_PAD), jnp.float32)],
        ),
        compiler_params=pltpu.CompilerParams(
            dimension_semantics=("arbitrary",),   # reduction axis (accumulator)
            vmem_limit_bytes=VMEM_LIMIT,
        ),
    )(x_bf16, w1, b1, w2, b2, w3, b3)


# ----------------------------------------------------------------------------
# Parameters (deterministic, mirrors the shapes in Classifier.__init__)
# ----------------------------------------------------------------------------
def init_params(key):
    ks = jax.random.split(key, 10)
    return {
        # BatchNorm1d(5952) running stats / affine (non-trivial, to exercise fold)
        "bn_gamma": 1.0 + 0.3 * jax.random.normal(ks[0], (IN_FEAT,), jnp.float32),
        "bn_beta": 0.1 * jax.random.normal(ks[1], (IN_FEAT,), jnp.float32),
        "bn_mean": 0.1 * jax.random.normal(ks[2], (IN_FEAT,), jnp.float32),
        "bn_var": 0.7 + 0.6 * jax.random.uniform(ks[3], (IN_FEAT,), jnp.float32),
        # Linear(5952, 2976) — stored (in, out), i.e. PyTorch weight transposed
        "w1": jax.random.normal(ks[4], (IN_FEAT, H1), jnp.float32) * 0.02,
        "b1": jax.random.normal(ks[5], (H1,), jnp.float32) * 0.02,
        # Linear(2976, 1000)
        "w2": jax.random.normal(ks[6], (H1, H2), jnp.float32) * 0.02,
        "b2": jax.random.normal(ks[7], (H2,), jnp.float32) * 0.02,
        # Linear(1000, 10)
        "w3": jax.random.normal(ks[8], (H2, NUM_CLASSES), jnp.float32) * 0.02,
        "b3": jax.random.normal(ks[9], (NUM_CLASSES,), jnp.float32) * 0.02,
    }


def prepare_params(p, eps=1e-5):
    """Fold eval-mode BatchNorm into (w1, b1), pad N dims, cast weights to bf16."""
    scale = p["bn_gamma"] * jax.lax.rsqrt(p["bn_var"] + eps)   # (IN_FEAT,)
    shift = p["bn_beta"] - p["bn_mean"] * scale                # (IN_FEAT,)
    w1f = scale[:, None] * p["w1"]                             # BN * W1
    b1f = p["b1"] + shift @ p["w1"]
    return {
        # K (5952) is NOT padded — it already satisfies layout requirements.
        "w1": _pad2d(w1f, IN_FEAT, H1_PAD).astype(jnp.bfloat16),
        "b1": _pad1d(b1f, H1_PAD).reshape(1, H1_PAD).astype(jnp.float32),
        "w2": _pad2d(p["w2"], H1_PAD, H2_PAD).astype(jnp.bfloat16),
        "b2": _pad1d(p["b2"], H2_PAD).reshape(1, H2_PAD).astype(jnp.float32),
        "w3": _pad2d(p["w3"], H2_PAD, OUT_PAD).astype(jnp.bfloat16),
        "b3": _pad1d(p["b3"], OUT_PAD).reshape(1, OUT_PAD).astype(jnp.float32),
    }


# ----------------------------------------------------------------------------
# Forward pass of the classifier head
# ----------------------------------------------------------------------------
@jax.jit
def classifier_forward(cnn_features, sift_features, pp):
    B = cnn_features.shape[0]
    # torch.cat([cnn_features, sift_features], dim=1)
    feats = jnp.concatenate(
        [cnn_features.reshape(B, CNN_FEAT), sift_features], axis=1
    )
    m_pad = _round_up(max(B, 16), 16)   # bf16 sublane tile = 16
    # Cast once here (not per grid step in-kernel); accumulation stays fp32.
    x = _pad2d(feats.astype(jnp.float32), m_pad, IN_FEAT).astype(jnp.bfloat16)

    # TODO(synk): Cnn() backbone / PIL preprocess / dense-SIFT are external and
    # not translatable; Dropout(0.2) is identity at inference; eval-mode
    # BatchNorm1d is folded into w1/b1 in prepare_params().
    out = fused_mlp(x, pp["w1"], pp["b1"], pp["w2"], pp["b2"], pp["w3"], pp["b3"])
    return out[:B, :NUM_CLASSES]


# ----------------------------------------------------------------------------
# Pure-JAX references
# ----------------------------------------------------------------------------
def classifier_ref_fp32(cnn_features, sift_features, p, eps=1e-5):
    """Exact (fp32) semantics of the PyTorch module (eval mode)."""
    B = cnn_features.shape[0]
    x = jnp.concatenate(
        [cnn_features.reshape(B, CNN_FEAT), sift_features], axis=1
    ).astype(jnp.float32)
    x = (x - p["bn_mean"]) * jax.lax.rsqrt(p["bn_var"] + eps) * p["bn_gamma"] + p["bn_beta"]
    x = jnp.maximum(x @ p["w1"] + p["b1"], 0.0)
    x = jnp.maximum(x @ p["w2"] + p["b2"], 0.0)
    return x @ p["w3"] + p["b3"]


def classifier_ref_bf16(cnn_features, sift_features, pp):
    """Mirrors the kernel numerics (bf16 weights / casts, fp32 accumulation)."""
    B = cnn_features.shape[0]
    feats = jnp.concatenate(
        [cnn_features.reshape(B, CNN_FEAT), sift_features], axis=1
    )
    m_pad = _round_up(max(B, 16), 16)
    x = _pad2d(feats.astype(jnp.float32), m_pad, IN_FEAT).astype(jnp.bfloat16)

    def lin(xx, w, b, relu):
        y = jnp.dot(xx.astype(jnp.bfloat16), w,
                    preferred_element_type=jnp.float32) + b
        return jnp.maximum(y, 0.0) if relu else y

    h1 = lin(x, pp["w1"], pp["b1"], True)
    h2 = lin(h1, pp["w2"], pp["b2"], True)
    o = lin(h2, pp["w3"], pp["b3"], False)
    return o[:B, :NUM_CLASSES]


if __name__ == "__main__":
    key = jax.random.PRNGKey(0)
    kp, kc, ks = jax.random.split(key, 3)

    B = 2
    # cnn_features as the CNN would emit them: (B, 192, 5, 5)
    cnn_features = jax.random.normal(kc, (B, 192, 5, 5), jnp.float32)
    sift_features = jax.random.normal(ks, (B, SIFT_FEAT), jnp.float32)

    params = init_params(kp)
    pp = prepare_params(params)

    out = jax.block_until_ready(classifier_forward(cnn_features, sift_features, pp))
    assert out.shape == (B, NUM_CLASSES), out.shape

    # Tight check against a pure-JAX model of the exact kernel numerics.
    ref_bf16 = classifier_ref_bf16(cnn_features, sift_features, pp)
    err_bf16 = float(jnp.max(jnp.abs(out - ref_bf16)))
    assert jnp.allclose(out, ref_bf16, atol=1e-2, rtol=1e-2), err_bf16

    # Loose sanity check against full-fp32 module semantics (bf16 weight
    # rounding accounts for the residual difference).
    ref_fp32 = classifier_ref_fp32(cnn_features, sift_features, params)
    err_fp32 = float(jnp.max(jnp.abs(out - ref_fp32)))
    assert jnp.allclose(out, ref_fp32, atol=0.15, rtol=0.05), err_fp32

    print("KERNEL_OK")
</pallas_src>

<mosaic_0001>
module attributes {stable_mosaic.version = 11 : i64} {
  func.func @_fused_mlp_kernel(%arg0: i32, %arg1: memref<16x5952xbf16, #tpu.memory_space<vmem>>, %arg2: memref<5952x512xbf16, #tpu.memory_space<vmem>>, %arg3: memref<1x512xf32, #tpu.memory_space<vmem>>, %arg4: memref<512x1024xbf16, #tpu.memory_space<vmem>>, %arg5: memref<1x1024xf32, #tpu.memory_space<vmem>>, %arg6: memref<1024x128xbf16, #tpu.memory_space<vmem>>, %arg7: memref<1x128xf32, #tpu.memory_space<vmem>>, %arg8: memref<16x128xf32, #tpu.memory_space<vmem>>, %arg9: memref<16x1024xf32, #tpu.memory_space<vmem>>) attributes {dimension_semantics = [#tpu.dimension_semantics<arbitrary>], iteration_bounds = array<i64: 6>, scalar_prefetch = 0 : i64, scratch_operands = 1 : i64, tpu.core_type = #tpu.core_type<tc>, window_params = [{pipeline_mode = #tpu.pipeline_mode<synchronous>, transform_indices = @transform_0, window_bounds = array<i64: 16, 5952>}, {transform_indices = @transform_1, window_bounds = array<i64: 5952, 512>}, {transform_indices = @transform_2, window_bounds = array<i64: 1, 512>}, {transform_indices = @transform_3, window_bounds = array<i64: 512, 1024>}, {pipeline_mode = #tpu.pipeline_mode<synchronous>, transform_indices = @transform_4, window_bounds = array<i64: 1, 1024>}, {pipeline_mode = #tpu.pipeline_mode<synchronous>, transform_indices = @transform_5, window_bounds = array<i64: 1024, 128>}, {pipeline_mode = #tpu.pipeline_mode<synchronous>, transform_indices = @transform_6, window_bounds = array<i64: 1, 128>}, {pipeline_mode = #tpu.pipeline_mode<synchronous>, transform_indices = @transform_7, window_bounds = array<i64: 16, 128>}]} {
    %c0_i32 = arith.constant 0 : i32
    %0 = arith.cmpi eq, %arg0, %c0_i32 : i32
    %1 = arith.extui %0 : i1 to i32
    %c0_i32_0 = arith.constant 0 : i32
    %2 = arith.cmpi ne, %1, %c0_i32_0 : i32
    scf.if %2 {
      %cst_15 = arith.constant 0.000000e+00 : f32
      %20 = vector.broadcast %cst_15 : f32 to vector<16x1024xf32>
      %c0_16 = arith.constant 0 : index
      %c0_17 = arith.constant 0 : index
      %21 = vector.load %arg9[%c0_16, %c0_17] : memref<16x1024xf32, #tpu.memory_space<vmem>>, vector<16x1024xf32>
      tpu.vector_store %arg9[%c0_16, %c0_17], %20 {strides = array<i32>} : memref<16x1024xf32, #tpu.memory_space<vmem>>, vector<16x1024xf32>,
    } else {
    }
    %c0 = arith.constant 0 : index
    %c0_1 = arith.constant 0 : index
    %3 = vector.load %arg1[%c0, %c0_1] : memref<16x5952xbf16, #tpu.memory_space<vmem>>, vector<16x5952xbf16>
    %c0_2 = arith.constant 0 : index
    %c0_3 = arith.constant 0 : index
    %4 = vector.load %arg2[%c0_2, %c0_3] : memref<5952x512xbf16, #tpu.memory_space<vmem>>, vector<5952x512xbf16>
    %cst = arith.constant dense<0.000000e+00> : vector<16x512xf32>
    %5 = tpu.matmul %3, %4, %cst {dimension_numbers = #tpu.dot_dimension_numbers<[1], [0], [0], [1], [0, 0, 1, 1], [], []>} : vector<16x5952xbf16>, vector<5952x512xbf16>, vector<16x512xf32> -> vector<16x512xf32>
    %c0_4 = arith.constant 0 : index
    %c0_5 = arith.constant 0 : index
    %6 = vector.load %arg3[%c0_4, %c0_5] : memref<1x512xf32, #tpu.memory_space<vmem>>, vector<1x512xf32>
    %7 = vector.broadcast %6 : vector<1x512xf32> to vector<16x512xf32>
    %8 = arith.addf %5, %7 : vector<16x512xf32>
    %cst_6 = arith.constant 0.000000e+00 : f32
    %9 = vector.broadcast %cst_6 : f32 to vector<16x512xf32>
    %10 = arith.maximumf %8, %9 : vector<16x512xf32>
    %c0_7 = arith.constant 0 : index
    %c0_8 = arith.constant 0 : index
    %11 = vector.load %arg9[%c0_7, %c0_8] : memref<16x1024xf32, #tpu.memory_space<vmem>>, vector<16x1024xf32>
    %12 = arith.truncf %10 : vector<16x512xf32> to vector<16x512xbf16>
    %c0_9 = arith.constant 0 : index
    %c0_10 = arith.constant 0 : index
    %13 = vector.load %arg4[%c0_9, %c0_10] : memref<512x1024xbf16, #tpu.memory_space<vmem>>, vector<512x1024xbf16>
    %cst_11 = arith.constant dense<0.000000e+00> : vector<16x1024xf32>
    %14 = tpu.matmul %12, %13, %cst_11 {dimension_numbers = #tpu.dot_dimension_numbers<[1], [0], [0], [1], [0, 0, 1, 1], [], []>} : vector<16x512xbf16>, vector<512x1024xbf16>, vector<16x1024xf32> -> vector<16x1024xf32>
    %15 = arith.addf %11, %14 : vector<16x1024xf32>
    %c0_12 = arith.constant 0 : index
    %c0_13 = arith.constant 0 : index
    %16 = vector.load %arg9[%c0_12, %c0_13] : memref<16x1024xf32, #tpu.memory_space<vmem>>, vector<16x1024xf32>
    tpu.vector_store %arg9[%c0_12, %c0_13], %15 {strides = array<i32>} : memref<16x1024xf32, #tpu.memory_space<vmem>>, vector<16x1024xf32>,
    %c5_i32 = arith.constant 5 : i32
    %17 = arith.cmpi eq, %arg0, %c5_i32 : i32
    %18 = arith.extui %17 : i1 to i32
    %c0_i32_14 = arith.constant 0 : i32
    %19 = arith.cmpi ne, %18, %c0_i32_14 : i32
    scf.if %19 {
      %c0_15 = arith.constant 0 : index
      %c0_16 = arith.constant 0 : index
      %20 = vector.load %arg9[%c0_15, %c0_16] : memref<16x1024xf32, #tpu.memory_space<vmem>>, vector<16x1024xf32>
      %c0_17 = arith.constant 0 : index
      %c0_18 = arith.constant 0 : index
      %21 = vector.load %arg5[%c0_17, %c0_18] : memref<1x1024xf32, #tpu.memory_space<vmem>>, vector<1x1024xf32>
      %22 = vector.broadcast %21 : vector<1x1024xf32> to vector<16x1024xf32>
      %23 = arith.addf %20, %22 : vector<16x1024xf32>
      %cst_19 = arith.constant 0.000000e+00 : f32
      %24 = vector.broadcast %cst_19 : f32 to vector<16x1024xf32>
      %25 = arith.maximumf %23, %24 : vector<16x1024xf32>
      %26 = arith.truncf %25 : vector<16x1024xf32> to vector<16x1024xbf16>
      %c0_20 = arith.constant 0 : index
      %c0_21 = arith.constant 0 : index
      %27 = vector.load %arg6[%c0_20, %c0_21] : memref<1024x128xbf16, #tpu.memory_space<vmem>>, vector<1024x128xbf16>
      %cst_22 = arith.constant dense<0.000000e+00> : vector<16x128xf32>
      %28 = tpu.matmul %26, %27, %cst_22 {dimension_numbers = #tpu.dot_dimension_numbers<[1], [0], [0], [1], [0, 0, 1, 1], [], []>} : vector<16x1024xbf16>, vector<1024x128xbf16>, vector<16x128xf32> -> vector<16x128xf32>
      %c0_23 = arith.constant 0 : index
      %c0_24 = arith.constant 0 : index
      %29 = vector.load %arg7[%c0_23, %c0_24] : memref<1x128xf32, #tpu.memory_space<vmem>>, vector<1x128xf32>
      %30 = vector.broadcast %29 : vector<1x128xf32> to vector<16x128xf32>
      %31 = arith.addf %28, %30 : vector<16x128xf32>
      %c0_25 = arith.constant 0 : index
      %c0_26 = arith.constant 0 : index
      %32 = vector.load %arg8[%c0_25, %c0_26] : memref<16x128xf32, #tpu.memory_space<vmem>>, vector<16x128xf32>
      tpu.vector_store %arg8[%c0_25, %c0_26], %31 {strides = array<i32>} : memref<16x128xf32, #tpu.memory_space<vmem>>, vector<16x128xf32>,
    } else {
    }
    return
  }
  func.func @transform_0(%arg0: i32) -> (i32, i32) {
    %c0_i32 = arith.constant 0 : i32
    %c0_i32_0 = arith.constant 0 : i32
    %c0_i32_1 = arith.constant 0 : i32
    return %c0_i32, %c0_i32_0 : i32, i32
  }
  func.func @transform_1(%arg0: i32) -> (i32, i32) {
    %c0_i32 = arith.constant 0 : i32
    %c0_i32_0 = arith.constant 0 : i32
    return %c0_i32, %arg0 : i32, i32
  }
  func.func @transform_2(%arg0: i32) -> (i32, i32) {
    %c0_i32 = arith.constant 0 : i32
    %c0_i32_0 = arith.constant 0 : i32
    return %c0_i32, %arg0 : i32, i32
  }
  func.func @transform_3(%arg0: i32) -> (i32, i32) {
    %c0_i32 = arith.constant 0 : i32
    %c0_i32_0 = arith.constant 0 : i32
    return %arg0, %c0_i32 : i32, i32
  }
  func.func @transform_4(%arg0: i32) -> (i32, i32) {
    %c0_i32 = arith.constant 0 : i32
    %c0_i32_0 = arith.constant 0 : i32
    %c0_i32_1 = arith.constant 0 : i32
    return %c0_i32, %c0_i32_0 : i32, i32
  }
  func.func @transform_5(%arg0: i32) -> (i32, i32) {
    %c0_i32 = arith.constant 0 : i32
    %c0_i32_0 = arith.constant 0 : i32
    %c0_i32_1 = arith.constant 0 : i32
    return %c0_i32, %c0_i32_0 : i32, i32
  }
  func.func @transform_6(%arg0: i32) -> (i32, i32) {
    %c0_i32 = arith.constant 0 : i32
    %c0_i32_0 = arith.constant 0 : i32
    %c0_i32_1 = arith.constant 0 : i32
    return %c0_i32, %c0_i32_0 : i32, i32
  }
  func.func @transform_7(%arg0: i32) -> (i32, i32) {
    %c0_i32 = arith.constant 0 : i32
    %c0_i32_0 = arith.constant 0 : i32
    %c0_i32_1 = arith.constant 0 : i32
    return %c0_i32, %c0_i32_0 : i32, i32
  }
}

</mosaic_0001>

<bundles_post_ra>
// kernel: classifier_forward.1
= control target key start
LH: loop header
LB: loop body
LE: loop exit
PB: predicated region body
PF: predicated region fallthrough
CT: control target
= control target key end

     0   :  { %s21727_s0 = inlined_call_operand.vmem [shape: bf16[16,5952], index: 0, kind: input, shape index: {}]   ;;  %s21728_s1 = inlined_call_operand.hbm [shape: bf16[5952,3072], index: 1, kind: input, shape index: {}]   ;;  %s21729_s2 = inlined_call_operand.hbm [shape: f32[1,3072], index: 2, kind: input, shape index: {}]   ;;  %s21730_s3 = inlined_call_operand.hbm [shape: bf16[3072,1024], index: 3, kind: input, shape index: {}]   ;;  %s21731_s4 = inlined_call_operand.hbm [shape: f32[1,1024], index: 4, kind: input, shape index: {}]   ;;  %s21732_s5 = inlined_call_operand.hbm [shape: bf16[1024,128], index: 5, kind: input, shape index: {}]   ;;  %s21733_s6 = inlined_call_operand.hbm [shape: f32[1,128], index: 6, kind: input, shape index: {}]   ;;  %s21734_s7 = inlined_call_operand.vmem [shape: f32[16,128], index: 7, kind: output, shape index: {}]  }
   0x1   :  { %21749 = sst [smem:[#allocation20_spill]] %s21729_s2 }
   0x2   :  { %21750 = sst [smem:[#allocation21_spill]] %s21731_s4 }
   0x3   :  { %12 = vsyncpa [#allocation4], 0 }
   0x4   :  { %14 = vsyncpa [#allocation4 + $0x1], 0 }
   0x5   :  { %15 = vsyncpa [#allocation6], 0 }
   0x6   :  { %17 = vsyncpa [#allocation6 + $0x1], 0 }
   0x7   :  { %18 = vsyncpa [#allocation9], 0 }
   0x8   :  { %19 = vsyncpa [#allocation12], 0  ;;  %s19480_s24 = smov 0   ;;  %s19482_s25 = smov 0  }
   0x9   :  { %s19484_s26 = smov 0   ;;  %s19486_s27 = smov 0  }
   0xa LB: > { %21751 = sst [smem:[#allocation17_spill]] %s19419_s26  ;;  %s19499_s28 = sadd.s32 4294967295, %s19423_s27   ;;  %s19423_s27 = sphi %s19486_s27, %s21778_s27   ;;  %s19419_s26 = sphi %s19484_s26, %s21780_s26   ;;  %s19415_s25 = sphi %s19482_s25, %s21782_s25   ;;  %s19411_s24 = sphi %s19480_s24, %s21781_s24  }
   0xb   : > { %p66_p0 = scmp.ne.s32.totalorder %s19415_s25, %s19411_s24  ;;  %p21735_p1 = scmp.eq.s32.totalorder %s19499_s28, 0 }
   0xc   : > { %p14564_p2 = scmp.ge.s32.totalorder %s19423_s27, 1  ;;  %p213_p3 = scmp.lt.s32.totalorder %s19423_s27, 7 }
   0xd   : > { %p19508_p5 = por %p21735_p1, %p66_p0  ;;  %s19425_s8 = smov [#allocation8]  }
   0xe   : > { %p19512_p6 = pnand %p14564_p2, %p213_p3  ;;  %s229_s9 = sshll.u32 %s19425_s8, 4  ;;  %s230_s9 = int_to_ptr.vmem [resolvable:$true] %s229_s9 }
   0xf   : > { %s21752_s29 = scalar_select %p19508_p5, 1, 0 }
  0x10   : > { %s21753_s30 = scalar_select %p19512_p6, 1, 0 }
  0x11   : > { %p16766_p7 = pneg %p19512_p6  ;;  %s19519_s10 = sadd.s32 1, %s19423_s27  }
  0x12   : > { %21754 = sst [smem:[#allocation18_spill]] %s19519_s10  ;;  %s50_s12 = ssub.s32 %s19423_s27, %s19519_s10 }
  0x13   : > { %p19523_p8 = pnand %p16766_p7, %p21735_p1  ;;  %p19529_p9 = scmp.eq.s32.totalorder %s50_s12, 0 }
  0x14   : > { %s53_s14 = sadd.s32 1, %s19419_s26  ;;  %s21757_s4 = sld [smem:[#allocation21_spill]] }
  0x15   : > { %s21755_s11 = scalar_select %p19523_p8, 1, 0 }
  0x16   : > { %s21756_s13 = scalar_select %p19529_p9, 1, 0 }
  0x17   : > { %p19544_p12 = pneg %p19523_p8 }
  0x19   : > { %s21758_s20 = scalar_select %p19544_p12, 1, 0 }
  0x1a   : > { %s19203_s17 = scalar_lea.hbm %s21757_s4, 128 }
  0x1b   : > { %p19204_p11 = scmp.ne.s32.totalorder %s21757_s4, %s19203_s17  ;;  %p19210_p2 = scmp.lt.u32.totalorder %s19203_s17, %s21757_s4 }
  0x1d   : > { %p19206_p13 = pnand %p19544_p12, %p19204_p11 }
  0x1f   : > { %p19207_p0 = pneg %p19206_p13 }
  0x21   : > { %p19212_p3 = pnand %p19210_p2, %p19207_p0 }
  0x23   : > { %19215 = shalt.err (!%p19212_p3)
}
  0x24   : > { %s19216_s23 = scalar_lea.vmem %s230_s9, 128  ;;  %p19224_p10 = scmp.lt.s32.totalorder %s230_s9, %s230_s9 }
  0x25   : > { %p19217_p7 = scmp.ne.s32.totalorder %s230_s9, %s19216_s23  ;;  %p19225_p5 = scmp.lt.s32.totalorder %s19216_s23, %s19216_s23 }
  0x27   : > { %p19219_p4 = pnand %p19217_p7, %p19544_p12  ;;  %p19226_p6 = por %p19225_p5, %p19224_p10 }
  0x29   : > { %p19220_p1 = pneg %p19219_p4 }
  0x2b   : > { %p19227_p9 = pnand %p19226_p6, %p19220_p1 }
  0x2d   : > { %19230 = shalt.err (!%p19227_p9)
}
  0x2e   : > { %16769 = dma.hbm_to_vmem [thread:$0]  (!%p19523_p8), %s21757_s4, 128, %s230_s9, [#allocation9]  }
  0x2f   : > { %p21759_p4 = scmp.ne.s32.totalorder %s21756_s13, 0  ;;  %p61_p1 = scmp.eq.s32.totalorder %s19423_s27, 0 }
  0x30   : > { %p16789_p5 = scmp.lt.s32.totalorder %s19423_s27, 6  ;;  %s19568_s15 = sand.u32 1, %s19419_s26  }
  0x31   : > { %s19563_s12 = scalar_select %p21759_p4, %s19419_s26, %s53_s14  }
  0x32   : > { %s285_s16 = sand.u32 1, %s19423_s27   ;;  %p21761_p6 = scmp.ne.s32.totalorder %s19419_s26, %s19415_s25 }
  0x33   : > { %21760 = sst [smem:[#allocation19_spill]] %s19563_s12  ;;  %s14571_s18 = sshll.u32 %s19568_s15, 2 }
  0x34   : > { %p62_p9 = por %p61_p1, %p21761_p6  ;;  %s16447_s9 = sshll.u32 %s19423_s27, 6 }
  0x35   : > { %s289_s13 = scalar_lea.vmem [#allocation5], %s14571_s18  ;;  %s21763_s2 = sld [smem:[#allocation20_spill]] }
  0x36   : > { %p19576_p10 = pnand %p16789_p5, %p62_p9  ;;  %s297_s14 = sshll.u32 %s289_s13, 4  ;;  %s19586_s14 = int_to_ptr.vmem [resolvable:$true] %s297_s14 }
  0x37   : > { %s19589_s8 = scalar_lea.sflag [#allocation6], %s285_s16 }
  0x38   : > { %s21762_s19 = scalar_select %p19576_p10, 1, 0 }
  0x39   : > { %p19595_p13 = pneg %p19576_p10 }
  0x3b   : > { %s19584_s23 = scalar_lea.hbm %s21763_s2, %s16447_s9  ;;  %s19236_s21 = scalar_lea.hbm %s21763_s2, 384 }
  0x3c   : > { %s19231_s17 = scalar_lea.hbm %s19584_s23, 64  ;;  %p19237_p3 = scmp.lt.u32.totalorder %s19584_s23, %s21763_s2 }
  0x3d   : > { %p19232_p11 = scmp.ne.s32.totalorder %s19584_s23, %s19231_s17  ;;  %p19238_p7 = scmp.lt.u32.totalorder %s19236_s21, %s19231_s17 }
  0x3e   : > { %s21764_s18 = scalar_select %p19595_p13, 1, 0 }
  0x3f   : > { %p19234_p0 = pnand %p19595_p13, %p19232_p11  ;;  %p19239_p4 = por %p19238_p7, %p19237_p3 }
  0x40   : > { %p19240_p1 = scmp.lt.u32.totalorder %s19231_s17, %s19584_s23 }
  0x41   : > { %p19235_p2 = pneg %p19234_p0 }
  0x42   : > { %p19241_p5 = por %p19240_p1, %p19239_p4 }
  0x44   : > { %p19242_p6 = pnand %p19241_p5, %p19235_p2 }
  0x46   : > { %19245 = shalt.err (!%p19242_p6)
}
  0x47   : > { %s19246_s16 = scalar_lea.vmem %s19586_s14, 64  ;;  %s19426_s9 = smov [#allocation5]  }
  0x48   : > { %p19247_p9 = scmp.ne.s32.totalorder %s19586_s14, %s19246_s16  ;;  %s19251_s13 = sshll.u32 %s19426_s9, 4  ;;  %s19252_s13 = int_to_ptr.vmem [resolvable:$false] %s19251_s13 }
  0x49   : > { %s19253_s4 = scalar_lea.vmem %s19252_s13, 128  ;;  %p19254_p8 = scmp.lt.s32.totalorder %s19586_s14, %s19252_s13 }
  0x4a   : > { %p19249_p11 = pnand %p19247_p9, %p19595_p13  ;;  %p19255_p12 = scmp.lt.s32.totalorder %s19253_s4, %s19246_s16 }
  0x4c   : > { %p19250_p0 = pneg %p19249_p11  ;;  %p19256_p3 = por %p19255_p12, %p19254_p8 }
  0x4e   : > { %p19257_p7 = pnand %p19256_p3, %p19250_p0 }
  0x50   : > { %19260 = shalt.err (!%p19257_p7)
}
  0x51   : > { %16782 = dma.hbm_to_vmem [thread:$0]  (!%p19576_p10), %s19584_s23, 64, %s19586_s14, %s19589_s8  }
  0x52   : > { %s19427_s17 = smov [#allocation10]   ;;  %s19261_s9 = scalar_lea.hbm %s21732_s5, 8192 }
  0x53   : > { %s239_s21 = sshll.u32 %s19427_s17, 4  ;;  %p19262_p8 = scmp.ne.s32.totalorder %s21732_s5, %s19261_s9  ;;  %s240_s21 = int_to_ptr.vmem [resolvable:$true] %s239_s21 }
  0x54   : > { %p21765_p12 = scmp.ne.s32.totalorder %s21758_s20, 0  ;;  %p19268_p1 = scmp.lt.u32.totalorder %s19261_s9, %s21732_s5 }
  0x56   : > { %p19264_p2 = pnand %p19262_p8, %p21765_p12 }
  0x58   : > { %p19265_p4 = pneg %p19264_p2 }
  0x5a   : > { %p19270_p5 = pnand %p19268_p1, %p19265_p4 }
  0x5c   : > { %19273 = shalt.err (!%p19270_p5)
}
  0x5d   : > { %s19274_s14 = scalar_lea.vmem %s240_s21, 8192  ;;  %p19282_p0 = scmp.lt.s32.totalorder %s240_s21, %s240_s21 }
  0x5e   : > { %p19275_p6 = scmp.ne.s32.totalorder %s240_s21, %s19274_s14  ;;  %p19283_p3 = scmp.lt.s32.totalorder %s19274_s14, %s19274_s14 }
  0x60   : > { %p19277_p9 = pnand %p19275_p6, %p21765_p12  ;;  %p19284_p7 = por %p19283_p3, %p19282_p0 }
  0x62   : > { %p19278_p11 = pneg %p19277_p9 }
  0x64   : > { %p19285_p10 = pnand %p19284_p7, %p19278_p11 }
  0x66   : > { %19288 = shalt.err (!%p19285_p10)
}
  0x67   : > { %s19428_s2 = smov 64   ;;  %s19429_s23 = smov 4  }
  0x68   : > { %p21766_p8 = scmp.ne.s32.totalorder %s21755_s11, 0  ;;  %s19430_s22 = smov [#allocation11]  }
  0x69   : > { %s253_s9 = sshll.u32 %s19430_s22, 4  ;;  %s19289_s4 = scalar_lea.hbm %s21733_s6, 16  ;;  %s254_s9 = int_to_ptr.vmem [resolvable:$true] %s253_s9 }
  0x6a   : > { %16772 = dma.hbm_to_vmem [thread:$0]  (!%p21766_p8), %s21732_s5, 8192, %s240_s21, [#allocation9], %s19428_s2, %s19428_s2, %s19429_s23  }
  0x6b   : > { %p19290_p10 = scmp.ne.s32.totalorder %s21733_s6, %s19289_s4  ;;  %p19296_p1 = scmp.lt.u32.totalorder %s19289_s4, %s21733_s6 }
  0x6d   : > { %p19292_p2 = pnand %p19290_p10, %p21765_p12 }
  0x6f   : > { %p19293_p4 = pneg %p19292_p2 }
  0x71   : > { %p19298_p5 = pnand %p19296_p1, %p19293_p4 }
  0x73   : > { %19301 = shalt.err (!%p19298_p5)
}
  0x74   : > { %s19302_s21 = scalar_lea.vmem %s254_s9, 16  ;;  %s19309_s2 = scalar_lea.vmem %s254_s9, 32 }
  0x75   : > { %p19303_p6 = scmp.ne.s32.totalorder %s254_s9, %s19302_s21  ;;  %p19310_p0 = scmp.lt.s32.totalorder %s254_s9, %s254_s9 }
  0x76   : > { %p19311_p3 = scmp.lt.s32.totalorder %s19309_s2, %s19302_s21 }
  0x77   : > { %p19305_p9 = pnand %p19303_p6, %p21765_p12 }
  0x78   : > { %p19312_p7 = por %p19311_p3, %p19310_p0 }
  0x79   : > { %p19306_p11 = pneg %p19305_p9 }
  0x7b   : > { %p19313_p13 = pnand %p19312_p7, %p19306_p11 }
  0x7d   : > { %19316 = shalt.err (!%p19313_p13)
}
  0x7e   : > { %16775 = dma.hbm_to_vmem [thread:$0]  (!%p21766_p8), %s21733_s6, 16, %s254_s9, [#allocation12]  }
  0x7f   : > { %s16446_s26 = sshll.u32 %s19423_s27, 8  ;;  %s21767_s10 = smul.u32 11904, %s19568_s15 }
  0x80   : > { %s19661_s13 = scalar_lea.hbm %s21728_s1, %s16446_s26  ;;  %s265_s11 = scalar_lea.sflag [#allocation4], %s19568_s15 }
  0x81   : > { %s268_s20 = scalar_lea.vmem [#allocation3], %s21767_s10  ;;  %s19317_s16 = scalar_lea.hbm %s19661_s13, 190464 }
  0x82   : > { %s275_s24 = sshll.u32 %s268_s20, 4  ;;  %p19318_p13 = scmp.ne.s32.totalorder %s19661_s13, %s19317_s16  ;;  %s19663_s24 = int_to_ptr.vmem [resolvable:$true] %s275_s24 }
  0x83   : > { %p21768_p12 = scmp.ne.s32.totalorder %s21764_s18, 0  ;;  %s19322_s14 = scalar_lea.hbm %s21728_s1, 1142784 }
  0x84   : > { %p19323_p2 = scmp.lt.u32.totalorder %s19661_s13, %s21728_s1  ;;  %p19324_p4 = scmp.lt.u32.totalorder %s19322_s14, %s19317_s16 }
  0x85   : > { %p19320_p8 = pnand %p19318_p13, %p21768_p12  ;;  %p19326_p5 = scmp.lt.u32.totalorder %s19317_s16, %s19661_s13 }
  0x86   : > { %p19325_p1 = por %p19324_p4, %p19323_p2 }
  0x87   : > { %p19321_p10 = pneg %p19320_p8 }
  0x88   : > { %p19327_p6 = por %p19326_p5, %p19325_p1 }
  0x8a   : > { %p19328_p9 = pnand %p19327_p6, %p19321_p10 }
  0x8c   : > { %19331 = shalt.err (!%p19328_p9)
}
  0x8d   : > { %s19332_s12 = scalar_lea.vmem %s19663_s24, 190464  ;;  %s19431_s23 = smov [#allocation3]  }
  0x8e   : > { %p19333_p11 = scmp.ne.s32.totalorder %s19663_s24, %s19332_s12  ;;  %s19337_s26 = sshll.u32 %s19431_s23, 4  ;;  %s19338_s26 = int_to_ptr.vmem [resolvable:$false] %s19337_s26 }
  0x8f   : > { %s19339_s10 = scalar_lea.vmem %s19338_s26, 380928  ;;  %p19340_p7 = scmp.lt.s32.totalorder %s19663_s24, %s19338_s26 }
  0x90   : > { %p19335_p0 = pnand %p19333_p11, %p21768_p12  ;;  %p19341_p13 = scmp.lt.s32.totalorder %s19339_s10, %s19332_s12 }
  0x92   : > { %p19336_p3 = pneg %p19335_p0  ;;  %p19342_p8 = por %p19341_p13, %p19340_p7 }
  0x94   : > { %p19343_p2 = pnand %p19342_p8, %p19336_p3 }
  0x96   : > { %19346 = shalt.err (!%p19343_p2)
}
  0x97   : > { %s19432_s20 = smov 1536   ;;  %s19433_s17 = smov 256  }
  0x98   : > { %s19434_s22 = smov 16   ;;  %p21769_p10 = scmp.ne.s32.totalorder %s21762_s19, 0 }
  0x99   : > { %s16449_s16 = sshll.u32 %s19423_s27, 15  ;;  %s21770_s9 = sshll.u32 %s19568_s15, 11 }
  0x9a   : > { %16779 = dma.hbm_to_vmem [thread:$0]  (!%p21769_p10), %s19661_s13, 190464, %s19663_s24, %s265_s11, %s19432_s20, %s19433_s17, %s19434_s22  }
  0x9b   : > { %s308_s4 = scalar_lea.vmem [#allocation7], %s21770_s9  ;;  %s19695_s12 = scalar_lea.hbm %s21730_s3, %s16449_s16 }
  0x9c   : > { %s316_s14 = sshll.u32 %s308_s4, 4  ;;  %s19347_s23 = scalar_lea.hbm %s19695_s12, 32768  ;;  %s19697_s14 = int_to_ptr.vmem [resolvable:$true] %s316_s14 }
  0x9d   : > { %p19348_p4 = scmp.ne.s32.totalorder %s19695_s12, %s19347_s23  ;;  %s19352_s24 = scalar_lea.hbm %s21730_s3, 196608 }
  0x9e   : > { %p19353_p6 = scmp.lt.u32.totalorder %s19695_s12, %s21730_s3  ;;  %p19354_p9 = scmp.lt.u32.totalorder %s19352_s24, %s19347_s23 }
  0x9f   : > { %p19350_p1 = pnand %p19348_p4, %p21768_p12  ;;  %p19356_p0 = scmp.lt.u32.totalorder %s19347_s23, %s19695_s12 }
  0xa0   : > { %p19355_p11 = por %p19354_p9, %p19353_p6 }
  0xa1   : > { %p19351_p5 = pneg %p19350_p1 }
  0xa2   : > { %p19357_p3 = por %p19356_p0, %p19355_p11 }
  0xa4   : > { %p19358_p7 = pnand %p19357_p3, %p19351_p5 }
  0xa6   : > { %19361 = shalt.err (!%p19358_p7)
}
  0xa7   : > { %s19362_s26 = scalar_lea.vmem %s19697_s14, 32768  ;;  %s19435_s10 = smov [#allocation7]  }
  0xa8   : > { %p19363_p13 = scmp.ne.s32.totalorder %s19697_s14, %s19362_s26  ;;  %s19367_s20 = sshll.u32 %s19435_s10, 4  ;;  %s19368_s20 = int_to_ptr.vmem [resolvable:$false] %s19367_s20 }
  0xa9   : > { %s19369_s17 = scalar_lea.vmem %s19368_s20, 65536  ;;  %p19370_p4 = scmp.lt.s32.totalorder %s19697_s14, %s19368_s20 }
  0xaa   : > { %p19365_p8 = pnand %p19363_p13, %p21768_p12  ;;  %p19371_p1 = scmp.lt.s32.totalorder %s19369_s17, %s19362_s26 }
  0xac   : > { %p19366_p2 = pneg %p19365_p8  ;;  %p19372_p6 = por %p19371_p1, %p19370_p4 }
  0xae   : > { %p19373_p9 = pnand %p19372_p6, %p19366_p2 }
  0xb0   : > { %19376 = shalt.err (!%p19373_p9)
}
  0xb1   : > { %s19436_s22 = smov 512   ;;  %s19437_s16 = smov 32  }
  0xb2   : > { %16785 = dma.hbm_to_vmem [thread:$0]  (!%p21769_p10), %s19695_s12, 32768, %s19697_s14, %s19589_s8, %s19436_s22, %s19436_s22, %s19437_s16  }
  0xb3   : > { %p21771_p12 = scmp.ne.s32.totalorder %s21753_s30, 0 }
  0xb4   : > { %s330_s18 = sand.u32 (!%p21771_p12), 1, %s19415_s25   ;;  %p21772_p5 = scmp.ne.s32.totalorder (!%p21771_p12), %s21752_s29, 0 }
  0xb5   : > { %328 = sbr.rel (%p21771_p12) target bundleno = 2588 (0xa1c), region = 48  ;;  %s331_s4 = scalar_lea.sflag (!%p21771_p12), [#allocation4], %s330_s18 }
  0xb6   : > { %s16747_s9 = smul.u32 (!%p21771_p12), 11904, %s330_s18 }
  0xb8   : > { %s19724_s21 = scalar_lea.vmem (!%p21771_p12), [#allocation3], %s16747_s9 }
  0xbc   : > { %19394 = dma.done.wait (%p21772_p5), %s331_s4, 190464  }
  0xbd   : > { %19396 = vsyncadd (%p21772_p5), %s331_s4, 4294776832  ;;  %s339_s2 = sand.u32 1, %s19499_s28   ;;  %s14579_s19 = sshll.u32 %s330_s18, 2 }
  0xbe   : > { %s340_s8 = scalar_lea.sflag [#allocation6], %s339_s2  ;;  %s19731_s14 = scalar_lea.vmem [#allocation5], %s14579_s19 }
  0xbf   : > { %19398 = dma.done.wait (%p21772_p5), %s340_s8, 32832  }
  0xc0   : > { %19400 = vsyncadd (%p21772_p5), %s340_s8, 4294934464  ;;  %s14580_s30 = sshll.u32 %s330_s18, 11  ;;  %p21773_p10 = scmp.eq.s32.totalorder %s19499_s28, 0 }
  0xc1   : > { %s19737_s12 = scalar_lea.vmem [#allocation7], %s14580_s30 }
  0xc2   : > { %19402 = dma.done.wait (%p21773_p10), [#allocation9], 8320   ;;  %p21774_p11 = pmov %p21773_p10 }
  0xc3   : > { %p21775_p0 = pmov %p21773_p10 }
  0xc4   : > { %19404 = vsyncadd (%p21774_p11), [#allocation9], 4294958976 }
  0xc5   : > { %19406 = dma.done.wait (%p21775_p0), [#allocation12], 16   ;;  %p21776_p3 = pmov %p21775_p0 }
  0xc6   : > { %p21777_p7 = scmp.ne.s32.totalorder %s19499_s28, 0 }
  0xc7   : > { %19408 = vsyncadd (%p21776_p3), [#allocation12], 4294967280  ;;  %v19438_v0 = vmov (!%p21777_p7), 0.0  }
  0xc8   : > { %407 = sbr.rel (%p21777_p7) target bundleno = 208 (0xd0), region = 76  ;;  %408 = vst [vmem:[#allocation2] sm:$0xff] (!%p21777_p7), %v19438_v0  ;;  %409 = vst [vmem:[#allocation2 + $0x8] sm:$0xff] (!%p21777_p7), %v19438_v0 }
  0xc9   : > { %410 = vst [vmem:[#allocation2 + $0x10] sm:$0xff] (!%p21777_p7), %v19438_v0  ;;  %411 = vst [vmem:[#allocation2 + $0x18] sm:$0xff] (!%p21777_p7), %v19438_v0 }
  0xca   : > { %412 = vst [vmem:[#allocation2 + $0x20] sm:$0xff] (!%p21777_p7), %v19438_v0  ;;  %413 = vst [vmem:[#allocation2 + $0x28] sm:$0xff] (!%p21777_p7), %v19438_v0 }
  0xcb   : > { %414 = vst [vmem:[#allocation2 + $0x30] sm:$0xff] (!%p21777_p7), %v19438_v0  ;;  %415 = vst [vmem:[#allocation2 + $0x38] sm:$0xff] (!%p21777_p7), %v19438_v0 }
  0xcc   : > { %416 = vst [vmem:[#allocation2 + $0x40] sm:$0xff] (!%p21777_p7), %v19438_v0  ;;  %417 = vst [vmem:[#allocation2 + $0x48] sm:$0xff] (!%p21777_p7), %v19438_v0 }
  0xcd   : > { %418 = vst [vmem:[#allocation2 + $0x50] sm:$0xff] (!%p21777_p7), %v19438_v0  ;;  %419 = vst [vmem:[#allocation2 + $0x58] sm:$0xff] (!%p21777_p7), %v19438_v0 }
  0xce   : > { %420 = vst [vmem:[#allocation2 + $0x60] sm:$0xff] (!%p21777_p7), %v19438_v0  ;;  %421 = vst [vmem:[#allocation2 + $0x68] sm:$0xff] (!%p21777_p7), %v19438_v0 }
  0xcf   : > { %422 = vst [vmem:[#allocation2 + $0x70] sm:$0xff] %v19438_v0  ;;  %423 = vst [vmem:[#allocation2 + $0x78] sm:$0xff] %v19438_v0 }
  0xd0 PF: > { %v16837_v1 = vld [vmem:[%s19724_s21 + $0x4] ss:$16 sps:$4 sm:$0xff]   ;;  %v16839_v2 = vld [vmem:[%s19724_s21 + $0xc] ss:$16 sps:$4 sm:$0xff]   ;;  %v16841_v3 = vld [vmem:[%s19724_s21] ss:$16 sps:$4 sm:$0xff]  }
  0xd1   : > { %9661 = vmatprep.subr.bf16.mxu0 %v16837_v1  ;;  %v16842_v4 = vld [vmem:[%s19724_s21 + $0x8] ss:$16 sps:$4 sm:$0xff]   ;;  %10693 = vmatprep.subr.bf16.mxu1 %v16839_v2  ;;  %v16843_v5 = vld [vmem:[%s19724_s21 + $0x24] ss:$16 sps:$4 sm:$0xff]   ;;  %v16845_v6 = vld [vmem:[%s19724_s21 + $0x2c] ss:$16 sps:$4 sm:$0xff]  }
  0xd2   : > { %9662 = vmatpush1.bf16.msra.mxu0 %v16841_v3  ;;  %10694 = vmatpush1.bf16.msra.mxu1 %v16842_v4  ;;  %v16847_v7 = vld [vmem:[%s19724_s21 + $0x20] ss:$16 sps:$4 sm:$0xff]   ;;  %v16848_v8 = vld [vmem:[%s19724_s21 + $0x28] ss:$16 sps:$4 sm:$0xff]   ;;  %v16849_v9 = vld [vmem:[%s19724_s21 + $0x44] ss:$16 sps:$4 sm:$0xff]  }
  0xd3   : > { %9663 = vmatprep.subr.bf16.mxu0 %v16843_v5  ;;  %10695 = vmatprep.subr.bf16.mxu1 %v16845_v6  ;;  %v16851_v10 = vld [vmem:[%s19724_s21 + $0x4c] ss:$16 sps:$4 sm:$0xff]   ;;  %v16853_v11 = vld [vmem:[%s19724_s21 + $0x40] ss:$16 sps:$4 sm:$0xff]   ;;  %v16854_v12 = vld [vmem:[%s19724_s21 + $0x48] ss:$16 sps:$4 sm:$0xff]  }
  0xd4   : > { %v16855_v13 = vld [vmem:[%s19724_s21 + $0x64] ss:$16 sps:$4 sm:$0xff]   ;;  %v16857_v14 = vld [vmem:[%s19724_s21 + $0x6c] ss:$16 sps:$4 sm:$0xff]   ;;  %v16859_v15 = vld [vmem:[%s19724_s21 + $0x60] ss:$16 sps:$4 sm:$0xff]  }
  0xd5   : > { %v16860_v16 = vld [vmem:[%s19724_s21 + $0x68] ss:$16 sps:$4 sm:$0xff]   ;;  %v16861_v17 = vld [vmem:[%s19724_s21 + $0x84] ss:$16 sps:$4 sm:$0xff]   ;;  %v16863_v18 = vld [vmem:[%s19724_s21 + $0x8c] ss:$16 sps:$4 sm:$0xff]  }
  0xd6   : > { %9664 = vmatpush1.bf16.msra.mxu0 %v16847_v7  ;;  %10696 = vmatpush1.bf16.msra.mxu1 %v16848_v8  ;;  %v16865_v19 = vld [vmem:[%s19724_s21 + $0x80] ss:$16 sps:$4 sm:$0xff]   ;;  %v16866_v20 = vld [vmem:[%s19724_s21 + $0x88] ss:$16 sps:$4 sm:$0xff]   ;;  %v16867_v21 = vld [vmem:[%s19724_s21 + $0xa4] ss:$16 sps:$4 sm:$0xff]  }
  0xd7   : > { %9665 = vmatprep.subr.bf16.mxu0 %v16849_v9  ;;  %10697 = vmatprep.subr.bf16.mxu1 %v16851_v10  ;;  %v16869_v22 = vld [vmem:[%s19724_s21 + $0xac] ss:$16 sps:$4 sm:$0xff]   ;;  %v16871_v23 = vld [vmem:[%s19724_s21 + $0xa0] ss:$16 sps:$4 sm:$0xff]   ;;  %v16872_v24 = vld [vmem:[%s19724_s21 + $0xa8] ss:$16 sps:$4 sm:$0xff]  }
  0xd8   : > { %v16873_v25 = vld [vmem:[%s19724_s21 + $0xc4] ss:$16 sps:$4 sm:$0xff]   ;;  %v16875_v26 = vld [vmem:[%s19724_s21 + $0xcc] ss:$16 sps:$4 sm:$0xff]   ;;  %v16877_v27 = vld [vmem:[%s19724_s21 + $0xc0] ss:$16 sps:$4 sm:$0xff]  }
  0xd9   : > { %v16878_v28 = vld [vmem:[%s19724_s21 + $0xc8] ss:$16 sps:$4 sm:$0xff]   ;;  %v16879_v29 = vld [vmem:[%s19724_s21 + $0xe4] ss:$16 sps:$4 sm:$0xff]   ;;  %v16881_v30 = vld [vmem:[%s19724_s21 + $0xec] ss:$16 sps:$4 sm:$0xff]  }
  0xda   : > { %9666 = vmatpush1.bf16.msra.mxu0 %v16853_v11  ;;  %10698 = vmatpush1.bf16.msra.mxu1 %v16854_v12  ;;  %v16883_v31 = vld [vmem:[%s19724_s21 + $0xe0] ss:$16 sps:$4 sm:$0xff]   ;;  %v16884_v32 = vld [vmem:[%s19724_s21 + $0xe8] ss:$16 sps:$4 sm:$0xff]   ;;  %v16885_v33 = vld [vmem:[%s19724_s21 + $0x104] ss:$16 sps:$4 sm:$0xff]  }
  0xdb   : > { %9667 = vmatprep.subr.bf16.mxu0 %v16855_v13  ;;  %10699 = vmatprep.subr.bf16.mxu1 %v16857_v14  ;;  %v16887_v34 = vld [vmem:[%s19724_s21 + $0x10c] ss:$16 sps:$4 sm:$0xff]   ;;  %v16889_v35 = vld [vmem:[%s19724_s21 + $0x100] ss:$16 sps:$4 sm:$0xff]   ;;  %v16890_v36 = vld [vmem:[%s19724_s21 + $0x108] ss:$16 sps:$4 sm:$0xff]  }
  0xdc   : > { %v16891_v37 = vld [vmem:[%s19724_s21 + $0x124] ss:$16 sps:$4 sm:$0xff]   ;;  %v16893_v38 = vld [vmem:[%s19724_s21 + $0x12c] ss:$16 sps:$4 sm:$0xff]   ;;  %v16895_v39 = vld [vmem:[%s19724_s21 + $0x120] ss:$16 sps:$4 sm:$0xff]  }
  0xdd   : > { %v16896_v40 = vld [vmem:[%s19724_s21 + $0x128] ss:$16 sps:$4 sm:$0xff]   ;;  %v16897_v41 = vld [vmem:[%s19724_s21 + $0x144] ss:$16 sps:$4 sm:$0xff]   ;;  %v16899_v42 = vld [vmem:[%s19724_s21 + $0x14c] ss:$16 sps:$4 sm:$0xff]  }
  0xde   : > { %9668 = vmatpush1.bf16.msra.mxu0 %v16859_v15  ;;  %10700 = vmatpush1.bf16.msra.mxu1 %v16860_v16  ;;  %v16901_v43 = vld [vmem:[%s19724_s21 + $0x140] ss:$16 sps:$4 sm:$0xff]   ;;  %v16902_v44 = vld [vmem:[%s19724_s21 + $0x148] ss:$16 sps:$4 sm:$0xff]   ;;  %v16903_v45 = vld [vmem:[%s19724_s21 + $0x164] ss:$16 sps:$4 sm:$0xff]  }
  0xdf   : > { %9669 = vmatprep.subr.bf16.mxu0 %v16861_v17  ;;  %10701 = vmatprep.subr.bf16.mxu1 %v16863_v18  ;;  %v16905_v46 = vld [vmem:[%s19724_s21 + $0x16c] ss:$16 sps:$4 sm:$0xff]   ;;  %v16907_v47 = vld [vmem:[%s19724_s21 + $0x160] ss:$16 sps:$4 sm:$0xff]   ;;  %v16908_v48 = vld [vmem:[%s19724_s21 + $0x168] ss:$16 sps:$4 sm:$0xff]  }
  0xe0   : > { %v16935_v49 = vld [vmem:[%s21727_s0 + $0x4] ss:$188 sps:$4 sm:$0xff]   ;;  %v16911_v51 = vld [vmem:[%s19724_s21 + $0x18c] ss:$16 sps:$4 sm:$0xff]   ;;  %v16914_v53 = vld [vmem:[%s19724_s21 + $0x188] ss:$16 sps:$4 sm:$0xff]  }
  0xe1   : > { %v16909_v50 = vld [vmem:[%s19724_s21 + $0x184] ss:$16 sps:$4 sm:$0xff]   ;;  %9693 = vmatprep.mubr.bf16.mxu0 %v16935_v49  ;;  %10725 = vmatprep.mubr.bf16.mxu1 %v16935_v49  ;;  %v16913_v52 = vld [vmem:[%s19724_s21 + $0x180] ss:$16 sps:$4 sm:$0xff]   ;;  %v16917_v55 = vld [vmem:[%s19724_s21 + $0x1ac] ss:$16 sps:$4 sm:$0xff]  }
  0xe2   : > { %9670 = vmatpush1.bf16.msra.mxu0 %v16865_v19  ;;  %10702 = vmatpush1.bf16.msra.mxu1 %v16866_v20  ;;  %v16915_v54 = vld [vmem:[%s19724_s21 + $0x1a4] ss:$16 sps:$4 sm:$0xff]   ;;  %v16919_v56 = vld [vmem:[%s19724_s21 + $0x1a0] ss:$16 sps:$4 sm:$0xff]   ;;  %v16920_v57 = vld [vmem:[%s19724_s21 + $0x1a8] ss:$16 sps:$4 sm:$0xff]  }
  0xe3   : > { %9671 = vmatprep.subr.bf16.mxu0 %v16867_v21  ;;  %10703 = vmatprep.subr.bf16.mxu1 %v16869_v22  ;;  %v16921_v58 = vld [vmem:[%s19724_s21 + $0x1c4] ss:$16 sps:$4 sm:$0xff]   ;;  %v16923_v59 = vld [vmem:[%s19724_s21 + $0x1cc] ss:$16 sps:$4 sm:$0xff]   ;;  %v16925_v60 = vld [vmem:[%s19724_s21 + $0x1c0] ss:$16 sps:$4 sm:$0xff]  }
  0xe4   : > { %v16926_v61 = vld [vmem:[%s19724_s21 + $0x1c8] ss:$16 sps:$4 sm:$0xff]   ;;  %v16927_v62 = vld [vmem:[%s19724_s21 + $0x1e4] ss:$16 sps:$4 sm:$0xff]   ;;  %v16929_v63 = vld [vmem:[%s19724_s21 + $0x1ec] ss:$16 sps:$4 sm:$0xff]  }
  0xe5   : > { %v16931_v0 = vld [vmem:[%s19724_s21 + $0x1e0] ss:$16 sps:$4 sm:$0xff]   ;;  %v16932_v1 = vld [vmem:[%s19724_s21 + $0x1e8] ss:$16 sps:$4 sm:$0xff]   ;;  %v16938_v2 = vld [vmem:[%s19724_s21 + $0x204] ss:$16 sps:$4 sm:$0xff]  }
  0xe6   : > { %9672 = vmatpush1.bf16.msra.mxu0 %v16871_v23  ;;  %10704 = vmatpush1.bf16.msra.mxu1 %v16872_v24  ;;  %v16941_v3 = vld [vmem:[%s19724_s21 + $0x20c] ss:$16 sps:$4 sm:$0xff]   ;;  %v16936_v5 = vld [vmem:[%s19724_s21 + $0x200] ss:$16 sps:$4 sm:$0xff]   ;;  %v16939_v6 = vld [vmem:[%s19724_s21 + $0x208] ss:$16 sps:$4 sm:$0xff]  }
  0xe7   : > { %9673 = vmatprep.subr.bf16.mxu0 %v16873_v25  ;;  %10705 = vmatprep.subr.bf16.mxu1 %v16875_v26  ;;  %v16933_v4 = vld [vmem:[%s21727_s0] ss:$188 sps:$4 sm:$0xff]   ;;  %v16944_v7 = vld [vmem:[%s19724_s21 + $0x224] ss:$16 sps:$4 sm:$0xff]   ;;  %v16945_v10 = vld [vmem:[%s19724_s21 + $0x228] ss:$16 sps:$4 sm:$0xff]  }
  0xe8   : > { %v16947_v8 = vld [vmem:[%s19724_s21 + $0x22c] ss:$16 sps:$4 sm:$0xff]   ;;  %v16942_v9 = vld [vmem:[%s19724_s21 + $0x220] ss:$16 sps:$4 sm:$0xff]   ;;  %v16950_v11 = vld [vmem:[%s19724_s21 + $0x244] ss:$16 sps:$4 sm:$0xff]  }
  0xe9   : > { %v16953_v12 = vld [vmem:[%s19724_s21 + $0x24c] ss:$16 sps:$4 sm:$0xff]   ;;  %v16948_v13 = vld [vmem:[%s19724_s21 + $0x240] ss:$16 sps:$4 sm:$0xff]   ;;  %v16951_v14 = vld [vmem:[%s19724_s21 + $0x248] ss:$16 sps:$4 sm:$0xff]  }
  0xea   : > { %9674 = vmatpush1.bf16.msra.mxu0 %v16877_v27  ;;  %10706 = vmatpush1.bf16.msra.mxu1 %v16878_v28  ;;  %v16956_v15 = vld [vmem:[%s19724_s21 + $0x264] ss:$16 sps:$4 sm:$0xff]   ;;  %v16959_v16 = vld [vmem:[%s19724_s21 + $0x26c] ss:$16 sps:$4 sm:$0xff]   ;;  %v16954_v17 = vld [vmem:[%s19724_s21 + $0x260] ss:$16 sps:$4 sm:$0xff]  }
  0xeb   : > { %9675 = vmatprep.subr.bf16.mxu0 %v16879_v29  ;;  %10707 = vmatprep.subr.bf16.mxu1 %v16881_v30  ;;  %v16957_v18 = vld [vmem:[%s19724_s21 + $0x268] ss:$16 sps:$4 sm:$0xff]   ;;  %v16962_v19 = vld [vmem:[%s19724_s21 + $0x284] ss:$16 sps:$4 sm:$0xff]   ;;  %v16965_v20 = vld [vmem:[%s19724_s21 + $0x28c] ss:$16 sps:$4 sm:$0xff]  }
  0xec   : > { %v16960_v21 = vld [vmem:[%s19724_s21 + $0x280] ss:$16 sps:$4 sm:$0xff]   ;;  %v16963_v22 = vld [vmem:[%s19724_s21 + $0x288] ss:$16 sps:$4 sm:$0xff]   ;;  %v16968_v23 = vld [vmem:[%s19724_s21 + $0x2a4] ss:$16 sps:$4 sm:$0xff]  }
  0xed   : > { %v16971_v24 = vld [vmem:[%s19724_s21 + $0x2ac] ss:$16 sps:$4 sm:$0xff]   ;;  %v16966_v25 = vld [vmem:[%s19724_s21 + $0x2a0] ss:$16 sps:$4 sm:$0xff]   ;;  %v16969_v26 = vld [vmem:[%s19724_s21 + $0x2a8] ss:$16 sps:$4 sm:$0xff]  }
  0xee   : > { %9676 = vmatpush1.bf16.msra.mxu0 %v16883_v31  ;;  %10708 = vmatpush1.bf16.msra.mxu1 %v16884_v32  ;;  %v16974_v27 = vld [vmem:[%s19724_s21 + $0x2c4] ss:$16 sps:$4 sm:$0xff]   ;;  %v16977_v28 = vld [vmem:[%s19724_s21 + $0x2cc] ss:$16 sps:$4 sm:$0xff]   ;;  %v16972_v29 = vld [vmem:[%s19724_s21 + $0x2c0] ss:$16 sps:$4 sm:$0xff]  }
  0xef   : > { %9677 = vmatprep.subr.bf16.mxu0 %v16885_v33  ;;  %10709 = vmatprep.subr.bf16.mxu1 %v16887_v34  ;;  %v16975_v30 = vld [vmem:[%s19724_s21 + $0x2c8] ss:$16 sps:$4 sm:$0xff]   ;;  %v16980_v32 = vld [vmem:[%s19724_s21 + $0x2e4] ss:$16 sps:$4 sm:$0xff]   ;;  %v16983_v33 = vld [vmem:[%s19724_s21 + $0x2ec] ss:$16 sps:$4 sm:$0xff]  }
  0xf0   : > { %v17034_v31 = vld [vmem:[%s21727_s0 + $0xc] ss:$188 sps:$4 sm:$0xff]   ;;  %v16978_v34 = vld [vmem:[%s19724_s21 + $0x2e0] ss:$16 sps:$4 sm:$0xff]   ;;  %vm9657_vm0 = vcmask 523264   ;;  %p16378_p13 = scmp.ne.s32.totalorder %s19499_s28, 5 }
  0xf1   : > { %v17007_v49 = vld [vmem:[%s19724_s21 + $0x36c] ss:$16 sps:$4 sm:$0xff]  }
  0xf2   : > { %9678 = vmatpush1.bf16.msra.mxu0 %v16889_v35  ;;  %10710 = vmatpush1.bf16.msra.mxu1 %v16890_v36  ;;  %v16981_v35 = vld [vmem:[%s19724_s21 + $0x2e8] ss:$16 sps:$4 sm:$0xff]   ;;  %v16986_v36 = vld [vmem:[%s19724_s21 + $0x304] ss:$16 sps:$4 sm:$0xff]  }
  0xf3   : > { %9679 = vmatprep.subr.bf16.mxu0 %v16891_v37  ;;  %10711 = vmatprep.subr.bf16.mxu1 %v16893_v38  ;;  %v16989_v37 = vld [vmem:[%s19724_s21 + $0x30c] ss:$16 sps:$4 sm:$0xff]   ;;  %v16984_v38 = vld [vmem:[%s19724_s21 + $0x300] ss:$16 sps:$4 sm:$0xff]  }
  0xf6   : > { %9680 = vmatpush1.bf16.msra.mxu0 %v16895_v39  ;;  %10712 = vmatpush1.bf16.msra.mxu1 %v16896_v40  ;;  %v16987_v39 = vld [vmem:[%s19724_s21 + $0x308] ss:$16 sps:$4 sm:$0xff]   ;;  %v16992_v40 = vld [vmem:[%s19724_s21 + $0x324] ss:$16 sps:$4 sm:$0xff]  }
  0xf7   : > { %9681 = vmatprep.subr.bf16.mxu0 %v16897_v41  ;;  %10713 = vmatprep.subr.bf16.mxu1 %v16899_v42  ;;  %v16995_v41 = vld [vmem:[%s19724_s21 + $0x32c] ss:$16 sps:$4 sm:$0xff]   ;;  %v16990_v42 = vld [vmem:[%s19724_s21 + $0x320] ss:$16 sps:$4 sm:$0xff]  }
  0xfa   : > { %9682 = vmatpush1.bf16.msra.mxu0 %v16901_v43  ;;  %10714 = vmatpush1.bf16.msra.mxu1 %v16902_v44  ;;  %v16993_v43 = vld [vmem:[%s19724_s21 + $0x328] ss:$16 sps:$4 sm:$0xff]   ;;  %v16998_v44 = vld [vmem:[%s19724_s21 + $0x344] ss:$16 sps:$4 sm:$0xff]  }
  0xfb   : > { %9683 = vmatprep.subr.bf16.mxu0 %v16903_v45  ;;  %10715 = vmatprep.subr.bf16.mxu1 %v16905_v46  ;;  %v17001_v45 = vld [vmem:[%s19724_s21 + $0x34c] ss:$16 sps:$4 sm:$0xff]   ;;  %v16996_v46 = vld [vmem:[%s19724_s21 + $0x340] ss:$16 sps:$4 sm:$0xff]  }
  0xfe   : > { %9684 = vmatpush1.bf16.msra.mxu0 %v16907_v47  ;;  %10716 = vmatpush1.bf16.msra.mxu1 %v16908_v48  ;;  %v16999_v47 = vld [vmem:[%s19724_s21 + $0x348] ss:$16 sps:$4 sm:$0xff]   ;;  %v17004_v48 = vld [vmem:[%s19724_s21 + $0x364] ss:$16 sps:$4 sm:$0xff]  }
  0xff   : > { %9685 = vmatprep.subr.bf16.mxu0 %v16909_v50  ;;  %10717 = vmatprep.subr.bf16.mxu1 %v16911_v51  ;;  %v17002_v50 = vld [vmem:[%s19724_s21 + $0x360] ss:$16 sps:$4 sm:$0xff]   ;;  %v17005_v51 = vld [vmem:[%s19724_s21 + $0x368] ss:$16 sps:$4 sm:$0xff]  }
 0x102   : > { %9686 = vmatpush1.bf16.msra.mxu0 %v16913_v52  ;;  %10718 = vmatpush1.bf16.msra.mxu1 %v16914_v53  ;;  %v17010_v52 = vld [vmem:[%s19724_s21 + $0x384] ss:$16 sps:$4 sm:$0xff]   ;;  %v17013_v53 = vld [vmem:[%s19724_s21 + $0x38c] ss:$16 sps:$4 sm:$0xff]  }
 0x103   : > { %9687 = vmatprep.subr.bf16.mxu0 %v16915_v54  ;;  %10719 = vmatprep.subr.bf16.mxu1 %v16917_v55  ;;  %v17008_v54 = vld [vmem:[%s19724_s21 + $0x380] ss:$16 sps:$4 sm:$0xff]   ;;  %v17011_v55 = vld [vmem:[%s19724_s21 + $0x388] ss:$16 sps:$4 sm:$0xff]  }
 0x106   : > { %9688 = vmatpush1.bf16.msra.mxu0 %v16919_v56  ;;  %10720 = vmatpush1.bf16.msra.mxu1 %v16920_v57  ;;  %v17016_v56 = vld [vmem:[%s19724_s21 + $0x3a4] ss:$16 sps:$4 sm:$0xff]   ;;  %v17019_v57 = vld [vmem:[%s19724_s21 + $0x3ac] ss:$16 sps:$4 sm:$0xff]  }
 0x107   : > { %9689 = vmatprep.subr.bf16.mxu0 %v16921_v58  ;;  %10721 = vmatprep.subr.bf16.mxu1 %v16923_v59  ;;  %v17014_v58 = vld [vmem:[%s19724_s21 + $0x3a0] ss:$16 sps:$4 sm:$0xff]   ;;  %v17017_v59 = vld [vmem:[%s19724_s21 + $0x3a8] ss:$16 sps:$4 sm:$0xff]  }
 0x10a   : > { %9690 = vmatpush1.bf16.msra.mxu0 %v16925_v60  ;;  %10722 = vmatpush1.bf16.msra.mxu1 %v16926_v61  ;;  %v17022_v60 = vld [vmem:[%s19724_s21 + $0x3c4] ss:$16 sps:$4 sm:$0xff]   ;;  %v17025_v61 = vld [vmem:[%s19724_s21 + $0x3cc] ss:$16 sps:$4 sm:$0xff]  }
 0x10b   : > { %9691 = vmatprep.subr.bf16.mxu0 %v16927_v62  ;;  %10723 = vmatprep.subr.bf16.mxu1 %v16929_v63  ;;  %v17020_v62 = vld [vmem:[%s19724_s21 + $0x3c0] ss:$16 sps:$4 sm:$0xff]   ;;  %v17023_v63 = vld [vmem:[%s19724_s21 + $0x3c8] ss:$16 sps:$4 sm:$0xff]  }
 0x10e   : > { %9692 = vmatpush1.bf16.msra.mxu0 %v16931_v0  ;;  %10724 = vmatpush1.bf16.msra.mxu1 %v16932_v1  ;;  %v17028_v0 = vld [vmem:[%s19724_s21 + $0x3e4] ss:$16 sps:$4 sm:$0xff]   ;;  %v17031_v1 = vld [vmem:[%s19724_s21 + $0x3ec] ss:$16 sps:$4 sm:$0xff]  }
 0x10f   : > { %9704 = vmatprep.subr.bf16.mxu0 %v16938_v2  ;;  %10736 = vmatprep.subr.bf16.mxu1 %v16941_v3  ;;  %v17026_v2 = vld [vmem:[%s19724_s21 + $0x3e0] ss:$16 sps:$4 sm:$0xff]   ;;  %v17029_v3 = vld [vmem:[%s19724_s21 + $0x3e8] ss:$16 sps:$4 sm:$0xff]  }
 0x111   : > { %9694 = vmatmul.mubr.bf16.vlgmr.msra.gmra.mrb[0].mxu0 %v16933_v4  ;;  %10726 = vmatmul.mubr.bf16.vlgmr.msra.gmra.mrb[0].mxu1 %v16933_v4  ;;  %v17037_v4 = vld [vmem:[%s19724_s21 + $0x404] ss:$16 sps:$4 sm:$0xff]  }
 0x112   : > { %9705 = vmatpush1.bf16.msra.mxu0 %v16936_v5  ;;  %10737 = vmatpush1.bf16.msra.mxu1 %v16939_v6  ;;  %v17040_v5 = vld [vmem:[%s19724_s21 + $0x40c] ss:$16 sps:$4 sm:$0xff]   ;;  %v17032_v6 = vld [vmem:[%s21727_s0 + $0x8] ss:$188 sps:$4 sm:$0xff]  }
 0x113   : > { %9706 = vmatprep.subr.bf16.mxu0 %v16944_v7  ;;  %10738 = vmatprep.subr.bf16.mxu1 %v16947_v8  ;;  %v17035_v7 = vld [vmem:[%s19724_s21 + $0x400] ss:$16 sps:$4 sm:$0xff]   ;;  %v17038_v8 = vld [vmem:[%s19724_s21 + $0x408] ss:$16 sps:$4 sm:$0xff]  }
 0x114   : > { %9736 = vmatprep.mubr.bf16.mxu0 %v17034_v31  ;;  %10768 = vmatprep.mubr.bf16.mxu1 %v17034_v31  ;;  %v17076_v31 = vld [vmem:[%s19724_s21 + $0x4cc] ss:$16 sps:$4 sm:$0xff]  }
 0x116   : > { %9707 = vmatpush1.bf16.msra.mxu0 %v16942_v9  ;;  %10739 = vmatpush1.bf16.msra.mxu1 %v16945_v10  ;;  %v17043_v9 = vld [vmem:[%s19724_s21 + $0x424] ss:$16 sps:$4 sm:$0xff]   ;;  %v17046_v10 = vld [vmem:[%s19724_s21 + $0x42c] ss:$16 sps:$4 sm:$0xff]  }
 0x117   : > { %9708 = vmatprep.subr.bf16.mxu0 %v16950_v11  ;;  %10740 = vmatprep.subr.bf16.mxu1 %v16953_v12  ;;  %v17041_v11 = vld [vmem:[%s19724_s21 + $0x420] ss:$16 sps:$4 sm:$0xff]   ;;  %v17044_v12 = vld [vmem:[%s19724_s21 + $0x428] ss:$16 sps:$4 sm:$0xff]  }
 0x11a   : > { %9709 = vmatpush1.bf16.msra.mxu0 %v16948_v13  ;;  %10741 = vmatpush1.bf16.msra.mxu1 %v16951_v14  ;;  %v17133_v13 = vld [vmem:[%s21727_s0 + $0x14] ss:$188 sps:$4 sm:$0xff]  }
 0x11b   : > { %9710 = vmatprep.subr.bf16.mxu0 %v16956_v15  ;;  %10742 = vmatprep.subr.bf16.mxu1 %v16959_v16  ;;  %v17049_v14 = vld [vmem:[%s19724_s21 + $0x444] ss:$16 sps:$4 sm:$0xff]   ;;  %v17052_v15 = vld [vmem:[%s19724_s21 + $0x44c] ss:$16 sps:$4 sm:$0xff]   ;;  %v17047_v16 = vld [vmem:[%s19724_s21 + $0x440] ss:$16 sps:$4 sm:$0xff]  }
 0x11e   : > { %9711 = vmatpush1.bf16.msra.mxu0 %v16954_v17  ;;  %10743 = vmatpush1.bf16.msra.mxu1 %v16957_v18  ;;  %v17050_v17 = vld [vmem:[%s19724_s21 + $0x448] ss:$16 sps:$4 sm:$0xff]   ;;  %v17055_v18 = vld [vmem:[%s19724_s21 + $0x464] ss:$16 sps:$4 sm:$0xff]  }
 0x11f   : > { %9712 = vmatprep.subr.bf16.mxu0 %v16962_v19  ;;  %10744 = vmatprep.subr.bf16.mxu1 %v16965_v20  ;;  %v17058_v19 = vld [vmem:[%s19724_s21 + $0x46c] ss:$16 sps:$4 sm:$0xff]   ;;  %v17053_v20 = vld [vmem:[%s19724_s21 + $0x460] ss:$16 sps:$4 sm:$0xff]  }
 0x122   : > { %9713 = vmatpush1.bf16.msra.mxu0 %v16960_v21  ;;  %10745 = vmatpush1.bf16.msra.mxu1 %v16963_v22  ;;  %v17056_v21 = vld [vmem:[%s19724_s21 + $0x468] ss:$16 sps:$4 sm:$0xff]   ;;  %v17061_v22 = vld [vmem:[%s19724_s21 + $0x484] ss:$16 sps:$4 sm:$0xff]  }
 0x123   : > { %9714 = vmatprep.subr.bf16.mxu0 %v16968_v23  ;;  %10746 = vmatprep.subr.bf16.mxu1 %v16971_v24  ;;  %v17064_v23 = vld [vmem:[%s19724_s21 + $0x48c] ss:$16 sps:$4 sm:$0xff]   ;;  %v17059_v24 = vld [vmem:[%s19724_s21 + $0x480] ss:$16 sps:$4 sm:$0xff]  }
 0x126   : > { %9715 = vmatpush1.bf16.msra.mxu0 %v16966_v25  ;;  %10747 = vmatpush1.bf16.msra.mxu1 %v16969_v26  ;;  %v17062_v25 = vld [vmem:[%s19724_s21 + $0x488] ss:$16 sps:$4 sm:$0xff]   ;;  %v17067_v26 = vld [vmem:[%s19724_s21 + $0x4a4] ss:$16 sps:$4 sm:$0xff]  }
 0x127   : > { %9716 = vmatprep.subr.bf16.mxu0 %v16974_v27  ;;  %10748 = vmatprep.subr.bf16.mxu1 %v16977_v28  ;;  %v17070_v27 = vld [vmem:[%s19724_s21 + $0x4ac] ss:$16 sps:$4 sm:$0xff]   ;;  %v17065_v28 = vld [vmem:[%s19724_s21 + $0x4a0] ss:$16 sps:$4 sm:$0xff]  }
 0x12a   : > { %9717 = vmatpush1.bf16.msra.mxu0 %v16972_v29  ;;  %10749 = vmatpush1.bf16.msra.mxu1 %v16975_v30  ;;  %v17068_v29 = vld [vmem:[%s19724_s21 + $0x4a8] ss:$16 sps:$4 sm:$0xff]   ;;  %v17073_v30 = vld [vmem:[%s19724_s21 + $0x4c4] ss:$16 sps:$4 sm:$0xff]  }
 0x12b   : > { %9718 = vmatprep.subr.bf16.mxu0 %v16980_v32  ;;  %10750 = vmatprep.subr.bf16.mxu1 %v16983_v33  ;;  %v17071_v32 = vld [vmem:[%s19724_s21 + $0x4c0] ss:$16 sps:$4 sm:$0xff]   ;;  %v17074_v33 = vld [vmem:[%s19724_s21 + $0x4c8] ss:$16 sps:$4 sm:$0xff]  }
 0x12e   : > { %9719 = vmatpush1.bf16.msra.mxu0 %v16978_v34  ;;  %10751 = vmatpush1.bf16.msra.mxu1 %v16981_v35  ;;  %v17079_v34 = vld [vmem:[%s19724_s21 + $0x4e4] ss:$16 sps:$4 sm:$0xff]   ;;  %v17082_v35 = vld [vmem:[%s19724_s21 + $0x4ec] ss:$16 sps:$4 sm:$0xff]  }
 0x12f   : > { %9720 = vmatprep.subr.bf16.mxu0 %v16986_v36  ;;  %10752 = vmatprep.subr.bf16.mxu1 %v16989_v37  ;;  %v17077_v36 = vld [vmem:[%s19724_s21 + $0x4e0] ss:$16 sps:$4 sm:$0xff]   ;;  %v17080_v37 = vld [vmem:[%s19724_s21 + $0x4e8] ss:$16 sps:$4 sm:$0xff]  }
 0x132   : > { %9721 = vmatpush1.bf16.msra.mxu0 %v16984_v38  ;;  %10753 = vmatpush1.bf16.msra.mxu1 %v16987_v39  ;;  %v17085_v38 = vld [vmem:[%s19724_s21 + $0x504] ss:$16 sps:$4 sm:$0xff]   ;;  %v17088_v39 = vld [vmem:[%s19724_s21 + $0x50c] ss:$16 sps:$4 sm:$0xff]  }
 0x133   : > { %9722 = vmatprep.subr.bf16.mxu0 %v16992_v40  ;;  %10754 = vmatprep.subr.bf16.mxu1 %v16995_v41  ;;  %v17083_v40 = vld [vmem:[%s19724_s21 + $0x500] ss:$16 sps:$4 sm:$0xff]   ;;  %v17086_v41 = vld [vmem:[%s19724_s21 + $0x508] ss:$16 sps:$4 sm:$0xff]  }
 0x136   : > { %9723 = vmatpush1.bf16.msra.mxu0 %v16990_v42  ;;  %10755 = vmatpush1.bf16.msra.mxu1 %v16993_v43  ;;  %v17091_v42 = vld [vmem:[%s19724_s21 + $0x524] ss:$16 sps:$4 sm:$0xff]   ;;  %v17094_v43 = vld [vmem:[%s19724_s21 + $0x52c] ss:$16 sps:$4 sm:$0xff]  }
 0x137   : > { %9724 = vmatprep.subr.bf16.mxu0 %v16998_v44  ;;  %10756 = vmatprep.subr.bf16.mxu1 %v17001_v45  ;;  %v17089_v44 = vld [vmem:[%s19724_s21 + $0x520] ss:$16 sps:$4 sm:$0xff]   ;;  %v17092_v45 = vld [vmem:[%s19724_s21 + $0x528] ss:$16 sps:$4 sm:$0xff]  }
 0x13a   : > { %9725 = vmatpush1.bf16.msra.mxu0 %v16996_v46  ;;  %10757 = vmatpush1.bf16.msra.mxu1 %v16999_v47  ;;  %v17097_v46 = vld [vmem:[%s19724_s21 + $0x544] ss:$16 sps:$4 sm:$0xff]   ;;  %v17100_v47 = vld [vmem:[%s19724_s21 + $0x54c] ss:$16 sps:$4 sm:$0xff]  }
 0x13b   : > { %9726 = vmatprep.subr.bf16.mxu0 %v17004_v48  ;;  %10758 = vmatprep.subr.bf16.mxu1 %v17007_v49  ;;  %v17095_v48 = vld [vmem:[%s19724_s21 + $0x540] ss:$16 sps:$4 sm:$0xff]   ;;  %v17098_v49 = vld [vmem:[%s19724_s21 + $0x548] ss:$16 sps:$4 sm:$0xff]  }
 0x13e   : > { %9727 = vmatpush1.bf16.msra.mxu0 %v17002_v50  ;;  %10759 = vmatpush1.bf16.msra.mxu1 %v17005_v51  ;;  %v17103_v50 = vld [vmem:[%s19724_s21 + $0x564] ss:$16 sps:$4 sm:$0xff]   ;;  %v17106_v51 = vld [vmem:[%s19724_s21 + $0x56c] ss:$16 sps:$4 sm:$0xff]  }
 0x13f   : > { %9728 = vmatprep.subr.bf16.mxu0 %v17010_v52  ;;  %10760 = vmatprep.subr.bf16.mxu1 %v17013_v53  ;;  %v17101_v52 = vld [vmem:[%s19724_s21 + $0x560] ss:$16 sps:$4 sm:$0xff]   ;;  %v17104_v53 = vld [vmem:[%s19724_s21 + $0x568] ss:$16 sps:$4 sm:$0xff]  }
 0x142   : > { %9729 = vmatpush1.bf16.msra.mxu0 %v17008_v54  ;;  %10761 = vmatpush1.bf16.msra.mxu1 %v17011_v55  ;;  %v17109_v54 = vld [vmem:[%s19724_s21 + $0x584] ss:$16 sps:$4 sm:$0xff]   ;;  %v17112_v55 = vld [vmem:[%s19724_s21 + $0x58c] ss:$16 sps:$4 sm:$0xff]  }
 0x143   : > { %9730 = vmatprep.subr.bf16.mxu0 %v17016_v56  ;;  %10762 = vmatprep.subr.bf16.mxu1 %v17019_v57  ;;  %v17107_v56 = vld [vmem:[%s19724_s21 + $0x580] ss:$16 sps:$4 sm:$0xff]   ;;  %v17110_v57 = vld [vmem:[%s19724_s21 + $0x588] ss:$16 sps:$4 sm:$0xff]  }
 0x146   : > { %9731 = vmatpush1.bf16.msra.mxu0 %v17014_v58  ;;  %10763 = vmatpush1.bf16.msra.mxu1 %v17017_v59  ;;  %v17115_v58 = vld [vmem:[%s19724_s21 + $0x5a4] ss:$16 sps:$4 sm:$0xff]   ;;  %v17118_v59 = vld [vmem:[%s19724_s21 + $0x5ac] ss:$16 sps:$4 sm:$0xff]  }
 0x147   : > { %9732 = vmatprep.subr.bf16.mxu0 %v17022_v60  ;;  %10764 = vmatprep.subr.bf16.mxu1 %v17025_v61  ;;  %v17113_v60 = vld [vmem:[%s19724_s21 + $0x5a0] ss:$16 sps:$4 sm:$0xff]   ;;  %v17116_v61 = vld [vmem:[%s19724_s21 + $0x5a8] ss:$16 sps:$4 sm:$0xff]  }
 0x14a   : > { %9733 = vmatpush1.bf16.msra.mxu0 %v17020_v62  ;;  %10765 = vmatpush1.bf16.msra.mxu1 %v17023_v63  ;;  %v17121_v62 = vld [vmem:[%s19724_s21 + $0x5c4] ss:$16 sps:$4 sm:$0xff]   ;;  %v17124_v63 = vld [vmem:[%s19724_s21 + $0x5cc] ss:$16 sps:$4 sm:$0xff]  }
 0x14b   : > { %9734 = vmatprep.subr.bf16.mxu0 %v17028_v0  ;;  %10766 = vmatprep.subr.bf16.mxu1 %v17031_v1  ;;  %v17119_v0 = vld [vmem:[%s19724_s21 + $0x5c0] ss:$16 sps:$4 sm:$0xff]   ;;  %v17122_v1 = vld [vmem:[%s19724_s21 + $0x5c8] ss:$16 sps:$4 sm:$0xff]  }
 0x14e   : > { %9735 = vmatpush1.bf16.msra.mxu0 %v17026_v2  ;;  %10767 = vmatpush1.bf16.msra.mxu1 %v17029_v3  ;;  %v17127_v2 = vld [vmem:[%s19724_s21 + $0x5e4] ss:$16 sps:$4 sm:$0xff]   ;;  %v17130_v3 = vld [vmem:[%s19724_s21 + $0x5ec] ss:$16 sps:$4 sm:$0xff]  }
 0x14f   : > { %9747 = vmatprep.subr.bf16.mxu0 %v17037_v4  ;;  %10779 = vmatprep.subr.bf16.mxu1 %v17040_v5  ;;  %v17125_v4 = vld [vmem:[%s19724_s21 + $0x5e0] ss:$16 sps:$4 sm:$0xff]   ;;  %v17128_v5 = vld [vmem:[%s19724_s21 + $0x5e8] ss:$16 sps:$4 sm:$0xff]  }
 0x151   : > { %9737 = vmatmul.mubr.bf16.vlgmr.msra.gmra.mrb[0].mxu0 %v17032_v6  ;;  %10769 = vmatmul.mubr.bf16.vlgmr.msra.gmra.mrb[0].mxu1 %v17032_v6  ;;  %v17136_v6 = vld [vmem:[%s19724_s21 + $0x604] ss:$16 sps:$4 sm:$0xff]  }
 0x152   : > { %9748 = vmatpush1.bf16.msra.mxu0 %v17035_v7  ;;  %10780 = vmatpush1.bf16.msra.mxu1 %v17038_v8  ;;  %v17139_v7 = vld [vmem:[%s19724_s21 + $0x60c] ss:$16 sps:$4 sm:$0xff]  }
 0x153   : > { %9749 = vmatprep.subr.bf16.mxu0 %v17043_v9  ;;  %10781 = vmatprep.subr.bf16.mxu1 %v17046_v10  ;;  %v17131_v8 = vld [vmem:[%s21727_s0 + $0x10] ss:$188 sps:$4 sm:$0xff]   ;;  %v17137_v10 = vld [vmem:[%s19724_s21 + $0x608] ss:$16 sps:$4 sm:$0xff]  }
 0x154   : > { %9779 = vmatprep.mubr.bf16.mxu0 %v17133_v13  ;;  %10811 = vmatprep.mubr.bf16.mxu1 %v17133_v13  ;;  %v17134_v9 = vld [vmem:[%s19724_s21 + $0x600] ss:$16 sps:$4 sm:$0xff]   ;;  %v17232_v13 = vld [vmem:[%s21727_s0 + $0x1c] ss:$188 sps:$4 sm:$0xff]  }
 0x156   : > { %9750 = vmatpush1.bf16.msra.mxu0 %v17041_v11  ;;  %10782 = vmatpush1.bf16.msra.mxu1 %v17044_v12  ;;  %v17142_v11 = vld [vmem:[%s19724_s21 + $0x624] ss:$16 sps:$4 sm:$0xff]   ;;  %v17145_v12 = vld [vmem:[%s19724_s21 + $0x62c] ss:$16 sps:$4 sm:$0xff]  }
 0x157   : > { %9751 = vmatprep.subr.bf16.mxu0 %v17049_v14  ;;  %10783 = vmatprep.subr.bf16.mxu1 %v17052_v15  ;;  %v17140_v14 = vld [vmem:[%s19724_s21 + $0x620] ss:$16 sps:$4 sm:$0xff]   ;;  %v17143_v15 = vld [vmem:[%s19724_s21 + $0x628] ss:$16 sps:$4 sm:$0xff]  }
 0x15a   : > { %9752 = vmatpush1.bf16.msra.mxu0 %v17047_v16  ;;  %10784 = vmatpush1.bf16.msra.mxu1 %v17050_v17  ;;  %v17148_v16 = vld [vmem:[%s19724_s21 + $0x644] ss:$16 sps:$4 sm:$0xff]   ;;  %v17151_v17 = vld [vmem:[%s19724_s21 + $0x64c] ss:$16 sps:$4 sm:$0xff]  }
 0x15b   : > { %9753 = vmatprep.subr.bf16.mxu0 %v17055_v18  ;;  %10785 = vmatprep.subr.bf16.mxu1 %v17058_v19  ;;  %v17146_v18 = vld [vmem:[%s19724_s21 + $0x640] ss:$16 sps:$4 sm:$0xff]   ;;  %v17149_v19 = vld [vmem:[%s19724_s21 + $0x648] ss:$16 sps:$4 sm:$0xff]  }
 0x15e   : > { %9754 = vmatpush1.bf16.msra.mxu0 %v17053_v20  ;;  %10786 = vmatpush1.bf16.msra.mxu1 %v17056_v21  ;;  %v17154_v20 = vld [vmem:[%s19724_s21 + $0x664] ss:$16 sps:$4 sm:$0xff]   ;;  %v17157_v21 = vld [vmem:[%s19724_s21 + $0x66c] ss:$16 sps:$4 sm:$0xff]  }
 0x15f   : > { %9755 = vmatprep.subr.bf16.mxu0 %v17061_v22  ;;  %10787 = vmatprep.subr.bf16.mxu1 %v17064_v23  ;;  %v17152_v22 = vld [vmem:[%s19724_s21 + $0x660] ss:$16 sps:$4 sm:$0xff]   ;;  %v17155_v23 = vld [vmem:[%s19724_s21 + $0x668] ss:$16 sps:$4 sm:$0xff]  }
 0x162   : > { %9756 = vmatpush1.bf16.msra.mxu0 %v17059_v24  ;;  %10788 = vmatpush1.bf16.msra.mxu1 %v17062_v25  ;;  %v17160_v24 = vld [vmem:[%s19724_s21 + $0x684] ss:$16 sps:$4 sm:$0xff]   ;;  %v17163_v25 = vld [vmem:[%s19724_s21 + $0x68c] ss:$16 sps:$4 sm:$0xff]  }
 0x163   : > { %9757 = vmatprep.subr.bf16.mxu0 %v17067_v26  ;;  %10789 = vmatprep.subr.bf16.mxu1 %v17070_v27  ;;  %v17158_v26 = vld [vmem:[%s19724_s21 + $0x680] ss:$16 sps:$4 sm:$0xff]   ;;  %v17161_v27 = vld [vmem:[%s19724_s21 + $0x688] ss:$16 sps:$4 sm:$0xff]  }
 0x166   : > { %9758 = vmatpush1.bf16.msra.mxu0 %v17065_v28  ;;  %10790 = vmatpush1.bf16.msra.mxu1 %v17068_v29  ;;  %v17166_v28 = vld [vmem:[%s19724_s21 + $0x6a4] ss:$16 sps:$4 sm:$0xff]   ;;  %v17169_v29 = vld [vmem:[%s19724_s21 + $0x6ac] ss:$16 sps:$4 sm:$0xff]  }
 0x167   : > { %9759 = vmatprep.subr.bf16.mxu0 %v17073_v30  ;;  %10791 = vmatprep.subr.bf16.mxu1 %v17076_v31  ;;  %v17164_v30 = vld [vmem:[%s19724_s21 + $0x6a0] ss:$16 sps:$4 sm:$0xff]   ;;  %v17167_v31 = vld [vmem:[%s19724_s21 + $0x6a8] ss:$16 sps:$4 sm:$0xff]  }
 0x16a   : > { %9760 = vmatpush1.bf16.msra.mxu0 %v17071_v32  ;;  %10792 = vmatpush1.bf16.msra.mxu1 %v17074_v33  ;;  %v17172_v32 = vld [vmem:[%s19724_s21 + $0x6c4] ss:$16 sps:$4 sm:$0xff]   ;;  %v17175_v33 = vld [vmem:[%s19724_s21 + $0x6cc] ss:$16 sps:$4 sm:$0xff]  }
 0x16b   : > { %9761 = vmatprep.subr.bf16.mxu0 %v17079_v34  ;;  %10793 = vmatprep.subr.bf16.mxu1 %v17082_v35  ;;  %v17170_v34 = vld [vmem:[%s19724_s21 + $0x6c0] ss:$16 sps:$4 sm:$0xff]   ;;  %v17173_v35 = vld [vmem:[%s19724_s21 + $0x6c8] ss:$16 sps:$4 sm:$0xff]  }
 0x16e   : > { %9762 = vmatpush1.bf16.msra.mxu0 %v17077_v36  ;;  %10794 = vmatpush1.bf16.msra.mxu1 %v17080_v37  ;;  %v17178_v36 = vld [vmem:[%s19724_s21 + $0x6e4] ss:$16 sps:$4 sm:$0xff]   ;;  %v17181_v37 = vld [vmem:[%s19724_s21 + $0x6ec] ss:$16 sps:$4 sm:$0xff]  }
 0x16f   : > { %9763 = vmatprep.subr.bf16.mxu0 %v17085_v38  ;;  %10795 = vmatprep.subr.bf16.mxu1 %v17088_v39  ;;  %v17176_v38 = vld [vmem:[%s19724_s21 + $0x6e0] ss:$16 sps:$4 sm:$0xff]   ;;  %v17179_v39 = vld [vmem:[%s19724_s21 + $0x6e8] ss:$16 sps:$4 sm:$0xff]  }
 0x172   : > { %9764 = vmatpush1.bf16.msra.mxu0 %v17083_v40  ;;  %10796 = vmatpush1.bf16.msra.mxu1 %v17086_v41  ;;  %v17184_v40 = vld [vmem:[%s19724_s21 + $0x704] ss:$16 sps:$4 sm:$0xff]   ;;  %v17187_v41 = vld [vmem:[%s19724_s21 + $0x70c] ss:$16 sps:$4 sm:$0xff]  }
 0x173   : > { %9765 = vmatprep.subr.bf16.mxu0 %v17091_v42  ;;  %10797 = vmatprep.subr.bf16.mxu1 %v17094_v43  ;;  %v17182_v42 = vld [vmem:[%s19724_s21 + $0x700] ss:$16 sps:$4 sm:$0xff]   ;;  %v17185_v43 = vld [vmem:[%s19724_s21 + $0x708] ss:$16 sps:$4 sm:$0xff]  }
 0x176   : > { %9766 = vmatpush1.bf16.msra.mxu0 %v17089_v44  ;;  %10798 = vmatpush1.bf16.msra.mxu1 %v17092_v45  ;;  %v17190_v44 = vld [vmem:[%s19724_s21 + $0x724] ss:$16 sps:$4 sm:$0xff]   ;;  %v17193_v45 = vld [vmem:[%s19724_s21 + $0x72c] ss:$16 sps:$4 sm:$0xff]  }
 0x177   : > { %9767 = vmatprep.subr.bf16.mxu0 %v17097_v46  ;;  %10799 = vmatprep.subr.bf16.mxu1 %v17100_v47  ;;  %v17188_v46 = vld [vmem:[%s19724_s21 + $0x720] ss:$16 sps:$4 sm:$0xff]   ;;  %v17191_v47 = vld [vmem:[%s19724_s21 + $0x728] ss:$16 sps:$4 sm:$0xff]  }
 0x17a   : > { %9768 = vmatpush1.bf16.msra.mxu0 %v17095_v48  ;;  %10800 = vmatpush1.bf16.msra.mxu1 %v17098_v49  ;;  %v17196_v48 = vld [vmem:[%s19724_s21 + $0x744] ss:$16 sps:$4 sm:$0xff]   ;;  %v17199_v49 = vld [vmem:[%s19724_s21 + $0x74c] ss:$16 sps:$4 sm:$0xff]  }
 0x17b   : > { %9769 = vmatprep.subr.bf16.mxu0 %v17103_v50  ;;  %10801 = vmatprep.subr.bf16.mxu1 %v17106_v51  ;;  %v17194_v50 = vld [vmem:[%s19724_s21 + $0x740] ss:$16 sps:$4 sm:$0xff]   ;;  %v17197_v51 = vld [vmem:[%s19724_s21 + $0x748] ss:$16 sps:$4 sm:$0xff]  }
 0x17e   : > { %9770 = vmatpush1.bf16.msra.mxu0 %v17101_v52  ;;  %10802 = vmatpush1.bf16.msra.mxu1 %v17104_v53  ;;  %v17202_v52 = vld [vmem:[%s19724_s21 + $0x764] ss:$16 sps:$4 sm:$0xff]   ;;  %v17205_v53 = vld [vmem:[%s19724_s21 + $0x76c] ss:$16 sps:$4 sm:$0xff]  }
 0x17f   : > { %9771 = vmatprep.subr.bf16.mxu0 %v17109_v54  ;;  %10803 = vmatprep.subr.bf16.mxu1 %v17112_v55  ;;  %v17200_v54 = vld [vmem:[%s19724_s21 + $0x760] ss:$16 sps:$4 sm:$0xff]   ;;  %v17203_v55 = vld [vmem:[%s19724_s21 + $0x768] ss:$16 sps:$4 sm:$0xff]  }
 0x182   : > { %9772 = vmatpush1.bf16.msra.mxu0 %v17107_v56  ;;  %10804 = vmatpush1.bf16.msra.mxu1 %v17110_v57  ;;  %v17208_v56 = vld [vmem:[%s19724_s21 + $0x784] ss:$16 sps:$4 sm:$0xff]   ;;  %v17211_v57 = vld [vmem:[%s19724_s21 + $0x78c] ss:$16 sps:$4 sm:$0xff]  }
 0x183   : > { %9773 = vmatprep.subr.bf16.mxu0 %v17115_v58  ;;  %10805 = vmatprep.subr.bf16.mxu1 %v17118_v59  ;;  %v17206_v58 = vld [vmem:[%s19724_s21 + $0x780] ss:$16 sps:$4 sm:$0xff]   ;;  %v17209_v59 = vld [vmem:[%s19724_s21 + $0x788] ss:$16 sps:$4 sm:$0xff]  }
 0x186   : > { %9774 = vmatpush1.bf16.msra.mxu0 %v17113_v60  ;;  %10806 = vmatpush1.bf16.msra.mxu1 %v17116_v61  ;;  %v17214_v60 = vld [vmem:[%s19724_s21 + $0x7a4] ss:$16 sps:$4 sm:$0xff]   ;;  %v17217_v61 = vld [vmem:[%s19724_s21 + $0x7ac] ss:$16 sps:$4 sm:$0xff]  }
 0x187   : > { %9775 = vmatprep.subr.bf16.mxu0 %v17121_v62  ;;  %10807 = vmatprep.subr.bf16.mxu1 %v17124_v63  ;;  %v17212_v62 = vld [vmem:[%s19724_s21 + $0x7a0] ss:$16 sps:$4 sm:$0xff]   ;;  %v17215_v63 = vld [vmem:[%s19724_s21 + $0x7a8] ss:$16 sps:$4 sm:$0xff]  }
 0x18a   : > { %9776 = vmatpush1.bf16.msra.mxu0 %v17119_v0  ;;  %10808 = vmatpush1.bf16.msra.mxu1 %v17122_v1  ;;  %v17220_v0 = vld [vmem:[%s19724_s21 + $0x7c4] ss:$16 sps:$4 sm:$0xff]   ;;  %v17223_v1 = vld [vmem:[%s19724_s21 + $0x7cc] ss:$16 sps:$4 sm:$0xff]  }
 0x18b   : > { %9777 = vmatprep.subr.bf16.mxu0 %v17127_v2  ;;  %10809 = vmatprep.subr.bf16.mxu1 %v17130_v3  ;;  %v17218_v2 = vld [vmem:[%s19724_s21 + $0x7c0] ss:$16 sps:$4 sm:$0xff]   ;;  %v17221_v3 = vld [vmem:[%s19724_s21 + $0x7c8] ss:$16 sps:$4 sm:$0xff]  }
 0x18e   : > { %9778 = vmatpush1.bf16.msra.mxu0 %v17125_v4  ;;  %10810 = vmatpush1.bf16.msra.mxu1 %v17128_v5  ;;  %v17226_v4 = vld [vmem:[%s19724_s21 + $0x7e4] ss:$16 sps:$4 sm:$0xff]   ;;  %v17229_v5 = vld [vmem:[%s19724_s21 + $0x7ec] ss:$16 sps:$4 sm:$0xff]  }
 0x18f   : > { %9790 = vmatprep.subr.bf16.mxu0 %v17136_v6  ;;  %10822 = vmatprep.subr.bf16.mxu1 %v17139_v7  ;;  %v17224_v6 = vld [vmem:[%s19724_s21 + $0x7e0] ss:$16 sps:$4 sm:$0xff]   ;;  %v17227_v7 = vld [vmem:[%s19724_s21 + $0x7e8] ss:$16 sps:$4 sm:$0xff]  }
 0x191   : > { %9780 = vmatmul.mubr.bf16.vlgmr.msra.gmra.mrb[0].mxu0 %v17131_v8  ;;  %10812 = vmatmul.mubr.bf16.vlgmr.msra.gmra.mrb[0].mxu1 %v17131_v8  ;;  %v17235_v8 = vld [vmem:[%s19724_s21 + $0x804] ss:$16 sps:$4 sm:$0xff]  }
 0x192   : > { %9791 = vmatpush1.bf16.msra.mxu0 %v17134_v9  ;;  %10823 = vmatpush1.bf16.msra.mxu1 %v17137_v10  ;;  %v17238_v9 = vld [vmem:[%s19724_s21 + $0x80c] ss:$16 sps:$4 sm:$0xff]   ;;  %v17230_v10 = vld [vmem:[%s21727_s0 + $0x18] ss:$188 sps:$4 sm:$0xff]  }
 0x193   : > { %9792 = vmatprep.subr.bf16.mxu0 %v17142_v11  ;;  %10824 = vmatprep.subr.bf16.mxu1 %v17145_v12  ;;  %v17233_v11 = vld [vmem:[%s19724_s21 + $0x800] ss:$16 sps:$4 sm:$0xff]   ;;  %v17236_v12 = vld [vmem:[%s19724_s21 + $0x808] ss:$16 sps:$4 sm:$0xff]  }
 0x194   : > { %9822 = vmatprep.mubr.bf16.mxu0 %v17232_v13  ;;  %10854 = vmatprep.mubr.bf16.mxu1 %v17232_v13  ;;  %v17241_v13 = vld [vmem:[%s19724_s21 + $0x824] ss:$16 sps:$4 sm:$0xff]  }
 0x196   : > { %9793 = vmatpush1.bf16.msra.mxu0 %v17140_v14  ;;  %10825 = vmatpush1.bf16.msra.mxu1 %v17143_v15  ;;  %v17244_v14 = vld [vmem:[%s19724_s21 + $0x82c] ss:$16 sps:$4 sm:$0xff]   ;;  %v17331_v15 = vld [vmem:[%s21727_s0 + $0x24] ss:$188 sps:$4 sm:$0xff]  }
 0x197   : > { %9794 = vmatprep.subr.bf16.mxu0 %v17148_v16  ;;  %10826 = vmatprep.subr.bf16.mxu1 %v17151_v17  ;;  %v17239_v16 = vld [vmem:[%s19724_s21 + $0x820] ss:$16 sps:$4 sm:$0xff]   ;;  %v17242_v17 = vld [vmem:[%s19724_s21 + $0x828] ss:$16 sps:$4 sm:$0xff]  }
 0x19a   : > { %9795 = vmatpush1.bf16.msra.mxu0 %v17146_v18  ;;  %10827 = vmatpush1.bf16.msra.mxu1 %v17149_v19  ;;  %v17247_v18 = vld [vmem:[%s19724_s21 + $0x844] ss:$16 sps:$4 sm:$0xff]   ;;  %v17250_v19 = vld [vmem:[%s19724_s21 + $0x84c] ss:$16 sps:$4 sm:$0xff]  }
 0x19b   : > { %9796 = vmatprep.subr.bf16.mxu0 %v17154_v20  ;;  %10828 = vmatprep.subr.bf16.mxu1 %v17157_v21  ;;  %v17245_v20 = vld [vmem:[%s19724_s21 + $0x840] ss:$16 sps:$4 sm:$0xff]   ;;  %v17248_v21 = vld [vmem:[%s19724_s21 + $0x848] ss:$16 sps:$4 sm:$0xff]  }
 0x19e   : > { %9797 = vmatpush1.bf16.msra.mxu0 %v17152_v22  ;;  %10829 = vmatpush1.bf16.msra.mxu1 %v17155_v23  ;;  %v17253_v22 = vld [vmem:[%s19724_s21 + $0x864] ss:$16 sps:$4 sm:$0xff]   ;;  %v17256_v23 = vld [vmem:[%s19724_s21 + $0x86c] ss:$16 sps:$4 sm:$0xff]  }
 0x19f   : > { %9798 = vmatprep.subr.bf16.mxu0 %v17160_v24  ;;  %10830 = vmatprep.subr.bf16.mxu1 %v17163_v25  ;;  %v17251_v24 = vld [vmem:[%s19724_s21 + $0x860] ss:$16 sps:$4 sm:$0xff]   ;;  %v17254_v25 = vld [vmem:[%s19724_s21 + $0x868] ss:$16 sps:$4 sm:$0xff]  }
 0x1a2   : > { %9799 = vmatpush1.bf16.msra.mxu0 %v17158_v26  ;;  %10831 = vmatpush1.bf16.msra.mxu1 %v17161_v27  ;;  %v17259_v26 = vld [vmem:[%s19724_s21 + $0x884] ss:$16 sps:$4 sm:$0xff]   ;;  %v17262_v27 = vld [vmem:[%s19724_s21 + $0x88c] ss:$16 sps:$4 sm:$0xff]  }
 0x1a3   : > { %9800 = vmatprep.subr.bf16.mxu0 %v17166_v28  ;;  %10832 = vmatprep.subr.bf16.mxu1 %v17169_v29  ;;  %v17257_v28 = vld [vmem:[%s19724_s21 + $0x880] ss:$16 sps:$4 sm:$0xff]   ;;  %v17260_v29 = vld [vmem:[%s19724_s21 + $0x888] ss:$16 sps:$4 sm:$0xff]  }
 0x1a6   : > { %9801 = vmatpush1.bf16.msra.mxu0 %v17164_v30  ;;  %10833 = vmatpush1.bf16.msra.mxu1 %v17167_v31  ;;  %v17265_v30 = vld [vmem:[%s19724_s21 + $0x8a4] ss:$16 sps:$4 sm:$0xff]   ;;  %v17268_v31 = vld [vmem:[%s19724_s21 + $0x8ac] ss:$16 sps:$4 sm:$0xff]  }
 0x1a7   : > { %9802 = vmatprep.subr.bf16.mxu0 %v17172_v32  ;;  %10834 = vmatprep.subr.bf16.mxu1 %v17175_v33  ;;  %v17263_v32 = vld [vmem:[%s19724_s21 + $0x8a0] ss:$16 sps:$4 sm:$0xff]   ;;  %v17266_v33 = vld [vmem:[%s19724_s21 + $0x8a8] ss:$16 sps:$4 sm:$0xff]  }
 0x1aa   : > { %9803 = vmatpush1.bf16.msra.mxu0 %v17170_v34  ;;  %10835 = vmatpush1.bf16.msra.mxu1 %v17173_v35  ;;  %v17271_v34 = vld [vmem:[%s19724_s21 + $0x8c4] ss:$16 sps:$4 sm:$0xff]   ;;  %v17274_v35 = vld [vmem:[%s19724_s21 + $0x8cc] ss:$16 sps:$4 sm:$0xff]  }
 0x1ab   : > { %9804 = vmatprep.subr.bf16.mxu0 %v17178_v36  ;;  %10836 = vmatprep.subr.bf16.mxu1 %v17181_v37  ;;  %v17269_v36 = vld [vmem:[%s19724_s21 + $0x8c0] ss:$16 sps:$4 sm:$0xff]   ;;  %v17272_v37 = vld [vmem:[%s19724_s21 + $0x8c8] ss:$16 sps:$4 sm:$0xff]  }
 0x1ae   : > { %9805 = vmatpush1.bf16.msra.mxu0 %v17176_v38  ;;  %10837 = vmatpush1.bf16.msra.mxu1 %v17179_v39  ;;  %v17277_v38 = vld [vmem:[%s19724_s21 + $0x8e4] ss:$16 sps:$4 sm:$0xff]   ;;  %v17280_v39 = vld [vmem:[%s19724_s21 + $0x8ec] ss:$16 sps:$4 sm:$0xff]  }
 0x1af   : > { %9806 = vmatprep.subr.bf16.mxu0 %v17184_v40  ;;  %10838 = vmatprep.subr.bf16.mxu1 %v17187_v41  ;;  %v17275_v40 = vld [vmem:[%s19724_s21 + $0x8e0] ss:$16 sps:$4 sm:$0xff]   ;;  %v17278_v41 = vld [vmem:[%s19724_s21 + $0x8e8] ss:$16 sps:$4 sm:$0xff]  }
 0x1b2   : > { %9807 = vmatpush1.bf16.msra.mxu0 %v17182_v42  ;;  %10839 = vmatpush1.bf16.msra.mxu1 %v17185_v43  ;;  %v17283_v42 = vld [vmem:[%s19724_s21 + $0x904] ss:$16 sps:$4 sm:$0xff]   ;;  %v17286_v43 = vld [vmem:[%s19724_s21 + $0x90c] ss:$16 sps:$4 sm:$0xff]  }
 0x1b3   : > { %9808 = vmatprep.subr.bf16.mxu0 %v17190_v44  ;;  %10840 = vmatprep.subr.bf16.mxu1 %v17193_v45  ;;  %v17281_v44 = vld [vmem:[%s19724_s21 + $0x900] ss:$16 sps:$4 sm:$0xff]   ;;  %v17284_v45 = vld [vmem:[%s19724_s21 + $0x908] ss:$16 sps:$4 sm:$0xff]  }
 0x1b6   : > { %9809 = vmatpush1.bf16.msra.mxu0 %v17188_v46  ;;  %10841 = vmatpush1.bf16.msra.mxu1 %v17191_v47  ;;  %v17289_v46 = vld [vmem:[%s19724_s21 + $0x924] ss:$16 sps:$4 sm:$0xff]   ;;  %v17292_v47 = vld [vmem:[%s19724_s21 + $0x92c] ss:$16 sps:$4 sm:$0xff]  }
 0x1b7   : > { %9810 = vmatprep.subr.bf16.mxu0 %v17196_v48  ;;  %10842 = vmatprep.subr.bf16.mxu1 %v17199_v49  ;;  %v17287_v48 = vld [vmem:[%s19724_s21 + $0x920] ss:$16 sps:$4 sm:$0xff]   ;;  %v17290_v49 = vld [vmem:[%s19724_s21 + $0x928] ss:$16 sps:$4 sm:$0xff]  }
 0x1ba   : > { %9811 = vmatpush1.bf16.msra.mxu0 %v17194_v50  ;;  %10843 = vmatpush1.bf16.msra.mxu1 %v17197_v51  ;;  %v17295_v50 = vld [vmem:[%s19724_s21 + $0x944] ss:$16 sps:$4 sm:$0xff]   ;;  %v17298_v51 = vld [vmem:[%s19724_s21 + $0x94c] ss:$16 sps:$4 sm:$0xff]  }
 0x1bb   : > { %9812 = vmatprep.subr.bf16.mxu0 %v17202_v52  ;;  %10844 = vmatprep.subr.bf16.mxu1 %v17205_v53  ;;  %v17293_v52 = vld [vmem:[%s19724_s21 + $0x940] ss:$16 sps:$4 sm:$0xff]   ;;  %v17296_v53 = vld [vmem:[%s19724_s21 + $0x948] ss:$16 sps:$4 sm:$0xff]  }
 0x1be   : > { %9813 = vmatpush1.bf16.msra.mxu0 %v17200_v54  ;;  %10845 = vmatpush1.bf16.msra.mxu1 %v17203_v55  ;;  %v17301_v54 = vld [vmem:[%s19724_s21 + $0x964] ss:$16 sps:$4 sm:$0xff]   ;;  %v17304_v55 = vld [vmem:[%s19724_s21 + $0x96c] ss:$16 sps:$4 sm:$0xff]  }
 0x1bf   : > { %9814 = vmatprep.subr.bf16.mxu0 %v17208_v56  ;;  %10846 = vmatprep.subr.bf16.mxu1 %v17211_v57  ;;  %v17299_v56 = vld [vmem:[%s19724_s21 + $0x960] ss:$16 sps:$4 sm:$0xff]   ;;  %v17302_v57 = vld [vmem:[%s19724_s21 + $0x968] ss:$16 sps:$4 sm:$0xff]  }
 0x1c2   : > { %9815 = vmatpush1.bf16.msra.mxu0 %v17206_v58  ;;  %10847 = vmatpush1.bf16.msra.mxu1 %v17209_v59  ;;  %v17307_v58 = vld [vmem:[%s19724_s21 + $0x984] ss:$16 sps:$4 sm:$0xff]   ;;  %v17310_v59 = vld [vmem:[%s19724_s21 + $0x98c] ss:$16 sps:$4 sm:$0xff]  }
 0x1c3   : > { %9816 = vmatprep.subr.bf16.mxu0 %v17214_v60  ;;  %10848 = vmatprep.subr.bf16.mxu1 %v17217_v61  ;;  %v17305_v60 = vld [vmem:[%s19724_s21 + $0x980] ss:$16 sps:$4 sm:$0xff]   ;;  %v17308_v61 = vld [vmem:[%s19724_s21 + $0x988] ss:$16 sps:$4 sm:$0xff]  }
 0x1c6   : > { %9817 = vmatpush1.bf16.msra.mxu0 %v17212_v62  ;;  %10849 = vmatpush1.bf16.msra.mxu1 %v17215_v63  ;;  %v17313_v62 = vld [vmem:[%s19724_s21 + $0x9a4] ss:$16 sps:$4 sm:$0xff]   ;;  %v17316_v63 = vld [vmem:[%s19724_s21 + $0x9ac] ss:$16 sps:$4 sm:$0xff]  }
 0x1c7   : > { %9818 = vmatprep.subr.bf16.mxu0 %v17220_v0  ;;  %10850 = vmatprep.subr.bf16.mxu1 %v17223_v1  ;;  %v17311_v0 = vld [vmem:[%s19724_s21 + $0x9a0] ss:$16 sps:$4 sm:$0xff]   ;;  %v17314_v1 = vld [vmem:[%s19724_s21 + $0x9a8] ss:$16 sps:$4 sm:$0xff]  }
 0x1ca   : > { %9819 = vmatpush1.bf16.msra.mxu0 %v17218_v2  ;;  %10851 = vmatpush1.bf16.msra.mxu1 %v17221_v3  ;;  %v17319_v2 = vld [vmem:[%s19724_s21 + $0x9c4] ss:$16 sps:$4 sm:$0xff]   ;;  %v17322_v3 = vld [vmem:[%s19724_s21 + $0x9cc] ss:$16 sps:$4 sm:$0xff]  }
 0x1cb   : > { %9820 = vmatprep.subr.bf16.mxu0 %v17226_v4  ;;  %10852 = vmatprep.subr.bf16.mxu1 %v17229_v5  ;;  %v17317_v4 = vld [vmem:[%s19724_s21 + $0x9c0] ss:$16 sps:$4 sm:$0xff]   ;;  %v17320_v5 = vld [vmem:[%s19724_s21 + $0x9c8] ss:$16 sps:$4 sm:$0xff]  }
 0x1ce   : > { %9821 = vmatpush1.bf16.msra.mxu0 %v17224_v6  ;;  %10853 = vmatpush1.bf16.msra.mxu1 %v17227_v7  ;;  %v17325_v6 = vld [vmem:[%s19724_s21 + $0x9e4] ss:$16 sps:$4 sm:$0xff]   ;;  %v17328_v7 = vld [vmem:[%s19724_s21 + $0x9ec] ss:$16 sps:$4 sm:$0xff]  }
 0x1cf   : > { %9833 = vmatprep.subr.bf16.mxu0 %v17235_v8  ;;  %10865 = vmatprep.subr.bf16.mxu1 %v17238_v9  ;;  %v17323_v8 = vld [vmem:[%s19724_s21 + $0x9e0] ss:$16 sps:$4 sm:$0xff]   ;;  %v17326_v9 = vld [vmem:[%s19724_s21 + $0x9e8] ss:$16 sps:$4 sm:$0xff]  }
 0x1d1   : > { %9823 = vmatmul.mubr.bf16.vlgmr.msra.gmra.mrb[0].mxu0 %v17230_v10  ;;  %10855 = vmatmul.mubr.bf16.vlgmr.msra.gmra.mrb[0].mxu1 %v17230_v10  ;;  %v17329_v10 = vld [vmem:[%s21727_s0 + $0x20] ss:$188 sps:$4 sm:$0xff]  }
 0x1d2   : > { %9834 = vmatpush1.bf16.msra.mxu0 %v17233_v11  ;;  %10866 = vmatpush1.bf16.msra.mxu1 %v17236_v12  ;;  %v17334_v11 = vld [vmem:[%s19724_s21 + $0xa04] ss:$16 sps:$4 sm:$0xff]   ;;  %v17337_v12 = vld [vmem:[%s19724_s21 + $0xa0c] ss:$16 sps:$4 sm:$0xff]  }
 0x1d3   : > { %9835 = vmatprep.subr.bf16.mxu0 %v17241_v13  ;;  %10867 = vmatprep.subr.bf16.mxu1 %v17244_v14  ;;  %v17332_v13 = vld [vmem:[%s19724_s21 + $0xa00] ss:$16 sps:$4 sm:$0xff]   ;;  %v17335_v14 = vld [vmem:[%s19724_s21 + $0xa08] ss:$16 sps:$4 sm:$0xff]  }
 0x1d4   : > { %9865 = vmatprep.mubr.bf16.mxu0 %v17331_v15  ;;  %10897 = vmatprep.mubr.bf16.mxu1 %v17331_v15  ;;  %v17340_v15 = vld [vmem:[%s19724_s21 + $0xa24] ss:$16 sps:$4 sm:$0xff]  }
 0x1d6   : > { %9836 = vmatpush1.bf16.msra.mxu0 %v17239_v16  ;;  %10868 = vmatpush1.bf16.msra.mxu1 %v17242_v17  ;;  %v17343_v16 = vld [vmem:[%s19724_s21 + $0xa2c] ss:$16 sps:$4 sm:$0xff]  }
 0x1d7   : > { %9837 = vmatprep.subr.bf16.mxu0 %v17247_v18  ;;  %10869 = vmatprep.subr.bf16.mxu1 %v17250_v19  ;;  %v17430_v17 = vld [vmem:[%s21727_s0 + $0x2c] ss:$188 sps:$4 sm:$0xff]   ;;  %v17338_v18 = vld [vmem:[%s19724_s21 + $0xa20] ss:$16 sps:$4 sm:$0xff]  }
 0x1d8   : > { %v17341_v19 = vld [vmem:[%s19724_s21 + $0xa28] ss:$16 sps:$4 sm:$0xff]  }
 0x1da   : > { %9838 = vmatpush1.bf16.msra.mxu0 %v17245_v20  ;;  %10870 = vmatpush1.bf16.msra.mxu1 %v17248_v21  ;;  %v17346_v20 = vld [vmem:[%s19724_s21 + $0xa44] ss:$16 sps:$4 sm:$0xff]   ;;  %v17349_v21 = vld [vmem:[%s19724_s21 + $0xa4c] ss:$16 sps:$4 sm:$0xff]  }
 0x1db   : > { %9839 = vmatprep.subr.bf16.mxu0 %v17253_v22  ;;  %10871 = vmatprep.subr.bf16.mxu1 %v17256_v23  ;;  %v17344_v22 = vld [vmem:[%s19724_s21 + $0xa40] ss:$16 sps:$4 sm:$0xff]   ;;  %v17347_v23 = vld [vmem:[%s19724_s21 + $0xa48] ss:$16 sps:$4 sm:$0xff]  }
 0x1de   : > { %9840 = vmatpush1.bf16.msra.mxu0 %v17251_v24  ;;  %10872 = vmatpush1.bf16.msra.mxu1 %v17254_v25  ;;  %v17352_v24 = vld [vmem:[%s19724_s21 + $0xa64] ss:$16 sps:$4 sm:$0xff]   ;;  %v17355_v25 = vld [vmem:[%s19724_s21 + $0xa6c] ss:$16 sps:$4 sm:$0xff]  }
 0x1df   : > { %9841 = vmatprep.subr.bf16.mxu0 %v17259_v26  ;;  %10873 = vmatprep.subr.bf16.mxu1 %v17262_v27  ;;  %v17350_v26 = vld [vmem:[%s19724_s21 + $0xa60] ss:$16 sps:$4 sm:$0xff]   ;;  %v17353_v27 = vld [vmem:[%s19724_s21 + $0xa68] ss:$16 sps:$4 sm:$0xff]  }
 0x1e2   : > { %9842 = vmatpush1.bf16.msra.mxu0 %v17257_v28  ;;  %10874 = vmatpush1.bf16.msra.mxu1 %v17260_v29  ;;  %v17358_v28 = vld [vmem:[%s19724_s21 + $0xa84] ss:$16 sps:$4 sm:$0xff]   ;;  %v17361_v29 = vld [vmem:[%s19724_s21 + $0xa8c] ss:$16 sps:$4 sm:$0xff]  }
 0x1e3   : > { %9843 = vmatprep.subr.bf16.mxu0 %v17265_v30  ;;  %10875 = vmatprep.subr.bf16.mxu1 %v17268_v31  ;;  %v17356_v30 = vld [vmem:[%s19724_s21 + $0xa80] ss:$16 sps:$4 sm:$0xff]   ;;  %v17359_v31 = vld [vmem:[%s19724_s21 + $0xa88] ss:$16 sps:$4 sm:$0xff]  }
 0x1e6   : > { %9844 = vmatpush1.bf16.msra.mxu0 %v17263_v32  ;;  %10876 = vmatpush1.bf16.msra.mxu1 %v17266_v33  ;;  %v17364_v32 = vld [vmem:[%s19724_s21 + $0xaa4] ss:$16 sps:$4 sm:$0xff]   ;;  %v17367_v33 = vld [vmem:[%s19724_s21 + $0xaac] ss:$16 sps:$4 sm:$0xff]  }
 0x1e7   : > { %9845 = vmatprep.subr.bf16.mxu0 %v17271_v34  ;;  %10877 = vmatprep.subr.bf16.mxu1 %v17274_v35  ;;  %v17362_v34 = vld [vmem:[%s19724_s21 + $0xaa0] ss:$16 sps:$4 sm:$0xff]   ;;  %v17365_v35 = vld [vmem:[%s19724_s21 + $0xaa8] ss:$16 sps:$4 sm:$0xff]  }
 0x1ea   : > { %9846 = vmatpush1.bf16.msra.mxu0 %v17269_v36  ;;  %10878 = vmatpush1.bf16.msra.mxu1 %v17272_v37  ;;  %v17370_v36 = vld [vmem:[%s19724_s21 + $0xac4] ss:$16 sps:$4 sm:$0xff]   ;;  %v17373_v37 = vld [vmem:[%s19724_s21 + $0xacc] ss:$16 sps:$4 sm:$0xff]  }
 0x1eb   : > { %9847 = vmatprep.subr.bf16.mxu0 %v17277_v38  ;;  %10879 = vmatprep.subr.bf16.mxu1 %v17280_v39  ;;  %v17368_v38 = vld [vmem:[%s19724_s21 + $0xac0] ss:$16 sps:$4 sm:$0xff]   ;;  %v17371_v39 = vld [vmem:[%s19724_s21 + $0xac8] ss:$16 sps:$4 sm:$0xff]  }
 0x1ee   : > { %9848 = vmatpush1.bf16.msra.mxu0 %v17275_v40  ;;  %10880 = vmatpush1.bf16.msra.mxu1 %v17278_v41  ;;  %v17376_v40 = vld [vmem:[%s19724_s21 + $0xae4] ss:$16 sps:$4 sm:$0xff]   ;;  %v17379_v41 = vld [vmem:[%s19724_s21 + $0xaec] ss:$16 sps:$4 sm:$0xff]  }
 0x1ef   : > { %9849 = vmatprep.subr.bf16.mxu0 %v17283_v42  ;;  %10881 = vmatprep.subr.bf16.mxu1 %v17286_v43  ;;  %v17374_v42 = vld [vmem:[%s19724_s21 + $0xae0] ss:$16 sps:$4 sm:$0xff]   ;;  %v17377_v43 = vld [vmem:[%s19724_s21 + $0xae8] ss:$16 sps:$4 sm:$0xff]  }
 0x1f2   : > { %9850 = vmatpush1.bf16.msra.mxu0 %v17281_v44  ;;  %10882 = vmatpush1.bf16.msra.mxu1 %v17284_v45  ;;  %v17382_v44 = vld [vmem:[%s19724_s21 + $0xb04] ss:$16 sps:$4 sm:$0xff]   ;;  %v17385_v45 = vld [vmem:[%s19724_s21 + $0xb0c] ss:$16 sps:$4 sm:$0xff]  }
 0x1f3   : > { %9851 = vmatprep.subr.bf16.mxu0 %v17289_v46  ;;  %10883 = vmatprep.subr.bf16.mxu1 %v17292_v47  ;;  %v17380_v46 = vld [vmem:[%s19724_s21 + $0xb00] ss:$16 sps:$4 sm:$0xff]   ;;  %v17383_v47 = vld [vmem:[%s19724_s21 + $0xb08] ss:$16 sps:$4 sm:$0xff]  }
 0x1f6   : > { %9852 = vmatpush1.bf16.msra.mxu0 %v17287_v48  ;;  %10884 = vmatpush1.bf16.msra.mxu1 %v17290_v49  ;;  %v17388_v48 = vld [vmem:[%s19724_s21 + $0xb24] ss:$16 sps:$4 sm:$0xff]   ;;  %v17391_v49 = vld [vmem:[%s19724_s21 + $0xb2c] ss:$16 sps:$4 sm:$0xff]  }
 0x1f7   : > { %9853 = vmatprep.subr.bf16.mxu0 %v17295_v50  ;;  %10885 = vmatprep.subr.bf16.mxu1 %v17298_v51  ;;  %v17386_v50 = vld [vmem:[%s19724_s21 + $0xb20] ss:$16 sps:$4 sm:$0xff]   ;;  %v17389_v51 = vld [vmem:[%s19724_s21 + $0xb28] ss:$16 sps:$4 sm:$0xff]  }
 0x1fa   : > { %9854 = vmatpush1.bf16.msra.mxu0 %v17293_v52  ;;  %10886 = vmatpush1.bf16.msra.mxu1 %v17296_v53  ;;  %v17394_v52 = vld [vmem:[%s19724_s21 + $0xb44] ss:$16 sps:$4 sm:$0xff]   ;;  %v17397_v53 = vld [vmem:[%s19724_s21 + $0xb4c] ss:$16 sps:$4 sm:$0xff]  }
 0x1fb   : > { %9855 = vmatprep.subr.bf16.mxu0 %v17301_v54  ;;  %10887 = vmatprep.subr.bf16.mxu1 %v17304_v55  ;;  %v17392_v54 = vld [vmem:[%s19724_s21 + $0xb40] ss:$16 sps:$4 sm:$0xff]   ;;  %v17395_v55 = vld [vmem:[%s19724_s21 + $0xb48] ss:$16 sps:$4 sm:$0xff]  }
 0x1fe   : > { %9856 = vmatpush1.bf16.msra.mxu0 %v17299_v56  ;;  %10888 = vmatpush1.bf16.msra.mxu1 %v17302_v57  ;;  %v17400_v56 = vld [vmem:[%s19724_s21 + $0xb64] ss:$16 sps:$4 sm:$0xff]   ;;  %v17403_v57 = vld [vmem:[%s19724_s21 + $0xb6c] ss:$16 sps:$4 sm:$0xff]  }
 0x1ff   : > { %9857 = vmatprep.subr.bf16.mxu0 %v17307_v58  ;;  %10889 = vmatprep.subr.bf16.mxu1 %v17310_v59  ;;  %v17398_v58 = vld [vmem:[%s19724_s21 + $0xb60] ss:$16 sps:$4 sm:$0xff]   ;;  %v17401_v59 = vld [vmem:[%s19724_s21 + $0xb68] ss:$16 sps:$4 sm:$0xff]  }
 0x202   : > { %9858 = vmatpush1.bf16.msra.mxu0 %v17305_v60  ;;  %10890 = vmatpush1.bf16.msra.mxu1 %v17308_v61  ;;  %v17406_v60 = vld [vmem:[%s19724_s21 + $0xb84] ss:$16 sps:$4 sm:$0xff]   ;;  %v17409_v61 = vld [vmem:[%s19724_s21 + $0xb8c] ss:$16 sps:$4 sm:$0xff]  }
 0x203   : > { %9859 = vmatprep.subr.bf16.mxu0 %v17313_v62  ;;  %10891 = vmatprep.subr.bf16.mxu1 %v17316_v63  ;;  %v17404_v62 = vld [vmem:[%s19724_s21 + $0xb80] ss:$16 sps:$4 sm:$0xff]   ;;  %v17407_v63 = vld [vmem:[%s19724_s21 + $0xb88] ss:$16 sps:$4 sm:$0xff]  }
 0x206   : > { %9860 = vmatpush1.bf16.msra.mxu0 %v17311_v0  ;;  %10892 = vmatpush1.bf16.msra.mxu1 %v17314_v1  ;;  %v17412_v0 = vld [vmem:[%s19724_s21 + $0xba4] ss:$16 sps:$4 sm:$0xff]   ;;  %v17415_v1 = vld [vmem:[%s19724_s21 + $0xbac] ss:$16 sps:$4 sm:$0xff]  }
 0x207   : > { %9861 = vmatprep.subr.bf16.mxu0 %v17319_v2  ;;  %10893 = vmatprep.subr.bf16.mxu1 %v17322_v3  ;;  %v17410_v2 = vld [vmem:[%s19724_s21 + $0xba0] ss:$16 sps:$4 sm:$0xff]   ;;  %v17413_v3 = vld [vmem:[%s19724_s21 + $0xba8] ss:$16 sps:$4 sm:$0xff]  }
 0x20a   : > { %9862 = vmatpush1.bf16.msra.mxu0 %v17317_v4  ;;  %10894 = vmatpush1.bf16.msra.mxu1 %v17320_v5  ;;  %v17418_v4 = vld [vmem:[%s19724_s21 + $0xbc4] ss:$16 sps:$4 sm:$0xff]   ;;  %v17421_v5 = vld [vmem:[%s19724_s21 + $0xbcc] ss:$16 sps:$4 sm:$0xff]  }
 0x20b   : > { %9863 = vmatprep.subr.bf16.mxu0 %v17325_v6  ;;  %10895 = vmatprep.subr.bf16.mxu1 %v17328_v7  ;;  %v17416_v6 = vld [vmem:[%s19724_s21 + $0xbc0] ss:$16 sps:$4 sm:$0xff]   ;;  %v17419_v7 = vld [vmem:[%s19724_s21 + $0xbc8] ss:$16 sps:$4 sm:$0xff]  }
 0x20e   : > { %9864 = vmatpush1.bf16.msra.mxu0 %v17323_v8  ;;  %10896 = vmatpush1.bf16.msra.mxu1 %v17326_v9  ;;  %v17424_v8 = vld [vmem:[%s19724_s21 + $0xbe4] ss:$16 sps:$4 sm:$0xff]   ;;  %v17427_v9 = vld [vmem:[%s19724_s21 + $0xbec] ss:$16 sps:$4 sm:$0xff]  }
 0x20f   : > { %9876 = vmatprep.subr.bf16.mxu0 %v17334_v11  ;;  %10908 = vmatprep.subr.bf16.mxu1 %v17337_v12  ;;  %v17425_v11 = vld [vmem:[%s19724_s21 + $0xbe8] ss:$16 sps:$4 sm:$0xff]  }
 0x210   : > { %v17428_v12 = vld [vmem:[%s21727_s0 + $0x28] ss:$188 sps:$4 sm:$0xff]  }
 0x211   : > { %9866 = vmatmul.mubr.bf16.vlgmr.msra.gmra.mrb[0].mxu0 %v17329_v10  ;;  %10898 = vmatmul.mubr.bf16.vlgmr.msra.gmra.mrb[0].mxu1 %v17329_v10  ;;  %v17422_v10 = vld [vmem:[%s19724_s21 + $0xbe0] ss:$16 sps:$4 sm:$0xff]  }
 0x212   : > { %9877 = vmatpush1.bf16.msra.mxu0 %v17332_v13  ;;  %10909 = vmatpush1.bf16.msra.mxu1 %v17335_v14  ;;  %v17433_v13 = vld [vmem:[%s19724_s21 + $0xc04] ss:$16 sps:$4 sm:$0xff]   ;;  %v17436_v14 = vld [vmem:[%s19724_s21 + $0xc0c] ss:$16 sps:$4 sm:$0xff]  }
 0x213   : > { %9878 = vmatprep.subr.bf16.mxu0 %v17340_v15  ;;  %10910 = vmatprep.subr.bf16.mxu1 %v17343_v16  ;;  %v17431_v15 = vld [vmem:[%s19724_s21 + $0xc00] ss:$16 sps:$4 sm:$0xff]   ;;  %v17434_v16 = vld [vmem:[%s19724_s21 + $0xc08] ss:$16 sps:$4 sm:$0xff]  }
 0x214   : > { %9908 = vmatprep.mubr.bf16.mxu0 %v17430_v17  ;;  %10940 = vmatprep.mubr.bf16.mxu1 %v17430_v17  ;;  %v17439_v17 = vld [vmem:[%s19724_s21 + $0xc24] ss:$16 sps:$4 sm:$0xff]  }
 0x216   : > { %9879 = vmatpush1.bf16.msra.mxu0 %v17338_v18  ;;  %10911 = vmatpush1.bf16.msra.mxu1 %v17341_v19  ;;  %v17442_v18 = vld [vmem:[%s19724_s21 + $0xc2c] ss:$16 sps:$4 sm:$0xff]   ;;  %v17529_v19 = vld [vmem:[%s21727_s0 + $0x34] ss:$188 sps:$4 sm:$0xff]  }
 0x217   : > { %9880 = vmatprep.subr.bf16.mxu0 %v17346_v20  ;;  %10912 = vmatprep.subr.bf16.mxu1 %v17349_v21  ;;  %v17437_v20 = vld [vmem:[%s19724_s21 + $0xc20] ss:$16 sps:$4 sm:$0xff]   ;;  %v17440_v21 = vld [vmem:[%s19724_s21 + $0xc28] ss:$16 sps:$4 sm:$0xff]  }
 0x21a   : > { %9881 = vmatpush1.bf16.msra.mxu0 %v17344_v22  ;;  %10913 = vmatpush1.bf16.msra.mxu1 %v17347_v23  ;;  %v17445_v22 = vld [vmem:[%s19724_s21 + $0xc44] ss:$16 sps:$4 sm:$0xff]   ;;  %v17448_v23 = vld [vmem:[%s19724_s21 + $0xc4c] ss:$16 sps:$4 sm:$0xff]  }
 0x21b   : > { %9882 = vmatprep.subr.bf16.mxu0 %v17352_v24  ;;  %10914 = vmatprep.subr.bf16.mxu1 %v17355_v25  ;;  %v17443_v24 = vld [vmem:[%s19724_s21 + $0xc40] ss:$16 sps:$4 sm:$0xff]   ;;  %v17446_v25 = vld [vmem:[%s19724_s21 + $0xc48] ss:$16 sps:$4 sm:$0xff]  }
 0x21e   : > { %9883 = vmatpush1.bf16.msra.mxu0 %v17350_v26  ;;  %10915 = vmatpush1.bf16.msra.mxu1 %v17353_v27  ;;  %v17451_v26 = vld [vmem:[%s19724_s21 + $0xc64] ss:$16 sps:$4 sm:$0xff]   ;;  %v17454_v27 = vld [vmem:[%s19724_s21 + $0xc6c] ss:$16 sps:$4 sm:$0xff]  }
 0x21f   : > { %9884 = vmatprep.subr.bf16.mxu0 %v17358_v28  ;;  %10916 = vmatprep.subr.bf16.mxu1 %v17361_v29  ;;  %v17449_v28 = vld [vmem:[%s19724_s21 + $0xc60] ss:$16 sps:$4 sm:$0xff]   ;;  %v17452_v29 = vld [vmem:[%s19724_s21 + $0xc68] ss:$16 sps:$4 sm:$0xff]  }
 0x222   : > { %9885 = vmatpush1.bf16.msra.mxu0 %v17356_v30  ;;  %10917 = vmatpush1.bf16.msra.mxu1 %v17359_v31  ;;  %v17457_v30 = vld [vmem:[%s19724_s21 + $0xc84] ss:$16 sps:$4 sm:$0xff]   ;;  %v17460_v31 = vld [vmem:[%s19724_s21 + $0xc8c] ss:$16 sps:$4 sm:$0xff]  }
 0x223   : > { %9886 = vmatprep.subr.bf16.mxu0 %v17364_v32  ;;  %10918 = vmatprep.subr.bf16.mxu1 %v17367_v33  ;;  %v17455_v32 = vld [vmem:[%s19724_s21 + $0xc80] ss:$16 sps:$4 sm:$0xff]   ;;  %v17458_v33 = vld [vmem:[%s19724_s21 + $0xc88] ss:$16 sps:$4 sm:$0xff]  }
 0x226   : > { %9887 = vmatpush1.bf16.msra.mxu0 %v17362_v34  ;;  %10919 = vmatpush1.bf16.msra.mxu1 %v17365_v35  ;;  %v17463_v34 = vld [vmem:[%s19724_s21 + $0xca4] ss:$16 sps:$4 sm:$0xff]   ;;  %v17466_v35 = vld [vmem:[%s19724_s21 + $0xcac] ss:$16 sps:$4 sm:$0xff]  }
 0x227   : > { %9888 = vmatprep.subr.bf16.mxu0 %v17370_v36  ;;  %10920 = vmatprep.subr.bf16.mxu1 %v17373_v37  ;;  %v17461_v36 = vld [vmem:[%s19724_s21 + $0xca0] ss:$16 sps:$4 sm:$0xff]   ;;  %v17464_v37 = vld [vmem:[%s19724_s21 + $0xca8] ss:$16 sps:$4 sm:$0xff]  }
 0x22a   : > { %9889 = vmatpush1.bf16.msra.mxu0 %v17368_v38  ;;  %10921 = vmatpush1.bf16.msra.mxu1 %v17371_v39  ;;  %v17469_v38 = vld [vmem:[%s19724_s21 + $0xcc4] ss:$16 sps:$4 sm:$0xff]   ;;  %v17472_v39 = vld [vmem:[%s19724_s21 + $0xccc] ss:$16 sps:$4 sm:$0xff]  }
 0x22b   : > { %9890 = vmatprep.subr.bf16.mxu0 %v17376_v40  ;;  %10922 = vmatprep.subr.bf16.mxu1 %v17379_v41  ;;  %v17467_v40 = vld [vmem:[%s19724_s21 + $0xcc0] ss:$16 sps:$4 sm:$0xff]   ;;  %v17470_v41 = vld [vmem:[%s19724_s21 + $0xcc8] ss:$16 sps:$4 sm:$0xff]  }
 0x22e   : > { %9891 = vmatpush1.bf16.msra.mxu0 %v17374_v42  ;;  %10923 = vmatpush1.bf16.msra.mxu1 %v17377_v43  ;;  %v17475_v42 = vld [vmem:[%s19724_s21 + $0xce4] ss:$16 sps:$4 sm:$0xff]   ;;  %v17478_v43 = vld [vmem:[%s19724_s21 + $0xcec] ss:$16 sps:$4 sm:$0xff]  }
 0x22f   : > { %9892 = vmatprep.subr.bf16.mxu0 %v17382_v44  ;;  %10924 = vmatprep.subr.bf16.mxu1 %v17385_v45  ;;  %v17473_v44 = vld [vmem:[%s19724_s21 + $0xce0] ss:$16 sps:$4 sm:$0xff]   ;;  %v17476_v45 = vld [vmem:[%s19724_s21 + $0xce8] ss:$16 sps:$4 sm:$0xff]  }
 0x232   : > { %9893 = vmatpush1.bf16.msra.mxu0 %v17380_v46  ;;  %10925 = vmatpush1.bf16.msra.mxu1 %v17383_v47  ;;  %v17481_v46 = vld [vmem:[%s19724_s21 + $0xd04] ss:$16 sps:$4 sm:$0xff]   ;;  %v17484_v47 = vld [vmem:[%s19724_s21 + $0xd0c] ss:$16 sps:$4 sm:$0xff]  }
 0x233   : > { %9894 = vmatprep.subr.bf16.mxu0 %v17388_v48  ;;  %10926 = vmatprep.subr.bf16.mxu1 %v17391_v49  ;;  %v17479_v48 = vld [vmem:[%s19724_s21 + $0xd00] ss:$16 sps:$4 sm:$0xff]   ;;  %v17482_v49 = vld [vmem:[%s19724_s21 + $0xd08] ss:$16 sps:$4 sm:$0xff]  }
 0x236   : > { %9895 = vmatpush1.bf16.msra.mxu0 %v17386_v50  ;;  %10927 = vmatpush1.bf16.msra.mxu1 %v17389_v51  ;;  %v17487_v50 = vld [vmem:[%s19724_s21 + $0xd24] ss:$16 sps:$4 sm:$0xff]   ;;  %v17490_v51 = vld [vmem:[%s19724_s21 + $0xd2c] ss:$16 sps:$4 sm:$0xff]  }
 0x237   : > { %9896 = vmatprep.subr.bf16.mxu0 %v17394_v52  ;;  %10928 = vmatprep.subr.bf16.mxu1 %v17397_v53  ;;  %v17485_v52 = vld [vmem:[%s19724_s21 + $0xd20] ss:$16 sps:$4 sm:$0xff]   ;;  %v17488_v53 = vld [vmem:[%s19724_s21 + $0xd28] ss:$16 sps:$4 sm:$0xff]  }
 0x23a   : > { %9897 = vmatpush1.bf16.msra.mxu0 %v17392_v54  ;;  %10929 = vmatpush1.bf16.msra.mxu1 %v17395_v55  ;;  %v17493_v54 = vld [vmem:[%s19724_s21 + $0xd44] ss:$16 sps:$4 sm:$0xff]   ;;  %v17496_v55 = vld [vmem:[%s19724_s21 + $0xd4c] ss:$16 sps:$4 sm:$0xff]  }
 0x23b   : > { %9898 = vmatprep.subr.bf16.mxu0 %v17400_v56  ;;  %10930 = vmatprep.subr.bf16.mxu1 %v17403_v57  ;;  %v17491_v56 = vld [vmem:[%s19724_s21 + $0xd40] ss:$16 sps:$4 sm:$0xff]   ;;  %v17494_v57 = vld [vmem:[%s19724_s21 + $0xd48] ss:$16 sps:$4 sm:$0xff]  }
 0x23e   : > { %9899 = vmatpush1.bf16.msra.mxu0 %v17398_v58  ;;  %10931 = vmatpush1.bf16.msra.mxu1 %v17401_v59  ;;  %v17499_v58 = vld [vmem:[%s19724_s21 + $0xd64] ss:$16 sps:$4 sm:$0xff]   ;;  %v17502_v59 = vld [vmem:[%s19724_s21 + $0xd6c] ss:$16 sps:$4 sm:$0xff]  }
 0x23f   : > { %9900 = vmatprep.subr.bf16.mxu0 %v17406_v60  ;;  %10932 = vmatprep.subr.bf16.mxu1 %v17409_v61  ;;  %v17497_v60 = vld [vmem:[%s19724_s21 + $0xd60] ss:$16 sps:$4 sm:$0xff]   ;;  %v17500_v61 = vld [vmem:[%s19724_s21 + $0xd68] ss:$16 sps:$4 sm:$0xff]  }
 0x242   : > { %9901 = vmatpush1.bf16.msra.mxu0 %v17404_v62  ;;  %10933 = vmatpush1.bf16.msra.mxu1 %v17407_v63  ;;  %v17505_v62 = vld [vmem:[%s19724_s21 + $0xd84] ss:$16 sps:$4 sm:$0xff]   ;;  %v17508_v63 = vld [vmem:[%s19724_s21 + $0xd8c] ss:$16 sps:$4 sm:$0xff]  }
 0x243   : > { %9902 = vmatprep.subr.bf16.mxu0 %v17412_v0  ;;  %10934 = vmatprep.subr.bf16.mxu1 %v17415_v1  ;;  %v17503_v0 = vld [vmem:[%s19724_s21 + $0xd80] ss:$16 sps:$4 sm:$0xff]   ;;  %v17506_v1 = vld [vmem:[%s19724_s21 + $0xd88] ss:$16 sps:$4 sm:$0xff]  }
 0x246   : > { %9903 = vmatpush1.bf16.msra.mxu0 %v17410_v2  ;;  %10935 = vmatpush1.bf16.msra.mxu1 %v17413_v3  ;;  %v17511_v2 = vld [vmem:[%s19724_s21 + $0xda4] ss:$16 sps:$4 sm:$0xff]   ;;  %v17514_v3 = vld [vmem:[%s19724_s21 + $0xdac] ss:$16 sps:$4 sm:$0xff]  }
 0x247   : > { %9904 = vmatprep.subr.bf16.mxu0 %v17418_v4  ;;  %10936 = vmatprep.subr.bf16.mxu1 %v17421_v5  ;;  %v17509_v4 = vld [vmem:[%s19724_s21 + $0xda0] ss:$16 sps:$4 sm:$0xff]   ;;  %v17512_v5 = vld [vmem:[%s19724_s21 + $0xda8] ss:$16 sps:$4 sm:$0xff]  }
 0x24a   : > { %9905 = vmatpush1.bf16.msra.mxu0 %v17416_v6  ;;  %10937 = vmatpush1.bf16.msra.mxu1 %v17419_v7  ;;  %v17517_v6 = vld [vmem:[%s19724_s21 + $0xdc4] ss:$16 sps:$4 sm:$0xff]   ;;  %v17520_v7 = vld [vmem:[%s19724_s21 + $0xdcc] ss:$16 sps:$4 sm:$0xff]  }
 0x24b   : > { %9906 = vmatprep.subr.bf16.mxu0 %v17424_v8  ;;  %10938 = vmatprep.subr.bf16.mxu1 %v17427_v9  ;;  %v17515_v8 = vld [vmem:[%s19724_s21 + $0xdc0] ss:$16 sps:$4 sm:$0xff]   ;;  %v17518_v9 = vld [vmem:[%s19724_s21 + $0xdc8] ss:$16 sps:$4 sm:$0xff]  }
 0x24e   : > { %9907 = vmatpush1.bf16.msra.mxu0 %v17422_v10  ;;  %10939 = vmatpush1.bf16.msra.mxu1 %v17425_v11  ;;  %v17523_v10 = vld [vmem:[%s19724_s21 + $0xde4] ss:$16 sps:$4 sm:$0xff]   ;;  %v17526_v11 = vld [vmem:[%s19724_s21 + $0xdec] ss:$16 sps:$4 sm:$0xff]  }
 0x24f   : > { %9919 = vmatprep.subr.bf16.mxu0 %v17433_v13  ;;  %10951 = vmatprep.subr.bf16.mxu1 %v17436_v14  ;;  %v17524_v13 = vld [vmem:[%s19724_s21 + $0xde8] ss:$16 sps:$4 sm:$0xff]   ;;  %v17527_v14 = vld [vmem:[%s21727_s0 + $0x30] ss:$188 sps:$4 sm:$0xff]  }
 0x251   : > { %9909 = vmatmul.mubr.bf16.vlgmr.msra.gmra.mrb[0].mxu0 %v17428_v12  ;;  %10941 = vmatmul.mubr.bf16.vlgmr.msra.gmra.mrb[0].mxu1 %v17428_v12  ;;  %v17521_v12 = vld [vmem:[%s19724_s21 + $0xde0] ss:$16 sps:$4 sm:$0xff]  }
 0x252   : > { %9920 = vmatpush1.bf16.msra.mxu0 %v17431_v15  ;;  %10952 = vmatpush1.bf16.msra.mxu1 %v17434_v16  ;;  %v17532_v15 = vld [vmem:[%s19724_s21 + $0xe04] ss:$16 sps:$4 sm:$0xff]   ;;  %v17535_v16 = vld [vmem:[%s19724_s21 + $0xe0c] ss:$16 sps:$4 sm:$0xff]  }
 0x253   : > { %9921 = vmatprep.subr.bf16.mxu0 %v17439_v17  ;;  %10953 = vmatprep.subr.bf16.mxu1 %v17442_v18  ;;  %v17530_v17 = vld [vmem:[%s19724_s21 + $0xe00] ss:$16 sps:$4 sm:$0xff]   ;;  %v17533_v18 = vld [vmem:[%s19724_s21 + $0xe08] ss:$16 sps:$4 sm:$0xff]  }
 0x254   : > { %9951 = vmatprep.mubr.bf16.mxu0 %v17529_v19  ;;  %10983 = vmatprep.mubr.bf16.mxu1 %v17529_v19  ;;  %v17538_v19 = vld [vmem:[%s19724_s21 + $0xe24] ss:$16 sps:$4 sm:$0xff]  }
 0x256   : > { %9922 = vmatpush1.bf16.msra.mxu0 %v17437_v20  ;;  %10954 = vmatpush1.bf16.msra.mxu1 %v17440_v21  ;;  %v17541_v20 = vld [vmem:[%s19724_s21 + $0xe2c] ss:$16 sps:$4 sm:$0xff]  }
 0x257   : > { %9923 = vmatprep.subr.bf16.mxu0 %v17445_v22  ;;  %10955 = vmatprep.subr.bf16.mxu1 %v17448_v23  ;;  %v17628_v21 = vld [vmem:[%s21727_s0 + $0x3c] ss:$188 sps:$4 sm:$0xff]   ;;  %v17536_v22 = vld [vmem:[%s19724_s21 + $0xe20] ss:$16 sps:$4 sm:$0xff]  }
 0x258   : > { %v17539_v23 = vld [vmem:[%s19724_s21 + $0xe28] ss:$16 sps:$4 sm:$0xff]  }
 0x25a   : > { %9924 = vmatpush1.bf16.msra.mxu0 %v17443_v24  ;;  %10956 = vmatpush1.bf16.msra.mxu1 %v17446_v25  ;;  %v17544_v24 = vld [vmem:[%s19724_s21 + $0xe44] ss:$16 sps:$4 sm:$0xff]   ;;  %v17547_v25 = vld [vmem:[%s19724_s21 + $0xe4c] ss:$16 sps:$4 sm:$0xff]  }
 0x25b   : > { %9925 = vmatprep.subr.bf16.mxu0 %v17451_v26  ;;  %10957 = vmatprep.subr.bf16.mxu1 %v17454_v27  ;;  %v17542_v26 = vld [vmem:[%s19724_s21 + $0xe40] ss:$16 sps:$4 sm:$0xff]   ;;  %v17545_v27 = vld [vmem:[%s19724_s21 + $0xe48] ss:$16 sps:$4 sm:$0xff]  }
 0x25e   : > { %9926 = vmatpush1.bf16.msra.mxu0 %v17449_v28  ;;  %10958 = vmatpush1.bf16.msra.mxu1 %v17452_v29  ;;  %v17550_v28 = vld [vmem:[%s19724_s21 + $0xe64] ss:$16 sps:$4 sm:$0xff]   ;;  %v17553_v29 = vld [vmem:[%s19724_s21 + $0xe6c] ss:$16 sps:$4 sm:$0xff]  }
 0x25f   : > { %9927 = vmatprep.subr.bf16.mxu0 %v17457_v30  ;;  %10959 = vmatprep.subr.bf16.mxu1 %v17460_v31  ;;  %v17548_v30 = vld [vmem:[%s19724_s21 + $0xe60] ss:$16 sps:$4 sm:$0xff]   ;;  %v17551_v31 = vld [vmem:[%s19724_s21 + $0xe68] ss:$16 sps:$4 sm:$0xff]  }
 0x262   : > { %9928 = vmatpush1.bf16.msra.mxu0 %v17455_v32  ;;  %10960 = vmatpush1.bf16.msra.mxu1 %v17458_v33  ;;  %v17556_v32 = vld [vmem:[%s19724_s21 + $0xe84] ss:$16 sps:$4 sm:$0xff]   ;;  %v17559_v33 = vld [vmem:[%s19724_s21 + $0xe8c] ss:$16 sps:$4 sm:$0xff]  }
 0x263   : > { %9929 = vmatprep.subr.bf16.mxu0 %v17463_v34  ;;  %10961 = vmatprep.subr.bf16.mxu1 %v17466_v35  ;;  %v17554_v34 = vld [vmem:[%s19724_s21 + $0xe80] ss:$16 sps:$4 sm:$0xff]   ;;  %v17557_v35 = vld [vmem:[%s19724_s21 + $0xe88] ss:$16 sps:$4 sm:$0xff]  }
 0x266   : > { %9930 = vmatpush1.bf16.msra.mxu0 %v17461_v36  ;;  %10962 = vmatpush1.bf16.msra.mxu1 %v17464_v37  ;;  %v17562_v36 = vld [vmem:[%s19724_s21 + $0xea4] ss:$16 sps:$4 sm:$0xff]   ;;  %v17565_v37 = vld [vmem:[%s19724_s21 + $0xeac] ss:$16 sps:$4 sm:$0xff]  }
 0x267   : > { %9931 = vmatprep.subr.bf16.mxu0 %v17469_v38  ;;  %10963 = vmatprep.subr.bf16.mxu1 %v17472_v39  ;;  %v17560_v38 = vld [vmem:[%s19724_s21 + $0xea0] ss:$16 sps:$4 sm:$0xff]   ;;  %v17563_v39 = vld [vmem:[%s19724_s21 + $0xea8] ss:$16 sps:$4 sm:$0xff]  }
 0x26a   : > { %9932 = vmatpush1.bf16.msra.mxu0 %v17467_v40  ;;  %10964 = vmatpush1.bf16.msra.mxu1 %v17470_v41  ;;  %v17568_v40 = vld [vmem:[%s19724_s21 + $0xec4] ss:$16 sps:$4 sm:$0xff]   ;;  %v17571_v41 = vld [vmem:[%s19724_s21 + $0xecc] ss:$16 sps:$4 sm:$0xff]  }
 0x26b   : > { %9933 = vmatprep.subr.bf16.mxu0 %v17475_v42  ;;  %10965 = vmatprep.subr.bf16.mxu1 %v17478_v43  ;;  %v17566_v42 = vld [vmem:[%s19724_s21 + $0xec0] ss:$16 sps:$4 sm:$0xff]   ;;  %v17569_v43 = vld [vmem:[%s19724_s21 + $0xec8] ss:$16 sps:$4 sm:$0xff]  }
 0x26e   : > { %9934 = vmatpush1.bf16.msra.mxu0 %v17473_v44  ;;  %10966 = vmatpush1.bf16.msra.mxu1 %v17476_v45  ;;  %v17574_v44 = vld [vmem:[%s19724_s21 + $0xee4] ss:$16 sps:$4 sm:$0xff]   ;;  %v17577_v45 = vld [vmem:[%s19724_s21 + $0xeec] ss:$16 sps:$4 sm:$0xff]  }
 0x26f   : > { %9935 = vmatprep.subr.bf16.mxu0 %v17481_v46  ;;  %10967 = vmatprep.subr.bf16.mxu1 %v17484_v47  ;;  %v17572_v46 = vld [vmem:[%s19724_s21 + $0xee0] ss:$16 sps:$4 sm:$0xff]   ;;  %v17575_v47 = vld [vmem:[%s19724_s21 + $0xee8] ss:$16 sps:$4 sm:$0xff]  }
 0x272   : > { %9936 = vmatpush1.bf16.msra.mxu0 %v17479_v48  ;;  %10968 = vmatpush1.bf16.msra.mxu1 %v17482_v49  ;;  %v17580_v48 = vld [vmem:[%s19724_s21 + $0xf04] ss:$16 sps:$4 sm:$0xff]   ;;  %v17583_v49 = vld [vmem:[%s19724_s21 + $0xf0c] ss:$16 sps:$4 sm:$0xff]  }
 0x273   : > { %9937 = vmatprep.subr.bf16.mxu0 %v17487_v50  ;;  %10969 = vmatprep.subr.bf16.mxu1 %v17490_v51  ;;  %v17578_v50 = vld [vmem:[%s19724_s21 + $0xf00] ss:$16 sps:$4 sm:$0xff]   ;;  %v17581_v51 = vld [vmem:[%s19724_s21 + $0xf08] ss:$16 sps:$4 sm:$0xff]  }
 0x276   : > { %9938 = vmatpush1.bf16.msra.mxu0 %v17485_v52  ;;  %10970 = vmatpush1.bf16.msra.mxu1 %v17488_v53  ;;  %v17586_v52 = vld [vmem:[%s19724_s21 + $0xf24] ss:$16 sps:$4 sm:$0xff]   ;;  %v17589_v53 = vld [vmem:[%s19724_s21 + $0xf2c] ss:$16 sps:$4 sm:$0xff]  }
 0x277   : > { %9939 = vmatprep.subr.bf16.mxu0 %v17493_v54  ;;  %10971 = vmatprep.subr.bf16.mxu1 %v17496_v55  ;;  %v17584_v54 = vld [vmem:[%s19724_s21 + $0xf20] ss:$16 sps:$4 sm:$0xff]   ;;  %v17587_v55 = vld [vmem:[%s19724_s21 + $0xf28] ss:$16 sps:$4 sm:$0xff]  }
 0x27a   : > { %9940 = vmatpush1.bf16.msra.mxu0 %v17491_v56  ;;  %10972 = vmatpush1.bf16.msra.mxu1 %v17494_v57  ;;  %v17592_v56 = vld [vmem:[%s19724_s21 + $0xf44] ss:$16 sps:$4 sm:$0xff]   ;;  %v17595_v57 = vld [vmem:[%s19724_s21 + $0xf4c] ss:$16 sps:$4 sm:$0xff]  }
 0x27b   : > { %9941 = vmatprep.subr.bf16.mxu0 %v17499_v58  ;;  %10973 = vmatprep.subr.bf16.mxu1 %v17502_v59  ;;  %v17590_v58 = vld [vmem:[%s19724_s21 + $0xf40] ss:$16 sps:$4 sm:$0xff]   ;;  %v17593_v59 = vld [vmem:[%s19724_s21 + $0xf48] ss:$16 sps:$4 sm:$0xff]  }
 0x27e   : > { %9942 = vmatpush1.bf16.msra.mxu0 %v17497_v60  ;;  %10974 = vmatpush1.bf16.msra.mxu1 %v17500_v61  ;;  %v17598_v60 = vld [vmem:[%s19724_s21 + $0xf64] ss:$16 sps:$4 sm:$0xff]   ;;  %v17601_v61 = vld [vmem:[%s19724_s21 + $0xf6c] ss:$16 sps:$4 sm:$0xff]  }
 0x27f   : > { %9943 = vmatprep.subr.bf16.mxu0 %v17505_v62  ;;  %10975 = vmatprep.subr.bf16.mxu1 %v17508_v63  ;;  %v17596_v62 = vld [vmem:[%s19724_s21 + $0xf60] ss:$16 sps:$4 sm:$0xff]   ;;  %v17599_v63 = vld [vmem:[%s19724_s21 + $0xf68] ss:$16 sps:$4 sm:$0xff]  }
 0x282   : > { %9944 = vmatpush1.bf16.msra.mxu0 %v17503_v0  ;;  %10976 = vmatpush1.bf16.msra.mxu1 %v17506_v1  ;;  %v17604_v0 = vld [vmem:[%s19724_s21 + $0xf84] ss:$16 sps:$4 sm:$0xff]   ;;  %v17607_v1 = vld [vmem:[%s19724_s21 + $0xf8c] ss:$16 sps:$4 sm:$0xff]  }
 0x283   : > { %9945 = vmatprep.subr.bf16.mxu0 %v17511_v2  ;;  %10977 = vmatprep.subr.bf16.mxu1 %v17514_v3  ;;  %v17602_v2 = vld [vmem:[%s19724_s21 + $0xf80] ss:$16 sps:$4 sm:$0xff]   ;;  %v17605_v3 = vld [vmem:[%s19724_s21 + $0xf88] ss:$16 sps:$4 sm:$0xff]  }
 0x286   : > { %9946 = vmatpush1.bf16.msra.mxu0 %v17509_v4  ;;  %10978 = vmatpush1.bf16.msra.mxu1 %v17512_v5  ;;  %v17610_v4 = vld [vmem:[%s19724_s21 + $0xfa4] ss:$16 sps:$4 sm:$0xff]   ;;  %v17613_v5 = vld [vmem:[%s19724_s21 + $0xfac] ss:$16 sps:$4 sm:$0xff]  }
 0x287   : > { %9947 = vmatprep.subr.bf16.mxu0 %v17517_v6  ;;  %10979 = vmatprep.subr.bf16.mxu1 %v17520_v7  ;;  %v17608_v6 = vld [vmem:[%s19724_s21 + $0xfa0] ss:$16 sps:$4 sm:$0xff]   ;;  %v17611_v7 = vld [vmem:[%s19724_s21 + $0xfa8] ss:$16 sps:$4 sm:$0xff]  }
 0x28a   : > { %9948 = vmatpush1.bf16.msra.mxu0 %v17515_v8  ;;  %10980 = vmatpush1.bf16.msra.mxu1 %v17518_v9  ;;  %v17616_v8 = vld [vmem:[%s19724_s21 + $0xfc4] ss:$16 sps:$4 sm:$0xff]   ;;  %v17619_v9 = vld [vmem:[%s19724_s21 + $0xfcc] ss:$16 sps:$4 sm:$0xff]  }
 0x28b   : > { %9949 = vmatprep.subr.bf16.mxu0 %v17523_v10  ;;  %10981 = vmatprep.subr.bf16.mxu1 %v17526_v11  ;;  %v17614_v10 = vld [vmem:[%s19724_s21 + $0xfc0] ss:$16 sps:$4 sm:$0xff]   ;;  %v17617_v11 = vld [vmem:[%s19724_s21 + $0xfc8] ss:$16 sps:$4 sm:$0xff]  }
 0x28e   : > { %9950 = vmatpush1.bf16.msra.mxu0 %v17521_v12  ;;  %10982 = vmatpush1.bf16.msra.mxu1 %v17524_v13  ;;  %v17622_v12 = vld [vmem:[%s19724_s21 + $0xfe4] ss:$16 sps:$4 sm:$0xff]   ;;  %v17625_v13 = vld [vmem:[%s19724_s21 + $0xfec] ss:$16 sps:$4 sm:$0xff]  }
 0x28f   : > { %9962 = vmatprep.subr.bf16.mxu0 %v17532_v15  ;;  %10994 = vmatprep.subr.bf16.mxu1 %v17535_v16  ;;  %v17623_v15 = vld [vmem:[%s19724_s21 + $0xfe8] ss:$16 sps:$4 sm:$0xff]  }
 0x290   : > { %v17626_v16 = vld [vmem:[%s21727_s0 + $0x38] ss:$188 sps:$4 sm:$0xff]  }
 0x291   : > { %9952 = vmatmul.mubr.bf16.vlgmr.msra.gmra.mrb[0].mxu0 %v17527_v14  ;;  %10984 = vmatmul.mubr.bf16.vlgmr.msra.gmra.mrb[0].mxu1 %v17527_v14  ;;  %v17620_v14 = vld [vmem:[%s19724_s21 + $0xfe0] ss:$16 sps:$4 sm:$0xff]  }
 0x292   : > { %9963 = vmatpush1.bf16.msra.mxu0 %v17530_v17  ;;  %10995 = vmatpush1.bf16.msra.mxu1 %v17533_v18  ;;  %v17631_v17 = vld [vmem:[%s19724_s21 + $0x1004] ss:$16 sps:$4 sm:$0xff]   ;;  %v17634_v18 = vld [vmem:[%s19724_s21 + $0x100c] ss:$16 sps:$4 sm:$0xff]  }
 0x293   : > { %9964 = vmatprep.subr.bf16.mxu0 %v17538_v19  ;;  %10996 = vmatprep.subr.bf16.mxu1 %v17541_v20  ;;  %v17629_v19 = vld [vmem:[%s19724_s21 + $0x1000] ss:$16 sps:$4 sm:$0xff]   ;;  %v17632_v20 = vld [vmem:[%s19724_s21 + $0x1008] ss:$16 sps:$4 sm:$0xff]  }
 0x294   : > { %9994 = vmatprep.mubr.bf16.mxu0 %v17628_v21  ;;  %11026 = vmatprep.mubr.bf16.mxu1 %v17628_v21  ;;  %v17637_v21 = vld [vmem:[%s19724_s21 + $0x1024] ss:$16 sps:$4 sm:$0xff]  }
 0x296   : > { %9965 = vmatpush1.bf16.msra.mxu0 %v17536_v22  ;;  %10997 = vmatpush1.bf16.msra.mxu1 %v17539_v23  ;;  %v17640_v22 = vld [vmem:[%s19724_s21 + $0x102c] ss:$16 sps:$4 sm:$0xff]   ;;  %v17727_v23 = vld [vmem:[%s21727_s0 + $0x44] ss:$188 sps:$4 sm:$0xff]  }
 0x297   : > { %9966 = vmatprep.subr.bf16.mxu0 %v17544_v24  ;;  %10998 = vmatprep.subr.bf16.mxu1 %v17547_v25  ;;  %v17635_v24 = vld [vmem:[%s19724_s21 + $0x1020] ss:$16 sps:$4 sm:$0xff]   ;;  %v17638_v25 = vld [vmem:[%s19724_s21 + $0x1028] ss:$16 sps:$4 sm:$0xff]  }
 0x29a   : > { %9967 = vmatpush1.bf16.msra.mxu0 %v17542_v26  ;;  %10999 = vmatpush1.bf16.msra.mxu1 %v17545_v27  ;;  %v17643_v26 = vld [vmem:[%s19724_s21 + $0x1044] ss:$16 sps:$4 sm:$0xff]   ;;  %v17646_v27 = vld [vmem:[%s19724_s21 + $0x104c] ss:$16 sps:$4 sm:$0xff]  }
 0x29b   : > { %9968 = vmatprep.subr.bf16.mxu0 %v17550_v28  ;;  %11000 = vmatprep.subr.bf16.mxu1 %v17553_v29  ;;  %v17641_v28 = vld [vmem:[%s19724_s21 + $0x1040] ss:$16 sps:$4 sm:$0xff]   ;;  %v17644_v29 = vld [vmem:[%s19724_s21 + $0x1048] ss:$16 sps:$4 sm:$0xff]  }
 0x29e   : > { %9969 = vmatpush1.bf16.msra.mxu0 %v17548_v30  ;;  %11001 = vmatpush1.bf16.msra.mxu1 %v17551_v31  ;;  %v17649_v30 = vld [vmem:[%s19724_s21 + $0x1064] ss:$16 sps:$4 sm:$0xff]   ;;  %v17652_v31 = vld [vmem:[%s19724_s21 + $0x106c] ss:$16 sps:$4 sm:$0xff]  }
 0x29f   : > { %9970 = vmatprep.subr.bf16.mxu0 %v17556_v32  ;;  %11002 = vmatprep.subr.bf16.mxu1 %v17559_v33  ;;  %v17647_v32 = vld [vmem:[%s19724_s21 + $0x1060] ss:$16 sps:$4 sm:$0xff]   ;;  %v17650_v33 = vld [vmem:[%s19724_s21 + $0x1068] ss:$16 sps:$4 sm:$0xff]  }
 0x2a2   : > { %9971 = vmatpush1.bf16.msra.mxu0 %v17554_v34  ;;  %11003 = vmatpush1.bf16.msra.mxu1 %v17557_v35  ;;  %v17655_v34 = vld [vmem:[%s19724_s21 + $0x1084] ss:$16 sps:$4 sm:$0xff]   ;;  %v17658_v35 = vld [vmem:[%s19724_s21 + $0x108c] ss:$16 sps:$4 sm:$0xff]  }
 0x2a3   : > { %9972 = vmatprep.subr.bf16.mxu0 %v17562_v36  ;;  %11004 = vmatprep.subr.bf16.mxu1 %v17565_v37  ;;  %v17653_v36 = vld [vmem:[%s19724_s21 + $0x1080] ss:$16 sps:$4 sm:$0xff]   ;;  %v17656_v37 = vld [vmem:[%s19724_s21 + $0x1088] ss:$16 sps:$4 sm:$0xff]  }
 0x2a6   : > { %9973 = vmatpush1.bf16.msra.mxu0 %v17560_v38  ;;  %11005 = vmatpush1.bf16.msra.mxu1 %v17563_v39  ;;  %v17661_v38 = vld [vmem:[%s19724_s21 + $0x10a4] ss:$16 sps:$4 sm:$0xff]   ;;  %v17664_v39 = vld [vmem:[%s19724_s21 + $0x10ac] ss:$16 sps:$4 sm:$0xff]  }
 0x2a7   : > { %9974 = vmatprep.subr.bf16.mxu0 %v17568_v40  ;;  %11006 = vmatprep.subr.bf16.mxu1 %v17571_v41  ;;  %v17659_v40 = vld [vmem:[%s19724_s21 + $0x10a0] ss:$16 sps:$4 sm:$0xff]   ;;  %v17662_v41 = vld [vmem:[%s19724_s21 + $0x10a8] ss:$16 sps:$4 sm:$0xff]  }
 0x2aa   : > { %9975 = vmatpush1.bf16.msra.mxu0 %v17566_v42  ;;  %11007 = vmatpush1.bf16.msra.mxu1 %v17569_v43  ;;  %v17667_v42 = vld [vmem:[%s19724_s21 + $0x10c4] ss:$16 sps:$4 sm:$0xff]   ;;  %v17670_v43 = vld [vmem:[%s19724_s21 + $0x10cc] ss:$16 sps:$4 sm:$0xff]  }
 0x2ab   : > { %9976 = vmatprep.subr.bf16.mxu0 %v17574_v44  ;;  %11008 = vmatprep.subr.bf16.mxu1 %v17577_v45  ;;  %v17665_v44 = vld [vmem:[%s19724_s21 + $0x10c0] ss:$16 sps:$4 sm:$0xff]   ;;  %v17668_v45 = vld [vmem:[%s19724_s21 + $0x10c8] ss:$16 sps:$4 sm:$0xff]  }
 0x2ae   : > { %9977 = vmatpush1.bf16.msra.mxu0 %v17572_v46  ;;  %11009 = vmatpush1.bf16.msra.mxu1 %v17575_v47  ;;  %v17673_v46 = vld [vmem:[%s19724_s21 + $0x10e4] ss:$16 sps:$4 sm:$0xff]   ;;  %v17676_v47 = vld [vmem:[%s19724_s21 + $0x10ec] ss:$16 sps:$4 sm:$0xff]  }
 0x2af   : > { %9978 = vmatprep.subr.bf16.mxu0 %v17580_v48  ;;  %11010 = vmatprep.subr.bf16.mxu1 %v17583_v49  ;;  %v17671_v48 = vld [vmem:[%s19724_s21 + $0x10e0] ss:$16 sps:$4 sm:$0xff]   ;;  %v17674_v49 = vld [vmem:[%s19724_s21 + $0x10e8] ss:$16 sps:$4 sm:$0xff]  }
 0x2b2   : > { %9979 = vmatpush1.bf16.msra.mxu0 %v17578_v50  ;;  %11011 = vmatpush1.bf16.msra.mxu1 %v17581_v51  ;;  %v17679_v50 = vld [vmem:[%s19724_s21 + $0x1104] ss:$16 sps:$4 sm:$0xff]   ;;  %v17682_v51 = vld [vmem:[%s19724_s21 + $0x110c] ss:$16 sps:$4 sm:$0xff]  }
 0x2b3   : > { %9980 = vmatprep.subr.bf16.mxu0 %v17586_v52  ;;  %11012 = vmatprep.subr.bf16.mxu1 %v17589_v53  ;;  %v17677_v52 = vld [vmem:[%s19724_s21 + $0x1100] ss:$16 sps:$4 sm:$0xff]   ;;  %v17680_v53 = vld [vmem:[%s19724_s21 + $0x1108] ss:$16 sps:$4 sm:$0xff]  }
 0x2b6   : > { %9981 = vmatpush1.bf16.msra.mxu0 %v17584_v54  ;;  %11013 = vmatpush1.bf16.msra.mxu1 %v17587_v55  ;;  %v17685_v54 = vld [vmem:[%s19724_s21 + $0x1124] ss:$16 sps:$4 sm:$0xff]   ;;  %v17688_v55 = vld [vmem:[%s19724_s21 + $0x112c] ss:$16 sps:$4 sm:$0xff]  }
 0x2b7   : > { %9982 = vmatprep.subr.bf16.mxu0 %v17592_v56  ;;  %11014 = vmatprep.subr.bf16.mxu1 %v17595_v57  ;;  %v17683_v56 = vld [vmem:[%s19724_s21 + $0x1120] ss:$16 sps:$4 sm:$0xff]   ;;  %v17686_v57 = vld [vmem:[%s19724_s21 + $0x1128] ss:$16 sps:$4 sm:$0xff]  }
 0x2ba   : > { %9983 = vmatpush1.bf16.msra.mxu0 %v17590_v58  ;;  %11015 = vmatpush1.bf16.msra.mxu1 %v17593_v59  ;;  %v17691_v58 = vld [vmem:[%s19724_s21 + $0x1144] ss:$16 sps:$4 sm:$0xff]   ;;  %v17694_v59 = vld [vmem:[%s19724_s21 + $0x114c] ss:$16 sps:$4 sm:$0xff]  }
 0x2bb   : > { %9984 = vmatprep.subr.bf16.mxu0 %v17598_v60  ;;  %11016 = vmatprep.subr.bf16.mxu1 %v17601_v61  ;;  %v17689_v60 = vld [vmem:[%s19724_s21 + $0x1140] ss:$16 sps:$4 sm:$0xff]   ;;  %v17692_v61 = vld [vmem:[%s19724_s21 + $0x1148] ss:$16 sps:$4 sm:$0xff]  }
 0x2be   : > { %9985 = vmatpush1.bf16.msra.mxu0 %v17596_v62  ;;  %11017 = vmatpush1.bf16.msra.mxu1 %v17599_v63  ;;  %v17697_v62 = vld [vmem:[%s19724_s21 + $0x1164] ss:$16 sps:$4 sm:$0xff]   ;;  %v17700_v63 = vld [vmem:[%s19724_s21 + $0x116c] ss:$16 sps:$4 sm:$0xff]  }
 0x2bf   : > { %9986 = vmatprep.subr.bf16.mxu0 %v17604_v0  ;;  %11018 = vmatprep.subr.bf16.mxu1 %v17607_v1  ;;  %v17695_v0 = vld [vmem:[%s19724_s21 + $0x1160] ss:$16 sps:$4 sm:$0xff]   ;;  %v17698_v1 = vld [vmem:[%s19724_s21 + $0x1168] ss:$16 sps:$4 sm:$0xff]  }
 0x2c2   : > { %9987 = vmatpush1.bf16.msra.mxu0 %v17602_v2  ;;  %11019 = vmatpush1.bf16.msra.mxu1 %v17605_v3  ;;  %v17703_v2 = vld [vmem:[%s19724_s21 + $0x1184] ss:$16 sps:$4 sm:$0xff]   ;;  %v17706_v3 = vld [vmem:[%s19724_s21 + $0x118c] ss:$16 sps:$4 sm:$0xff]  }
 0x2c3   : > { %9988 = vmatprep.subr.bf16.mxu0 %v17610_v4  ;;  %11020 = vmatprep.subr.bf16.mxu1 %v17613_v5  ;;  %v17701_v4 = vld [vmem:[%s19724_s21 + $0x1180] ss:$16 sps:$4 sm:$0xff]   ;;  %v17704_v5 = vld [vmem:[%s19724_s21 + $0x1188] ss:$16 sps:$4 sm:$0xff]  }
 0x2c6   : > { %9989 = vmatpush1.bf16.msra.mxu0 %v17608_v6  ;;  %11021 = vmatpush1.bf16.msra.mxu1 %v17611_v7  ;;  %v17709_v6 = vld [vmem:[%s19724_s21 + $0x11a4] ss:$16 sps:$4 sm:$0xff]   ;;  %v17712_v7 = vld [vmem:[%s19724_s21 + $0x11ac] ss:$16 sps:$4 sm:$0xff]  }
 0x2c7   : > { %9990 = vmatprep.subr.bf16.mxu0 %v17616_v8  ;;  %11022 = vmatprep.subr.bf16.mxu1 %v17619_v9  ;;  %v17707_v8 = vld [vmem:[%s19724_s21 + $0x11a0] ss:$16 sps:$4 sm:$0xff]   ;;  %v17710_v9 = vld [vmem:[%s19724_s21 + $0x11a8] ss:$16 sps:$4 sm:$0xff]  }
 0x2ca   : > { %9991 = vmatpush1.bf16.msra.mxu0 %v17614_v10  ;;  %11023 = vmatpush1.bf16.msra.mxu1 %v17617_v11  ;;  %v17715_v10 = vld [vmem:[%s19724_s21 + $0x11c4] ss:$16 sps:$4 sm:$0xff]   ;;  %v17718_v11 = vld [vmem:[%s19724_s21 + $0x11cc] ss:$16 sps:$4 sm:$0xff]  }
 0x2cb   : > { %9992 = vmatprep.subr.bf16.mxu0 %v17622_v12  ;;  %11024 = vmatprep.subr.bf16.mxu1 %v17625_v13  ;;  %v17713_v12 = vld [vmem:[%s19724_s21 + $0x11c0] ss:$16 sps:$4 sm:$0xff]   ;;  %v17716_v13 = vld [vmem:[%s19724_s21 + $0x11c8] ss:$16 sps:$4 sm:$0xff]  }
 0x2ce   : > { %9993 = vmatpush1.bf16.msra.mxu0 %v17620_v14  ;;  %11025 = vmatpush1.bf16.msra.mxu1 %v17623_v15  ;;  %v17721_v14 = vld [vmem:[%s19724_s21 + $0x11e4] ss:$16 sps:$4 sm:$0xff]   ;;  %v17724_v15 = vld [vmem:[%s19724_s21 + $0x11ec] ss:$16 sps:$4 sm:$0xff]  }
 0x2cf   : > { %10005 = vmatprep.subr.bf16.mxu0 %v17631_v17  ;;  %11037 = vmatprep.subr.bf16.mxu1 %v17634_v18  ;;  %v17722_v17 = vld [vmem:[%s19724_s21 + $0x11e8] ss:$16 sps:$4 sm:$0xff]   ;;  %v17725_v18 = vld [vmem:[%s21727_s0 + $0x40] ss:$188 sps:$4 sm:$0xff]  }
 0x2d1   : > { %9995 = vmatmul.mubr.bf16.vlgmr.msra.gmra.mrb[0].mxu0 %v17626_v16  ;;  %11027 = vmatmul.mubr.bf16.vlgmr.msra.gmra.mrb[0].mxu1 %v17626_v16  ;;  %v17719_v16 = vld [vmem:[%s19724_s21 + $0x11e0] ss:$16 sps:$4 sm:$0xff]  }
 0x2d2   : > { %10006 = vmatpush1.bf16.msra.mxu0 %v17629_v19  ;;  %11038 = vmatpush1.bf16.msra.mxu1 %v17632_v20  ;;  %v17730_v19 = vld [vmem:[%s19724_s21 + $0x1204] ss:$16 sps:$4 sm:$0xff]   ;;  %v17733_v20 = vld [vmem:[%s19724_s21 + $0x120c] ss:$16 sps:$4 sm:$0xff]  }
 0x2d3   : > { %10007 = vmatprep.subr.bf16.mxu0 %v17637_v21  ;;  %11039 = vmatprep.subr.bf16.mxu1 %v17640_v22  ;;  %v17728_v21 = vld [vmem:[%s19724_s21 + $0x1200] ss:$16 sps:$4 sm:$0xff]   ;;  %v17731_v22 = vld [vmem:[%s19724_s21 + $0x1208] ss:$16 sps:$4 sm:$0xff]  }
 0x2d4   : > { %10037 = vmatprep.mubr.bf16.mxu0 %v17727_v23  ;;  %11069 = vmatprep.mubr.bf16.mxu1 %v17727_v23  ;;  %v17736_v23 = vld [vmem:[%s19724_s21 + $0x1224] ss:$16 sps:$4 sm:$0xff]  }
 0x2d6   : > { %10008 = vmatpush1.bf16.msra.mxu0 %v17635_v24  ;;  %11040 = vmatpush1.bf16.msra.mxu1 %v17638_v25  ;;  %v17739_v24 = vld [vmem:[%s19724_s21 + $0x122c] ss:$16 sps:$4 sm:$0xff]  }
 0x2d7   : > { %10009 = vmatprep.subr.bf16.mxu0 %v17643_v26  ;;  %11041 = vmatprep.subr.bf16.mxu1 %v17646_v27  ;;  %v17826_v25 = vld [vmem:[%s21727_s0 + $0x4c] ss:$188 sps:$4 sm:$0xff]   ;;  %v17734_v26 = vld [vmem:[%s19724_s21 + $0x1220] ss:$16 sps:$4 sm:$0xff]  }
 0x2d8   : > { %v17737_v27 = vld [vmem:[%s19724_s21 + $0x1228] ss:$16 sps:$4 sm:$0xff]  }
 0x2da   : > { %10010 = vmatpush1.bf16.msra.mxu0 %v17641_v28  ;;  %11042 = vmatpush1.bf16.msra.mxu1 %v17644_v29  ;;  %v17742_v28 = vld [vmem:[%s19724_s21 + $0x1244] ss:$16 sps:$4 sm:$0xff]   ;;  %v17745_v29 = vld [vmem:[%s19724_s21 + $0x124c] ss:$16 sps:$4 sm:$0xff]  }
 0x2db   : > { %10011 = vmatprep.subr.bf16.mxu0 %v17649_v30  ;;  %11043 = vmatprep.subr.bf16.mxu1 %v17652_v31  ;;  %v17740_v30 = vld [vmem:[%s19724_s21 + $0x1240] ss:$16 sps:$4 sm:$0xff]   ;;  %v17743_v31 = vld [vmem:[%s19724_s21 + $0x1248] ss:$16 sps:$4 sm:$0xff]  }
 0x2de   : > { %10012 = vmatpush1.bf16.msra.mxu0 %v17647_v32  ;;  %11044 = vmatpush1.bf16.msra.mxu1 %v17650_v33  ;;  %v17748_v32 = vld [vmem:[%s19724_s21 + $0x1264] ss:$16 sps:$4 sm:$0xff]   ;;  %v17751_v33 = vld [vmem:[%s19724_s21 + $0x126c] ss:$16 sps:$4 sm:$0xff]  }
 0x2df   : > { %10013 = vmatprep.subr.bf16.mxu0 %v17655_v34  ;;  %11045 = vmatprep.subr.bf16.mxu1 %v17658_v35  ;;  %v17746_v34 = vld [vmem:[%s19724_s21 + $0x1260] ss:$16 sps:$4 sm:$0xff]   ;;  %v17749_v35 = vld [vmem:[%s19724_s21 + $0x1268] ss:$16 sps:$4 sm:$0xff]  }
 0x2e2   : > { %10014 = vmatpush1.bf16.msra.mxu0 %v17653_v36  ;;  %11046 = vmatpush1.bf16.msra.mxu1 %v17656_v37  ;;  %v17754_v36 = vld [vmem:[%s19724_s21 + $0x1284] ss:$16 sps:$4 sm:$0xff]   ;;  %v17757_v37 = vld [vmem:[%s19724_s21 + $0x128c] ss:$16 sps:$4 sm:$0xff]  }
 0x2e3   : > { %10015 = vmatprep.subr.bf16.mxu0 %v17661_v38  ;;  %11047 = vmatprep.subr.bf16.mxu1 %v17664_v39  ;;  %v17752_v38 = vld [vmem:[%s19724_s21 + $0x1280] ss:$16 sps:$4 sm:$0xff]   ;;  %v17755_v39 = vld [vmem:[%s19724_s21 + $0x1288] ss:$16 sps:$4 sm:$0xff]  }
 0x2e6   : > { %10016 = vmatpush1.bf16.msra.mxu0 %v17659_v40  ;;  %11048 = vmatpush1.bf16.msra.mxu1 %v17662_v41  ;;  %v17760_v40 = vld [vmem:[%s19724_s21 + $0x12a4] ss:$16 sps:$4 sm:$0xff]   ;;  %v17763_v41 = vld [vmem:[%s19724_s21 + $0x12ac] ss:$16 sps:$4 sm:$0xff]  }
 0x2e7   : > { %10017 = vmatprep.subr.bf16.mxu0 %v17667_v42  ;;  %11049 = vmatprep.subr.bf16.mxu1 %v17670_v43  ;;  %v17758_v42 = vld [vmem:[%s19724_s21 + $0x12a0] ss:$16 sps:$4 sm:$0xff]   ;;  %v17761_v43 = vld [vmem:[%s19724_s21 + $0x12a8] ss:$16 sps:$4 sm:$0xff]  }
 0x2ea   : > { %10018 = vmatpush1.bf16.msra.mxu0 %v17665_v44  ;;  %11050 = vmatpush1.bf16.msra.mxu1 %v17668_v45  ;;  %v17766_v44 = vld [vmem:[%s19724_s21 + $0x12c4] ss:$16 sps:$4 sm:$0xff]   ;;  %v17769_v45 = vld [vmem:[%s19724_s21 + $0x12cc] ss:$16 sps:$4 sm:$0xff]  }
 0x2eb   : > { %10019 = vmatprep.subr.bf16.mxu0 %v17673_v46  ;;  %11051 = vmatprep.subr.bf16.mxu1 %v17676_v47  ;;  %v17764_v46 = vld [vmem:[%s19724_s21 + $0x12c0] ss:$16 sps:$4 sm:$0xff]   ;;  %v17767_v47 = vld [vmem:[%s19724_s21 + $0x12c8] ss:$16 sps:$4 sm:$0xff]  }
 0x2ee   : > { %10020 = vmatpush1.bf16.msra.mxu0 %v17671_v48  ;;  %11052 = vmatpush1.bf16.msra.mxu1 %v17674_v49  ;;  %v17772_v48 = vld [vmem:[%s19724_s21 + $0x12e4] ss:$16 sps:$4 sm:$0xff]   ;;  %v17775_v49 = vld [vmem:[%s19724_s21 + $0x12ec] ss:$16 sps:$4 sm:$0xff]  }
 0x2ef   : > { %10021 = vmatprep.subr.bf16.mxu0 %v17679_v50  ;;  %11053 = vmatprep.subr.bf16.mxu1 %v17682_v51  ;;  %v17770_v50 = vld [vmem:[%s19724_s21 + $0x12e0] ss:$16 sps:$4 sm:$0xff]   ;;  %v17773_v51 = vld [vmem:[%s19724_s21 + $0x12e8] ss:$16 sps:$4 sm:$0xff]  }
 0x2f2   : > { %10022 = vmatpush1.bf16.msra.mxu0 %v17677_v52  ;;  %11054 = vmatpush1.bf16.msra.mxu1 %v17680_v53  ;;  %v17778_v52 = vld [vmem:[%s19724_s21 + $0x1304] ss:$16 sps:$4 sm:$0xff]   ;;  %v17781_v53 = vld [vmem:[%s19724_s21 + $0x130c] ss:$16 sps:$4 sm:$0xff]  }
 0x2f3   : > { %10023 = vmatprep.subr.bf16.mxu0 %v17685_v54  ;;  %11055 = vmatprep.subr.bf16.mxu1 %v17688_v55  ;;  %v17776_v54 = vld [vmem:[%s19724_s21 + $0x1300] ss:$16 sps:$4 sm:$0xff]   ;;  %v17779_v55 = vld [vmem:[%s19724_s21 + $0x1308] ss:$16 sps:$4 sm:$0xff]  }
 0x2f6   : > { %10024 = vmatpush1.bf16.msra.mxu0 %v17683_v56  ;;  %11056 = vmatpush1.bf16.msra.mxu1 %v17686_v57  ;;  %v17784_v56 = vld [vmem:[%s19724_s21 + $0x1324] ss:$16 sps:$4 sm:$0xff]   ;;  %v17787_v57 = vld [vmem:[%s19724_s21 + $0x132c] ss:$16 sps:$4 sm:$0xff]  }
 0x2f7   : > { %10025 = vmatprep.subr.bf16.mxu0 %v17691_v58  ;;  %11057 = vmatprep.subr.bf16.mxu1 %v17694_v59  ;;  %v17782_v58 = vld [vmem:[%s19724_s21 + $0x1320] ss:$16 sps:$4 sm:$0xff]   ;;  %v17785_v59 = vld [vmem:[%s19724_s21 + $0x1328] ss:$16 sps:$4 sm:$0xff]  }
 0x2fa   : > { %10026 = vmatpush1.bf16.msra.mxu0 %v17689_v60  ;;  %11058 = vmatpush1.bf16.msra.mxu1 %v17692_v61  ;;  %v17790_v60 = vld [vmem:[%s19724_s21 + $0x1344] ss:$16 sps:$4 sm:$0xff]   ;;  %v17793_v61 = vld [vmem:[%s19724_s21 + $0x134c] ss:$16 sps:$4 sm:$0xff]  }
 0x2fb   : > { %10027 = vmatprep.subr.bf16.mxu0 %v17697_v62  ;;  %11059 = vmatprep.subr.bf16.mxu1 %v17700_v63  ;;  %v17788_v62 = vld [vmem:[%s19724_s21 + $0x1340] ss:$16 sps:$4 sm:$0xff]   ;;  %v17791_v63 = vld [vmem:[%s19724_s21 + $0x1348] ss:$16 sps:$4 sm:$0xff]  }
 0x2fe   : > { %10028 = vmatpush1.bf16.msra.mxu0 %v17695_v0  ;;  %11060 = vmatpush1.bf16.msra.mxu1 %v17698_v1  ;;  %v17796_v0 = vld [vmem:[%s19724_s21 + $0x1364] ss:$16 sps:$4 sm:$0xff]   ;;  %v17799_v1 = vld [vmem:[%s19724_s21 + $0x136c] ss:$16 sps:$4 sm:$0xff]  }
 0x2ff   : > { %10029 = vmatprep.subr.bf16.mxu0 %v17703_v2  ;;  %11061 = vmatprep.subr.bf16.mxu1 %v17706_v3  ;;  %v17794_v2 = vld [vmem:[%s19724_s21 + $0x1360] ss:$16 sps:$4 sm:$0xff]   ;;  %v17797_v3 = vld [vmem:[%s19724_s21 + $0x1368] ss:$16 sps:$4 sm:$0xff]  }
 0x302   : > { %10030 = vmatpush1.bf16.msra.mxu0 %v17701_v4  ;;  %11062 = vmatpush1.bf16.msra.mxu1 %v17704_v5  ;;  %v17802_v4 = vld [vmem:[%s19724_s21 + $0x1384] ss:$16 sps:$4 sm:$0xff]   ;;  %v17805_v5 = vld [vmem:[%s19724_s21 + $0x138c] ss:$16 sps:$4 sm:$0xff]  }
 0x303   : > { %10031 = vmatprep.subr.bf16.mxu0 %v17709_v6  ;;  %11063 = vmatprep.subr.bf16.mxu1 %v17712_v7  ;;  %v17800_v6 = vld [vmem:[%s19724_s21 + $0x1380] ss:$16 sps:$4 sm:$0xff]   ;;  %v17803_v7 = vld [vmem:[%s19724_s21 + $0x1388] ss:$16 sps:$4 sm:$0xff]  }
 0x306   : > { %10032 = vmatpush1.bf16.msra.mxu0 %v17707_v8  ;;  %11064 = vmatpush1.bf16.msra.mxu1 %v17710_v9  ;;  %v17808_v8 = vld [vmem:[%s19724_s21 + $0x13a4] ss:$16 sps:$4 sm:$0xff]   ;;  %v17811_v9 = vld [vmem:[%s19724_s21 + $0x13ac] ss:$16 sps:$4 sm:$0xff]  }
 0x307   : > { %10033 = vmatprep.subr.bf16.mxu0 %v17715_v10  ;;  %11065 = vmatprep.subr.bf16.mxu1 %v17718_v11  ;;  %v17806_v10 = vld [vmem:[%s19724_s21 + $0x13a0] ss:$16 sps:$4 sm:$0xff]   ;;  %v17809_v11 = vld [vmem:[%s19724_s21 + $0x13a8] ss:$16 sps:$4 sm:$0xff]  }
 0x30a   : > { %10034 = vmatpush1.bf16.msra.mxu0 %v17713_v12  ;;  %11066 = vmatpush1.bf16.msra.mxu1 %v17716_v13  ;;  %v17814_v12 = vld [vmem:[%s19724_s21 + $0x13c4] ss:$16 sps:$4 sm:$0xff]   ;;  %v17817_v13 = vld [vmem:[%s19724_s21 + $0x13cc] ss:$16 sps:$4 sm:$0xff]  }
 0x30b   : > { %10035 = vmatprep.subr.bf16.mxu0 %v17721_v14  ;;  %11067 = vmatprep.subr.bf16.mxu1 %v17724_v15  ;;  %v17812_v14 = vld [vmem:[%s19724_s21 + $0x13c0] ss:$16 sps:$4 sm:$0xff]   ;;  %v17815_v15 = vld [vmem:[%s19724_s21 + $0x13c8] ss:$16 sps:$4 sm:$0xff]  }
 0x30e   : > { %10036 = vmatpush1.bf16.msra.mxu0 %v17719_v16  ;;  %11068 = vmatpush1.bf16.msra.mxu1 %v17722_v17  ;;  %v17820_v16 = vld [vmem:[%s19724_s21 + $0x13e4] ss:$16 sps:$4 sm:$0xff]   ;;  %v17823_v17 = vld [vmem:[%s19724_s21 + $0x13ec] ss:$16 sps:$4 sm:$0xff]  }
 0x30f   : > { %10048 = vmatprep.subr.bf16.mxu0 %v17730_v19  ;;  %11080 = vmatprep.subr.bf16.mxu1 %v17733_v20  ;;  %v17821_v19 = vld [vmem:[%s19724_s21 + $0x13e8] ss:$16 sps:$4 sm:$0xff]  }
 0x310   : > { %v17824_v20 = vld [vmem:[%s21727_s0 + $0x48] ss:$188 sps:$4 sm:$0xff]  }
 0x311   : > { %10038 = vmatmul.mubr.bf16.vlgmr.msra.gmra.mrb[0].mxu0 %v17725_v18  ;;  %11070 = vmatmul.mubr.bf16.vlgmr.msra.gmra.mrb[0].mxu1 %v17725_v18  ;;  %v17818_v18 = vld [vmem:[%s19724_s21 + $0x13e0] ss:$16 sps:$4 sm:$0xff]  }
 0x312   : > { %10049 = vmatpush1.bf16.msra.mxu0 %v17728_v21  ;;  %11081 = vmatpush1.bf16.msra.mxu1 %v17731_v22  ;;  %v17829_v21 = vld [vmem:[%s19724_s21 + $0x1404] ss:$16 sps:$4 sm:$0xff]   ;;  %v17832_v22 = vld [vmem:[%s19724_s21 + $0x140c] ss:$16 sps:$4 sm:$0xff]  }
 0x313   : > { %10050 = vmatprep.subr.bf16.mxu0 %v17736_v23  ;;  %11082 = vmatprep.subr.bf16.mxu1 %v17739_v24  ;;  %v17827_v23 = vld [vmem:[%s19724_s21 + $0x1400] ss:$16 sps:$4 sm:$0xff]   ;;  %v17830_v24 = vld [vmem:[%s19724_s21 + $0x1408] ss:$16 sps:$4 sm:$0xff]  }
 0x314   : > { %10080 = vmatprep.mubr.bf16.mxu0 %v17826_v25  ;;  %11112 = vmatprep.mubr.bf16.mxu1 %v17826_v25  ;;  %v17835_v25 = vld [vmem:[%s19724_s21 + $0x1424] ss:$16 sps:$4 sm:$0xff]  }
 0x316   : > { %10051 = vmatpush1.bf16.msra.mxu0 %v17734_v26  ;;  %11083 = vmatpush1.bf16.msra.mxu1 %v17737_v27  ;;  %v17838_v26 = vld [vmem:[%s19724_s21 + $0x142c] ss:$16 sps:$4 sm:$0xff]   ;;  %v17925_v27 = vld [vmem:[%s21727_s0 + $0x54] ss:$188 sps:$4 sm:$0xff]  }
 0x317   : > { %10052 = vmatprep.subr.bf16.mxu0 %v17742_v28  ;;  %11084 = vmatprep.subr.bf16.mxu1 %v17745_v29  ;;  %v17833_v28 = vld [vmem:[%s19724_s21 + $0x1420] ss:$16 sps:$4 sm:$0xff]   ;;  %v17836_v29 = vld [vmem:[%s19724_s21 + $0x1428] ss:$16 sps:$4 sm:$0xff]  }
 0x31a   : > { %10053 = vmatpush1.bf16.msra.mxu0 %v17740_v30  ;;  %11085 = vmatpush1.bf16.msra.mxu1 %v17743_v31  ;;  %v17841_v30 = vld [vmem:[%s19724_s21 + $0x1444] ss:$16 sps:$4 sm:$0xff]   ;;  %v17844_v31 = vld [vmem:[%s19724_s21 + $0x144c] ss:$16 sps:$4 sm:$0xff]  }
 0x31b   : > { %10054 = vmatprep.subr.bf16.mxu0 %v17748_v32  ;;  %11086 = vmatprep.subr.bf16.mxu1 %v17751_v33  ;;  %v17839_v32 = vld [vmem:[%s19724_s21 + $0x1440] ss:$16 sps:$4 sm:$0xff]   ;;  %v17842_v33 = vld [vmem:[%s19724_s21 + $0x1448] ss:$16 sps:$4 sm:$0xff]  }
 0x31e   : > { %10055 = vmatpush1.bf16.msra.mxu0 %v17746_v34  ;;  %11087 = vmatpush1.bf16.msra.mxu1 %v17749_v35  ;;  %v17847_v34 = vld [vmem:[%s19724_s21 + $0x1464] ss:$16 sps:$4 sm:$0xff]   ;;  %v17850_v35 = vld [vmem:[%s19724_s21 + $0x146c] ss:$16 sps:$4 sm:$0xff]  }
 0x31f   : > { %10056 = vmatprep.subr.bf16.mxu0 %v17754_v36  ;;  %11088 = vmatprep.subr.bf16.mxu1 %v17757_v37  ;;  %v17845_v36 = vld [vmem:[%s19724_s21 + $0x1460] ss:$16 sps:$4 sm:$0xff]   ;;  %v17848_v37 = vld [vmem:[%s19724_s21 + $0x1468] ss:$16 sps:$4 sm:$0xff]  }
 0x322   : > { %10057 = vmatpush1.bf16.msra.mxu0 %v17752_v38  ;;  %11089 = vmatpush1.bf16.msra.mxu1 %v17755_v39  ;;  %v17853_v38 = vld [vmem:[%s19724_s21 + $0x1484] ss:$16 sps:$4 sm:$0xff]   ;;  %v17856_v39 = vld [vmem:[%s19724_s21 + $0x148c] ss:$16 sps:$4 sm:$0xff]  }
 0x323   : > { %10058 = vmatprep.subr.bf16.mxu0 %v17760_v40  ;;  %11090 = vmatprep.subr.bf16.mxu1 %v17763_v41  ;;  %v17851_v40 = vld [vmem:[%s19724_s21 + $0x1480] ss:$16 sps:$4 sm:$0xff]   ;;  %v17854_v41 = vld [vmem:[%s19724_s21 + $0x1488] ss:$16 sps:$4 sm:$0xff]  }
 0x326   : > { %10059 = vmatpush1.bf16.msra.mxu0 %v17758_v42  ;;  %11091 = vmatpush1.bf16.msra.mxu1 %v17761_v43  ;;  %v17859_v42 = vld [vmem:[%s19724_s21 + $0x14a4] ss:$16 sps:$4 sm:$0xff]   ;;  %v17862_v43 = vld [vmem:[%s19724_s21 + $0x14ac] ss:$16 sps:$4 sm:$0xff]  }
 0x327   : > { %10060 = vmatprep.subr.bf16.mxu0 %v17766_v44  ;;  %11092 = vmatprep.subr.bf16.mxu1 %v17769_v45  ;;  %v17857_v44 = vld [vmem:[%s19724_s21 + $0x14a0] ss:$16 sps:$4 sm:$0xff]   ;;  %v17860_v45 = vld [vmem:[%s19724_s21 + $0x14a8] ss:$16 sps:$4 sm:$0xff]  }
 0x32a   : > { %10061 = vmatpush1.bf16.msra.mxu0 %v17764_v46  ;;  %11093 = vmatpush1.bf16.msra.mxu1 %v17767_v47  ;;  %v17865_v46 = vld [vmem:[%s19724_s21 + $0x14c4] ss:$16 sps:$4 sm:$0xff]   ;;  %v17868_v47 = vld [vmem:[%s19724_s21 + $0x14cc] ss:$16 sps:$4 sm:$0xff]  }
 0x32b   : > { %10062 = vmatprep.subr.bf16.mxu0 %v17772_v48  ;;  %11094 = vmatprep.subr.bf16.mxu1 %v17775_v49  ;;  %v17863_v48 = vld [vmem:[%s19724_s21 + $0x14c0] ss:$16 sps:$4 sm:$0xff]   ;;  %v17866_v49 = vld [vmem:[%s19724_s21 + $0x14c8] ss:$16 sps:$4 sm:$0xff]  }
 0x32e   : > { %10063 = vmatpush1.bf16.msra.mxu0 %v17770_v50  ;;  %11095 = vmatpush1.bf16.msra.mxu1 %v17773_v51  ;;  %v17871_v50 = vld [vmem:[%s19724_s21 + $0x14e4] ss:$16 sps:$4 sm:$0xff]   ;;  %v17874_v51 = vld [vmem:[%s19724_s21 + $0x14ec] ss:$16 sps:$4 sm:$0xff]  }
 0x32f   : > { %10064 = vmatprep.subr.bf16.mxu0 %v17778_v52  ;;  %11096 = vmatprep.subr.bf16.mxu1 %v17781_v53  ;;  %v17869_v52 = vld [vmem:[%s19724_s21 + $0x14e0] ss:$16 sps:$4 sm:$0xff]   ;;  %v17872_v53 = vld [vmem:[%s19724_s21 + $0x14e8] ss:$16 sps:$4 sm:$0xff]  }
 0x332   : > { %10065 = vmatpush1.bf16.msra.mxu0 %v17776_v54  ;;  %11097 = vmatpush1.bf16.msra.mxu1 %v17779_v55  ;;  %v17877_v54 = vld [vmem:[%s19724_s21 + $0x1504] ss:$16 sps:$4 sm:$0xff]   ;;  %v17880_v55 = vld [vmem:[%s19724_s21 + $0x150c] ss:$16 sps:$4 sm:$0xff]  }
 0x333   : > { %10066 = vmatprep.subr.bf16.mxu0 %v17784_v56  ;;  %11098 = vmatprep.subr.bf16.mxu1 %v17787_v57  ;;  %v17875_v56 = vld [vmem:[%s19724_s21 + $0x1500] ss:$16 sps:$4 sm:$0xff]   ;;  %v17878_v57 = vld [vmem:[%s19724_s21 + $0x1508] ss:$16 sps:$4 sm:$0xff]  }
 0x336   : > { %10067 = vmatpush1.bf16.msra.mxu0 %v17782_v58  ;;  %11099 = vmatpush1.bf16.msra.mxu1 %v17785_v59  ;;  %v17883_v58 = vld [vmem:[%s19724_s21 + $0x1524] ss:$16 sps:$4 sm:$0xff]   ;;  %v17886_v59 = vld [vmem:[%s19724_s21 + $0x152c] ss:$16 sps:$4 sm:$0xff]  }
 0x337   : > { %10068 = vmatprep.subr.bf16.mxu0 %v17790_v60  ;;  %11100 = vmatprep.subr.bf16.mxu1 %v17793_v61  ;;  %v17881_v60 = vld [vmem:[%s19724_s21 + $0x1520] ss:$16 sps:$4 sm:$0xff]   ;;  %v17884_v61 = vld [vmem:[%s19724_s21 + $0x1528] ss:$16 sps:$4 sm:$0xff]  }
 0x33a   : > { %10069 = vmatpush1.bf16.msra.mxu0 %v17788_v62  ;;  %11101 = vmatpush1.bf16.msra.mxu1 %v17791_v63  ;;  %v17889_v62 = vld [vmem:[%s19724_s21 + $0x1544] ss:$16 sps:$4 sm:$0xff]   ;;  %v17892_v63 = vld [vmem:[%s19724_s21 + $0x154c] ss:$16 sps:$4 sm:$0xff]  }
 0x33b   : > { %10070 = vmatprep.subr.bf16.mxu0 %v17796_v0  ;;  %11102 = vmatprep.subr.bf16.mxu1 %v17799_v1  ;;  %v17887_v0 = vld [vmem:[%s19724_s21 + $0x1540] ss:$16 sps:$4 sm:$0xff]   ;;  %v17890_v1 = vld [vmem:[%s19724_s21 + $0x1548] ss:$16 sps:$4 sm:$0xff]  }
 0x33e   : > { %10071 = vmatpush1.bf16.msra.mxu0 %v17794_v2  ;;  %11103 = vmatpush1.bf16.msra.mxu1 %v17797_v3  ;;  %v17895_v2 = vld [vmem:[%s19724_s21 + $0x1564] ss:$16 sps:$4 sm:$0xff]   ;;  %v17898_v3 = vld [vmem:[%s19724_s21 + $0x156c] ss:$16 sps:$4 sm:$0xff]  }
 0x33f   : > { %10072 = vmatprep.subr.bf16.mxu0 %v17802_v4  ;;  %11104 = vmatprep.subr.bf16.mxu1 %v17805_v5  ;;  %v17893_v4 = vld [vmem:[%s19724_s21 + $0x1560] ss:$16 sps:$4 sm:$0xff]   ;;  %v17896_v5 = vld [vmem:[%s19724_s21 + $0x1568] ss:$16 sps:$4 sm:$0xff]  }
 0x342   : > { %10073 = vmatpush1.bf16.msra.mxu0 %v17800_v6  ;;  %11105 = vmatpush1.bf16.msra.mxu1 %v17803_v7  ;;  %v17901_v6 = vld [vmem:[%s19724_s21 + $0x1584] ss:$16 sps:$4 sm:$0xff]   ;;  %v17904_v7 = vld [vmem:[%s19724_s21 + $0x158c] ss:$16 sps:$4 sm:$0xff]  }
 0x343   : > { %10074 = vmatprep.subr.bf16.mxu0 %v17808_v8  ;;  %11106 = vmatprep.subr.bf16.mxu1 %v17811_v9  ;;  %v17899_v8 = vld [vmem:[%s19724_s21 + $0x1580] ss:$16 sps:$4 sm:$0xff]   ;;  %v17902_v9 = vld [vmem:[%s19724_s21 + $0x1588] ss:$16 sps:$4 sm:$0xff]  }
 0x346   : > { %10075 = vmatpush1.bf16.msra.mxu0 %v17806_v10  ;;  %11107 = vmatpush1.bf16.msra.mxu1 %v17809_v11  ;;  %v17907_v10 = vld [vmem:[%s19724_s21 + $0x15a4] ss:$16 sps:$4 sm:$0xff]   ;;  %v17910_v11 = vld [vmem:[%s19724_s21 + $0x15ac] ss:$16 sps:$4 sm:$0xff]  }
 0x347   : > { %10076 = vmatprep.subr.bf16.mxu0 %v17814_v12  ;;  %11108 = vmatprep.subr.bf16.mxu1 %v17817_v13  ;;  %v17905_v12 = vld [vmem:[%s19724_s21 + $0x15a0] ss:$16 sps:$4 sm:$0xff]   ;;  %v17908_v13 = vld [vmem:[%s19724_s21 + $0x15a8] ss:$16 sps:$4 sm:$0xff]  }
 0x34a   : > { %10077 = vmatpush1.bf16.msra.mxu0 %v17812_v14  ;;  %11109 = vmatpush1.bf16.msra.mxu1 %v17815_v15  ;;  %v17913_v14 = vld [vmem:[%s19724_s21 + $0x15c4] ss:$16 sps:$4 sm:$0xff]   ;;  %v17916_v15 = vld [vmem:[%s19724_s21 + $0x15cc] ss:$16 sps:$4 sm:$0xff]  }
 0x34b   : > { %10078 = vmatprep.subr.bf16.mxu0 %v17820_v16  ;;  %11110 = vmatprep.subr.bf16.mxu1 %v17823_v17  ;;  %v17911_v16 = vld [vmem:[%s19724_s21 + $0x15c0] ss:$16 sps:$4 sm:$0xff]   ;;  %v17914_v17 = vld [vmem:[%s19724_s21 + $0x15c8] ss:$16 sps:$4 sm:$0xff]  }
 0x34e   : > { %10079 = vmatpush1.bf16.msra.mxu0 %v17818_v18  ;;  %11111 = vmatpush1.bf16.msra.mxu1 %v17821_v19  ;;  %v17919_v18 = vld [vmem:[%s19724_s21 + $0x15e4] ss:$16 sps:$4 sm:$0xff]   ;;  %v17922_v19 = vld [vmem:[%s19724_s21 + $0x15ec] ss:$16 sps:$4 sm:$0xff]  }
 0x34f   : > { %10091 = vmatprep.subr.bf16.mxu0 %v17829_v21  ;;  %11123 = vmatprep.subr.bf16.mxu1 %v17832_v22  ;;  %v17920_v21 = vld [vmem:[%s19724_s21 + $0x15e8] ss:$16 sps:$4 sm:$0xff]   ;;  %v17923_v22 = vld [vmem:[%s21727_s0 + $0x50] ss:$188 sps:$4 sm:$0xff]  }
 0x351   : > { %10081 = vmatmul.mubr.bf16.vlgmr.msra.gmra.mrb[0].mxu0 %v17824_v20  ;;  %11113 = vmatmul.mubr.bf16.vlgmr.msra.gmra.mrb[0].mxu1 %v17824_v20  ;;  %v17917_v20 = vld [vmem:[%s19724_s21 + $0x15e0] ss:$16 sps:$4 sm:$0xff]  }
 0x352   : > { %10092 = vmatpush1.bf16.msra.mxu0 %v17827_v23  ;;  %11124 = vmatpush1.bf16.msra.mxu1 %v17830_v24  ;;  %v17928_v23 = vld [vmem:[%s19724_s21 + $0x1604] ss:$16 sps:$4 sm:$0xff]   ;;  %v17931_v24 = vld [vmem:[%s19724_s21 + $0x160c] ss:$16 sps:$4 sm:$0xff]  }
 0x353   : > { %10093 = vmatprep.subr.bf16.mxu0 %v17835_v25  ;;  %11125 = vmatprep.subr.bf16.mxu1 %v17838_v26  ;;  %v17926_v25 = vld [vmem:[%s19724_s21 + $0x1600] ss:$16 sps:$4 sm:$0xff]   ;;  %v17929_v26 = vld [vmem:[%s19724_s21 + $0x1608] ss:$16 sps:$4 sm:$0xff]  }
 0x354   : > { %10123 = vmatprep.mubr.bf16.mxu0 %v17925_v27  ;;  %11155 = vmatprep.mubr.bf16.mxu1 %v17925_v27  ;;  %v17934_v27 = vld [vmem:[%s19724_s21 + $0x1624] ss:$16 sps:$4 sm:$0xff]  }
 0x356   : > { %10094 = vmatpush1.bf16.msra.mxu0 %v17833_v28  ;;  %11126 = vmatpush1.bf16.msra.mxu1 %v17836_v29  ;;  %v17937_v28 = vld [vmem:[%s19724_s21 + $0x162c] ss:$16 sps:$4 sm:$0xff]  }
 0x357   : > { %10095 = vmatprep.subr.bf16.mxu0 %v17841_v30  ;;  %11127 = vmatprep.subr.bf16.mxu1 %v17844_v31  ;;  %v18024_v29 = vld [vmem:[%s21727_s0 + $0x5c] ss:$188 sps:$4 sm:$0xff]   ;;  %v17932_v30 = vld [vmem:[%s19724_s21 + $0x1620] ss:$16 sps:$4 sm:$0xff]  }
 0x358   : > { %v17935_v31 = vld [vmem:[%s19724_s21 + $0x1628] ss:$16 sps:$4 sm:$0xff]  }
 0x35a   : > { %10096 = vmatpush1.bf16.msra.mxu0 %v17839_v32  ;;  %11128 = vmatpush1.bf16.msra.mxu1 %v17842_v33  ;;  %v17940_v32 = vld [vmem:[%s19724_s21 + $0x1644] ss:$16 sps:$4 sm:$0xff]   ;;  %v17943_v33 = vld [vmem:[%s19724_s21 + $0x164c] ss:$16 sps:$4 sm:$0xff]  }
 0x35b   : > { %10097 = vmatprep.subr.bf16.mxu0 %v17847_v34  ;;  %11129 = vmatprep.subr.bf16.mxu1 %v17850_v35  ;;  %v17938_v34 = vld [vmem:[%s19724_s21 + $0x1640] ss:$16 sps:$4 sm:$0xff]   ;;  %v17941_v35 = vld [vmem:[%s19724_s21 + $0x1648] ss:$16 sps:$4 sm:$0xff]  }
 0x35e   : > { %10098 = vmatpush1.bf16.msra.mxu0 %v17845_v36  ;;  %11130 = vmatpush1.bf16.msra.mxu1 %v17848_v37  ;;  %v17946_v36 = vld [vmem:[%s19724_s21 + $0x1664] ss:$16 sps:$4 sm:$0xff]   ;;  %v17949_v37 = vld [vmem:[%s19724_s21 + $0x166c] ss:$16 sps:$4 sm:$0xff]  }
 0x35f   : > { %10099 = vmatprep.subr.bf16.mxu0 %v17853_v38  ;;  %11131 = vmatprep.subr.bf16.mxu1 %v17856_v39  ;;  %v17944_v38 = vld [vmem:[%s19724_s21 + $0x1660] ss:$16 sps:$4 sm:$0xff]   ;;  %v17947_v39 = vld [vmem:[%s19724_s21 + $0x1668] ss:$16 sps:$4 sm:$0xff]  }
 0x362   : > { %10100 = vmatpush1.bf16.msra.mxu0 %v17851_v40  ;;  %11132 = vmatpush1.bf16.msra.mxu1 %v17854_v41  ;;  %v17952_v40 = vld [vmem:[%s19724_s21 + $0x1684] ss:$16 sps:$4 sm:$0xff]   ;;  %v17955_v41 = vld [vmem:[%s19724_s21 + $0x168c] ss:$16 sps:$4 sm:$0xff]  }
 0x363   : > { %10101 = vmatprep.subr.bf16.mxu0 %v17859_v42  ;;  %11133 = vmatprep.subr.bf16.mxu1 %v17862_v43  ;;  %v17950_v42 = vld [vmem:[%s19724_s21 + $0x1680] ss:$16 sps:$4 sm:$0xff]   ;;  %v17953_v43 = vld [vmem:[%s19724_s21 + $0x1688] ss:$16 sps:$4 sm:$0xff]  }
 0x366   : > { %10102 = vmatpush1.bf16.msra.mxu0 %v17857_v44  ;;  %11134 = vmatpush1.bf16.msra.mxu1 %v17860_v45  ;;  %v17958_v44 = vld [vmem:[%s19724_s21 + $0x16a4] ss:$16 sps:$4 sm:$0xff]   ;;  %v17961_v45 = vld [vmem:[%s19724_s21 + $0x16ac] ss:$16 sps:$4 sm:$0xff]  }
 0x367   : > { %10103 = vmatprep.subr.bf16.mxu0 %v17865_v46  ;;  %11135 = vmatprep.subr.bf16.mxu1 %v17868_v47  ;;  %v17956_v46 = vld [vmem:[%s19724_s21 + $0x16a0] ss:$16 sps:$4 sm:$0xff]   ;;  %v17959_v47 = vld [vmem:[%s19724_s21 + $0x16a8] ss:$16 sps:$4 sm:$0xff]  }
 0x36a   : > { %10104 = vmatpush1.bf16.msra.mxu0 %v17863_v48  ;;  %11136 = vmatpush1.bf16.msra.mxu1 %v17866_v49  ;;  %v17964_v48 = vld [vmem:[%s19724_s21 + $0x16c4] ss:$16 sps:$4 sm:$0xff]   ;;  %v17967_v49 = vld [vmem:[%s19724_s21 + $0x16cc] ss:$16 sps:$4 sm:$0xff]  }
 0x36b   : > { %10105 = vmatprep.subr.bf16.mxu0 %v17871_v50  ;;  %11137 = vmatprep.subr.bf16.mxu1 %v17874_v51  ;;  %v17962_v50 = vld [vmem:[%s19724_s21 + $0x16c0] ss:$16 sps:$4 sm:$0xff]   ;;  %v17965_v51 = vld [vmem:[%s19724_s21 + $0x16c8] ss:$16 sps:$4 sm:$0xff]  }
 0x36e   : > { %10106 = vmatpush1.bf16.msra.mxu0 %v17869_v52  ;;  %11138 = vmatpush1.bf16.msra.mxu1 %v17872_v53  ;;  %v17970_v52 = vld [vmem:[%s19724_s21 + $0x16e4] ss:$16 sps:$4 sm:$0xff]   ;;  %v17973_v53 = vld [vmem:[%s19724_s21 + $0x16ec] ss:$16 sps:$4 sm:$0xff]  }
 0x36f   : > { %10107 = vmatprep.subr.bf16.mxu0 %v17877_v54  ;;  %11139 = vmatprep.subr.bf16.mxu1 %v17880_v55  ;;  %v17968_v54 = vld [vmem:[%s19724_s21 + $0x16e0] ss:$16 sps:$4 sm:$0xff]   ;;  %v17971_v55 = vld [vmem:[%s19724_s21 + $0x16e8] ss:$16 sps:$4 sm:$0xff]  }
 0x372   : > { %10108 = vmatpush1.bf16.msra.mxu0 %v17875_v56  ;;  %11140 = vmatpush1.bf16.msra.mxu1 %v17878_v57  ;;  %v17976_v56 = vld [vmem:[%s19724_s21 + $0x1704] ss:$16 sps:$4 sm:$0xff]   ;;  %v17979_v57 = vld [vmem:[%s19724_s21 + $0x170c] ss:$16 sps:$4 sm:$0xff]  }
 0x373   : > { %10109 = vmatprep.subr.bf16.mxu0 %v17883_v58  ;;  %11141 = vmatprep.subr.bf16.mxu1 %v17886_v59  ;;  %v17974_v58 = vld [vmem:[%s19724_s21 + $0x1700] ss:$16 sps:$4 sm:$0xff]   ;;  %v17977_v59 = vld [vmem:[%s19724_s21 + $0x1708] ss:$16 sps:$4 sm:$0xff]  }
 0x376   : > { %10110 = vmatpush1.bf16.msra.mxu0 %v17881_v60  ;;  %11142 = vmatpush1.bf16.msra.mxu1 %v17884_v61  ;;  %v17982_v60 = vld [vmem:[%s19724_s21 + $0x1724] ss:$16 sps:$4 sm:$0xff]   ;;  %v17985_v61 = vld [vmem:[%s19724_s21 + $0x172c] ss:$16 sps:$4 sm:$0xff]  }
 0x377   : > { %10111 = vmatprep.subr.bf16.mxu0 %v17889_v62  ;;  %11143 = vmatprep.subr.bf16.mxu1 %v17892_v63  ;;  %v17980_v62 = vld [vmem:[%s19724_s21 + $0x1720] ss:$16 sps:$4 sm:$0xff]   ;;  %v17983_v63 = vld [vmem:[%s19724_s21 + $0x1728] ss:$16 sps:$4 sm:$0xff]  }
 0x37a   : > { %10112 = vmatpush1.bf16.msra.mxu0 %v17887_v0  ;;  %11144 = vmatpush1.bf16.msra.mxu1 %v17890_v1  ;;  %v17988_v0 = vld [vmem:[%s19724_s21 + $0x1744] ss:$16 sps:$4 sm:$0xff]   ;;  %v17991_v1 = vld [vmem:[%s19724_s21 + $0x174c] ss:$16 sps:$4 sm:$0xff]  }
 0x37b   : > { %10113 = vmatprep.subr.bf16.mxu0 %v17895_v2  ;;  %11145 = vmatprep.subr.bf16.mxu1 %v17898_v3  ;;  %v17986_v2 = vld [vmem:[%s19724_s21 + $0x1740] ss:$16 sps:$4 sm:$0xff]   ;;  %v17989_v3 = vld [vmem:[%s19724_s21 + $0x1748] ss:$16 sps:$4 sm:$0xff]  }
 0x37e   : > { %10114 = vmatpush1.bf16.msra.mxu0 %v17893_v4  ;;  %11146 = vmatpush1.bf16.msra.mxu1 %v17896_v5  ;;  %v17994_v4 = vld [vmem:[%s19724_s21 + $0x1764] ss:$16 sps:$4 sm:$0xff]   ;;  %v17997_v5 = vld [vmem:[%s19724_s21 + $0x176c] ss:$16 sps:$4 sm:$0xff]  }
 0x37f   : > { %10115 = vmatprep.subr.bf16.mxu0 %v17901_v6  ;;  %11147 = vmatprep.subr.bf16.mxu1 %v17904_v7  ;;  %v17992_v6 = vld [vmem:[%s19724_s21 + $0x1760] ss:$16 sps:$4 sm:$0xff]   ;;  %v17995_v7 = vld [vmem:[%s19724_s21 + $0x1768] ss:$16 sps:$4 sm:$0xff]  }
 0x382   : > { %10116 = vmatpush1.bf16.msra.mxu0 %v17899_v8  ;;  %11148 = vmatpush1.bf16.msra.mxu1 %v17902_v9  ;;  %v18000_v8 = vld [vmem:[%s19724_s21 + $0x1784] ss:$16 sps:$4 sm:$0xff]   ;;  %v18003_v9 = vld [vmem:[%s19724_s21 + $0x178c] ss:$16 sps:$4 sm:$0xff]  }
 0x383   : > { %10117 = vmatprep.subr.bf16.mxu0 %v17907_v10  ;;  %11149 = vmatprep.subr.bf16.mxu1 %v17910_v11  ;;  %v17998_v10 = vld [vmem:[%s19724_s21 + $0x1780] ss:$16 sps:$4 sm:$0xff]   ;;  %v18001_v11 = vld [vmem:[%s19724_s21 + $0x1788] ss:$16 sps:$4 sm:$0xff]  }
 0x386   : > { %10118 = vmatpush1.bf16.msra.mxu0 %v17905_v12  ;;  %11150 = vmatpush1.bf16.msra.mxu1 %v17908_v13  ;;  %v18006_v12 = vld [vmem:[%s19724_s21 + $0x17a4] ss:$16 sps:$4 sm:$0xff]   ;;  %v18009_v13 = vld [vmem:[%s19724_s21 + $0x17ac] ss:$16 sps:$4 sm:$0xff]  }
 0x387   : > { %10119 = vmatprep.subr.bf16.mxu0 %v17913_v14  ;;  %11151 = vmatprep.subr.bf16.mxu1 %v17916_v15  ;;  %v18004_v14 = vld [vmem:[%s19724_s21 + $0x17a0] ss:$16 sps:$4 sm:$0xff]   ;;  %v18007_v15 = vld [vmem:[%s19724_s21 + $0x17a8] ss:$16 sps:$4 sm:$0xff]  }
 0x38a   : > { %10120 = vmatpush1.bf16.msra.mxu0 %v17911_v16  ;;  %11152 = vmatpush1.bf16.msra.mxu1 %v17914_v17  ;;  %v18012_v16 = vld [vmem:[%s19724_s21 + $0x17c4] ss:$16 sps:$4 sm:$0xff]   ;;  %v18015_v17 = vld [vmem:[%s19724_s21 + $0x17cc] ss:$16 sps:$4 sm:$0xff]  }
 0x38b   : > { %10121 = vmatprep.subr.bf16.mxu0 %v17919_v18  ;;  %11153 = vmatprep.subr.bf16.mxu1 %v17922_v19  ;;  %v18010_v18 = vld [vmem:[%s19724_s21 + $0x17c0] ss:$16 sps:$4 sm:$0xff]   ;;  %v18013_v19 = vld [vmem:[%s19724_s21 + $0x17c8] ss:$16 sps:$4 sm:$0xff]  }
 0x38e   : > { %10122 = vmatpush1.bf16.msra.mxu0 %v17917_v20  ;;  %11154 = vmatpush1.bf16.msra.mxu1 %v17920_v21  ;;  %v18018_v20 = vld [vmem:[%s19724_s21 + $0x17e4] ss:$16 sps:$4 sm:$0xff]   ;;  %v18021_v21 = vld [vmem:[%s19724_s21 + $0x17ec] ss:$16 sps:$4 sm:$0xff]  }
 0x38f   : > { %10134 = vmatprep.subr.bf16.mxu0 %v17928_v23  ;;  %11166 = vmatprep.subr.bf16.mxu1 %v17931_v24  ;;  %v18019_v23 = vld [vmem:[%s19724_s21 + $0x17e8] ss:$16 sps:$4 sm:$0xff]  }
 0x390   : > { %v18022_v24 = vld [vmem:[%s21727_s0 + $0x58] ss:$188 sps:$4 sm:$0xff]  }
 0x391   : > { %10124 = vmatmul.mubr.bf16.vlgmr.msra.gmra.mrb[0].mxu0 %v17923_v22  ;;  %11156 = vmatmul.mubr.bf16.vlgmr.msra.gmra.mrb[0].mxu1 %v17923_v22  ;;  %v18016_v22 = vld [vmem:[%s19724_s21 + $0x17e0] ss:$16 sps:$4 sm:$0xff]  }
 0x392   : > { %10135 = vmatpush1.bf16.msra.mxu0 %v17926_v25  ;;  %11167 = vmatpush1.bf16.msra.mxu1 %v17929_v26  ;;  %v18027_v25 = vld [vmem:[%s19724_s21 + $0x1804] ss:$16 sps:$4 sm:$0xff]   ;;  %v18030_v26 = vld [vmem:[%s19724_s21 + $0x180c] ss:$16 sps:$4 sm:$0xff]  }
 0x393   : > { %10136 = vmatprep.subr.bf16.mxu0 %v17934_v27  ;;  %11168 = vmatprep.subr.bf16.mxu1 %v17937_v28  ;;  %v18025_v27 = vld [vmem:[%s19724_s21 + $0x1800] ss:$16 sps:$4 sm:$0xff]   ;;  %v18028_v28 = vld [vmem:[%s19724_s21 + $0x1808] ss:$16 sps:$4 sm:$0xff]  }
 0x394   : > { %10166 = vmatprep.mubr.bf16.mxu0 %v18024_v29  ;;  %11198 = vmatprep.mubr.bf16.mxu1 %v18024_v29  ;;  %v18033_v29 = vld [vmem:[%s19724_s21 + $0x1824] ss:$16 sps:$4 sm:$0xff]  }
 0x396   : > { %10137 = vmatpush1.bf16.msra.mxu0 %v17932_v30  ;;  %11169 = vmatpush1.bf16.msra.mxu1 %v17935_v31  ;;  %v18036_v30 = vld [vmem:[%s19724_s21 + $0x182c] ss:$16 sps:$4 sm:$0xff]   ;;  %v18123_v31 = vld [vmem:[%s21727_s0 + $0x64] ss:$188 sps:$4 sm:$0xff]  }
 0x397   : > { %10138 = vmatprep.subr.bf16.mxu0 %v17940_v32  ;;  %11170 = vmatprep.subr.bf16.mxu1 %v17943_v33  ;;  %v18031_v32 = vld [vmem:[%s19724_s21 + $0x1820] ss:$16 sps:$4 sm:$0xff]   ;;  %v18034_v33 = vld [vmem:[%s19724_s21 + $0x1828] ss:$16 sps:$4 sm:$0xff]  }
 0x39a   : > { %10139 = vmatpush1.bf16.msra.mxu0 %v17938_v34  ;;  %11171 = vmatpush1.bf16.msra.mxu1 %v17941_v35  ;;  %v18039_v34 = vld [vmem:[%s19724_s21 + $0x1844] ss:$16 sps:$4 sm:$0xff]   ;;  %v18042_v35 = vld [vmem:[%s19724_s21 + $0x184c] ss:$16 sps:$4 sm:$0xff]  }
 0x39b   : > { %10140 = vmatprep.subr.bf16.mxu0 %v17946_v36  ;;  %11172 = vmatprep.subr.bf16.mxu1 %v17949_v37  ;;  %v18037_v36 = vld [vmem:[%s19724_s21 + $0x1840] ss:$16 sps:$4 sm:$0xff]   ;;  %v18040_v37 = vld [vmem:[%s19724_s21 + $0x1848] ss:$16 sps:$4 sm:$0xff]  }
 0x39e   : > { %10141 = vmatpush1.bf16.msra.mxu0 %v17944_v38  ;;  %11173 = vmatpush1.bf16.msra.mxu1 %v17947_v39  ;;  %v18045_v38 = vld [vmem:[%s19724_s21 + $0x1864] ss:$16 sps:$4 sm:$0xff]   ;;  %v18048_v39 = vld [vmem:[%s19724_s21 + $0x186c] ss:$16 sps:$4 sm:$0xff]  }
 0x39f   : > { %10142 = vmatprep.subr.bf16.mxu0 %v17952_v40  ;;  %11174 = vmatprep.subr.bf16.mxu1 %v17955_v41  ;;  %v18043_v40 = vld [vmem:[%s19724_s21 + $0x1860] ss:$16 sps:$4 sm:$0xff]   ;;  %v18046_v41 = vld [vmem:[%s19724_s21 + $0x1868] ss:$16 sps:$4 sm:$0xff]  }
 0x3a2   : > { %10143 = vmatpush1.bf16.msra.mxu0 %v17950_v42  ;;  %11175 = vmatpush1.bf16.msra.mxu1 %v17953_v43  ;;  %v18051_v42 = vld [vmem:[%s19724_s21 + $0x1884] ss:$16 sps:$4 sm:$0xff]   ;;  %v18054_v43 = vld [vmem:[%s19724_s21 + $0x188c] ss:$16 sps:$4 sm:$0xff]  }
 0x3a3   : > { %10144 = vmatprep.subr.bf16.mxu0 %v17958_v44  ;;  %11176 = vmatprep.subr.bf16.mxu1 %v17961_v45  ;;  %v18049_v44 = vld [vmem:[%s19724_s21 + $0x1880] ss:$16 sps:$4 sm:$0xff]   ;;  %v18052_v45 = vld [vmem:[%s19724_s21 + $0x1888] ss:$16 sps:$4 sm:$0xff]  }
 0x3a6   : > { %10145 = vmatpush1.bf16.msra.mxu0 %v17956_v46  ;;  %11177 = vmatpush1.bf16.msra.mxu1 %v17959_v47  ;;  %v18057_v46 = vld [vmem:[%s19724_s21 + $0x18a4] ss:$16 sps:$4 sm:$0xff]   ;;  %v18060_v47 = vld [vmem:[%s19724_s21 + $0x18ac] ss:$16 sps:$4 sm:$0xff]  }
 0x3a7   : > { %10146 = vmatprep.subr.bf16.mxu0 %v17964_v48  ;;  %11178 = vmatprep.subr.bf16.mxu1 %v17967_v49  ;;  %v18055_v48 = vld [vmem:[%s19724_s21 + $0x18a0] ss:$16 sps:$4 sm:$0xff]   ;;  %v18058_v49 = vld [vmem:[%s19724_s21 + $0x18a8] ss:$16 sps:$4 sm:$0xff]  }
 0x3aa   : > { %10147 = vmatpush1.bf16.msra.mxu0 %v17962_v50  ;;  %11179 = vmatpush1.bf16.msra.mxu1 %v17965_v51  ;;  %v18063_v50 = vld [vmem:[%s19724_s21 + $0x18c4] ss:$16 sps:$4 sm:$0xff]   ;;  %v18066_v51 = vld [vmem:[%s19724_s21 + $0x18cc] ss:$16 sps:$4 sm:$0xff]  }
 0x3ab   : > { %10148 = vmatprep.subr.bf16.mxu0 %v17970_v52  ;;  %11180 = vmatprep.subr.bf16.mxu1 %v17973_v53  ;;  %v18061_v52 = vld [vmem:[%s19724_s21 + $0x18c0] ss:$16 sps:$4 sm:$0xff]   ;;  %v18064_v53 = vld [vmem:[%s19724_s21 + $0x18c8] ss:$16 sps:$4 sm:$0xff]  }
 0x3ae   : > { %10149 = vmatpush1.bf16.msra.mxu0 %v17968_v54  ;;  %11181 = vmatpush1.bf16.msra.mxu1 %v17971_v55  ;;  %v18069_v54 = vld [vmem:[%s19724_s21 + $0x18e4] ss:$16 sps:$4 sm:$0xff]   ;;  %v18072_v55 = vld [vmem:[%s19724_s21 + $0x18ec] ss:$16 sps:$4 sm:$0xff]  }
 0x3af   : > { %10150 = vmatprep.subr.bf16.mxu0 %v17976_v56  ;;  %11182 = vmatprep.subr.bf16.mxu1 %v17979_v57  ;;  %v18067_v56 = vld [vmem:[%s19724_s21 + $0x18e0] ss:$16 sps:$4 sm:$0xff]   ;;  %v18070_v57 = vld [vmem:[%s19724_s21 + $0x18e8] ss:$16 sps:$4 sm:$0xff]  }
 0x3b2   : > { %10151 = vmatpush1.bf16.msra.mxu0 %v17974_v58  ;;  %11183 = vmatpush1.bf16.msra.mxu1 %v17977_v59  ;;  %v18075_v58 = vld [vmem:[%s19724_s21 + $0x1904] ss:$16 sps:$4 sm:$0xff]   ;;  %v18078_v59 = vld [vmem:[%s19724_s21 + $0x190c] ss:$16 sps:$4 sm:$0xff]  }
 0x3b3   : > { %10152 = vmatprep.subr.bf16.mxu0 %v17982_v60  ;;  %11184 = vmatprep.subr.bf16.mxu1 %v17985_v61  ;;  %v18073_v60 = vld [vmem:[%s19724_s21 + $0x1900] ss:$16 sps:$4 sm:$0xff]   ;;  %v18076_v61 = vld [vmem:[%s19724_s21 + $0x1908] ss:$16 sps:$4 sm:$0xff]  }
 0x3b6   : > { %10153 = vmatpush1.bf16.msra.mxu0 %v17980_v62  ;;  %11185 = vmatpush1.bf16.msra.mxu1 %v17983_v63  ;;  %v18081_v62 = vld [vmem:[%s19724_s21 + $0x1924] ss:$16 sps:$4 sm:$0xff]   ;;  %v18084_v63 = vld [vmem:[%s19724_s21 + $0x192c] ss:$16 sps:$4 sm:$0xff]  }
 0x3b7   : > { %10154 = vmatprep.subr.bf16.mxu0 %v17988_v0  ;;  %11186 = vmatprep.subr.bf16.mxu1 %v17991_v1  ;;  %v18079_v0 = vld [vmem:[%s19724_s21 + $0x1920] ss:$16 sps:$4 sm:$0xff]   ;;  %v18082_v1 = vld [vmem:[%s19724_s21 + $0x1928] ss:$16 sps:$4 sm:$0xff]  }
 0x3ba   : > { %10155 = vmatpush1.bf16.msra.mxu0 %v17986_v2  ;;  %11187 = vmatpush1.bf16.msra.mxu1 %v17989_v3  ;;  %v18087_v2 = vld [vmem:[%s19724_s21 + $0x1944] ss:$16 sps:$4 sm:$0xff]   ;;  %v18090_v3 = vld [vmem:[%s19724_s21 + $0x194c] ss:$16 sps:$4 sm:$0xff]  }
 0x3bb   : > { %10156 = vmatprep.subr.bf16.mxu0 %v17994_v4  ;;  %11188 = vmatprep.subr.bf16.mxu1 %v17997_v5  ;;  %v18085_v4 = vld [vmem:[%s19724_s21 + $0x1940] ss:$16 sps:$4 sm:$0xff]   ;;  %v18088_v5 = vld [vmem:[%s19724_s21 + $0x1948] ss:$16 sps:$4 sm:$0xff]  }
 0x3be   : > { %10157 = vmatpush1.bf16.msra.mxu0 %v17992_v6  ;;  %11189 = vmatpush1.bf16.msra.mxu1 %v17995_v7  ;;  %v18093_v6 = vld [vmem:[%s19724_s21 + $0x1964] ss:$16 sps:$4 sm:$0xff]   ;;  %v18096_v7 = vld [vmem:[%s19724_s21 + $0x196c] ss:$16 sps:$4 sm:$0xff]  }
 0x3bf   : > { %10158 = vmatprep.subr.bf16.mxu0 %v18000_v8  ;;  %11190 = vmatprep.subr.bf16.mxu1 %v18003_v9  ;;  %v18091_v8 = vld [vmem:[%s19724_s21 + $0x1960] ss:$16 sps:$4 sm:$0xff]   ;;  %v18094_v9 = vld [vmem:[%s19724_s21 + $0x1968] ss:$16 sps:$4 sm:$0xff]  }
 0x3c2   : > { %10159 = vmatpush1.bf16.msra.mxu0 %v17998_v10  ;;  %11191 = vmatpush1.bf16.msra.mxu1 %v18001_v11  ;;  %v18099_v10 = vld [vmem:[%s19724_s21 + $0x1984] ss:$16 sps:$4 sm:$0xff]   ;;  %v18102_v11 = vld [vmem:[%s19724_s21 + $0x198c] ss:$16 sps:$4 sm:$0xff]  }
 0x3c3   : > { %10160 = vmatprep.subr.bf16.mxu0 %v18006_v12  ;;  %11192 = vmatprep.subr.bf16.mxu1 %v18009_v13  ;;  %v18097_v12 = vld [vmem:[%s19724_s21 + $0x1980] ss:$16 sps:$4 sm:$0xff]   ;;  %v18100_v13 = vld [vmem:[%s19724_s21 + $0x1988] ss:$16 sps:$4 sm:$0xff]  }
 0x3c6   : > { %10161 = vmatpush1.bf16.msra.mxu0 %v18004_v14  ;;  %11193 = vmatpush1.bf16.msra.mxu1 %v18007_v15  ;;  %v18105_v14 = vld [vmem:[%s19724_s21 + $0x19a4] ss:$16 sps:$4 sm:$0xff]   ;;  %v18108_v15 = vld [vmem:[%s19724_s21 + $0x19ac] ss:$16 sps:$4 sm:$0xff]  }
 0x3c7   : > { %10162 = vmatprep.subr.bf16.mxu0 %v18012_v16  ;;  %11194 = vmatprep.subr.bf16.mxu1 %v18015_v17  ;;  %v18103_v16 = vld [vmem:[%s19724_s21 + $0x19a0] ss:$16 sps:$4 sm:$0xff]   ;;  %v18106_v17 = vld [vmem:[%s19724_s21 + $0x19a8] ss:$16 sps:$4 sm:$0xff]  }
 0x3ca   : > { %10163 = vmatpush1.bf16.msra.mxu0 %v18010_v18  ;;  %11195 = vmatpush1.bf16.msra.mxu1 %v18013_v19  ;;  %v18111_v18 = vld [vmem:[%s19724_s21 + $0x19c4] ss:$16 sps:$4 sm:$0xff]   ;;  %v18114_v19 = vld [vmem:[%s19724_s21 + $0x19cc] ss:$16 sps:$4 sm:$0xff]  }
 0x3cb   : > { %10164 = vmatprep.subr.bf16.mxu0 %v18018_v20  ;;  %11196 = vmatprep.subr.bf16.mxu1 %v18021_v21  ;;  %v18109_v20 = vld [vmem:[%s19724_s21 + $0x19c0] ss:$16 sps:$4 sm:$0xff]   ;;  %v18112_v21 = vld [vmem:[%s19724_s21 + $0x19c8] ss:$16 sps:$4 sm:$0xff]  }
 0x3ce   : > { %10165 = vmatpush1.bf16.msra.mxu0 %v18016_v22  ;;  %11197 = vmatpush1.bf16.msra.mxu1 %v18019_v23  ;;  %v18117_v22 = vld [vmem:[%s19724_s21 + $0x19e4] ss:$16 sps:$4 sm:$0xff]   ;;  %v18120_v23 = vld [vmem:[%s19724_s21 + $0x19ec] ss:$16 sps:$4 sm:$0xff]  }
 0x3cf   : > { %10177 = vmatprep.subr.bf16.mxu0 %v18027_v25  ;;  %11209 = vmatprep.subr.bf16.mxu1 %v18030_v26  ;;  %v18118_v25 = vld [vmem:[%s19724_s21 + $0x19e8] ss:$16 sps:$4 sm:$0xff]   ;;  %v18121_v26 = vld [vmem:[%s21727_s0 + $0x60] ss:$188 sps:$4 sm:$0xff]  }
 0x3d1   : > { %10167 = vmatmul.mubr.bf16.vlgmr.msra.gmra.mrb[0].mxu0 %v18022_v24  ;;  %11199 = vmatmul.mubr.bf16.vlgmr.msra.gmra.mrb[0].mxu1 %v18022_v24  ;;  %v18115_v24 = vld [vmem:[%s19724_s21 + $0x19e0] ss:$16 sps:$4 sm:$0xff]  }
 0x3d2   : > { %10178 = vmatpush1.bf16.msra.mxu0 %v18025_v27  ;;  %11210 = vmatpush1.bf16.msra.mxu1 %v18028_v28  ;;  %v18126_v27 = vld [vmem:[%s19724_s21 + $0x1a04] ss:$16 sps:$4 sm:$0xff]   ;;  %v18129_v28 = vld [vmem:[%s19724_s21 + $0x1a0c] ss:$16 sps:$4 sm:$0xff]  }
 0x3d3   : > { %10179 = vmatprep.subr.bf16.mxu0 %v18033_v29  ;;  %11211 = vmatprep.subr.bf16.mxu1 %v18036_v30  ;;  %v18124_v29 = vld [vmem:[%s19724_s21 + $0x1a00] ss:$16 sps:$4 sm:$0xff]   ;;  %v18127_v30 = vld [vmem:[%s19724_s21 + $0x1a08] ss:$16 sps:$4 sm:$0xff]  }
 0x3d4   : > { %10209 = vmatprep.mubr.bf16.mxu0 %v18123_v31  ;;  %11241 = vmatprep.mubr.bf16.mxu1 %v18123_v31  ;;  %v18132_v31 = vld [vmem:[%s19724_s21 + $0x1a24] ss:$16 sps:$4 sm:$0xff]  }
 0x3d6   : > { %10180 = vmatpush1.bf16.msra.mxu0 %v18031_v32  ;;  %11212 = vmatpush1.bf16.msra.mxu1 %v18034_v33  ;;  %v18135_v32 = vld [vmem:[%s19724_s21 + $0x1a2c] ss:$16 sps:$4 sm:$0xff]  }
 0x3d7   : > { %10181 = vmatprep.subr.bf16.mxu0 %v18039_v34  ;;  %11213 = vmatprep.subr.bf16.mxu1 %v18042_v35  ;;  %v18222_v33 = vld [vmem:[%s21727_s0 + $0x6c] ss:$188 sps:$4 sm:$0xff]   ;;  %v18130_v34 = vld [vmem:[%s19724_s21 + $0x1a20] ss:$16 sps:$4 sm:$0xff]  }
 0x3d8   : > { %v18133_v35 = vld [vmem:[%s19724_s21 + $0x1a28] ss:$16 sps:$4 sm:$0xff]  }
 0x3da   : > { %10182 = vmatpush1.bf16.msra.mxu0 %v18037_v36  ;;  %11214 = vmatpush1.bf16.msra.mxu1 %v18040_v37  ;;  %v18138_v36 = vld [vmem:[%s19724_s21 + $0x1a44] ss:$16 sps:$4 sm:$0xff]   ;;  %v18141_v37 = vld [vmem:[%s19724_s21 + $0x1a4c] ss:$16 sps:$4 sm:$0xff]  }
 0x3db   : > { %10183 = vmatprep.subr.bf16.mxu0 %v18045_v38  ;;  %11215 = vmatprep.subr.bf16.mxu1 %v18048_v39  ;;  %v18136_v38 = vld [vmem:[%s19724_s21 + $0x1a40] ss:$16 sps:$4 sm:$0xff]   ;;  %v18139_v39 = vld [vmem:[%s19724_s21 + $0x1a48] ss:$16 sps:$4 sm:$0xff]  }
 0x3de   : > { %10184 = vmatpush1.bf16.msra.mxu0 %v18043_v40  ;;  %11216 = vmatpush1.bf16.msra.mxu1 %v18046_v41  ;;  %v18144_v40 = vld [vmem:[%s19724_s21 + $0x1a64] ss:$16 sps:$4 sm:$0xff]   ;;  %v18147_v41 = vld [vmem:[%s19724_s21 + $0x1a6c] ss:$16 sps:$4 sm:$0xff]  }
 0x3df   : > { %10185 = vmatprep.subr.bf16.mxu0 %v18051_v42  ;;  %11217 = vmatprep.subr.bf16.mxu1 %v18054_v43  ;;  %v18142_v42 = vld [vmem:[%s19724_s21 + $0x1a60] ss:$16 sps:$4 sm:$0xff]   ;;  %v18145_v43 = vld [vmem:[%s19724_s21 + $0x1a68] ss:$16 sps:$4 sm:$0xff]  }
 0x3e2   : > { %10186 = vmatpush1.bf16.msra.mxu0 %v18049_v44  ;;  %11218 = vmatpush1.bf16.msra.mxu1 %v18052_v45  ;;  %v18150_v44 = vld [vmem:[%s19724_s21 + $0x1a84] ss:$16 sps:$4 sm:$0xff]   ;;  %v18153_v45 = vld [vmem:[%s19724_s21 + $0x1a8c] ss:$16 sps:$4 sm:$0xff]  }
 0x3e3   : > { %10187 = vmatprep.subr.bf16.mxu0 %v18057_v46  ;;  %11219 = vmatprep.subr.bf16.mxu1 %v18060_v47  ;;  %v18148_v46 = vld [vmem:[%s19724_s21 + $0x1a80] ss:$16 sps:$4 sm:$0xff]   ;;  %v18151_v47 = vld [vmem:[%s19724_s21 + $0x1a88] ss:$16 sps:$4 sm:$0xff]  }
 0x3e6   : > { %10188 = vmatpush1.bf16.msra.mxu0 %v18055_v48  ;;  %11220 = vmatpush1.bf16.msra.mxu1 %v18058_v49  ;;  %v18156_v48 = vld [vmem:[%s19724_s21 + $0x1aa4] ss:$16 sps:$4 sm:$0xff]   ;;  %v18159_v49 = vld [vmem:[%s19724_s21 + $0x1aac] ss:$16 sps:$4 sm:$0xff]  }
 0x3e7   : > { %10189 = vmatprep.subr.bf16.mxu0 %v18063_v50  ;;  %11221 = vmatprep.subr.bf16.mxu1 %v18066_v51  ;;  %v18154_v50 = vld [vmem:[%s19724_s21 + $0x1aa0] ss:$16 sps:$4 sm:$0xff]   ;;  %v18157_v51 = vld [vmem:[%s19724_s21 + $0x1aa8] ss:$16 sps:$4 sm:$0xff]  }
 0x3ea   : > { %10190 = vmatpush1.bf16.msra.mxu0 %v18061_v52  ;;  %11222 = vmatpush1.bf16.msra.mxu1 %v18064_v53  ;;  %v18162_v52 = vld [vmem:[%s19724_s21 + $0x1ac4] ss:$16 sps:$4 sm:$0xff]   ;;  %v18165_v53 = vld [vmem:[%s19724_s21 + $0x1acc] ss:$16 sps:$4 sm:$0xff]  }
 0x3eb   : > { %10191 = vmatprep.subr.bf16.mxu0 %v18069_v54  ;;  %11223 = vmatprep.subr.bf16.mxu1 %v18072_v55  ;;  %v18160_v54 = vld [vmem:[%s19724_s21 + $0x1ac0] ss:$16 sps:$4 sm:$0xff]   ;;  %v18163_v55 = vld [vmem:[%s19724_s21 + $0x1ac8] ss:$16 sps:$4 sm:$0xff]  }
 0x3ee   : > { %10192 = vmatpush1.bf16.msra.mxu0 %v18067_v56  ;;  %11224 = vmatpush1.bf16.msra.mxu1 %v18070_v57  ;;  %v18168_v56 = vld [vmem:[%s19724_s21 + $0x1ae4] ss:$16 sps:$4 sm:$0xff]   ;;  %v18171_v57 = vld [vmem:[%s19724_s21 + $0x1aec] ss:$16 sps:$4 sm:$0xff]  }
 0x3ef   : > { %10193 = vmatprep.subr.bf16.mxu0 %v18075_v58  ;;  %11225 = vmatprep.subr.bf16.mxu1 %v18078_v59  ;;  %v18166_v58 = vld [vmem:[%s19724_s21 + $0x1ae0] ss:$16 sps:$4 sm:$0xff]   ;;  %v18169_v59 = vld [vmem:[%s19724_s21 + $0x1ae8] ss:$16 sps:$4 sm:$0xff]  }
 0x3f2   : > { %10194 = vmatpush1.bf16.msra.mxu0 %v18073_v60  ;;  %11226 = vmatpush1.bf16.msra.mxu1 %v18076_v61  ;;  %v18174_v60 = vld [vmem:[%s19724_s21 + $0x1b04] ss:$16 sps:$4 sm:$0xff]   ;;  %v18177_v61 = vld [vmem:[%s19724_s21 + $0x1b0c] ss:$16 sps:$4 sm:$0xff]  }
 0x3f3   : > { %10195 = vmatprep.subr.bf16.mxu0 %v18081_v62  ;;  %11227 = vmatprep.subr.bf16.mxu1 %v18084_v63  ;;  %v18172_v62 = vld [vmem:[%s19724_s21 + $0x1b00] ss:$16 sps:$4 sm:$0xff]   ;;  %v18175_v63 = vld [vmem:[%s19724_s21 + $0x1b08] ss:$16 sps:$4 sm:$0xff]  }
 0x3f6   : > { %10196 = vmatpush1.bf16.msra.mxu0 %v18079_v0  ;;  %11228 = vmatpush1.bf16.msra.mxu1 %v18082_v1  ;;  %v18180_v0 = vld [vmem:[%s19724_s21 + $0x1b24] ss:$16 sps:$4 sm:$0xff]   ;;  %v18183_v1 = vld [vmem:[%s19724_s21 + $0x1b2c] ss:$16 sps:$4 sm:$0xff]  }
 0x3f7   : > { %10197 = vmatprep.subr.bf16.mxu0 %v18087_v2  ;;  %11229 = vmatprep.subr.bf16.mxu1 %v18090_v3  ;;  %v18178_v2 = vld [vmem:[%s19724_s21 + $0x1b20] ss:$16 sps:$4 sm:$0xff]   ;;  %v18181_v3 = vld [vmem:[%s19724_s21 + $0x1b28] ss:$16 sps:$4 sm:$0xff]  }
 0x3fa   : > { %10198 = vmatpush1.bf16.msra.mxu0 %v18085_v4  ;;  %11230 = vmatpush1.bf16.msra.mxu1 %v18088_v5  ;;  %v18186_v4 = vld [vmem:[%s19724_s21 + $0x1b44] ss:$16 sps:$4 sm:$0xff]   ;;  %v18189_v5 = vld [vmem:[%s19724_s21 + $0x1b4c] ss:$16 sps:$4 sm:$0xff]  }
 0x3fb   : > { %10199 = vmatprep.subr.bf16.mxu0 %v18093_v6  ;;  %11231 = vmatprep.subr.bf16.mxu1 %v18096_v7  ;;  %v18184_v6 = vld [vmem:[%s19724_s21 + $0x1b40] ss:$16 sps:$4 sm:$0xff]   ;;  %v18187_v7 = vld [vmem:[%s19724_s21 + $0x1b48] ss:$16 sps:$4 sm:$0xff]  }
 0x3fe   : > { %10200 = vmatpush1.bf16.msra.mxu0 %v18091_v8  ;;  %11232 = vmatpush1.bf16.msra.mxu1 %v18094_v9  ;;  %v18192_v8 = vld [vmem:[%s19724_s21 + $0x1b64] ss:$16 sps:$4 sm:$0xff]   ;;  %v18195_v9 = vld [vmem:[%s19724_s21 + $0x1b6c] ss:$16 sps:$4 sm:$0xff]  }
 0x3ff   : > { %10201 = vmatprep.subr.bf16.mxu0 %v18099_v10  ;;  %11233 = vmatprep.subr.bf16.mxu1 %v18102_v11  ;;  %v18190_v10 = vld [vmem:[%s19724_s21 + $0x1b60] ss:$16 sps:$4 sm:$0xff]   ;;  %v18193_v11 = vld [vmem:[%s19724_s21 + $0x1b68] ss:$16 sps:$4 sm:$0xff]  }
 0x402   : > { %10202 = vmatpush1.bf16.msra.mxu0 %v18097_v12  ;;  %11234 = vmatpush1.bf16.msra.mxu1 %v18100_v13  ;;  %v18198_v12 = vld [vmem:[%s19724_s21 + $0x1b84] ss:$16 sps:$4 sm:$0xff]   ;;  %v18201_v13 = vld [vmem:[%s19724_s21 + $0x1b8c] ss:$16 sps:$4 sm:$0xff]  }
 0x403   : > { %10203 = vmatprep.subr.bf16.mxu0 %v18105_v14  ;;  %11235 = vmatprep.subr.bf16.mxu1 %v18108_v15  ;;  %v18196_v14 = vld [vmem:[%s19724_s21 + $0x1b80] ss:$16 sps:$4 sm:$0xff]   ;;  %v18199_v15 = vld [vmem:[%s19724_s21 + $0x1b88] ss:$16 sps:$4 sm:$0xff]  }
 0x406   : > { %10204 = vmatpush1.bf16.msra.mxu0 %v18103_v16  ;;  %11236 = vmatpush1.bf16.msra.mxu1 %v18106_v17  ;;  %v18204_v16 = vld [vmem:[%s19724_s21 + $0x1ba4] ss:$16 sps:$4 sm:$0xff]   ;;  %v18207_v17 = vld [vmem:[%s19724_s21 + $0x1bac] ss:$16 sps:$4 sm:$0xff]  }
 0x407   : > { %10205 = vmatprep.subr.bf16.mxu0 %v18111_v18  ;;  %11237 = vmatprep.subr.bf16.mxu1 %v18114_v19  ;;  %v18202_v18 = vld [vmem:[%s19724_s21 + $0x1ba0] ss:$16 sps:$4 sm:$0xff]   ;;  %v18205_v19 = vld [vmem:[%s19724_s21 + $0x1ba8] ss:$16 sps:$4 sm:$0xff]  }
 0x40a   : > { %10206 = vmatpush1.bf16.msra.mxu0 %v18109_v20  ;;  %11238 = vmatpush1.bf16.msra.mxu1 %v18112_v21  ;;  %v18210_v20 = vld [vmem:[%s19724_s21 + $0x1bc4] ss:$16 sps:$4 sm:$0xff]   ;;  %v18213_v21 = vld [vmem:[%s19724_s21 + $0x1bcc] ss:$16 sps:$4 sm:$0xff]  }
 0x40b   : > { %10207 = vmatprep.subr.bf16.mxu0 %v18117_v22  ;;  %11239 = vmatprep.subr.bf16.mxu1 %v18120_v23  ;;  %v18208_v22 = vld [vmem:[%s19724_s21 + $0x1bc0] ss:$16 sps:$4 sm:$0xff]   ;;  %v18211_v23 = vld [vmem:[%s19724_s21 + $0x1bc8] ss:$16 sps:$4 sm:$0xff]  }
 0x40e   : > { %10208 = vmatpush1.bf16.msra.mxu0 %v18115_v24  ;;  %11240 = vmatpush1.bf16.msra.mxu1 %v18118_v25  ;;  %v18216_v24 = vld [vmem:[%s19724_s21 + $0x1be4] ss:$16 sps:$4 sm:$0xff]   ;;  %v18219_v25 = vld [vmem:[%s19724_s21 + $0x1bec] ss:$16 sps:$4 sm:$0xff]  }
 0x40f   : > { %10220 = vmatprep.subr.bf16.mxu0 %v18126_v27  ;;  %11252 = vmatprep.subr.bf16.mxu1 %v18129_v28  ;;  %v18217_v27 = vld [vmem:[%s19724_s21 + $0x1be8] ss:$16 sps:$4 sm:$0xff]   ;;  %v18225_v28 = vld [vmem:[%s19724_s21 + $0x1c04] ss:$16 sps:$4 sm:$0xff]  }
 0x411   : > { %10210 = vmatmul.mubr.bf16.vlgmr.msra.gmra.mrb[0].mxu0 %v18121_v26  ;;  %11242 = vmatmul.mubr.bf16.vlgmr.msra.gmra.mrb[0].mxu1 %v18121_v26  ;;  %v18214_v26 = vld [vmem:[%s19724_s21 + $0x1be0] ss:$16 sps:$4 sm:$0xff]  }
 0x412   : > { %10221 = vmatpush1.bf16.msra.mxu0 %v18124_v29  ;;  %11253 = vmatpush1.bf16.msra.mxu1 %v18127_v30  ;;  %v18228_v29 = vld [vmem:[%s19724_s21 + $0x1c0c] ss:$16 sps:$4 sm:$0xff]   ;;  %v18220_v30 = vld [vmem:[%s21727_s0 + $0x68] ss:$188 sps:$4 sm:$0xff]  }
 0x413   : > { %10222 = vmatprep.subr.bf16.mxu0 %v18132_v31  ;;  %11254 = vmatprep.subr.bf16.mxu1 %v18135_v32  ;;  %v18223_v31 = vld [vmem:[%s19724_s21 + $0x1c00] ss:$16 sps:$4 sm:$0xff]   ;;  %v18226_v32 = vld [vmem:[%s19724_s21 + $0x1c08] ss:$16 sps:$4 sm:$0xff]  }
 0x414   : > { %10252 = vmatprep.mubr.bf16.mxu0 %v18222_v33  ;;  %11284 = vmatprep.mubr.bf16.mxu1 %v18222_v33  ;;  %v18231_v33 = vld [vmem:[%s19724_s21 + $0x1c24] ss:$16 sps:$4 sm:$0xff]  }
 0x416   : > { %10223 = vmatpush1.bf16.msra.mxu0 %v18130_v34  ;;  %11255 = vmatpush1.bf16.msra.mxu1 %v18133_v35  ;;  %v18234_v34 = vld [vmem:[%s19724_s21 + $0x1c2c] ss:$16 sps:$4 sm:$0xff]   ;;  %v18321_v35 = vld [vmem:[%s21727_s0 + $0x74] ss:$188 sps:$4 sm:$0xff]  }
 0x417   : > { %10224 = vmatprep.subr.bf16.mxu0 %v18138_v36  ;;  %11256 = vmatprep.subr.bf16.mxu1 %v18141_v37  ;;  %v18229_v36 = vld [vmem:[%s19724_s21 + $0x1c20] ss:$16 sps:$4 sm:$0xff]   ;;  %v18232_v37 = vld [vmem:[%s19724_s21 + $0x1c28] ss:$16 sps:$4 sm:$0xff]  }
 0x41a   : > { %10225 = vmatpush1.bf16.msra.mxu0 %v18136_v38  ;;  %11257 = vmatpush1.bf16.msra.mxu1 %v18139_v39  ;;  %v18237_v38 = vld [vmem:[%s19724_s21 + $0x1c44] ss:$16 sps:$4 sm:$0xff]   ;;  %v18240_v39 = vld [vmem:[%s19724_s21 + $0x1c4c] ss:$16 sps:$4 sm:$0xff]  }
 0x41b   : > { %10226 = vmatprep.subr.bf16.mxu0 %v18144_v40  ;;  %11258 = vmatprep.subr.bf16.mxu1 %v18147_v41  ;;  %v18235_v40 = vld [vmem:[%s19724_s21 + $0x1c40] ss:$16 sps:$4 sm:$0xff]   ;;  %v18238_v41 = vld [vmem:[%s19724_s21 + $0x1c48] ss:$16 sps:$4 sm:$0xff]  }
 0x41e   : > { %10227 = vmatpush1.bf16.msra.mxu0 %v18142_v42  ;;  %11259 = vmatpush1.bf16.msra.mxu1 %v18145_v43  ;;  %v18243_v42 = vld [vmem:[%s19724_s21 + $0x1c64] ss:$16 sps:$4 sm:$0xff]   ;;  %v18246_v43 = vld [vmem:[%s19724_s21 + $0x1c6c] ss:$16 sps:$4 sm:$0xff]  }
 0x41f   : > { %10228 = vmatprep.subr.bf16.mxu0 %v18150_v44  ;;  %11260 = vmatprep.subr.bf16.mxu1 %v18153_v45  ;;  %v18241_v44 = vld [vmem:[%s19724_s21 + $0x1c60] ss:$16 sps:$4 sm:$0xff]   ;;  %v18244_v45 = vld [vmem:[%s19724_s21 + $0x1c68] ss:$16 sps:$4 sm:$0xff]  }
 0x422   : > { %10229 = vmatpush1.bf16.msra.mxu0 %v18148_v46  ;;  %11261 = vmatpush1.bf16.msra.mxu1 %v18151_v47  ;;  %v18249_v46 = vld [vmem:[%s19724_s21 + $0x1c84] ss:$16 sps:$4 sm:$0xff]   ;;  %v18252_v47 = vld [vmem:[%s19724_s21 + $0x1c8c] ss:$16 sps:$4 sm:$0xff]  }
 0x423   : > { %10230 = vmatprep.subr.bf16.mxu0 %v18156_v48  ;;  %11262 = vmatprep.subr.bf16.mxu1 %v18159_v49  ;;  %v18247_v48 = vld [vmem:[%s19724_s21 + $0x1c80] ss:$16 sps:$4 sm:$0xff]   ;;  %v18250_v49 = vld [vmem:[%s19724_s21 + $0x1c88] ss:$16 sps:$4 sm:$0xff]  }
 0x426   : > { %10231 = vmatpush1.bf16.msra.mxu0 %v18154_v50  ;;  %11263 = vmatpush1.bf16.msra.mxu1 %v18157_v51  ;;  %v18255_v50 = vld [vmem:[%s19724_s21 + $0x1ca4] ss:$16 sps:$4 sm:$0xff]   ;;  %v18258_v51 = vld [vmem:[%s19724_s21 + $0x1cac] ss:$16 sps:$4 sm:$0xff]  }
 0x427   : > { %10232 = vmatprep.subr.bf16.mxu0 %v18162_v52  ;;  %11264 = vmatprep.subr.bf16.mxu1 %v18165_v53  ;;  %v18253_v52 = vld [vmem:[%s19724_s21 + $0x1ca0] ss:$16 sps:$4 sm:$0xff]   ;;  %v18256_v53 = vld [vmem:[%s19724_s21 + $0x1ca8] ss:$16 sps:$4 sm:$0xff]  }
 0x42a   : > { %10233 = vmatpush1.bf16.msra.mxu0 %v18160_v54  ;;  %11265 = vmatpush1.bf16.msra.mxu1 %v18163_v55  ;;  %v18261_v54 = vld [vmem:[%s19724_s21 + $0x1cc4] ss:$16 sps:$4 sm:$0xff]   ;;  %v18264_v55 = vld [vmem:[%s19724_s21 + $0x1ccc] ss:$16 sps:$4 sm:$0xff]  }
 0x42b   : > { %10234 = vmatprep.subr.bf16.mxu0 %v18168_v56  ;;  %11266 = vmatprep.subr.bf16.mxu1 %v18171_v57  ;;  %v18259_v56 = vld [vmem:[%s19724_s21 + $0x1cc0] ss:$16 sps:$4 sm:$0xff]   ;;  %v18262_v57 = vld [vmem:[%s19724_s21 + $0x1cc8] ss:$16 sps:$4 sm:$0xff]  }
 0x42e   : > { %10235 = vmatpush1.bf16.msra.mxu0 %v18166_v58  ;;  %11267 = vmatpush1.bf16.msra.mxu1 %v18169_v59  ;;  %v18267_v58 = vld [vmem:[%s19724_s21 + $0x1ce4] ss:$16 sps:$4 sm:$0xff]   ;;  %v18270_v59 = vld [vmem:[%s19724_s21 + $0x1cec] ss:$16 sps:$4 sm:$0xff]  }
 0x42f   : > { %10236 = vmatprep.subr.bf16.mxu0 %v18174_v60  ;;  %11268 = vmatprep.subr.bf16.mxu1 %v18177_v61  ;;  %v18265_v60 = vld [vmem:[%s19724_s21 + $0x1ce0] ss:$16 sps:$4 sm:$0xff]   ;;  %v18268_v61 = vld [vmem:[%s19724_s21 + $0x1ce8] ss:$16 sps:$4 sm:$0xff]  }
 0x432   : > { %10237 = vmatpush1.bf16.msra.mxu0 %v18172_v62  ;;  %11269 = vmatpush1.bf16.msra.mxu1 %v18175_v63  ;;  %v18273_v62 = vld [vmem:[%s19724_s21 + $0x1d04] ss:$16 sps:$4 sm:$0xff]   ;;  %v18276_v63 = vld [vmem:[%s19724_s21 + $0x1d0c] ss:$16 sps:$4 sm:$0xff]  }
 0x433   : > { %10238 = vmatprep.subr.bf16.mxu0 %v18180_v0  ;;  %11270 = vmatprep.subr.bf16.mxu1 %v18183_v1  ;;  %v18271_v0 = vld [vmem:[%s19724_s21 + $0x1d00] ss:$16 sps:$4 sm:$0xff]   ;;  %v18274_v1 = vld [vmem:[%s19724_s21 + $0x1d08] ss:$16 sps:$4 sm:$0xff]  }
 0x436   : > { %10239 = vmatpush1.bf16.msra.mxu0 %v18178_v2  ;;  %11271 = vmatpush1.bf16.msra.mxu1 %v18181_v3  ;;  %v18279_v2 = vld [vmem:[%s19724_s21 + $0x1d24] ss:$16 sps:$4 sm:$0xff]   ;;  %v18282_v3 = vld [vmem:[%s19724_s21 + $0x1d2c] ss:$16 sps:$4 sm:$0xff]  }
 0x437   : > { %10240 = vmatprep.subr.bf16.mxu0 %v18186_v4  ;;  %11272 = vmatprep.subr.bf16.mxu1 %v18189_v5  ;;  %v18277_v4 = vld [vmem:[%s19724_s21 + $0x1d20] ss:$16 sps:$4 sm:$0xff]   ;;  %v18280_v5 = vld [vmem:[%s19724_s21 + $0x1d28] ss:$16 sps:$4 sm:$0xff]  }
 0x43a   : > { %10241 = vmatpush1.bf16.msra.mxu0 %v18184_v6  ;;  %11273 = vmatpush1.bf16.msra.mxu1 %v18187_v7  ;;  %v18285_v6 = vld [vmem:[%s19724_s21 + $0x1d44] ss:$16 sps:$4 sm:$0xff]   ;;  %v18288_v7 = vld [vmem:[%s19724_s21 + $0x1d4c] ss:$16 sps:$4 sm:$0xff]  }
 0x43b   : > { %10242 = vmatprep.subr.bf16.mxu0 %v18192_v8  ;;  %11274 = vmatprep.subr.bf16.mxu1 %v18195_v9  ;;  %v18283_v8 = vld [vmem:[%s19724_s21 + $0x1d40] ss:$16 sps:$4 sm:$0xff]   ;;  %v18286_v9 = vld [vmem:[%s19724_s21 + $0x1d48] ss:$16 sps:$4 sm:$0xff]  }
 0x43e   : > { %10243 = vmatpush1.bf16.msra.mxu0 %v18190_v10  ;;  %11275 = vmatpush1.bf16.msra.mxu1 %v18193_v11  ;;  %v18291_v10 = vld [vmem:[%s19724_s21 + $0x1d64] ss:$16 sps:$4 sm:$0xff]   ;;  %v18294_v11 = vld [vmem:[%s19724_s21 + $0x1d6c] ss:$16 sps:$4 sm:$0xff]  }
 0x43f   : > { %10244 = vmatprep.subr.bf16.mxu0 %v18198_v12  ;;  %11276 = vmatprep.subr.bf16.mxu1 %v18201_v13  ;;  %v18289_v12 = vld [vmem:[%s19724_s21 + $0x1d60] ss:$16 sps:$4 sm:$0xff]   ;;  %v18292_v13 = vld [vmem:[%s19724_s21 + $0x1d68] ss:$16 sps:$4 sm:$0xff]  }
 0x442   : > { %10245 = vmatpush1.bf16.msra.mxu0 %v18196_v14  ;;  %11277 = vmatpush1.bf16.msra.mxu1 %v18199_v15  ;;  %v18297_v14 = vld [vmem:[%s19724_s21 + $0x1d84] ss:$16 sps:$4 sm:$0xff]   ;;  %v18300_v15 = vld [vmem:[%s19724_s21 + $0x1d8c] ss:$16 sps:$4 sm:$0xff]  }
 0x443   : > { %10246 = vmatprep.subr.bf16.mxu0 %v18204_v16  ;;  %11278 = vmatprep.subr.bf16.mxu1 %v18207_v17  ;;  %v18295_v16 = vld [vmem:[%s19724_s21 + $0x1d80] ss:$16 sps:$4 sm:$0xff]   ;;  %v18298_v17 = vld [vmem:[%s19724_s21 + $0x1d88] ss:$16 sps:$4 sm:$0xff]  }
 0x446   : > { %10247 = vmatpush1.bf16.msra.mxu0 %v18202_v18  ;;  %11279 = vmatpush1.bf16.msra.mxu1 %v18205_v19  ;;  %v18303_v18 = vld [vmem:[%s19724_s21 + $0x1da4] ss:$16 sps:$4 sm:$0xff]   ;;  %v18306_v19 = vld [vmem:[%s19724_s21 + $0x1dac] ss:$16 sps:$4 sm:$0xff]  }
 0x447   : > { %10248 = vmatprep.subr.bf16.mxu0 %v18210_v20  ;;  %11280 = vmatprep.subr.bf16.mxu1 %v18213_v21  ;;  %v18301_v20 = vld [vmem:[%s19724_s21 + $0x1da0] ss:$16 sps:$4 sm:$0xff]   ;;  %v18304_v21 = vld [vmem:[%s19724_s21 + $0x1da8] ss:$16 sps:$4 sm:$0xff]  }
 0x44a   : > { %10249 = vmatpush1.bf16.msra.mxu0 %v18208_v22  ;;  %11281 = vmatpush1.bf16.msra.mxu1 %v18211_v23  ;;  %v18309_v22 = vld [vmem:[%s19724_s21 + $0x1dc4] ss:$16 sps:$4 sm:$0xff]   ;;  %v18312_v23 = vld [vmem:[%s19724_s21 + $0x1dcc] ss:$16 sps:$4 sm:$0xff]  }
 0x44b   : > { %10250 = vmatprep.subr.bf16.mxu0 %v18216_v24  ;;  %11282 = vmatprep.subr.bf16.mxu1 %v18219_v25  ;;  %v18307_v24 = vld [vmem:[%s19724_s21 + $0x1dc0] ss:$16 sps:$4 sm:$0xff]   ;;  %v18310_v25 = vld [vmem:[%s19724_s21 + $0x1dc8] ss:$16 sps:$4 sm:$0xff]  }
 0x44e   : > { %10251 = vmatpush1.bf16.msra.mxu0 %v18214_v26  ;;  %11283 = vmatpush1.bf16.msra.mxu1 %v18217_v27  ;;  %v18315_v26 = vld [vmem:[%s19724_s21 + $0x1de4] ss:$16 sps:$4 sm:$0xff]   ;;  %v18318_v27 = vld [vmem:[%s19724_s21 + $0x1dec] ss:$16 sps:$4 sm:$0xff]  }
 0x44f   : > { %10263 = vmatprep.subr.bf16.mxu0 %v18225_v28  ;;  %11295 = vmatprep.subr.bf16.mxu1 %v18228_v29  ;;  %v18313_v28 = vld [vmem:[%s19724_s21 + $0x1de0] ss:$16 sps:$4 sm:$0xff]   ;;  %v18316_v29 = vld [vmem:[%s19724_s21 + $0x1de8] ss:$16 sps:$4 sm:$0xff]  }
 0x451   : > { %10253 = vmatmul.mubr.bf16.vlgmr.msra.gmra.mrb[0].mxu0 %v18220_v30  ;;  %11285 = vmatmul.mubr.bf16.vlgmr.msra.gmra.mrb[0].mxu1 %v18220_v30  ;;  %v18324_v30 = vld [vmem:[%s19724_s21 + $0x1e04] ss:$16 sps:$4 sm:$0xff]  }
 0x452   : > { %10264 = vmatpush1.bf16.msra.mxu0 %v18223_v31  ;;  %11296 = vmatpush1.bf16.msra.mxu1 %v18226_v32  ;;  %v18327_v31 = vld [vmem:[%s19724_s21 + $0x1e0c] ss:$16 sps:$4 sm:$0xff]  }
 0x453   : > { %10265 = vmatprep.subr.bf16.mxu0 %v18231_v33  ;;  %11297 = vmatprep.subr.bf16.mxu1 %v18234_v34  ;;  %v18319_v32 = vld [vmem:[%s21727_s0 + $0x70] ss:$188 sps:$4 sm:$0xff]   ;;  %v18325_v34 = vld [vmem:[%s19724_s21 + $0x1e08] ss:$16 sps:$4 sm:$0xff]  }
 0x454   : > { %10295 = vmatprep.mubr.bf16.mxu0 %v18321_v35  ;;  %11327 = vmatprep.mubr.bf16.mxu1 %v18321_v35  ;;  %v18322_v33 = vld [vmem:[%s19724_s21 + $0x1e00] ss:$16 sps:$4 sm:$0xff]   ;;  %v18330_v35 = vld [vmem:[%s19724_s21 + $0x1e24] ss:$16 sps:$4 sm:$0xff]  }
 0x456   : > { %10266 = vmatpush1.bf16.msra.mxu0 %v18229_v36  ;;  %11298 = vmatpush1.bf16.msra.mxu1 %v18232_v37  ;;  %v18333_v36 = vld [vmem:[%s19724_s21 + $0x1e2c] ss:$16 sps:$4 sm:$0xff]  }
 0x457   : > { %10267 = vmatprep.subr.bf16.mxu0 %v18237_v38  ;;  %11299 = vmatprep.subr.bf16.mxu1 %v18240_v39  ;;  %v18420_v37 = vld [vmem:[%s21727_s0 + $0x7c] ss:$188 sps:$4 sm:$0xff]   ;;  %v18328_v38 = vld [vmem:[%s19724_s21 + $0x1e20] ss:$16 sps:$4 sm:$0xff]  }
 0x458   : > { %v18331_v39 = vld [vmem:[%s19724_s21 + $0x1e28] ss:$16 sps:$4 sm:$0xff]  }
 0x45a   : > { %10268 = vmatpush1.bf16.msra.mxu0 %v18235_v40  ;;  %11300 = vmatpush1.bf16.msra.mxu1 %v18238_v41  ;;  %v18336_v40 = vld [vmem:[%s19724_s21 + $0x1e44] ss:$16 sps:$4 sm:$0xff]   ;;  %v18339_v41 = vld [vmem:[%s19724_s21 + $0x1e4c] ss:$16 sps:$4 sm:$0xff]  }
 0x45b   : > { %10269 = vmatprep.subr.bf16.mxu0 %v18243_v42  ;;  %11301 = vmatprep.subr.bf16.mxu1 %v18246_v43  ;;  %v18334_v42 = vld [vmem:[%s19724_s21 + $0x1e40] ss:$16 sps:$4 sm:$0xff]   ;;  %v18337_v43 = vld [vmem:[%s19724_s21 + $0x1e48] ss:$16 sps:$4 sm:$0xff]  }
 0x45e   : > { %10270 = vmatpush1.bf16.msra.mxu0 %v18241_v44  ;;  %11302 = vmatpush1.bf16.msra.mxu1 %v18244_v45  ;;  %v18342_v44 = vld [vmem:[%s19724_s21 + $0x1e64] ss:$16 sps:$4 sm:$0xff]   ;;  %v18345_v45 = vld [vmem:[%s19724_s21 + $0x1e6c] ss:$16 sps:$4 sm:$0xff]  }
 0x45f   : > { %10271 = vmatprep.subr.bf16.mxu0 %v18249_v46  ;;  %11303 = vmatprep.subr.bf16.mxu1 %v18252_v47  ;;  %v18340_v46 = vld [vmem:[%s19724_s21 + $0x1e60] ss:$16 sps:$4 sm:$0xff]   ;;  %v18343_v47 = vld [vmem:[%s19724_s21 + $0x1e68] ss:$16 sps:$4 sm:$0xff]  }
 0x462   : > { %10272 = vmatpush1.bf16.msra.mxu0 %v18247_v48  ;;  %11304 = vmatpush1.bf16.msra.mxu1 %v18250_v49  ;;  %v18348_v48 = vld [vmem:[%s19724_s21 + $0x1e84] ss:$16 sps:$4 sm:$0xff]   ;;  %v18351_v49 = vld [vmem:[%s19724_s21 + $0x1e8c] ss:$16 sps:$4 sm:$0xff]  }
 0x463   : > { %10273 = vmatprep.subr.bf16.mxu0 %v18255_v50  ;;  %11305 = vmatprep.subr.bf16.mxu1 %v18258_v51  ;;  %v18346_v50 = vld [vmem:[%s19724_s21 + $0x1e80] ss:$16 sps:$4 sm:$0xff]   ;;  %v18349_v51 = vld [vmem:[%s19724_s21 + $0x1e88] ss:$16 sps:$4 sm:$0xff]  }
 0x466   : > { %10274 = vmatpush1.bf16.msra.mxu0 %v18253_v52  ;;  %11306 = vmatpush1.bf16.msra.mxu1 %v18256_v53  ;;  %v18354_v52 = vld [vmem:[%s19724_s21 + $0x1ea4] ss:$16 sps:$4 sm:$0xff]   ;;  %v18357_v53 = vld [vmem:[%s19724_s21 + $0x1eac] ss:$16 sps:$4 sm:$0xff]  }
 0x467   : > { %10275 = vmatprep.subr.bf16.mxu0 %v18261_v54  ;;  %11307 = vmatprep.subr.bf16.mxu1 %v18264_v55  ;;  %v18352_v54 = vld [vmem:[%s19724_s21 + $0x1ea0] ss:$16 sps:$4 sm:$0xff]   ;;  %v18355_v55 = vld [vmem:[%s19724_s21 + $0x1ea8] ss:$16 sps:$4 sm:$0xff]  }
 0x46a   : > { %10276 = vmatpush1.bf16.msra.mxu0 %v18259_v56  ;;  %11308 = vmatpush1.bf16.msra.mxu1 %v18262_v57  ;;  %v18360_v56 = vld [vmem:[%s19724_s21 + $0x1ec4] ss:$16 sps:$4 sm:$0xff]   ;;  %v18363_v57 = vld [vmem:[%s19724_s21 + $0x1ecc] ss:$16 sps:$4 sm:$0xff]  }
 0x46b   : > { %10277 = vmatprep.subr.bf16.mxu0 %v18267_v58  ;;  %11309 = vmatprep.subr.bf16.mxu1 %v18270_v59  ;;  %v18358_v58 = vld [vmem:[%s19724_s21 + $0x1ec0] ss:$16 sps:$4 sm:$0xff]   ;;  %v18361_v59 = vld [vmem:[%s19724_s21 + $0x1ec8] ss:$16 sps:$4 sm:$0xff]  }
 0x46e   : > { %10278 = vmatpush1.bf16.msra.mxu0 %v18265_v60  ;;  %11310 = vmatpush1.bf16.msra.mxu1 %v18268_v61  ;;  %v18366_v60 = vld [vmem:[%s19724_s21 + $0x1ee4] ss:$16 sps:$4 sm:$0xff]   ;;  %v18369_v61 = vld [vmem:[%s19724_s21 + $0x1eec] ss:$16 sps:$4 sm:$0xff]  }
 0x46f   : > { %10279 = vmatprep.subr.bf16.mxu0 %v18273_v62  ;;  %11311 = vmatprep.subr.bf16.mxu1 %v18276_v63  ;;  %v18364_v62 = vld [vmem:[%s19724_s21 + $0x1ee0] ss:$16 sps:$4 sm:$0xff]   ;;  %v18367_v63 = vld [vmem:[%s19724_s21 + $0x1ee8] ss:$16 sps:$4 sm:$0xff]  }
 0x472   : > { %10280 = vmatpush1.bf16.msra.mxu0 %v18271_v0  ;;  %11312 = vmatpush1.bf16.msra.mxu1 %v18274_v1  ;;  %v18372_v0 = vld [vmem:[%s19724_s21 + $0x1f04] ss:$16 sps:$4 sm:$0xff]   ;;  %v18375_v1 = vld [vmem:[%s19724_s21 + $0x1f0c] ss:$16 sps:$4 sm:$0xff]  }
 0x473   : > { %10281 = vmatprep.subr.bf16.mxu0 %v18279_v2  ;;  %11313 = vmatprep.subr.bf16.mxu1 %v18282_v3  ;;  %v18370_v2 = vld [vmem:[%s19724_s21 + $0x1f00] ss:$16 sps:$4 sm:$0xff]   ;;  %v18373_v3 = vld [vmem:[%s19724_s21 + $0x1f08] ss:$16 sps:$4 sm:$0xff]  }
 0x476   : > { %10282 = vmatpush1.bf16.msra.mxu0 %v18277_v4  ;;  %11314 = vmatpush1.bf16.msra.mxu1 %v18280_v5  ;;  %v18378_v4 = vld [vmem:[%s19724_s21 + $0x1f24] ss:$16 sps:$4 sm:$0xff]   ;;  %v18381_v5 = vld [vmem:[%s19724_s21 + $0x1f2c] ss:$16 sps:$4 sm:$0xff]  }
 0x477   : > { %10283 = vmatprep.subr.bf16.mxu0 %v18285_v6  ;;  %11315 = vmatprep.subr.bf16.mxu1 %v18288_v7  ;;  %v18376_v6 = vld [vmem:[%s19724_s21 + $0x1f20] ss:$16 sps:$4 sm:$0xff]   ;;  %v18379_v7 = vld [vmem:[%s19724_s21 + $0x1f28] ss:$16 sps:$4 sm:$0xff]  }
 0x47a   : > { %10284 = vmatpush1.bf16.msra.mxu0 %v18283_v8  ;;  %11316 = vmatpush1.bf16.msra.mxu1 %v18286_v9  ;;  %v18384_v8 = vld [vmem:[%s19724_s21 + $0x1f44] ss:$16 sps:$4 sm:$0xff]   ;;  %v18387_v9 = vld [vmem:[%s19724_s21 + $0x1f4c] ss:$16 sps:$4 sm:$0xff]  }
 0x47b   : > { %10285 = vmatprep.subr.bf16.mxu0 %v18291_v10  ;;  %11317 = vmatprep.subr.bf16.mxu1 %v18294_v11  ;;  %v18382_v10 = vld [vmem:[%s19724_s21 + $0x1f40] ss:$16 sps:$4 sm:$0xff]   ;;  %v18385_v11 = vld [vmem:[%s19724_s21 + $0x1f48] ss:$16 sps:$4 sm:$0xff]  }
 0x47e   : > { %10286 = vmatpush1.bf16.msra.mxu0 %v18289_v12  ;;  %11318 = vmatpush1.bf16.msra.mxu1 %v18292_v13  ;;  %v18390_v12 = vld [vmem:[%s19724_s21 + $0x1f64] ss:$16 sps:$4 sm:$0xff]   ;;  %v18393_v13 = vld [vmem:[%s19724_s21 + $0x1f6c] ss:$16 sps:$4 sm:$0xff]  }
 0x47f   : > { %10287 = vmatprep.subr.bf16.mxu0 %v18297_v14  ;;  %11319 = vmatprep.subr.bf16.mxu1 %v18300_v15  ;;  %v18388_v14 = vld [vmem:[%s19724_s21 + $0x1f60] ss:$16 sps:$4 sm:$0xff]   ;;  %v18391_v15 = vld [vmem:[%s19724_s21 + $0x1f68] ss:$16 sps:$4 sm:$0xff]  }
 0x482   : > { %10288 = vmatpush1.bf16.msra.mxu0 %v18295_v16  ;;  %11320 = vmatpush1.bf16.msra.mxu1 %v18298_v17  ;;  %v18396_v16 = vld [vmem:[%s19724_s21 + $0x1f84] ss:$16 sps:$4 sm:$0xff]   ;;  %v18399_v17 = vld [vmem:[%s19724_s21 + $0x1f8c] ss:$16 sps:$4 sm:$0xff]  }
 0x483   : > { %10289 = vmatprep.subr.bf16.mxu0 %v18303_v18  ;;  %11321 = vmatprep.subr.bf16.mxu1 %v18306_v19  ;;  %v18394_v18 = vld [vmem:[%s19724_s21 + $0x1f80] ss:$16 sps:$4 sm:$0xff]   ;;  %v18397_v19 = vld [vmem:[%s19724_s21 + $0x1f88] ss:$16 sps:$4 sm:$0xff]  }
 0x486   : > { %10290 = vmatpush1.bf16.msra.mxu0 %v18301_v20  ;;  %11322 = vmatpush1.bf16.msra.mxu1 %v18304_v21  ;;  %v18402_v20 = vld [vmem:[%s19724_s21 + $0x1fa4] ss:$16 sps:$4 sm:$0xff]   ;;  %v18405_v21 = vld [vmem:[%s19724_s21 + $0x1fac] ss:$16 sps:$4 sm:$0xff]  }
 0x487   : > { %10291 = vmatprep.subr.bf16.mxu0 %v18309_v22  ;;  %11323 = vmatprep.subr.bf16.mxu1 %v18312_v23  ;;  %v18400_v22 = vld [vmem:[%s19724_s21 + $0x1fa0] ss:$16 sps:$4 sm:$0xff]   ;;  %v18403_v23 = vld [vmem:[%s19724_s21 + $0x1fa8] ss:$16 sps:$4 sm:$0xff]  }
 0x48a   : > { %10292 = vmatpush1.bf16.msra.mxu0 %v18307_v24  ;;  %11324 = vmatpush1.bf16.msra.mxu1 %v18310_v25  ;;  %v18408_v24 = vld [vmem:[%s19724_s21 + $0x1fc4] ss:$16 sps:$4 sm:$0xff]   ;;  %v18411_v25 = vld [vmem:[%s19724_s21 + $0x1fcc] ss:$16 sps:$4 sm:$0xff]  }
 0x48b   : > { %10293 = vmatprep.subr.bf16.mxu0 %v18315_v26  ;;  %11325 = vmatprep.subr.bf16.mxu1 %v18318_v27  ;;  %v18406_v26 = vld [vmem:[%s19724_s21 + $0x1fc0] ss:$16 sps:$4 sm:$0xff]   ;;  %v18409_v27 = vld [vmem:[%s19724_s21 + $0x1fc8] ss:$16 sps:$4 sm:$0xff]  }
 0x48e   : > { %10294 = vmatpush1.bf16.msra.mxu0 %v18313_v28  ;;  %11326 = vmatpush1.bf16.msra.mxu1 %v18316_v29  ;;  %v18414_v28 = vld [vmem:[%s19724_s21 + $0x1fe4] ss:$16 sps:$4 sm:$0xff]   ;;  %v18417_v29 = vld [vmem:[%s19724_s21 + $0x1fec] ss:$16 sps:$4 sm:$0xff]  }
 0x48f   : > { %10306 = vmatprep.subr.bf16.mxu0 %v18324_v30  ;;  %11338 = vmatprep.subr.bf16.mxu1 %v18327_v31  ;;  %v18412_v30 = vld [vmem:[%s19724_s21 + $0x1fe0] ss:$16 sps:$4 sm:$0xff]   ;;  %v18415_v31 = vld [vmem:[%s19724_s21 + $0x1fe8] ss:$16 sps:$4 sm:$0xff]  }
 0x491   : > { %10296 = vmatmul.mubr.bf16.vlgmr.msra.gmra.mrb[0].mxu0 %v18319_v32  ;;  %11328 = vmatmul.mubr.bf16.vlgmr.msra.gmra.mrb[0].mxu1 %v18319_v32  ;;  %v18423_v32 = vld [vmem:[%s19724_s21 + $0x2004] ss:$16 sps:$4 sm:$0xff]  }
 0x492   : > { %10307 = vmatpush1.bf16.msra.mxu0 %v18322_v33  ;;  %11339 = vmatpush1.bf16.msra.mxu1 %v18325_v34  ;;  %v18426_v33 = vld [vmem:[%s19724_s21 + $0x200c] ss:$16 sps:$4 sm:$0xff]   ;;  %v18418_v34 = vld [vmem:[%s21727_s0 + $0x78] ss:$188 sps:$4 sm:$0xff]  }
 0x493   : > { %10308 = vmatprep.subr.bf16.mxu0 %v18330_v35  ;;  %11340 = vmatprep.subr.bf16.mxu1 %v18333_v36  ;;  %v18421_v35 = vld [vmem:[%s19724_s21 + $0x2000] ss:$16 sps:$4 sm:$0xff]   ;;  %v18424_v36 = vld [vmem:[%s19724_s21 + $0x2008] ss:$16 sps:$4 sm:$0xff]  }
 0x494   : > { %10338 = vmatprep.mubr.bf16.mxu0 %v18420_v37  ;;  %11370 = vmatprep.mubr.bf16.mxu1 %v18420_v37  ;;  %v18429_v37 = vld [vmem:[%s19724_s21 + $0x2024] ss:$16 sps:$4 sm:$0xff]  }
 0x496   : > { %10309 = vmatpush1.bf16.msra.mxu0 %v18328_v38  ;;  %11341 = vmatpush1.bf16.msra.mxu1 %v18331_v39  ;;  %v18432_v38 = vld [vmem:[%s19724_s21 + $0x202c] ss:$16 sps:$4 sm:$0xff]   ;;  %v18519_v39 = vld [vmem:[%s21727_s0 + $0x84] ss:$188 sps:$4 sm:$0xff]  }
 0x497   : > { %10310 = vmatprep.subr.bf16.mxu0 %v18336_v40  ;;  %11342 = vmatprep.subr.bf16.mxu1 %v18339_v41  ;;  %v18427_v40 = vld [vmem:[%s19724_s21 + $0x2020] ss:$16 sps:$4 sm:$0xff]   ;;  %v18430_v41 = vld [vmem:[%s19724_s21 + $0x2028] ss:$16 sps:$4 sm:$0xff]  }
 0x49a   : > { %10311 = vmatpush1.bf16.msra.mxu0 %v18334_v42  ;;  %11343 = vmatpush1.bf16.msra.mxu1 %v18337_v43  ;;  %v18435_v42 = vld [vmem:[%s19724_s21 + $0x2044] ss:$16 sps:$4 sm:$0xff]   ;;  %v18438_v43 = vld [vmem:[%s19724_s21 + $0x204c] ss:$16 sps:$4 sm:$0xff]  }
 0x49b   : > { %10312 = vmatprep.subr.bf16.mxu0 %v18342_v44  ;;  %11344 = vmatprep.subr.bf16.mxu1 %v18345_v45  ;;  %v18433_v44 = vld [vmem:[%s19724_s21 + $0x2040] ss:$16 sps:$4 sm:$0xff]   ;;  %v18436_v45 = vld [vmem:[%s19724_s21 + $0x2048] ss:$16 sps:$4 sm:$0xff]  }
 0x49e   : > { %10313 = vmatpush1.bf16.msra.mxu0 %v18340_v46  ;;  %11345 = vmatpush1.bf16.msra.mxu1 %v18343_v47  ;;  %v18441_v46 = vld [vmem:[%s19724_s21 + $0x2064] ss:$16 sps:$4 sm:$0xff]   ;;  %v18444_v47 = vld [vmem:[%s19724_s21 + $0x206c] ss:$16 sps:$4 sm:$0xff]  }
 0x49f   : > { %10314 = vmatprep.subr.bf16.mxu0 %v18348_v48  ;;  %11346 = vmatprep.subr.bf16.mxu1 %v18351_v49  ;;  %v18439_v48 = vld [vmem:[%s19724_s21 + $0x2060] ss:$16 sps:$4 sm:$0xff]   ;;  %v18442_v49 = vld [vmem:[%s19724_s21 + $0x2068] ss:$16 sps:$4 sm:$0xff]  }
 0x4a2   : > { %10315 = vmatpush1.bf16.msra.mxu0 %v18346_v50  ;;  %11347 = vmatpush1.bf16.msra.mxu1 %v18349_v51  ;;  %v18447_v50 = vld [vmem:[%s19724_s21 + $0x2084] ss:$16 sps:$4 sm:$0xff]   ;;  %v18450_v51 = vld [vmem:[%s19724_s21 + $0x208c] ss:$16 sps:$4 sm:$0xff]  }
 0x4a3   : > { %10316 = vmatprep.subr.bf16.mxu0 %v18354_v52  ;;  %11348 = vmatprep.subr.bf16.mxu1 %v18357_v53  ;;  %v18445_v52 = vld [vmem:[%s19724_s21 + $0x2080] ss:$16 sps:$4 sm:$0xff]   ;;  %v18448_v53 = vld [vmem:[%s19724_s21 + $0x2088] ss:$16 sps:$4 sm:$0xff]  }
 0x4a6   : > { %10317 = vmatpush1.bf16.msra.mxu0 %v18352_v54  ;;  %11349 = vmatpush1.bf16.msra.mxu1 %v18355_v55  ;;  %v18453_v54 = vld [vmem:[%s19724_s21 + $0x20a4] ss:$16 sps:$4 sm:$0xff]   ;;  %v18456_v55 = vld [vmem:[%s19724_s21 + $0x20ac] ss:$16 sps:$4 sm:$0xff]  }
 0x4a7   : > { %10318 = vmatprep.subr.bf16.mxu0 %v18360_v56  ;;  %11350 = vmatprep.subr.bf16.mxu1 %v18363_v57  ;;  %v18451_v56 = vld [vmem:[%s19724_s21 + $0x20a0] ss:$16 sps:$4 sm:$0xff]   ;;  %v18454_v57 = vld [vmem:[%s19724_s21 + $0x20a8] ss:$16 sps:$4 sm:$0xff]  }
 0x4aa   : > { %10319 = vmatpush1.bf16.msra.mxu0 %v18358_v58  ;;  %11351 = vmatpush1.bf16.msra.mxu1 %v18361_v59  ;;  %v18459_v58 = vld [vmem:[%s19724_s21 + $0x20c4] ss:$16 sps:$4 sm:$0xff]   ;;  %v18462_v59 = vld [vmem:[%s19724_s21 + $0x20cc] ss:$16 sps:$4 sm:$0xff]  }
 0x4ab   : > { %10320 = vmatprep.subr.bf16.mxu0 %v18366_v60  ;;  %11352 = vmatprep.subr.bf16.mxu1 %v18369_v61  ;;  %v18457_v60 = vld [vmem:[%s19724_s21 + $0x20c0] ss:$16 sps:$4 sm:$0xff]   ;;  %v18460_v61 = vld [vmem:[%s19724_s21 + $0x20c8] ss:$16 sps:$4 sm:$0xff]  }
 0x4ae   : > { %10321 = vmatpush1.bf16.msra.mxu0 %v18364_v62  ;;  %11353 = vmatpush1.bf16.msra.mxu1 %v18367_v63  ;;  %v18465_v62 = vld [vmem:[%s19724_s21 + $0x20e4] ss:$16 sps:$4 sm:$0xff]   ;;  %v18468_v63 = vld [vmem:[%s19724_s21 + $0x20ec] ss:$16 sps:$4 sm:$0xff]  }
 0x4af   : > { %10322 = vmatprep.subr.bf16.mxu0 %v18372_v0  ;;  %11354 = vmatprep.subr.bf16.mxu1 %v18375_v1  ;;  %v18463_v0 = vld [vmem:[%s19724_s21 + $0x20e0] ss:$16 sps:$4 sm:$0xff]   ;;  %v18466_v1 = vld [vmem:[%s19724_s21 + $0x20e8] ss:$16 sps:$4 sm:$0xff]  }
 0x4b2   : > { %10323 = vmatpush1.bf16.msra.mxu0 %v18370_v2  ;;  %11355 = vmatpush1.bf16.msra.mxu1 %v18373_v3  ;;  %v18471_v2 = vld [vmem:[%s19724_s21 + $0x2104] ss:$16 sps:$4 sm:$0xff]   ;;  %v18474_v3 = vld [vmem:[%s19724_s21 + $0x210c] ss:$16 sps:$4 sm:$0xff]  }
 0x4b3   : > { %10324 = vmatprep.subr.bf16.mxu0 %v18378_v4  ;;  %11356 = vmatprep.subr.bf16.mxu1 %v18381_v5  ;;  %v18469_v4 = vld [vmem:[%s19724_s21 + $0x2100] ss:$16 sps:$4 sm:$0xff]   ;;  %v18472_v5 = vld [vmem:[%s19724_s21 + $0x2108] ss:$16 sps:$4 sm:$0xff]  }
 0x4b6   : > { %10325 = vmatpush1.bf16.msra.mxu0 %v18376_v6  ;;  %11357 = vmatpush1.bf16.msra.mxu1 %v18379_v7  ;;  %v18477_v6 = vld [vmem:[%s19724_s21 + $0x2124] ss:$16 sps:$4 sm:$0xff]   ;;  %v18480_v7 = vld [vmem:[%s19724_s21 + $0x212c] ss:$16 sps:$4 sm:$0xff]  }
 0x4b7   : > { %10326 = vmatprep.subr.bf16.mxu0 %v18384_v8  ;;  %11358 = vmatprep.subr.bf16.mxu1 %v18387_v9  ;;  %v18475_v8 = vld [vmem:[%s19724_s21 + $0x2120] ss:$16 sps:$4 sm:$0xff]   ;;  %v18478_v9 = vld [vmem:[%s19724_s21 + $0x2128] ss:$16 sps:$4 sm:$0xff]  }
 0x4ba   : > { %10327 = vmatpush1.bf16.msra.mxu0 %v18382_v10  ;;  %11359 = vmatpush1.bf16.msra.mxu1 %v18385_v11  ;;  %v18483_v10 = vld [vmem:[%s19724_s21 + $0x2144] ss:$16 sps:$4 sm:$0xff]   ;;  %v18486_v11 = vld [vmem:[%s19724_s21 + $0x214c] ss:$16 sps:$4 sm:$0xff]  }
 0x4bb   : > { %10328 = vmatprep.subr.bf16.mxu0 %v18390_v12  ;;  %11360 = vmatprep.subr.bf16.mxu1 %v18393_v13  ;;  %v18481_v12 = vld [vmem:[%s19724_s21 + $0x2140] ss:$16 sps:$4 sm:$0xff]   ;;  %v18484_v13 = vld [vmem:[%s19724_s21 + $0x2148] ss:$16 sps:$4 sm:$0xff]  }
 0x4be   : > { %10329 = vmatpush1.bf16.msra.mxu0 %v18388_v14  ;;  %11361 = vmatpush1.bf16.msra.mxu1 %v18391_v15  ;;  %v18489_v14 = vld [vmem:[%s19724_s21 + $0x2164] ss:$16 sps:$4 sm:$0xff]   ;;  %v18492_v15 = vld [vmem:[%s19724_s21 + $0x216c] ss:$16 sps:$4 sm:$0xff]  }
 0x4bf   : > { %10330 = vmatprep.subr.bf16.mxu0 %v18396_v16  ;;  %11362 = vmatprep.subr.bf16.mxu1 %v18399_v17  ;;  %v18487_v16 = vld [vmem:[%s19724_s21 + $0x2160] ss:$16 sps:$4 sm:$0xff]   ;;  %v18490_v17 = vld [vmem:[%s19724_s21 + $0x2168] ss:$16 sps:$4 sm:$0xff]  }
 0x4c2   : > { %10331 = vmatpush1.bf16.msra.mxu0 %v18394_v18  ;;  %11363 = vmatpush1.bf16.msra.mxu1 %v18397_v19  ;;  %v18495_v18 = vld [vmem:[%s19724_s21 + $0x2184] ss:$16 sps:$4 sm:$0xff]   ;;  %v18498_v19 = vld [vmem:[%s19724_s21 + $0x218c] ss:$16 sps:$4 sm:$0xff]  }
 0x4c3   : > { %10332 = vmatprep.subr.bf16.mxu0 %v18402_v20  ;;  %11364 = vmatprep.subr.bf16.mxu1 %v18405_v21  ;;  %v18493_v20 = vld [vmem:[%s19724_s21 + $0x2180] ss:$16 sps:$4 sm:$0xff]   ;;  %v18496_v21 = vld [vmem:[%s19724_s21 + $0x2188] ss:$16 sps:$4 sm:$0xff]  }
 0x4c6   : > { %10333 = vmatpush1.bf16.msra.mxu0 %v18400_v22  ;;  %11365 = vmatpush1.bf16.msra.mxu1 %v18403_v23  ;;  %v18501_v22 = vld [vmem:[%s19724_s21 + $0x21a4] ss:$16 sps:$4 sm:$0xff]   ;;  %v18504_v23 = vld [vmem:[%s19724_s21 + $0x21ac] ss:$16 sps:$4 sm:$0xff]  }
 0x4c7   : > { %10334 = vmatprep.subr.bf16.mxu0 %v18408_v24  ;;  %11366 = vmatprep.subr.bf16.mxu1 %v18411_v25  ;;  %v18499_v24 = vld [vmem:[%s19724_s21 + $0x21a0] ss:$16 sps:$4 sm:$0xff]   ;;  %v18502_v25 = vld [vmem:[%s19724_s21 + $0x21a8] ss:$16 sps:$4 sm:$0xff]  }
 0x4ca   : > { %10335 = vmatpush1.bf16.msra.mxu0 %v18406_v26  ;;  %11367 = vmatpush1.bf16.msra.mxu1 %v18409_v27  ;;  %v18507_v26 = vld [vmem:[%s19724_s21 + $0x21c4] ss:$16 sps:$4 sm:$0xff]   ;;  %v18510_v27 = vld [vmem:[%s19724_s21 + $0x21cc] ss:$16 sps:$4 sm:$0xff]  }
 0x4cb   : > { %10336 = vmatprep.subr.bf16.mxu0 %v18414_v28  ;;  %11368 = vmatprep.subr.bf16.mxu1 %v18417_v29  ;;  %v18505_v28 = vld [vmem:[%s19724_s21 + $0x21c0] ss:$16 sps:$4 sm:$0xff]   ;;  %v18508_v29 = vld [vmem:[%s19724_s21 + $0x21c8] ss:$16 sps:$4 sm:$0xff]  }
 0x4ce   : > { %10337 = vmatpush1.bf16.msra.mxu0 %v18412_v30  ;;  %11369 = vmatpush1.bf16.msra.mxu1 %v18415_v31  ;;  %v18513_v30 = vld [vmem:[%s19724_s21 + $0x21e4] ss:$16 sps:$4 sm:$0xff]   ;;  %v18516_v31 = vld [vmem:[%s19724_s21 + $0x21ec] ss:$16 sps:$4 sm:$0xff]  }
 0x4cf   : > { %10349 = vmatprep.subr.bf16.mxu0 %v18423_v32  ;;  %11381 = vmatprep.subr.bf16.mxu1 %v18426_v33  ;;  %v18511_v32 = vld [vmem:[%s19724_s21 + $0x21e0] ss:$16 sps:$4 sm:$0xff]   ;;  %v18514_v33 = vld [vmem:[%s19724_s21 + $0x21e8] ss:$16 sps:$4 sm:$0xff]  }
 0x4d1   : > { %10339 = vmatmul.mubr.bf16.vlgmr.msra.gmra.mrb[0].mxu0 %v18418_v34  ;;  %11371 = vmatmul.mubr.bf16.vlgmr.msra.gmra.mrb[0].mxu1 %v18418_v34  ;;  %v18522_v34 = vld [vmem:[%s19724_s21 + $0x2204] ss:$16 sps:$4 sm:$0xff]  }
 0x4d2   : > { %10350 = vmatpush1.bf16.msra.mxu0 %v18421_v35  ;;  %11382 = vmatpush1.bf16.msra.mxu1 %v18424_v36  ;;  %v18525_v35 = vld [vmem:[%s19724_s21 + $0x220c] ss:$16 sps:$4 sm:$0xff]  }
 0x4d3   : > { %10351 = vmatprep.subr.bf16.mxu0 %v18429_v37  ;;  %11383 = vmatprep.subr.bf16.mxu1 %v18432_v38  ;;  %v18517_v36 = vld [vmem:[%s21727_s0 + $0x80] ss:$188 sps:$4 sm:$0xff]   ;;  %v18523_v38 = vld [vmem:[%s19724_s21 + $0x2208] ss:$16 sps:$4 sm:$0xff]  }
 0x4d4   : > { %10381 = vmatprep.mubr.bf16.mxu0 %v18519_v39  ;;  %11413 = vmatprep.mubr.bf16.mxu1 %v18519_v39  ;;  %v18520_v37 = vld [vmem:[%s19724_s21 + $0x2200] ss:$16 sps:$4 sm:$0xff]   ;;  %v18528_v39 = vld [vmem:[%s19724_s21 + $0x2224] ss:$16 sps:$4 sm:$0xff]  }
 0x4d6   : > { %10352 = vmatpush1.bf16.msra.mxu0 %v18427_v40  ;;  %11384 = vmatpush1.bf16.msra.mxu1 %v18430_v41  ;;  %v18531_v40 = vld [vmem:[%s19724_s21 + $0x222c] ss:$16 sps:$4 sm:$0xff]  }
 0x4d7   : > { %10353 = vmatprep.subr.bf16.mxu0 %v18435_v42  ;;  %11385 = vmatprep.subr.bf16.mxu1 %v18438_v43  ;;  %v18618_v41 = vld [vmem:[%s21727_s0 + $0x8c] ss:$188 sps:$4 sm:$0xff]   ;;  %v18526_v42 = vld [vmem:[%s19724_s21 + $0x2220] ss:$16 sps:$4 sm:$0xff]  }
 0x4d8   : > { %v18529_v43 = vld [vmem:[%s19724_s21 + $0x2228] ss:$16 sps:$4 sm:$0xff]  }
 0x4da   : > { %10354 = vmatpush1.bf16.msra.mxu0 %v18433_v44  ;;  %11386 = vmatpush1.bf16.msra.mxu1 %v18436_v45  ;;  %v18534_v44 = vld [vmem:[%s19724_s21 + $0x2244] ss:$16 sps:$4 sm:$0xff]   ;;  %v18537_v45 = vld [vmem:[%s19724_s21 + $0x224c] ss:$16 sps:$4 sm:$0xff]  }
 0x4db   : > { %10355 = vmatprep.subr.bf16.mxu0 %v18441_v46  ;;  %11387 = vmatprep.subr.bf16.mxu1 %v18444_v47  ;;  %v18532_v46 = vld [vmem:[%s19724_s21 + $0x2240] ss:$16 sps:$4 sm:$0xff]   ;;  %v18535_v47 = vld [vmem:[%s19724_s21 + $0x2248] ss:$16 sps:$4 sm:$0xff]  }
 0x4de   : > { %10356 = vmatpush1.bf16.msra.mxu0 %v18439_v48  ;;  %11388 = vmatpush1.bf16.msra.mxu1 %v18442_v49  ;;  %v18540_v48 = vld [vmem:[%s19724_s21 + $0x2264] ss:$16 sps:$4 sm:$0xff]   ;;  %v18543_v49 = vld [vmem:[%s19724_s21 + $0x226c] ss:$16 sps:$4 sm:$0xff]  }
 0x4df   : > { %10357 = vmatprep.subr.bf16.mxu0 %v18447_v50  ;;  %11389 = vmatprep.subr.bf16.mxu1 %v18450_v51  ;;  %v18538_v50 = vld [vmem:[%s19724_s21 + $0x2260] ss:$16 sps:$4 sm:$0xff]   ;;  %v18541_v51 = vld [vmem:[%s19724_s21 + $0x2268] ss:$16 sps:$4 sm:$0xff]  }
 0x4e2   : > { %10358 = vmatpush1.bf16.msra.mxu0 %v18445_v52  ;;  %11390 = vmatpush1.bf16.msra.mxu1 %v18448_v53  ;;  %v18546_v52 = vld [vmem:[%s19724_s21 + $0x2284] ss:$16 sps:$4 sm:$0xff]   ;;  %v18549_v53 = vld [vmem:[%s19724_s21 + $0x228c] ss:$16 sps:$4 sm:$0xff]  }
 0x4e3   : > { %10359 = vmatprep.subr.bf16.mxu0 %v18453_v54  ;;  %11391 = vmatprep.subr.bf16.mxu1 %v18456_v55  ;;  %v18544_v54 = vld [vmem:[%s19724_s21 + $0x2280] ss:$16 sps:$4 sm:$0xff]   ;;  %v18547_v55 = vld [vmem:[%s19724_s21 + $0x2288] ss:$16 sps:$4 sm:$0xff]  }
 0x4e6   : > { %10360 = vmatpush1.bf16.msra.mxu0 %v18451_v56  ;;  %11392 = vmatpush1.bf16.msra.mxu1 %v18454_v57  ;;  %v18552_v56 = vld [vmem:[%s19724_s21 + $0x22a4] ss:$16 sps:$4 sm:$0xff]   ;;  %v18555_v57 = vld [vmem:[%s19724_s21 + $0x22ac] ss:$16 sps:$4 sm:$0xff]  }
 0x4e7   : > { %10361 = vmatprep.subr.bf16.mxu0 %v18459_v58  ;;  %11393 = vmatprep.subr.bf16.mxu1 %v18462_v59  ;;  %v18550_v58 = vld [vmem:[%s19724_s21 + $0x22a0] ss:$16 sps:$4 sm:$0xff]   ;;  %v18553_v59 = vld [vmem:[%s19724_s21 + $0x22a8] ss:$16 sps:$4 sm:$0xff]  }
 0x4ea   : > { %10362 = vmatpush1.bf16.msra.mxu0 %v18457_v60  ;;  %11394 = vmatpush1.bf16.msra.mxu1 %v18460_v61  ;;  %v18558_v60 = vld [vmem:[%s19724_s21 + $0x22c4] ss:$16 sps:$4 sm:$0xff]   ;;  %v18561_v61 = vld [vmem:[%s19724_s21 + $0x22cc] ss:$16 sps:$4 sm:$0xff]  }
 0x4eb   : > { %10363 = vmatprep.subr.bf16.mxu0 %v18465_v62  ;;  %11395 = vmatprep.subr.bf16.mxu1 %v18468_v63  ;;  %v18556_v62 = vld [vmem:[%s19724_s21 + $0x22c0] ss:$16 sps:$4 sm:$0xff]   ;;  %v18559_v63 = vld [vmem:[%s19724_s21 + $0x22c8] ss:$16 sps:$4 sm:$0xff]  }
 0x4ee   : > { %10364 = vmatpush1.bf16.msra.mxu0 %v18463_v0  ;;  %11396 = vmatpush1.bf16.msra.mxu1 %v18466_v1  ;;  %v18564_v0 = vld [vmem:[%s19724_s21 + $0x22e4] ss:$16 sps:$4 sm:$0xff]   ;;  %v18567_v1 = vld [vmem:[%s19724_s21 + $0x22ec] ss:$16 sps:$4 sm:$0xff]  }
 0x4ef   : > { %10365 = vmatprep.subr.bf16.mxu0 %v18471_v2  ;;  %11397 = vmatprep.subr.bf16.mxu1 %v18474_v3  ;;  %v18562_v2 = vld [vmem:[%s19724_s21 + $0x22e0] ss:$16 sps:$4 sm:$0xff]   ;;  %v18565_v3 = vld [vmem:[%s19724_s21 + $0x22e8] ss:$16 sps:$4 sm:$0xff]  }
 0x4f2   : > { %10366 = vmatpush1.bf16.msra.mxu0 %v18469_v4  ;;  %11398 = vmatpush1.bf16.msra.mxu1 %v18472_v5  ;;  %v18570_v4 = vld [vmem:[%s19724_s21 + $0x2304] ss:$16 sps:$4 sm:$0xff]   ;;  %v18573_v5 = vld [vmem:[%s19724_s21 + $0x230c] ss:$16 sps:$4 sm:$0xff]  }
 0x4f3   : > { %10367 = vmatprep.subr.bf16.mxu0 %v18477_v6  ;;  %11399 = vmatprep.subr.bf16.mxu1 %v18480_v7  ;;  %v18568_v6 = vld [vmem:[%s19724_s21 + $0x2300] ss:$16 sps:$4 sm:$0xff]   ;;  %v18571_v7 = vld [vmem:[%s19724_s21 + $0x2308] ss:$16 sps:$4 sm:$0xff]  }
 0x4f6   : > { %10368 = vmatpush1.bf16.msra.mxu0 %v18475_v8  ;;  %11400 = vmatpush1.bf16.msra.mxu1 %v18478_v9  ;;  %v18576_v8 = vld [vmem:[%s19724_s21 + $0x2324] ss:$16 sps:$4 sm:$0xff]   ;;  %v18579_v9 = vld [vmem:[%s19724_s21 + $0x232c] ss:$16 sps:$4 sm:$0xff]  }
 0x4f7   : > { %10369 = vmatprep.subr.bf16.mxu0 %v18483_v10  ;;  %11401 = vmatprep.subr.bf16.mxu1 %v18486_v11  ;;  %v18574_v10 = vld [vmem:[%s19724_s21 + $0x2320] ss:$16 sps:$4 sm:$0xff]   ;;  %v18577_v11 = vld [vmem:[%s19724_s21 + $0x2328] ss:$16 sps:$4 sm:$0xff]  }
 0x4fa   : > { %10370 = vmatpush1.bf16.msra.mxu0 %v18481_v12  ;;  %11402 = vmatpush1.bf16.msra.mxu1 %v18484_v13  ;;  %v18582_v12 = vld [vmem:[%s19724_s21 + $0x2344] ss:$16 sps:$4 sm:$0xff]   ;;  %v18585_v13 = vld [vmem:[%s19724_s21 + $0x234c] ss:$16 sps:$4 sm:$0xff]  }
 0x4fb   : > { %10371 = vmatprep.subr.bf16.mxu0 %v18489_v14  ;;  %11403 = vmatprep.subr.bf16.mxu1 %v18492_v15  ;;  %v18580_v14 = vld [vmem:[%s19724_s21 + $0x2340] ss:$16 sps:$4 sm:$0xff]   ;;  %v18583_v15 = vld [vmem:[%s19724_s21 + $0x2348] ss:$16 sps:$4 sm:$0xff]  }
 0x4fe   : > { %10372 = vmatpush1.bf16.msra.mxu0 %v18487_v16  ;;  %11404 = vmatpush1.bf16.msra.mxu1 %v18490_v17  ;;  %v18588_v16 = vld [vmem:[%s19724_s21 + $0x2364] ss:$16 sps:$4 sm:$0xff]   ;;  %v18591_v17 = vld [vmem:[%s19724_s21 + $0x236c] ss:$16 sps:$4 sm:$0xff]  }
 0x4ff   : > { %10373 = vmatprep.subr.bf16.mxu0 %v18495_v18  ;;  %11405 = vmatprep.subr.bf16.mxu1 %v18498_v19  ;;  %v18586_v18 = vld [vmem:[%s19724_s21 + $0x2360] ss:$16 sps:$4 sm:$0xff]   ;;  %v18589_v19 = vld [vmem:[%s19724_s21 + $0x2368] ss:$16 sps:$4 sm:$0xff]  }
 0x502   : > { %10374 = vmatpush1.bf16.msra.mxu0 %v18493_v20  ;;  %11406 = vmatpush1.bf16.msra.mxu1 %v18496_v21  ;;  %v18594_v20 = vld [vmem:[%s19724_s21 + $0x2384] ss:$16 sps:$4 sm:$0xff]   ;;  %v18597_v21 = vld [vmem:[%s19724_s21 + $0x238c] ss:$16 sps:$4 sm:$0xff]  }
 0x503   : > { %10375 = vmatprep.subr.bf16.mxu0 %v18501_v22  ;;  %11407 = vmatprep.subr.bf16.mxu1 %v18504_v23  ;;  %v18592_v22 = vld [vmem:[%s19724_s21 + $0x2380] ss:$16 sps:$4 sm:$0xff]   ;;  %v18595_v23 = vld [vmem:[%s19724_s21 + $0x2388] ss:$16 sps:$4 sm:$0xff]  }
 0x506   : > { %10376 = vmatpush1.bf16.msra.mxu0 %v18499_v24  ;;  %11408 = vmatpush1.bf16.msra.mxu1 %v18502_v25  ;;  %v18600_v24 = vld [vmem:[%s19724_s21 + $0x23a4] ss:$16 sps:$4 sm:$0xff]   ;;  %v18603_v25 = vld [vmem:[%s19724_s21 + $0x23ac] ss:$16 sps:$4 sm:$0xff]  }
 0x507   : > { %10377 = vmatprep.subr.bf16.mxu0 %v18507_v26  ;;  %11409 = vmatprep.subr.bf16.mxu1 %v18510_v27  ;;  %v18598_v26 = vld [vmem:[%s19724_s21 + $0x23a0] ss:$16 sps:$4 sm:$0xff]   ;;  %v18601_v27 = vld [vmem:[%s19724_s21 + $0x23a8] ss:$16 sps:$4 sm:$0xff]  }
 0x50a   : > { %10378 = vmatpush1.bf16.msra.mxu0 %v18505_v28  ;;  %11410 = vmatpush1.bf16.msra.mxu1 %v18508_v29  ;;  %v18606_v28 = vld [vmem:[%s19724_s21 + $0x23c4] ss:$16 sps:$4 sm:$0xff]   ;;  %v18609_v29 = vld [vmem:[%s19724_s21 + $0x23cc] ss:$16 sps:$4 sm:$0xff]  }
 0x50b   : > { %10379 = vmatprep.subr.bf16.mxu0 %v18513_v30  ;;  %11411 = vmatprep.subr.bf16.mxu1 %v18516_v31  ;;  %v18604_v30 = vld [vmem:[%s19724_s21 + $0x23c0] ss:$16 sps:$4 sm:$0xff]   ;;  %v18607_v31 = vld [vmem:[%s19724_s21 + $0x23c8] ss:$16 sps:$4 sm:$0xff]  }
 0x50e   : > { %10380 = vmatpush1.bf16.msra.mxu0 %v18511_v32  ;;  %11412 = vmatpush1.bf16.msra.mxu1 %v18514_v33  ;;  %v18612_v32 = vld [vmem:[%s19724_s21 + $0x23e4] ss:$16 sps:$4 sm:$0xff]   ;;  %v18615_v33 = vld [vmem:[%s19724_s21 + $0x23ec] ss:$16 sps:$4 sm:$0xff]  }
 0x50f   : > { %10392 = vmatprep.subr.bf16.mxu0 %v18522_v34  ;;  %11424 = vmatprep.subr.bf16.mxu1 %v18525_v35  ;;  %v18610_v34 = vld [vmem:[%s19724_s21 + $0x23e0] ss:$16 sps:$4 sm:$0xff]   ;;  %v18613_v35 = vld [vmem:[%s19724_s21 + $0x23e8] ss:$16 sps:$4 sm:$0xff]  }
 0x511   : > { %10382 = vmatmul.mubr.bf16.vlgmr.msra.gmra.mrb[0].mxu0 %v18517_v36  ;;  %11414 = vmatmul.mubr.bf16.vlgmr.msra.gmra.mrb[0].mxu1 %v18517_v36  ;;  %v18621_v36 = vld [vmem:[%s19724_s21 + $0x2404] ss:$16 sps:$4 sm:$0xff]  }
 0x512   : > { %10393 = vmatpush1.bf16.msra.mxu0 %v18520_v37  ;;  %11425 = vmatpush1.bf16.msra.mxu1 %v18523_v38  ;;  %v18624_v37 = vld [vmem:[%s19724_s21 + $0x240c] ss:$16 sps:$4 sm:$0xff]   ;;  %v18616_v38 = vld [vmem:[%s21727_s0 + $0x88] ss:$188 sps:$4 sm:$0xff]  }
 0x513   : > { %10394 = vmatprep.subr.bf16.mxu0 %v18528_v39  ;;  %11426 = vmatprep.subr.bf16.mxu1 %v18531_v40  ;;  %v18619_v39 = vld [vmem:[%s19724_s21 + $0x2400] ss:$16 sps:$4 sm:$0xff]   ;;  %v18622_v40 = vld [vmem:[%s19724_s21 + $0x2408] ss:$16 sps:$4 sm:$0xff]  }
 0x514   : > { %10424 = vmatprep.mubr.bf16.mxu0 %v18618_v41  ;;  %11456 = vmatprep.mubr.bf16.mxu1 %v18618_v41  ;;  %v18627_v41 = vld [vmem:[%s19724_s21 + $0x2424] ss:$16 sps:$4 sm:$0xff]  }
 0x516   : > { %10395 = vmatpush1.bf16.msra.mxu0 %v18526_v42  ;;  %11427 = vmatpush1.bf16.msra.mxu1 %v18529_v43  ;;  %v18630_v42 = vld [vmem:[%s19724_s21 + $0x242c] ss:$16 sps:$4 sm:$0xff]   ;;  %v18717_v43 = vld [vmem:[%s21727_s0 + $0x94] ss:$188 sps:$4 sm:$0xff]  }
 0x517   : > { %10396 = vmatprep.subr.bf16.mxu0 %v18534_v44  ;;  %11428 = vmatprep.subr.bf16.mxu1 %v18537_v45  ;;  %v18625_v44 = vld [vmem:[%s19724_s21 + $0x2420] ss:$16 sps:$4 sm:$0xff]   ;;  %v18628_v45 = vld [vmem:[%s19724_s21 + $0x2428] ss:$16 sps:$4 sm:$0xff]  }
 0x51a   : > { %10397 = vmatpush1.bf16.msra.mxu0 %v18532_v46  ;;  %11429 = vmatpush1.bf16.msra.mxu1 %v18535_v47  ;;  %v18633_v46 = vld [vmem:[%s19724_s21 + $0x2444] ss:$16 sps:$4 sm:$0xff]   ;;  %v18636_v47 = vld [vmem:[%s19724_s21 + $0x244c] ss:$16 sps:$4 sm:$0xff]  }
 0x51b   : > { %10398 = vmatprep.subr.bf16.mxu0 %v18540_v48  ;;  %11430 = vmatprep.subr.bf16.mxu1 %v18543_v49  ;;  %v18631_v48 = vld [vmem:[%s19724_s21 + $0x2440] ss:$16 sps:$4 sm:$0xff]   ;;  %v18634_v49 = vld [vmem:[%s19724_s21 + $0x2448] ss:$16 sps:$4 sm:$0xff]  }
 0x51e   : > { %10399 = vmatpush1.bf16.msra.mxu0 %v18538_v50  ;;  %11431 = vmatpush1.bf16.msra.mxu1 %v18541_v51  ;;  %v18639_v50 = vld [vmem:[%s19724_s21 + $0x2464] ss:$16 sps:$4 sm:$0xff]   ;;  %v18642_v51 = vld [vmem:[%s19724_s21 + $0x246c] ss:$16 sps:$4 sm:$0xff]  }
 0x51f   : > { %10400 = vmatprep.subr.bf16.mxu0 %v18546_v52  ;;  %11432 = vmatprep.subr.bf16.mxu1 %v18549_v53  ;;  %v18637_v52 = vld [vmem:[%s19724_s21 + $0x2460] ss:$16 sps:$4 sm:$0xff]   ;;  %v18640_v53 = vld [vmem:[%s19724_s21 + $0x2468] ss:$16 sps:$4 sm:$0xff]  }
 0x522   : > { %10401 = vmatpush1.bf16.msra.mxu0 %v18544_v54  ;;  %11433 = vmatpush1.bf16.msra.mxu1 %v18547_v55  ;;  %v18645_v54 = vld [vmem:[%s19724_s21 + $0x2484] ss:$16 sps:$4 sm:$0xff]   ;;  %v18648_v55 = vld [vmem:[%s19724_s21 + $0x248c] ss:$16 sps:$4 sm:$0xff]  }
 0x523   : > { %10402 = vmatprep.subr.bf16.mxu0 %v18552_v56  ;;  %11434 = vmatprep.subr.bf16.mxu1 %v18555_v57  ;;  %v18643_v56 = vld [vmem:[%s19724_s21 + $0x2480] ss:$16 sps:$4 sm:$0xff]   ;;  %v18646_v57 = vld [vmem:[%s19724_s21 + $0x2488] ss:$16 sps:$4 sm:$0xff]  }
 0x526   : > { %10403 = vmatpush1.bf16.msra.mxu0 %v18550_v58  ;;  %11435 = vmatpush1.bf16.msra.mxu1 %v18553_v59  ;;  %v18651_v58 = vld [vmem:[%s19724_s21 + $0x24a4] ss:$16 sps:$4 sm:$0xff]   ;;  %v18654_v59 = vld [vmem:[%s19724_s21 + $0x24ac] ss:$16 sps:$4 sm:$0xff]  }
 0x527   : > { %10404 = vmatprep.subr.bf16.mxu0 %v18558_v60  ;;  %11436 = vmatprep.subr.bf16.mxu1 %v18561_v61  ;;  %v18649_v60 = vld [vmem:[%s19724_s21 + $0x24a0] ss:$16 sps:$4 sm:$0xff]   ;;  %v18652_v61 = vld [vmem:[%s19724_s21 + $0x24a8] ss:$16 sps:$4 sm:$0xff]  }
 0x52a   : > { %10405 = vmatpush1.bf16.msra.mxu0 %v18556_v62  ;;  %11437 = vmatpush1.bf16.msra.mxu1 %v18559_v63  ;;  %v18657_v62 = vld [vmem:[%s19724_s21 + $0x24c4] ss:$16 sps:$4 sm:$0xff]   ;;  %v18660_v63 = vld [vmem:[%s19724_s21 + $0x24cc] ss:$16 sps:$4 sm:$0xff]  }
 0x52b   : > { %10406 = vmatprep.subr.bf16.mxu0 %v18564_v0  ;;  %11438 = vmatprep.subr.bf16.mxu1 %v18567_v1  ;;  %v18655_v0 = vld [vmem:[%s19724_s21 + $0x24c0] ss:$16 sps:$4 sm:$0xff]   ;;  %v18658_v1 = vld [vmem:[%s19724_s21 + $0x24c8] ss:$16 sps:$4 sm:$0xff]  }
 0x52e   : > { %10407 = vmatpush1.bf16.msra.mxu0 %v18562_v2  ;;  %11439 = vmatpush1.bf16.msra.mxu1 %v18565_v3  ;;  %v18663_v2 = vld [vmem:[%s19724_s21 + $0x24e4] ss:$16 sps:$4 sm:$0xff]   ;;  %v18666_v3 = vld [vmem:[%s19724_s21 + $0x24ec] ss:$16 sps:$4 sm:$0xff]  }
 0x52f   : > { %10408 = vmatprep.subr.bf16.mxu0 %v18570_v4  ;;  %11440 = vmatprep.subr.bf16.mxu1 %v18573_v5  ;;  %v18661_v4 = vld [vmem:[%s19724_s21 + $0x24e0] ss:$16 sps:$4 sm:$0xff]   ;;  %v18664_v5 = vld [vmem:[%s19724_s21 + $0x24e8] ss:$16 sps:$4 sm:$0xff]  }
 0x532   : > { %10409 = vmatpush1.bf16.msra.mxu0 %v18568_v6  ;;  %11441 = vmatpush1.bf16.msra.mxu1 %v18571_v7  ;;  %v18669_v6 = vld [vmem:[%s19724_s21 + $0x2504] ss:$16 sps:$4 sm:$0xff]   ;;  %v18672_v7 = vld [vmem:[%s19724_s21 + $0x250c] ss:$16 sps:$4 sm:$0xff]  }
 0x533   : > { %10410 = vmatprep.subr.bf16.mxu0 %v18576_v8  ;;  %11442 = vmatprep.subr.bf16.mxu1 %v18579_v9  ;;  %v18667_v8 = vld [vmem:[%s19724_s21 + $0x2500] ss:$16 sps:$4 sm:$0xff]   ;;  %v18670_v9 = vld [vmem:[%s19724_s21 + $0x2508] ss:$16 sps:$4 sm:$0xff]  }
 0x536   : > { %10411 = vmatpush1.bf16.msra.mxu0 %v18574_v10  ;;  %11443 = vmatpush1.bf16.msra.mxu1 %v18577_v11  ;;  %v18675_v10 = vld [vmem:[%s19724_s21 + $0x2524] ss:$16 sps:$4 sm:$0xff]   ;;  %v18678_v11 = vld [vmem:[%s19724_s21 + $0x252c] ss:$16 sps:$4 sm:$0xff]  }
 0x537   : > { %10412 = vmatprep.subr.bf16.mxu0 %v18582_v12  ;;  %11444 = vmatprep.subr.bf16.mxu1 %v18585_v13  ;;  %v18673_v12 = vld [vmem:[%s19724_s21 + $0x2520] ss:$16 sps:$4 sm:$0xff]   ;;  %v18676_v13 = vld [vmem:[%s19724_s21 + $0x2528] ss:$16 sps:$4 sm:$0xff]  }
 0x53a   : > { %10413 = vmatpush1.bf16.msra.mxu0 %v18580_v14  ;;  %11445 = vmatpush1.bf16.msra.mxu1 %v18583_v15  ;;  %v18681_v14 = vld [vmem:[%s19724_s21 + $0x2544] ss:$16 sps:$4 sm:$0xff]   ;;  %v18684_v15 = vld [vmem:[%s19724_s21 + $0x254c] ss:$16 sps:$4 sm:$0xff]  }
 0x53b   : > { %10414 = vmatprep.subr.bf16.mxu0 %v18588_v16  ;;  %11446 = vmatprep.subr.bf16.mxu1 %v18591_v17  ;;  %v18679_v16 = vld [vmem:[%s19724_s21 + $0x2540] ss:$16 sps:$4 sm:$0xff]   ;;  %v18682_v17 = vld [vmem:[%s19724_s21 + $0x2548] ss:$16 sps:$4 sm:$0xff]  }
 0x53e   : > { %10415 = vmatpush1.bf16.msra.mxu0 %v18586_v18  ;;  %11447 = vmatpush1.bf16.msra.mxu1 %v18589_v19  ;;  %v18687_v18 = vld [vmem:[%s19724_s21 + $0x2564] ss:$16 sps:$4 sm:$0xff]   ;;  %v18690_v19 = vld [vmem:[%s19724_s21 + $0x256c] ss:$16 sps:$4 sm:$0xff]  }
 0x53f   : > { %10416 = vmatprep.subr.bf16.mxu0 %v18594_v20  ;;  %11448 = vmatprep.subr.bf16.mxu1 %v18597_v21  ;;  %v18685_v20 = vld [vmem:[%s19724_s21 + $0x2560] ss:$16 sps:$4 sm:$0xff]   ;;  %v18688_v21 = vld [vmem:[%s19724_s21 + $0x2568] ss:$16 sps:$4 sm:$0xff]  }
 0x542   : > { %10417 = vmatpush1.bf16.msra.mxu0 %v18592_v22  ;;  %11449 = vmatpush1.bf16.msra.mxu1 %v18595_v23  ;;  %v18693_v22 = vld [vmem:[%s19724_s21 + $0x2584] ss:$16 sps:$4 sm:$0xff]   ;;  %v18696_v23 = vld [vmem:[%s19724_s21 + $0x258c] ss:$16 sps:$4 sm:$0xff]  }
 0x543   : > { %10418 = vmatprep.subr.bf16.mxu0 %v18600_v24  ;;  %11450 = vmatprep.subr.bf16.mxu1 %v18603_v25  ;;  %v18691_v24 = vld [vmem:[%s19724_s21 + $0x2580] ss:$16 sps:$4 sm:$0xff]   ;;  %v18694_v25 = vld [vmem:[%s19724_s21 + $0x2588] ss:$16 sps:$4 sm:$0xff]  }
 0x546   : > { %10419 = vmatpush1.bf16.msra.mxu0 %v18598_v26  ;;  %11451 = vmatpush1.bf16.msra.mxu1 %v18601_v27  ;;  %v18699_v26 = vld [vmem:[%s19724_s21 + $0x25a4] ss:$16 sps:$4 sm:$0xff]   ;;  %v18702_v27 = vld [vmem:[%s19724_s21 + $0x25ac] ss:$16 sps:$4 sm:$0xff]  }
 0x547   : > { %10420 = vmatprep.subr.bf16.mxu0 %v18606_v28  ;;  %11452 = vmatprep.subr.bf16.mxu1 %v18609_v29  ;;  %v18697_v28 = vld [vmem:[%s19724_s21 + $0x25a0] ss:$16 sps:$4 sm:$0xff]   ;;  %v18700_v29 = vld [vmem:[%s19724_s21 + $0x25a8] ss:$16 sps:$4 sm:$0xff]  }
 0x54a   : > { %10421 = vmatpush1.bf16.msra.mxu0 %v18604_v30  ;;  %11453 = vmatpush1.bf16.msra.mxu1 %v18607_v31  ;;  %v18705_v30 = vld [vmem:[%s19724_s21 + $0x25c4] ss:$16 sps:$4 sm:$0xff]   ;;  %v18708_v31 = vld [vmem:[%s19724_s21 + $0x25cc] ss:$16 sps:$4 sm:$0xff]  }
 0x54b   : > { %10422 = vmatprep.subr.bf16.mxu0 %v18612_v32  ;;  %11454 = vmatprep.subr.bf16.mxu1 %v18615_v33  ;;  %v18703_v32 = vld [vmem:[%s19724_s21 + $0x25c0] ss:$16 sps:$4 sm:$0xff]   ;;  %v18706_v33 = vld [vmem:[%s19724_s21 + $0x25c8] ss:$16 sps:$4 sm:$0xff]  }
 0x54e   : > { %10423 = vmatpush1.bf16.msra.mxu0 %v18610_v34  ;;  %11455 = vmatpush1.bf16.msra.mxu1 %v18613_v35  ;;  %v18711_v34 = vld [vmem:[%s19724_s21 + $0x25e4] ss:$16 sps:$4 sm:$0xff]   ;;  %v18714_v35 = vld [vmem:[%s19724_s21 + $0x25ec] ss:$16 sps:$4 sm:$0xff]  }
 0x54f   : > { %10435 = vmatprep.subr.bf16.mxu0 %v18621_v36  ;;  %11467 = vmatprep.subr.bf16.mxu1 %v18624_v37  ;;  %v18709_v36 = vld [vmem:[%s19724_s21 + $0x25e0] ss:$16 sps:$4 sm:$0xff]   ;;  %v18712_v37 = vld [vmem:[%s19724_s21 + $0x25e8] ss:$16 sps:$4 sm:$0xff]  }
 0x551   : > { %10425 = vmatmul.mubr.bf16.vlgmr.msra.gmra.mrb[0].mxu0 %v18616_v38  ;;  %11457 = vmatmul.mubr.bf16.vlgmr.msra.gmra.mrb[0].mxu1 %v18616_v38  ;;  %v18720_v38 = vld [vmem:[%s19724_s21 + $0x2604] ss:$16 sps:$4 sm:$0xff]  }
 0x552   : > { %10436 = vmatpush1.bf16.msra.mxu0 %v18619_v39  ;;  %11468 = vmatpush1.bf16.msra.mxu1 %v18622_v40  ;;  %v18723_v39 = vld [vmem:[%s19724_s21 + $0x260c] ss:$16 sps:$4 sm:$0xff]  }
 0x553   : > { %10437 = vmatprep.subr.bf16.mxu0 %v18627_v41  ;;  %11469 = vmatprep.subr.bf16.mxu1 %v18630_v42  ;;  %v18715_v40 = vld [vmem:[%s21727_s0 + $0x90] ss:$188 sps:$4 sm:$0xff]   ;;  %v18721_v42 = vld [vmem:[%s19724_s21 + $0x2608] ss:$16 sps:$4 sm:$0xff]  }
 0x554   : > { %10467 = vmatprep.mubr.bf16.mxu0 %v18717_v43  ;;  %11499 = vmatprep.mubr.bf16.mxu1 %v18717_v43  ;;  %v18718_v41 = vld [vmem:[%s19724_s21 + $0x2600] ss:$16 sps:$4 sm:$0xff]   ;;  %v18726_v43 = vld [vmem:[%s19724_s21 + $0x2624] ss:$16 sps:$4 sm:$0xff]  }
 0x556   : > { %10438 = vmatpush1.bf16.msra.mxu0 %v18625_v44  ;;  %11470 = vmatpush1.bf16.msra.mxu1 %v18628_v45  ;;  %v18729_v44 = vld [vmem:[%s19724_s21 + $0x262c] ss:$16 sps:$4 sm:$0xff]  }
 0x557   : > { %10439 = vmatprep.subr.bf16.mxu0 %v18633_v46  ;;  %11471 = vmatprep.subr.bf16.mxu1 %v18636_v47  ;;  %v18816_v45 = vld [vmem:[%s21727_s0 + $0x9c] ss:$188 sps:$4 sm:$0xff]   ;;  %v18724_v46 = vld [vmem:[%s19724_s21 + $0x2620] ss:$16 sps:$4 sm:$0xff]  }
 0x558   : > { %v18727_v47 = vld [vmem:[%s19724_s21 + $0x2628] ss:$16 sps:$4 sm:$0xff]  }
 0x55a   : > { %10440 = vmatpush1.bf16.msra.mxu0 %v18631_v48  ;;  %11472 = vmatpush1.bf16.msra.mxu1 %v18634_v49  ;;  %v18732_v48 = vld [vmem:[%s19724_s21 + $0x2644] ss:$16 sps:$4 sm:$0xff]   ;;  %v18735_v49 = vld [vmem:[%s19724_s21 + $0x264c] ss:$16 sps:$4 sm:$0xff]  }
 0x55b   : > { %10441 = vmatprep.subr.bf16.mxu0 %v18639_v50  ;;  %11473 = vmatprep.subr.bf16.mxu1 %v18642_v51  ;;  %v18730_v50 = vld [vmem:[%s19724_s21 + $0x2640] ss:$16 sps:$4 sm:$0xff]   ;;  %v18733_v51 = vld [vmem:[%s19724_s21 + $0x2648] ss:$16 sps:$4 sm:$0xff]  }
 0x55e   : > { %10442 = vmatpush1.bf16.msra.mxu0 %v18637_v52  ;;  %11474 = vmatpush1.bf16.msra.mxu1 %v18640_v53  ;;  %v18738_v52 = vld [vmem:[%s19724_s21 + $0x2664] ss:$16 sps:$4 sm:$0xff]   ;;  %v18741_v53 = vld [vmem:[%s19724_s21 + $0x266c] ss:$16 sps:$4 sm:$0xff]  }
 0x55f   : > { %10443 = vmatprep.subr.bf16.mxu0 %v18645_v54  ;;  %11475 = vmatprep.subr.bf16.mxu1 %v18648_v55  ;;  %v18736_v54 = vld [vmem:[%s19724_s21 + $0x2660] ss:$16 sps:$4 sm:$0xff]   ;;  %v18739_v55 = vld [vmem:[%s19724_s21 + $0x2668] ss:$16 sps:$4 sm:$0xff]  }
 0x562   : > { %10444 = vmatpush1.bf16.msra.mxu0 %v18643_v56  ;;  %11476 = vmatpush1.bf16.msra.mxu1 %v18646_v57  ;;  %v18744_v56 = vld [vmem:[%s19724_s21 + $0x2684] ss:$16 sps:$4 sm:$0xff]   ;;  %v18747_v57 = vld [vmem:[%s19724_s21 + $0x268c] ss:$16 sps:$4 sm:$0xff]  }
 0x563   : > { %10445 = vmatprep.subr.bf16.mxu0 %v18651_v58  ;;  %11477 = vmatprep.subr.bf16.mxu1 %v18654_v59  ;;  %v18742_v58 = vld [vmem:[%s19724_s21 + $0x2680] ss:$16 sps:$4 sm:$0xff]   ;;  %v18745_v59 = vld [vmem:[%s19724_s21 + $0x2688] ss:$16 sps:$4 sm:$0xff]  }
 0x566   : > { %10446 = vmatpush1.bf16.msra.mxu0 %v18649_v60  ;;  %11478 = vmatpush1.bf16.msra.mxu1 %v18652_v61  ;;  %v18750_v60 = vld [vmem:[%s19724_s21 + $0x26a4] ss:$16 sps:$4 sm:$0xff]   ;;  %v18753_v61 = vld [vmem:[%s19724_s21 + $0x26ac] ss:$16 sps:$4 sm:$0xff]  }
 0x567   : > { %10447 = vmatprep.subr.bf16.mxu0 %v18657_v62  ;;  %11479 = vmatprep.subr.bf16.mxu1 %v18660_v63  ;;  %v18748_v62 = vld [vmem:[%s19724_s21 + $0x26a0] ss:$16 sps:$4 sm:$0xff]   ;;  %v18751_v63 = vld [vmem:[%s19724_s21 + $0x26a8] ss:$16 sps:$4 sm:$0xff]  }
 0x56a   : > { %10448 = vmatpush1.bf16.msra.mxu0 %v18655_v0  ;;  %11480 = vmatpush1.bf16.msra.mxu1 %v18658_v1  ;;  %v18756_v0 = vld [vmem:[%s19724_s21 + $0x26c4] ss:$16 sps:$4 sm:$0xff]   ;;  %v18759_v1 = vld [vmem:[%s19724_s21 + $0x26cc] ss:$16 sps:$4 sm:$0xff]  }
 0x56b   : > { %10449 = vmatprep.subr.bf16.mxu0 %v18663_v2  ;;  %11481 = vmatprep.subr.bf16.mxu1 %v18666_v3  ;;  %v18754_v2 = vld [vmem:[%s19724_s21 + $0x26c0] ss:$16 sps:$4 sm:$0xff]   ;;  %v18757_v3 = vld [vmem:[%s19724_s21 + $0x26c8] ss:$16 sps:$4 sm:$0xff]  }
 0x56e   : > { %10450 = vmatpush1.bf16.msra.mxu0 %v18661_v4  ;;  %11482 = vmatpush1.bf16.msra.mxu1 %v18664_v5  ;;  %v18762_v4 = vld [vmem:[%s19724_s21 + $0x26e4] ss:$16 sps:$4 sm:$0xff]   ;;  %v18765_v5 = vld [vmem:[%s19724_s21 + $0x26ec] ss:$16 sps:$4 sm:$0xff]  }
 0x56f   : > { %10451 = vmatprep.subr.bf16.mxu0 %v18669_v6  ;;  %11483 = vmatprep.subr.bf16.mxu1 %v18672_v7  ;;  %v18760_v6 = vld [vmem:[%s19724_s21 + $0x26e0] ss:$16 sps:$4 sm:$0xff]   ;;  %v18763_v7 = vld [vmem:[%s19724_s21 + $0x26e8] ss:$16 sps:$4 sm:$0xff]  }
 0x572   : > { %10452 = vmatpush1.bf16.msra.mxu0 %v18667_v8  ;;  %11484 = vmatpush1.bf16.msra.mxu1 %v18670_v9  ;;  %v18768_v8 = vld [vmem:[%s19724_s21 + $0x2704] ss:$16 sps:$4 sm:$0xff]   ;;  %v18771_v9 = vld [vmem:[%s19724_s21 + $0x270c] ss:$16 sps:$4 sm:$0xff]  }
 0x573   : > { %10453 = vmatprep.subr.bf16.mxu0 %v18675_v10  ;;  %11485 = vmatprep.subr.bf16.mxu1 %v18678_v11  ;;  %v18766_v10 = vld [vmem:[%s19724_s21 + $0x2700] ss:$16 sps:$4 sm:$0xff]   ;;  %v18769_v11 = vld [vmem:[%s19724_s21 + $0x2708] ss:$16 sps:$4 sm:$0xff]  }
 0x576   : > { %10454 = vmatpush1.bf16.msra.mxu0 %v18673_v12  ;;  %11486 = vmatpush1.bf16.msra.mxu1 %v18676_v13  ;;  %v18774_v12 = vld [vmem:[%s19724_s21 + $0x2724] ss:$16 sps:$4 sm:$0xff]   ;;  %v18777_v13 = vld [vmem:[%s19724_s21 + $0x272c] ss:$16 sps:$4 sm:$0xff]  }
 0x577   : > { %10455 = vmatprep.subr.bf16.mxu0 %v18681_v14  ;;  %11487 = vmatprep.subr.bf16.mxu1 %v18684_v15  ;;  %v18772_v14 = vld [vmem:[%s19724_s21 + $0x2720] ss:$16 sps:$4 sm:$0xff]   ;;  %v18775_v15 = vld [vmem:[%s19724_s21 + $0x2728] ss:$16 sps:$4 sm:$0xff]  }
 0x57a   : > { %10456 = vmatpush1.bf16.msra.mxu0 %v18679_v16  ;;  %11488 = vmatpush1.bf16.msra.mxu1 %v18682_v17  ;;  %v18780_v16 = vld [vmem:[%s19724_s21 + $0x2744] ss:$16 sps:$4 sm:$0xff]   ;;  %v18783_v17 = vld [vmem:[%s19724_s21 + $0x274c] ss:$16 sps:$4 sm:$0xff]  }
 0x57b   : > { %10457 = vmatprep.subr.bf16.mxu0 %v18687_v18  ;;  %11489 = vmatprep.subr.bf16.mxu1 %v18690_v19  ;;  %v18778_v18 = vld [vmem:[%s19724_s21 + $0x2740] ss:$16 sps:$4 sm:$0xff]   ;;  %v18781_v19 = vld [vmem:[%s19724_s21 + $0x2748] ss:$16 sps:$4 sm:$0xff]  }
 0x57e   : > { %10458 = vmatpush1.bf16.msra.mxu0 %v18685_v20  ;;  %11490 = vmatpush1.bf16.msra.mxu1 %v18688_v21  ;;  %v18786_v20 = vld [vmem:[%s19724_s21 + $0x2764] ss:$16 sps:$4 sm:$0xff]   ;;  %v18789_v21 = vld [vmem:[%s19724_s21 + $0x276c] ss:$16 sps:$4 sm:$0xff]  }
 0x57f   : > { %10459 = vmatprep.subr.bf16.mxu0 %v18693_v22  ;;  %11491 = vmatprep.subr.bf16.mxu1 %v18696_v23  ;;  %v18784_v22 = vld [vmem:[%s19724_s21 + $0x2760] ss:$16 sps:$4 sm:$0xff]   ;;  %v18787_v23 = vld [vmem:[%s19724_s21 + $0x2768] ss:$16 sps:$4 sm:$0xff]  }
 0x582   : > { %10460 = vmatpush1.bf16.msra.mxu0 %v18691_v24  ;;  %11492 = vmatpush1.bf16.msra.mxu1 %v18694_v25  ;;  %v18792_v24 = vld [vmem:[%s19724_s21 + $0x2784] ss:$16 sps:$4 sm:$0xff]   ;;  %v18795_v25 = vld [vmem:[%s19724_s21 + $0x278c] ss:$16 sps:$4 sm:$0xff]  }
 0x583   : > { %10461 = vmatprep.subr.bf16.mxu0 %v18699_v26  ;;  %11493 = vmatprep.subr.bf16.mxu1 %v18702_v27  ;;  %v18790_v26 = vld [vmem:[%s19724_s21 + $0x2780] ss:$16 sps:$4 sm:$0xff]   ;;  %v18793_v27 = vld [vmem:[%s19724_s21 + $0x2788] ss:$16 sps:$4 sm:$0xff]  }
 0x586   : > { %10462 = vmatpush1.bf16.msra.mxu0 %v18697_v28  ;;  %11494 = vmatpush1.bf16.msra.mxu1 %v18700_v29  ;;  %v18798_v28 = vld [vmem:[%s19724_s21 + $0x27a4] ss:$16 sps:$4 sm:$0xff]   ;;  %v18801_v29 = vld [vmem:[%s19724_s21 + $0x27ac] ss:$16 sps:$4 sm:$0xff]  }
 0x587   : > { %10463 = vmatprep.subr.bf16.mxu0 %v18705_v30  ;;  %11495 = vmatprep.subr.bf16.mxu1 %v18708_v31  ;;  %v18796_v30 = vld [vmem:[%s19724_s21 + $0x27a0] ss:$16 sps:$4 sm:$0xff]   ;;  %v18799_v31 = vld [vmem:[%s19724_s21 + $0x27a8] ss:$16 sps:$4 sm:$0xff]  }
 0x58a   : > { %10464 = vmatpush1.bf16.msra.mxu0 %v18703_v32  ;;  %11496 = vmatpush1.bf16.msra.mxu1 %v18706_v33  ;;  %v18804_v32 = vld [vmem:[%s19724_s21 + $0x27c4] ss:$16 sps:$4 sm:$0xff]   ;;  %v18807_v33 = vld [vmem:[%s19724_s21 + $0x27cc] ss:$16 sps:$4 sm:$0xff]  }
 0x58b   : > { %10465 = vmatprep.subr.bf16.mxu0 %v18711_v34  ;;  %11497 = vmatprep.subr.bf16.mxu1 %v18714_v35  ;;  %v18802_v34 = vld [vmem:[%s19724_s21 + $0x27c0] ss:$16 sps:$4 sm:$0xff]   ;;  %v18805_v35 = vld [vmem:[%s19724_s21 + $0x27c8] ss:$16 sps:$4 sm:$0xff]  }
 0x58e   : > { %10466 = vmatpush1.bf16.msra.mxu0 %v18709_v36  ;;  %11498 = vmatpush1.bf16.msra.mxu1 %v18712_v37  ;;  %v18810_v36 = vld [vmem:[%s19724_s21 + $0x27e4] ss:$16 sps:$4 sm:$0xff]   ;;  %v18813_v37 = vld [vmem:[%s19724_s21 + $0x27ec] ss:$16 sps:$4 sm:$0xff]  }
 0x58f   : > { %10478 = vmatprep.subr.bf16.mxu0 %v18720_v38  ;;  %11510 = vmatprep.subr.bf16.mxu1 %v18723_v39  ;;  %v18808_v38 = vld [vmem:[%s19724_s21 + $0x27e0] ss:$16 sps:$4 sm:$0xff]   ;;  %v18811_v39 = vld [vmem:[%s19724_s21 + $0x27e8] ss:$16 sps:$4 sm:$0xff]  }
 0x591   : > { %10468 = vmatmul.mubr.bf16.vlgmr.msra.gmra.mrb[0].mxu0 %v18715_v40  ;;  %11500 = vmatmul.mubr.bf16.vlgmr.msra.gmra.mrb[0].mxu1 %v18715_v40  ;;  %v18819_v40 = vld [vmem:[%s19724_s21 + $0x2804] ss:$16 sps:$4 sm:$0xff]  }
 0x592   : > { %10479 = vmatpush1.bf16.msra.mxu0 %v18718_v41  ;;  %11511 = vmatpush1.bf16.msra.mxu1 %v18721_v42  ;;  %v18822_v41 = vld [vmem:[%s19724_s21 + $0x280c] ss:$16 sps:$4 sm:$0xff]   ;;  %v18814_v42 = vld [vmem:[%s21727_s0 + $0x98] ss:$188 sps:$4 sm:$0xff]  }
 0x593   : > { %10480 = vmatprep.subr.bf16.mxu0 %v18726_v43  ;;  %11512 = vmatprep.subr.bf16.mxu1 %v18729_v44  ;;  %v18817_v43 = vld [vmem:[%s19724_s21 + $0x2800] ss:$16 sps:$4 sm:$0xff]   ;;  %v18820_v44 = vld [vmem:[%s19724_s21 + $0x2808] ss:$16 sps:$4 sm:$0xff]  }
 0x594   : > { %10510 = vmatprep.mubr.bf16.mxu0 %v18816_v45  ;;  %11542 = vmatprep.mubr.bf16.mxu1 %v18816_v45  ;;  %v18825_v45 = vld [vmem:[%s19724_s21 + $0x2824] ss:$16 sps:$4 sm:$0xff]  }
 0x596   : > { %10481 = vmatpush1.bf16.msra.mxu0 %v18724_v46  ;;  %11513 = vmatpush1.bf16.msra.mxu1 %v18727_v47  ;;  %v18828_v46 = vld [vmem:[%s19724_s21 + $0x282c] ss:$16 sps:$4 sm:$0xff]   ;;  %v18915_v47 = vld [vmem:[%s21727_s0 + $0xa4] ss:$188 sps:$4 sm:$0xff]  }
 0x597   : > { %10482 = vmatprep.subr.bf16.mxu0 %v18732_v48  ;;  %11514 = vmatprep.subr.bf16.mxu1 %v18735_v49  ;;  %v18823_v48 = vld [vmem:[%s19724_s21 + $0x2820] ss:$16 sps:$4 sm:$0xff]   ;;  %v18826_v49 = vld [vmem:[%s19724_s21 + $0x2828] ss:$16 sps:$4 sm:$0xff]  }
 0x59a   : > { %10483 = vmatpush1.bf16.msra.mxu0 %v18730_v50  ;;  %11515 = vmatpush1.bf16.msra.mxu1 %v18733_v51  ;;  %v18831_v50 = vld [vmem:[%s19724_s21 + $0x2844] ss:$16 sps:$4 sm:$0xff]   ;;  %v18834_v51 = vld [vmem:[%s19724_s21 + $0x284c] ss:$16 sps:$4 sm:$0xff]  }
 0x59b   : > { %10484 = vmatprep.subr.bf16.mxu0 %v18738_v52  ;;  %11516 = vmatprep.subr.bf16.mxu1 %v18741_v53  ;;  %v18829_v52 = vld [vmem:[%s19724_s21 + $0x2840] ss:$16 sps:$4 sm:$0xff]   ;;  %v18832_v53 = vld [vmem:[%s19724_s21 + $0x2848] ss:$16 sps:$4 sm:$0xff]  }
 0x59e   : > { %10485 = vmatpush1.bf16.msra.mxu0 %v18736_v54  ;;  %11517 = vmatpush1.bf16.msra.mxu1 %v18739_v55  ;;  %v18837_v54 = vld [vmem:[%s19724_s21 + $0x2864] ss:$16 sps:$4 sm:$0xff]   ;;  %v18840_v55 = vld [vmem:[%s19724_s21 + $0x286c] ss:$16 sps:$4 sm:$0xff]  }
 0x59f   : > { %10486 = vmatprep.subr.bf16.mxu0 %v18744_v56  ;;  %11518 = vmatprep.subr.bf16.mxu1 %v18747_v57  ;;  %v18835_v56 = vld [vmem:[%s19724_s21 + $0x2860] ss:$16 sps:$4 sm:$0xff]   ;;  %v18838_v57 = vld [vmem:[%s19724_s21 + $0x2868] ss:$16 sps:$4 sm:$0xff]  }
 0x5a2   : > { %10487 = vmatpush1.bf16.msra.mxu0 %v18742_v58  ;;  %11519 = vmatpush1.bf16.msra.mxu1 %v18745_v59  ;;  %v18843_v58 = vld [vmem:[%s19724_s21 + $0x2884] ss:$16 sps:$4 sm:$0xff]   ;;  %v18846_v59 = vld [vmem:[%s19724_s21 + $0x288c] ss:$16 sps:$4 sm:$0xff]  }
 0x5a3   : > { %10488 = vmatprep.subr.bf16.mxu0 %v18750_v60  ;;  %11520 = vmatprep.subr.bf16.mxu1 %v18753_v61  ;;  %v18841_v60 = vld [vmem:[%s19724_s21 + $0x2880] ss:$16 sps:$4 sm:$0xff]   ;;  %v18844_v61 = vld [vmem:[%s19724_s21 + $0x2888] ss:$16 sps:$4 sm:$0xff]  }
 0x5a6   : > { %10489 = vmatpush1.bf16.msra.mxu0 %v18748_v62  ;;  %11521 = vmatpush1.bf16.msra.mxu1 %v18751_v63  ;;  %v18849_v62 = vld [vmem:[%s19724_s21 + $0x28a4] ss:$16 sps:$4 sm:$0xff]   ;;  %v18852_v63 = vld [vmem:[%s19724_s21 + $0x28ac] ss:$16 sps:$4 sm:$0xff]  }
 0x5a7   : > { %10490 = vmatprep.subr.bf16.mxu0 %v18756_v0  ;;  %11522 = vmatprep.subr.bf16.mxu1 %v18759_v1  ;;  %v18847_v0 = vld [vmem:[%s19724_s21 + $0x28a0] ss:$16 sps:$4 sm:$0xff]   ;;  %v18850_v1 = vld [vmem:[%s19724_s21 + $0x28a8] ss:$16 sps:$4 sm:$0xff]  }
 0x5aa   : > { %10491 = vmatpush1.bf16.msra.mxu0 %v18754_v2  ;;  %11523 = vmatpush1.bf16.msra.mxu1 %v18757_v3  ;;  %v18855_v2 = vld [vmem:[%s19724_s21 + $0x28c4] ss:$16 sps:$4 sm:$0xff]   ;;  %v18858_v3 = vld [vmem:[%s19724_s21 + $0x28cc] ss:$16 sps:$4 sm:$0xff]  }
 0x5ab   : > { %10492 = vmatprep.subr.bf16.mxu0 %v18762_v4  ;;  %11524 = vmatprep.subr.bf16.mxu1 %v18765_v5  ;;  %v18853_v4 = vld [vmem:[%s19724_s21 + $0x28c0] ss:$16 sps:$4 sm:$0xff]   ;;  %v18856_v5 = vld [vmem:[%s19724_s21 + $0x28c8] ss:$16 sps:$4 sm:$0xff]  }
 0x5ae   : > { %10493 = vmatpush1.bf16.msra.mxu0 %v18760_v6  ;;  %11525 = vmatpush1.bf16.msra.mxu1 %v18763_v7  ;;  %v18861_v6 = vld [vmem:[%s19724_s21 + $0x28e4] ss:$16 sps:$4 sm:$0xff]   ;;  %v18864_v7 = vld [vmem:[%s19724_s21 + $0x28ec] ss:$16 sps:$4 sm:$0xff]  }
 0x5af   : > { %10494 = vmatprep.subr.bf16.mxu0 %v18768_v8  ;;  %11526 = vmatprep.subr.bf16.mxu1 %v18771_v9  ;;  %v18859_v8 = vld [vmem:[%s19724_s21 + $0x28e0] ss:$16 sps:$4 sm:$0xff]   ;;  %v18862_v9 = vld [vmem:[%s19724_s21 + $0x28e8] ss:$16 sps:$4 sm:$0xff]  }
 0x5b2   : > { %10495 = vmatpush1.bf16.msra.mxu0 %v18766_v10  ;;  %11527 = vmatpush1.bf16.msra.mxu1 %v18769_v11  ;;  %v18867_v10 = vld [vmem:[%s19724_s21 + $0x2904] ss:$16 sps:$4 sm:$0xff]   ;;  %v18870_v11 = vld [vmem:[%s19724_s21 + $0x290c] ss:$16 sps:$4 sm:$0xff]  }
 0x5b3   : > { %10496 = vmatprep.subr.bf16.mxu0 %v18774_v12  ;;  %11528 = vmatprep.subr.bf16.mxu1 %v18777_v13  ;;  %v18865_v12 = vld [vmem:[%s19724_s21 + $0x2900] ss:$16 sps:$4 sm:$0xff]   ;;  %v18868_v13 = vld [vmem:[%s19724_s21 + $0x2908] ss:$16 sps:$4 sm:$0xff]  }
 0x5b6   : > { %10497 = vmatpush1.bf16.msra.mxu0 %v18772_v14  ;;  %11529 = vmatpush1.bf16.msra.mxu1 %v18775_v15  ;;  %v18873_v14 = vld [vmem:[%s19724_s21 + $0x2924] ss:$16 sps:$4 sm:$0xff]   ;;  %v18876_v15 = vld [vmem:[%s19724_s21 + $0x292c] ss:$16 sps:$4 sm:$0xff]  }
 0x5b7   : > { %10498 = vmatprep.subr.bf16.mxu0 %v18780_v16  ;;  %11530 = vmatprep.subr.bf16.mxu1 %v18783_v17  ;;  %v18871_v16 = vld [vmem:[%s19724_s21 + $0x2920] ss:$16 sps:$4 sm:$0xff]   ;;  %v18874_v17 = vld [vmem:[%s19724_s21 + $0x2928] ss:$16 sps:$4 sm:$0xff]  }
 0x5ba   : > { %10499 = vmatpush1.bf16.msra.mxu0 %v18778_v18  ;;  %11531 = vmatpush1.bf16.msra.mxu1 %v18781_v19  ;;  %v18879_v18 = vld [vmem:[%s19724_s21 + $0x2944] ss:$16 sps:$4 sm:$0xff]   ;;  %v18882_v19 = vld [vmem:[%s19724_s21 + $0x294c] ss:$16 sps:$4 sm:$0xff]  }
 0x5bb   : > { %10500 = vmatprep.subr.bf16.mxu0 %v18786_v20  ;;  %11532 = vmatprep.subr.bf16.mxu1 %v18789_v21  ;;  %v18877_v20 = vld [vmem:[%s19724_s21 + $0x2940] ss:$16 sps:$4 sm:$0xff]   ;;  %v18880_v21 = vld [vmem:[%s19724_s21 + $0x2948] ss:$16 sps:$4 sm:$0xff]  }
 0x5be   : > { %10501 = vmatpush1.bf16.msra.mxu0 %v18784_v22  ;;  %11533 = vmatpush1.bf16.msra.mxu1 %v18787_v23  ;;  %v18885_v22 = vld [vmem:[%s19724_s21 + $0x2964] ss:$16 sps:$4 sm:$0xff]   ;;  %v18888_v23 = vld [vmem:[%s19724_s21 + $0x296c] ss:$16 sps:$4 sm:$0xff]  }
 0x5bf   : > { %10502 = vmatprep.subr.bf16.mxu0 %v18792_v24  ;;  %11534 = vmatprep.subr.bf16.mxu1 %v18795_v25  ;;  %v18883_v24 = vld [vmem:[%s19724_s21 + $0x2960] ss:$16 sps:$4 sm:$0xff]   ;;  %v18886_v25 = vld [vmem:[%s19724_s21 + $0x2968] ss:$16 sps:$4 sm:$0xff]  }
 0x5c2   : > { %10503 = vmatpush1.bf16.msra.mxu0 %v18790_v26  ;;  %11535 = vmatpush1.bf16.msra.mxu1 %v18793_v27  ;;  %v18891_v26 = vld [vmem:[%s19724_s21 + $0x2984] ss:$16 sps:$4 sm:$0xff]   ;;  %v18894_v27 = vld [vmem:[%s19724_s21 + $0x298c] ss:$16 sps:$4 sm:$0xff]  }
 0x5c3   : > { %10504 = vmatprep.subr.bf16.mxu0 %v18798_v28  ;;  %11536 = vmatprep.subr.bf16.mxu1 %v18801_v29  ;;  %v18889_v28 = vld [vmem:[%s19724_s21 + $0x2980] ss:$16 sps:$4 sm:$0xff]   ;;  %v18892_v29 = vld [vmem:[%s19724_s21 + $0x2988] ss:$16 sps:$4 sm:$0xff]  }
 0x5c6   : > { %10505 = vmatpush1.bf16.msra.mxu0 %v18796_v30  ;;  %11537 = vmatpush1.bf16.msra.mxu1 %v18799_v31  ;;  %v18897_v30 = vld [vmem:[%s19724_s21 + $0x29a4] ss:$16 sps:$4 sm:$0xff]   ;;  %v18900_v31 = vld [vmem:[%s19724_s21 + $0x29ac] ss:$16 sps:$4 sm:$0xff]  }
 0x5c7   : > { %10506 = vmatprep.subr.bf16.mxu0 %v18804_v32  ;;  %11538 = vmatprep.subr.bf16.mxu1 %v18807_v33  ;;  %v18895_v32 = vld [vmem:[%s19724_s21 + $0x29a0] ss:$16 sps:$4 sm:$0xff]   ;;  %v18898_v33 = vld [vmem:[%s19724_s21 + $0x29a8] ss:$16 sps:$4 sm:$0xff]  }
 0x5ca   : > { %10507 = vmatpush1.bf16.msra.mxu0 %v18802_v34  ;;  %11539 = vmatpush1.bf16.msra.mxu1 %v18805_v35  ;;  %v18903_v34 = vld [vmem:[%s19724_s21 + $0x29c4] ss:$16 sps:$4 sm:$0xff]   ;;  %v18906_v35 = vld [vmem:[%s19724_s21 + $0x29cc] ss:$16 sps:$4 sm:$0xff]  }
 0x5cb   : > { %10508 = vmatprep.subr.bf16.mxu0 %v18810_v36  ;;  %11540 = vmatprep.subr.bf16.mxu1 %v18813_v37  ;;  %v18901_v36 = vld [vmem:[%s19724_s21 + $0x29c0] ss:$16 sps:$4 sm:$0xff]   ;;  %v18904_v37 = vld [vmem:[%s19724_s21 + $0x29c8] ss:$16 sps:$4 sm:$0xff]  }
 0x5ce   : > { %10509 = vmatpush1.bf16.msra.mxu0 %v18808_v38  ;;  %11541 = vmatpush1.bf16.msra.mxu1 %v18811_v39  ;;  %v18909_v38 = vld [vmem:[%s19724_s21 + $0x29e4] ss:$16 sps:$4 sm:$0xff]   ;;  %v18912_v39 = vld [vmem:[%s19724_s21 + $0x29ec] ss:$16 sps:$4 sm:$0xff]  }
 0x5cf   : > { %10521 = vmatprep.subr.bf16.mxu0 %v18819_v40  ;;  %11553 = vmatprep.subr.bf16.mxu1 %v18822_v41  ;;  %v18907_v40 = vld [vmem:[%s19724_s21 + $0x29e0] ss:$16 sps:$4 sm:$0xff]   ;;  %v18910_v41 = vld [vmem:[%s19724_s21 + $0x29e8] ss:$16 sps:$4 sm:$0xff]  }
 0x5d1   : > { %10511 = vmatmul.mubr.bf16.vlgmr.msra.gmra.mrb[0].mxu0 %v18814_v42  ;;  %11543 = vmatmul.mubr.bf16.vlgmr.msra.gmra.mrb[0].mxu1 %v18814_v42  ;;  %v18918_v42 = vld [vmem:[%s19724_s21 + $0x2a04] ss:$16 sps:$4 sm:$0xff]  }
 0x5d2   : > { %10522 = vmatpush1.bf16.msra.mxu0 %v18817_v43  ;;  %11554 = vmatpush1.bf16.msra.mxu1 %v18820_v44  ;;  %v18921_v43 = vld [vmem:[%s19724_s21 + $0x2a0c] ss:$16 sps:$4 sm:$0xff]  }
 0x5d3   : > { %10523 = vmatprep.subr.bf16.mxu0 %v18825_v45  ;;  %11555 = vmatprep.subr.bf16.mxu1 %v18828_v46  ;;  %v18913_v44 = vld [vmem:[%s21727_s0 + $0xa0] ss:$188 sps:$4 sm:$0xff]   ;;  %v18919_v46 = vld [vmem:[%s19724_s21 + $0x2a08] ss:$16 sps:$4 sm:$0xff]  }
 0x5d4   : > { %10553 = vmatprep.mubr.bf16.mxu0 %v18915_v47  ;;  %11585 = vmatprep.mubr.bf16.mxu1 %v18915_v47  ;;  %v18916_v45 = vld [vmem:[%s19724_s21 + $0x2a00] ss:$16 sps:$4 sm:$0xff]   ;;  %v18924_v47 = vld [vmem:[%s19724_s21 + $0x2a24] ss:$16 sps:$4 sm:$0xff]  }
 0x5d6   : > { %10524 = vmatpush1.bf16.msra.mxu0 %v18823_v48  ;;  %11556 = vmatpush1.bf16.msra.mxu1 %v18826_v49  ;;  %v18927_v48 = vld [vmem:[%s19724_s21 + $0x2a2c] ss:$16 sps:$4 sm:$0xff]  }
 0x5d7   : > { %10525 = vmatprep.subr.bf16.mxu0 %v18831_v50  ;;  %11557 = vmatprep.subr.bf16.mxu1 %v18834_v51  ;;  %v19014_v49 = vld [vmem:[%s21727_s0 + $0xac] ss:$188 sps:$4 sm:$0xff]   ;;  %v18922_v50 = vld [vmem:[%s19724_s21 + $0x2a20] ss:$16 sps:$4 sm:$0xff]  }
 0x5d8   : > { %v18925_v51 = vld [vmem:[%s19724_s21 + $0x2a28] ss:$16 sps:$4 sm:$0xff]  }
 0x5da   : > { %10526 = vmatpush1.bf16.msra.mxu0 %v18829_v52  ;;  %11558 = vmatpush1.bf16.msra.mxu1 %v18832_v53  ;;  %v18930_v52 = vld [vmem:[%s19724_s21 + $0x2a44] ss:$16 sps:$4 sm:$0xff]   ;;  %v18933_v53 = vld [vmem:[%s19724_s21 + $0x2a4c] ss:$16 sps:$4 sm:$0xff]  }
 0x5db   : > { %10527 = vmatprep.subr.bf16.mxu0 %v18837_v54  ;;  %11559 = vmatprep.subr.bf16.mxu1 %v18840_v55  ;;  %v18928_v54 = vld [vmem:[%s19724_s21 + $0x2a40] ss:$16 sps:$4 sm:$0xff]   ;;  %v18931_v55 = vld [vmem:[%s19724_s21 + $0x2a48] ss:$16 sps:$4 sm:$0xff]  }
 0x5de   : > { %10528 = vmatpush1.bf16.msra.mxu0 %v18835_v56  ;;  %11560 = vmatpush1.bf16.msra.mxu1 %v18838_v57  ;;  %v18936_v56 = vld [vmem:[%s19724_s21 + $0x2a64] ss:$16 sps:$4 sm:$0xff]   ;;  %v18939_v57 = vld [vmem:[%s19724_s21 + $0x2a6c] ss:$16 sps:$4 sm:$0xff]  }
 0x5df   : > { %10529 = vmatprep.subr.bf16.mxu0 %v18843_v58  ;;  %11561 = vmatprep.subr.bf16.mxu1 %v18846_v59  ;;  %v18934_v58 = vld [vmem:[%s19724_s21 + $0x2a60] ss:$16 sps:$4 sm:$0xff]   ;;  %v18937_v59 = vld [vmem:[%s19724_s21 + $0x2a68] ss:$16 sps:$4 sm:$0xff]  }
 0x5e2   : > { %10530 = vmatpush1.bf16.msra.mxu0 %v18841_v60  ;;  %11562 = vmatpush1.bf16.msra.mxu1 %v18844_v61  ;;  %v18942_v60 = vld [vmem:[%s19724_s21 + $0x2a84] ss:$16 sps:$4 sm:$0xff]   ;;  %v18945_v61 = vld [vmem:[%s19724_s21 + $0x2a8c] ss:$16 sps:$4 sm:$0xff]  }
 0x5e3   : > { %10531 = vmatprep.subr.bf16.mxu0 %v18849_v62  ;;  %11563 = vmatprep.subr.bf16.mxu1 %v18852_v63  ;;  %v18940_v62 = vld [vmem:[%s19724_s21 + $0x2a80] ss:$16 sps:$4 sm:$0xff]   ;;  %v18943_v63 = vld [vmem:[%s19724_s21 + $0x2a88] ss:$16 sps:$4 sm:$0xff]  }
 0x5e6   : > { %10532 = vmatpush1.bf16.msra.mxu0 %v18847_v0  ;;  %11564 = vmatpush1.bf16.msra.mxu1 %v18850_v1  ;;  %v18948_v0 = vld [vmem:[%s19724_s21 + $0x2aa4] ss:$16 sps:$4 sm:$0xff]   ;;  %v18951_v1 = vld [vmem:[%s19724_s21 + $0x2aac] ss:$16 sps:$4 sm:$0xff]  }
 0x5e7   : > { %10533 = vmatprep.subr.bf16.mxu0 %v18855_v2  ;;  %11565 = vmatprep.subr.bf16.mxu1 %v18858_v3  ;;  %v18946_v2 = vld [vmem:[%s19724_s21 + $0x2aa0] ss:$16 sps:$4 sm:$0xff]   ;;  %v18949_v3 = vld [vmem:[%s19724_s21 + $0x2aa8] ss:$16 sps:$4 sm:$0xff]  }
 0x5ea   : > { %10534 = vmatpush1.bf16.msra.mxu0 %v18853_v4  ;;  %11566 = vmatpush1.bf16.msra.mxu1 %v18856_v5  ;;  %v18954_v4 = vld [vmem:[%s19724_s21 + $0x2ac4] ss:$16 sps:$4 sm:$0xff]   ;;  %v18957_v5 = vld [vmem:[%s19724_s21 + $0x2acc] ss:$16 sps:$4 sm:$0xff]  }
 0x5eb   : > { %10535 = vmatprep.subr.bf16.mxu0 %v18861_v6  ;;  %11567 = vmatprep.subr.bf16.mxu1 %v18864_v7  ;;  %v18952_v6 = vld [vmem:[%s19724_s21 + $0x2ac0] ss:$16 sps:$4 sm:$0xff]   ;;  %v18955_v7 = vld [vmem:[%s19724_s21 + $0x2ac8] ss:$16 sps:$4 sm:$0xff]  }
 0x5ee   : > { %10536 = vmatpush1.bf16.msra.mxu0 %v18859_v8  ;;  %11568 = vmatpush1.bf16.msra.mxu1 %v18862_v9  ;;  %v18960_v8 = vld [vmem:[%s19724_s21 + $0x2ae4] ss:$16 sps:$4 sm:$0xff]   ;;  %v18963_v9 = vld [vmem:[%s19724_s21 + $0x2aec] ss:$16 sps:$4 sm:$0xff]  }
 0x5ef   : > { %10537 = vmatprep.subr.bf16.mxu0 %v18867_v10  ;;  %11569 = vmatprep.subr.bf16.mxu1 %v18870_v11  ;;  %v18958_v10 = vld [vmem:[%s19724_s21 + $0x2ae0] ss:$16 sps:$4 sm:$0xff]   ;;  %v18961_v11 = vld [vmem:[%s19724_s21 + $0x2ae8] ss:$16 sps:$4 sm:$0xff]  }
 0x5f2   : > { %10538 = vmatpush1.bf16.msra.mxu0 %v18865_v12  ;;  %11570 = vmatpush1.bf16.msra.mxu1 %v18868_v13  ;;  %v18966_v12 = vld [vmem:[%s19724_s21 + $0x2b04] ss:$16 sps:$4 sm:$0xff]   ;;  %v18969_v13 = vld [vmem:[%s19724_s21 + $0x2b0c] ss:$16 sps:$4 sm:$0xff]  }
 0x5f3   : > { %10539 = vmatprep.subr.bf16.mxu0 %v18873_v14  ;;  %11571 = vmatprep.subr.bf16.mxu1 %v18876_v15  ;;  %v18964_v14 = vld [vmem:[%s19724_s21 + $0x2b00] ss:$16 sps:$4 sm:$0xff]   ;;  %v18967_v15 = vld [vmem:[%s19724_s21 + $0x2b08] ss:$16 sps:$4 sm:$0xff]  }
 0x5f6   : > { %10540 = vmatpush1.bf16.msra.mxu0 %v18871_v16  ;;  %11572 = vmatpush1.bf16.msra.mxu1 %v18874_v17  ;;  %v18972_v16 = vld [vmem:[%s19724_s21 + $0x2b24] ss:$16 sps:$4 sm:$0xff]   ;;  %v18975_v17 = vld [vmem:[%s19724_s21 + $0x2b2c] ss:$16 sps:$4 sm:$0xff]  }
 0x5f7   : > { %10541 = vmatprep.subr.bf16.mxu0 %v18879_v18  ;;  %11573 = vmatprep.subr.bf16.mxu1 %v18882_v19  ;;  %v18970_v18 = vld [vmem:[%s19724_s21 + $0x2b20] ss:$16 sps:$4 sm:$0xff]   ;;  %v18973_v19 = vld [vmem:[%s19724_s21 + $0x2b28] ss:$16 sps:$4 sm:$0xff]  }
 0x5fa   : > { %10542 = vmatpush1.bf16.msra.mxu0 %v18877_v20  ;;  %11574 = vmatpush1.bf16.msra.mxu1 %v18880_v21  ;;  %v18978_v20 = vld [vmem:[%s19724_s21 + $0x2b44] ss:$16 sps:$4 sm:$0xff]   ;;  %v18981_v21 = vld [vmem:[%s19724_s21 + $0x2b4c] ss:$16 sps:$4 sm:$0xff]  }
 0x5fb   : > { %10543 = vmatprep.subr.bf16.mxu0 %v18885_v22  ;;  %11575 = vmatprep.subr.bf16.mxu1 %v18888_v23  ;;  %v18976_v22 = vld [vmem:[%s19724_s21 + $0x2b40] ss:$16 sps:$4 sm:$0xff]   ;;  %v18979_v23 = vld [vmem:[%s19724_s21 + $0x2b48] ss:$16 sps:$4 sm:$0xff]  }
 0x5fe   : > { %10544 = vmatpush1.bf16.msra.mxu0 %v18883_v24  ;;  %11576 = vmatpush1.bf16.msra.mxu1 %v18886_v25  ;;  %v18984_v24 = vld [vmem:[%s19724_s21 + $0x2b64] ss:$16 sps:$4 sm:$0xff]   ;;  %v18987_v25 = vld [vmem:[%s19724_s21 + $0x2b6c] ss:$16 sps:$4 sm:$0xff]  }
 0x5ff   : > { %10545 = vmatprep.subr.bf16.mxu0 %v18891_v26  ;;  %11577 = vmatprep.subr.bf16.mxu1 %v18894_v27  ;;  %v18982_v26 = vld [vmem:[%s19724_s21 + $0x2b60] ss:$16 sps:$4 sm:$0xff]   ;;  %v18985_v27 = vld [vmem:[%s19724_s21 + $0x2b68] ss:$16 sps:$4 sm:$0xff]  }
 0x602   : > { %10546 = vmatpush1.bf16.msra.mxu0 %v18889_v28  ;;  %11578 = vmatpush1.bf16.msra.mxu1 %v18892_v29  ;;  %v18990_v28 = vld [vmem:[%s19724_s21 + $0x2b84] ss:$16 sps:$4 sm:$0xff]   ;;  %v18993_v29 = vld [vmem:[%s19724_s21 + $0x2b8c] ss:$16 sps:$4 sm:$0xff]  }
 0x603   : > { %10547 = vmatprep.subr.bf16.mxu0 %v18897_v30  ;;  %11579 = vmatprep.subr.bf16.mxu1 %v18900_v31  ;;  %v18988_v30 = vld [vmem:[%s19724_s21 + $0x2b80] ss:$16 sps:$4 sm:$0xff]   ;;  %v18991_v31 = vld [vmem:[%s19724_s21 + $0x2b88] ss:$16 sps:$4 sm:$0xff]  }
 0x606   : > { %10548 = vmatpush1.bf16.msra.mxu0 %v18895_v32  ;;  %11580 = vmatpush1.bf16.msra.mxu1 %v18898_v33  ;;  %v18996_v32 = vld [vmem:[%s19724_s21 + $0x2ba4] ss:$16 sps:$4 sm:$0xff]   ;;  %v18999_v33 = vld [vmem:[%s19724_s21 + $0x2bac] ss:$16 sps:$4 sm:$0xff]  }
 0x607   : > { %10549 = vmatprep.subr.bf16.mxu0 %v18903_v34  ;;  %11581 = vmatprep.subr.bf16.mxu1 %v18906_v35  ;;  %v18994_v34 = vld [vmem:[%s19724_s21 + $0x2ba0] ss:$16 sps:$4 sm:$0xff]   ;;  %v18997_v35 = vld [vmem:[%s19724_s21 + $0x2ba8] ss:$16 sps:$4 sm:$0xff]  }
 0x60a   : > { %10550 = vmatpush1.bf16.msra.mxu0 %v18901_v36  ;;  %11582 = vmatpush1.bf16.msra.mxu1 %v18904_v37  ;;  %v19002_v36 = vld [vmem:[%s19724_s21 + $0x2bc4] ss:$16 sps:$4 sm:$0xff]   ;;  %v19005_v37 = vld [vmem:[%s19724_s21 + $0x2bcc] ss:$16 sps:$4 sm:$0xff]  }
 0x60b   : > { %10551 = vmatprep.subr.bf16.mxu0 %v18909_v38  ;;  %11583 = vmatprep.subr.bf16.mxu1 %v18912_v39  ;;  %v19000_v38 = vld [vmem:[%s19724_s21 + $0x2bc0] ss:$16 sps:$4 sm:$0xff]   ;;  %v19003_v39 = vld [vmem:[%s19724_s21 + $0x2bc8] ss:$16 sps:$4 sm:$0xff]  }
 0x60e   : > { %10552 = vmatpush1.bf16.msra.mxu0 %v18907_v40  ;;  %11584 = vmatpush1.bf16.msra.mxu1 %v18910_v41  ;;  %v19008_v40 = vld [vmem:[%s19724_s21 + $0x2be4] ss:$16 sps:$4 sm:$0xff]   ;;  %v19011_v41 = vld [vmem:[%s19724_s21 + $0x2bec] ss:$16 sps:$4 sm:$0xff]  }
 0x60f   : > { %10564 = vmatprep.subr.bf16.mxu0 %v18918_v42  ;;  %11596 = vmatprep.subr.bf16.mxu1 %v18921_v43  ;;  %v19006_v42 = vld [vmem:[%s19724_s21 + $0x2be0] ss:$16 sps:$4 sm:$0xff]   ;;  %v19009_v43 = vld [vmem:[%s19724_s21 + $0x2be8] ss:$16 sps:$4 sm:$0xff]  }
 0x611   : > { %10554 = vmatmul.mubr.bf16.vlgmr.msra.gmra.mrb[0].mxu0 %v18913_v44  ;;  %11586 = vmatmul.mubr.bf16.vlgmr.msra.gmra.mrb[0].mxu1 %v18913_v44  ;;  %v19017_v44 = vld [vmem:[%s19724_s21 + $0x2c04] ss:$16 sps:$4 sm:$0xff]  }
 0x612   : > { %10565 = vmatpush1.bf16.msra.mxu0 %v18916_v45  ;;  %11597 = vmatpush1.bf16.msra.mxu1 %v18919_v46  ;;  %v19020_v45 = vld [vmem:[%s19724_s21 + $0x2c0c] ss:$16 sps:$4 sm:$0xff]   ;;  %v19012_v46 = vld [vmem:[%s21727_s0 + $0xa8] ss:$188 sps:$4 sm:$0xff]  }
 0x613   : > { %10566 = vmatprep.subr.bf16.mxu0 %v18924_v47  ;;  %11598 = vmatprep.subr.bf16.mxu1 %v18927_v48  ;;  %v19015_v47 = vld [vmem:[%s19724_s21 + $0x2c00] ss:$16 sps:$4 sm:$0xff]   ;;  %v19018_v48 = vld [vmem:[%s19724_s21 + $0x2c08] ss:$16 sps:$4 sm:$0xff]  }
 0x614   : > { %10596 = vmatprep.mubr.bf16.mxu0 %v19014_v49  ;;  %11628 = vmatprep.mubr.bf16.mxu1 %v19014_v49  ;;  %v19023_v49 = vld [vmem:[%s19724_s21 + $0x2c24] ss:$16 sps:$4 sm:$0xff]  }
 0x616   : > { %10567 = vmatpush1.bf16.msra.mxu0 %v18922_v50  ;;  %11599 = vmatpush1.bf16.msra.mxu1 %v18925_v51  ;;  %v19026_v50 = vld [vmem:[%s19724_s21 + $0x2c2c] ss:$16 sps:$4 sm:$0xff]   ;;  %v19113_v51 = vld [vmem:[%s21727_s0 + $0xb4] ss:$188 sps:$4 sm:$0xff]  }
 0x617   : > { %10568 = vmatprep.subr.bf16.mxu0 %v18930_v52  ;;  %11600 = vmatprep.subr.bf16.mxu1 %v18933_v53  ;;  %v19021_v52 = vld [vmem:[%s19724_s21 + $0x2c20] ss:$16 sps:$4 sm:$0xff]   ;;  %v19024_v53 = vld [vmem:[%s19724_s21 + $0x2c28] ss:$16 sps:$4 sm:$0xff]  }
 0x61a   : > { %10569 = vmatpush1.bf16.msra.mxu0 %v18928_v54  ;;  %11601 = vmatpush1.bf16.msra.mxu1 %v18931_v55  ;;  %v19029_v54 = vld [vmem:[%s19724_s21 + $0x2c44] ss:$16 sps:$4 sm:$0xff]   ;;  %v19032_v55 = vld [vmem:[%s19724_s21 + $0x2c4c] ss:$16 sps:$4 sm:$0xff]  }
 0x61b   : > { %10570 = vmatprep.subr.bf16.mxu0 %v18936_v56  ;;  %11602 = vmatprep.subr.bf16.mxu1 %v18939_v57  ;;  %v19027_v56 = vld [vmem:[%s19724_s21 + $0x2c40] ss:$16 sps:$4 sm:$0xff]   ;;  %v19030_v57 = vld [vmem:[%s19724_s21 + $0x2c48] ss:$16 sps:$4 sm:$0xff]  }
 0x61e   : > { %10571 = vmatpush1.bf16.msra.mxu0 %v18934_v58  ;;  %11603 = vmatpush1.bf16.msra.mxu1 %v18937_v59  ;;  %v19035_v58 = vld [vmem:[%s19724_s21 + $0x2c64] ss:$16 sps:$4 sm:$0xff]   ;;  %v19038_v59 = vld [vmem:[%s19724_s21 + $0x2c6c] ss:$16 sps:$4 sm:$0xff]  }
 0x61f   : > { %10572 = vmatprep.subr.bf16.mxu0 %v18942_v60  ;;  %11604 = vmatprep.subr.bf16.mxu1 %v18945_v61  ;;  %v19033_v60 = vld [vmem:[%s19724_s21 + $0x2c60] ss:$16 sps:$4 sm:$0xff]   ;;  %v19036_v61 = vld [vmem:[%s19724_s21 + $0x2c68] ss:$16 sps:$4 sm:$0xff]  }
 0x622   : > { %10573 = vmatpush1.bf16.msra.mxu0 %v18940_v62  ;;  %11605 = vmatpush1.bf16.msra.mxu1 %v18943_v63  ;;  %v19041_v62 = vld [vmem:[%s19724_s21 + $0x2c84] ss:$16 sps:$4 sm:$0xff]   ;;  %v19044_v63 = vld [vmem:[%s19724_s21 + $0x2c8c] ss:$16 sps:$4 sm:$0xff]  }
 0x623   : > { %10574 = vmatprep.subr.bf16.mxu0 %v18948_v0  ;;  %11606 = vmatprep.subr.bf16.mxu1 %v18951_v1  ;;  %v19039_v0 = vld [vmem:[%s19724_s21 + $0x2c80] ss:$16 sps:$4 sm:$0xff]   ;;  %v19042_v1 = vld [vmem:[%s19724_s21 + $0x2c88] ss:$16 sps:$4 sm:$0xff]  }
 0x626   : > { %10575 = vmatpush1.bf16.msra.mxu0 %v18946_v2  ;;  %11607 = vmatpush1.bf16.msra.mxu1 %v18949_v3  ;;  %v19047_v2 = vld [vmem:[%s19724_s21 + $0x2ca4] ss:$16 sps:$4 sm:$0xff]   ;;  %v19050_v3 = vld [vmem:[%s19724_s21 + $0x2cac] ss:$16 sps:$4 sm:$0xff]  }
 0x627   : > { %10576 = vmatprep.subr.bf16.mxu0 %v18954_v4  ;;  %11608 = vmatprep.subr.bf16.mxu1 %v18957_v5  ;;  %v19045_v4 = vld [vmem:[%s19724_s21 + $0x2ca0] ss:$16 sps:$4 sm:$0xff]   ;;  %v19048_v5 = vld [vmem:[%s19724_s21 + $0x2ca8] ss:$16 sps:$4 sm:$0xff]  }
 0x62a   : > { %10577 = vmatpush1.bf16.msra.mxu0 %v18952_v6  ;;  %11609 = vmatpush1.bf16.msra.mxu1 %v18955_v7  ;;  %v19053_v6 = vld [vmem:[%s19724_s21 + $0x2cc4] ss:$16 sps:$4 sm:$0xff]   ;;  %v19056_v7 = vld [vmem:[%s19724_s21 + $0x2ccc] ss:$16 sps:$4 sm:$0xff]  }
 0x62b   : > { %10578 = vmatprep.subr.bf16.mxu0 %v18960_v8  ;;  %11610 = vmatprep.subr.bf16.mxu1 %v18963_v9  ;;  %v19051_v8 = vld [vmem:[%s19724_s21 + $0x2cc0] ss:$16 sps:$4 sm:$0xff]   ;;  %v19054_v9 = vld [vmem:[%s19724_s21 + $0x2cc8] ss:$16 sps:$4 sm:$0xff]  }
 0x62e   : > { %10579 = vmatpush1.bf16.msra.mxu0 %v18958_v10  ;;  %11611 = vmatpush1.bf16.msra.mxu1 %v18961_v11  ;;  %v19059_v10 = vld [vmem:[%s19724_s21 + $0x2ce4] ss:$16 sps:$4 sm:$0xff]   ;;  %v19062_v11 = vld [vmem:[%s19724_s21 + $0x2cec] ss:$16 sps:$4 sm:$0xff]  }
 0x62f   : > { %10580 = vmatprep.subr.bf16.mxu0 %v18966_v12  ;;  %11612 = vmatprep.subr.bf16.mxu1 %v18969_v13  ;;  %v19057_v12 = vld [vmem:[%s19724_s21 + $0x2ce0] ss:$16 sps:$4 sm:$0xff]   ;;  %v19060_v13 = vld [vmem:[%s19724_s21 + $0x2ce8] ss:$16 sps:$4 sm:$0xff]  }
 0x632   : > { %10581 = vmatpush1.bf16.msra.mxu0 %v18964_v14  ;;  %11613 = vmatpush1.bf16.msra.mxu1 %v18967_v15  ;;  %v19065_v14 = vld [vmem:[%s19724_s21 + $0x2d04] ss:$16 sps:$4 sm:$0xff]   ;;  %v19068_v15 = vld [vmem:[%s19724_s21 + $0x2d0c] ss:$16 sps:$4 sm:$0xff]  }
 0x633   : > { %10582 = vmatprep.subr.bf16.mxu0 %v18972_v16  ;;  %11614 = vmatprep.subr.bf16.mxu1 %v18975_v17  ;;  %v19063_v16 = vld [vmem:[%s19724_s21 + $0x2d00] ss:$16 sps:$4 sm:$0xff]   ;;  %v19066_v17 = vld [vmem:[%s19724_s21 + $0x2d08] ss:$16 sps:$4 sm:$0xff]  }
 0x636   : > { %10583 = vmatpush1.bf16.msra.mxu0 %v18970_v18  ;;  %11615 = vmatpush1.bf16.msra.mxu1 %v18973_v19  ;;  %v19071_v18 = vld [vmem:[%s19724_s21 + $0x2d24] ss:$16 sps:$4 sm:$0xff]   ;;  %v19074_v19 = vld [vmem:[%s19724_s21 + $0x2d2c] ss:$16 sps:$4 sm:$0xff]  }
 0x637   : > { %10584 = vmatprep.subr.bf16.mxu0 %v18978_v20  ;;  %11616 = vmatprep.subr.bf16.mxu1 %v18981_v21  ;;  %v19069_v20 = vld [vmem:[%s19724_s21 + $0x2d20] ss:$16 sps:$4 sm:$0xff]   ;;  %v19072_v21 = vld [vmem:[%s19724_s21 + $0x2d28] ss:$16 sps:$4 sm:$0xff]  }
 0x63a   : > { %10585 = vmatpush1.bf16.msra.mxu0 %v18976_v22  ;;  %11617 = vmatpush1.bf16.msra.mxu1 %v18979_v23  ;;  %v19077_v22 = vld [vmem:[%s19724_s21 + $0x2d44] ss:$16 sps:$4 sm:$0xff]   ;;  %v19080_v23 = vld [vmem:[%s19724_s21 + $0x2d4c] ss:$16 sps:$4 sm:$0xff]  }
 0x63b   : > { %10586 = vmatprep.subr.bf16.mxu0 %v18984_v24  ;;  %11618 = vmatprep.subr.bf16.mxu1 %v18987_v25  ;;  %v19075_v24 = vld [vmem:[%s19724_s21 + $0x2d40] ss:$16 sps:$4 sm:$0xff]   ;;  %v19078_v25 = vld [vmem:[%s19724_s21 + $0x2d48] ss:$16 sps:$4 sm:$0xff]  }
 0x63e   : > { %10587 = vmatpush1.bf16.msra.mxu0 %v18982_v26  ;;  %11619 = vmatpush1.bf16.msra.mxu1 %v18985_v27  ;;  %v19083_v26 = vld [vmem:[%s19724_s21 + $0x2d64] ss:$16 sps:$4 sm:$0xff]   ;;  %v19086_v27 = vld [vmem:[%s19724_s21 + $0x2d6c] ss:$16 sps:$4 sm:$0xff]  }
 0x63f   : > { %10588 = vmatprep.subr.bf16.mxu0 %v18990_v28  ;;  %11620 = vmatprep.subr.bf16.mxu1 %v18993_v29  ;;  %v19081_v28 = vld [vmem:[%s19724_s21 + $0x2d60] ss:$16 sps:$4 sm:$0xff]   ;;  %v19084_v29 = vld [vmem:[%s19724_s21 + $0x2d68] ss:$16 sps:$4 sm:$0xff]  }
 0x642   : > { %10589 = vmatpush1.bf16.msra.mxu0 %v18988_v30  ;;  %11621 = vmatpush1.bf16.msra.mxu1 %v18991_v31  ;;  %v19089_v30 = vld [vmem:[%s19724_s21 + $0x2d84] ss:$16 sps:$4 sm:$0xff]   ;;  %v19092_v31 = vld [vmem:[%s19724_s21 + $0x2d8c] ss:$16 sps:$4 sm:$0xff]  }
 0x643   : > { %10590 = vmatprep.subr.bf16.mxu0 %v18996_v32  ;;  %11622 = vmatprep.subr.bf16.mxu1 %v18999_v33  ;;  %v19087_v32 = vld [vmem:[%s19724_s21 + $0x2d80] ss:$16 sps:$4 sm:$0xff]   ;;  %v19090_v33 = vld [vmem:[%s19724_s21 + $0x2d88] ss:$16 sps:$4 sm:$0xff]  }
 0x646   : > { %10591 = vmatpush1.bf16.msra.mxu0 %v18994_v34  ;;  %11623 = vmatpush1.bf16.msra.mxu1 %v18997_v35  ;;  %v19095_v34 = vld [vmem:[%s19724_s21 + $0x2da4] ss:$16 sps:$4 sm:$0xff]   ;;  %v19098_v35 = vld [vmem:[%s19724_s21 + $0x2dac] ss:$16 sps:$4 sm:$0xff]  }
 0x647   : > { %10592 = vmatprep.subr.bf16.mxu0 %v19002_v36  ;;  %11624 = vmatprep.subr.bf16.mxu1 %v19005_v37  ;;  %v19093_v36 = vld [vmem:[%s19724_s21 + $0x2da0] ss:$16 sps:$4 sm:$0xff]   ;;  %v19096_v37 = vld [vmem:[%s19724_s21 + $0x2da8] ss:$16 sps:$4 sm:$0xff]  }
 0x64a   : > { %10593 = vmatpush1.bf16.msra.mxu0 %v19000_v38  ;;  %11625 = vmatpush1.bf16.msra.mxu1 %v19003_v39  ;;  %v19101_v38 = vld [vmem:[%s19724_s21 + $0x2dc4] ss:$16 sps:$4 sm:$0xff]   ;;  %v19104_v39 = vld [vmem:[%s19724_s21 + $0x2dcc] ss:$16 sps:$4 sm:$0xff]  }
 0x64b   : > { %10594 = vmatprep.subr.bf16.mxu0 %v19008_v40  ;;  %11626 = vmatprep.subr.bf16.mxu1 %v19011_v41  ;;  %v19099_v40 = vld [vmem:[%s19724_s21 + $0x2dc0] ss:$16 sps:$4 sm:$0xff]   ;;  %v19102_v41 = vld [vmem:[%s19724_s21 + $0x2dc8] ss:$16 sps:$4 sm:$0xff]  }
 0x64e   : > { %10595 = vmatpush1.bf16.msra.mxu0 %v19006_v42  ;;  %11627 = vmatpush1.bf16.msra.mxu1 %v19009_v43  ;;  %v19107_v42 = vld [vmem:[%s19724_s21 + $0x2de4] ss:$16 sps:$4 sm:$0xff]   ;;  %v19110_v43 = vld [vmem:[%s19724_s21 + $0x2dec] ss:$16 sps:$4 sm:$0xff]  }
 0x64f   : > { %10607 = vmatprep.subr.bf16.mxu0 %v19017_v44  ;;  %11639 = vmatprep.subr.bf16.mxu1 %v19020_v45  ;;  %v19105_v44 = vld [vmem:[%s19724_s21 + $0x2de0] ss:$16 sps:$4 sm:$0xff]   ;;  %v19108_v45 = vld [vmem:[%s19724_s21 + $0x2de8] ss:$16 sps:$4 sm:$0xff]  }
 0x651   : > { %10597 = vmatmul.mubr.bf16.vlgmr.msra.gmra.mrb[0].mxu0 %v19012_v46  ;;  %11629 = vmatmul.mubr.bf16.vlgmr.msra.gmra.mrb[0].mxu1 %v19012_v46  ;;  %v19116_v46 = vld [vmem:[%s19724_s21 + $0x2e04] ss:$16 sps:$4 sm:$0xff]  }
 0x652   : > { %10608 = vmatpush1.bf16.msra.mxu0 %v19015_v47  ;;  %11640 = vmatpush1.bf16.msra.mxu1 %v19018_v48  ;;  %v19119_v47 = vld [vmem:[%s19724_s21 + $0x2e0c] ss:$16 sps:$4 sm:$0xff]  }
 0x653   : > { %10609 = vmatprep.subr.bf16.mxu0 %v19023_v49  ;;  %11641 = vmatprep.subr.bf16.mxu1 %v19026_v50  ;;  %v19111_v48 = vld [vmem:[%s21727_s0 + $0xb0] ss:$188 sps:$4 sm:$0xff]   ;;  %v19117_v50 = vld [vmem:[%s19724_s21 + $0x2e08] ss:$16 sps:$4 sm:$0xff]  }
 0x654   : > { %10639 = vmatprep.mubr.bf16.mxu0 %v19113_v51  ;;  %11671 = vmatprep.mubr.bf16.mxu1 %v19113_v51  ;;  %v19114_v49 = vld [vmem:[%s19724_s21 + $0x2e00] ss:$16 sps:$4 sm:$0xff]   ;;  %v19122_v51 = vld [vmem:[%s19724_s21 + $0x2e24] ss:$16 sps:$4 sm:$0xff]  }
 0x656   : > { %10610 = vmatpush1.bf16.msra.mxu0 %v19021_v52  ;;  %11642 = vmatpush1.bf16.msra.mxu1 %v19024_v53  ;;  %v19125_v52 = vld [vmem:[%s19724_s21 + $0x2e2c] ss:$16 sps:$4 sm:$0xff]   ;;  %v19120_v53 = vld [vmem:[%s19724_s21 + $0x2e20] ss:$16 sps:$4 sm:$0xff]  }
 0x657   : > { %10611 = vmatprep.subr.bf16.mxu0 %v19029_v54  ;;  %11643 = vmatprep.subr.bf16.mxu1 %v19032_v55  ;;  %v19123_v54 = vld [vmem:[%s19724_s21 + $0x2e28] ss:$16 sps:$4 sm:$0xff]   ;;  %v19128_v55 = vld [vmem:[%s19724_s21 + $0x2e44] ss:$16 sps:$4 sm:$0xff]  }
 0x65a   : > { %10612 = vmatpush1.bf16.msra.mxu0 %v19027_v56  ;;  %11644 = vmatpush1.bf16.msra.mxu1 %v19030_v57  ;;  %v19131_v56 = vld [vmem:[%s19724_s21 + $0x2e4c] ss:$16 sps:$4 sm:$0xff]   ;;  %v19439_v57 = vmov 0  }
 0x65b   : > { %10613 = vmatprep.subr.bf16.mxu0 %v19035_v58  ;;  %11645 = vmatprep.subr.bf16.mxu1 %v19038_v59  ;;  %v19126_v58 = vld [vmem:[%s19724_s21 + $0x2e40] ss:$16 sps:$4 sm:$0xff]   ;;  %v19129_v59 = vld [vmem:[%s19724_s21 + $0x2e48] ss:$16 sps:$4 sm:$0xff]  }
 0x65e   : > { %10614 = vmatpush1.bf16.msra.mxu0 %v19033_v60  ;;  %11646 = vmatpush1.bf16.msra.mxu1 %v19036_v61  ;;  %v19134_v60 = vld [vmem:[%s19724_s21 + $0x2e64] ss:$16 sps:$4 sm:$0xff]   ;;  %v19137_v61 = vld [vmem:[%s19724_s21 + $0x2e6c] ss:$16 sps:$4 sm:$0xff]  }
 0x65f   : > { %10615 = vmatprep.subr.bf16.mxu0 %v19041_v62  ;;  %11647 = vmatprep.subr.bf16.mxu1 %v19044_v63  ;;  %v11753_v62 = vld [vmem:[%s19737_s12] sm:$0xff] }
 0x660   : > { %v11757_v63 = vld [vmem:[%s19737_s12 + $0x20] sm:$0xff] }
 0x662   : > { %10616 = vmatpush1.bf16.msra.mxu0 %v19039_v0  ;;  %11648 = vmatpush1.bf16.msra.mxu1 %v19042_v1  ;;  %v11754_v0 = vld [vmem:[%s19737_s12 + $0x8] sm:$0xff] }
 0x663   : > { %10617 = vmatprep.subr.bf16.mxu0 %v19047_v2  ;;  %11649 = vmatprep.subr.bf16.mxu1 %v19050_v3  ;;  %v11758_v1 = vld [vmem:[%s19737_s12 + $0x28] sm:$0xff]  ;;  %v19135_v3 = vld [vmem:[%s19724_s21 + $0x2e68] ss:$16 sps:$4 sm:$0xff]  }
 0x664   : > { %v19132_v2 = vld [vmem:[%s19724_s21 + $0x2e60] ss:$16 sps:$4 sm:$0xff]  }
 0x666   : > { %10618 = vmatpush1.bf16.msra.mxu0 %v19045_v4  ;;  %11650 = vmatpush1.bf16.msra.mxu1 %v19048_v5  ;;  %v16123_v4 = vcombine.high %v11753_v62, %v11757_v63  ;;  %v16125_v5 = vcombine.high %v11754_v0, %v11758_v1 }
 0x667   : > { %10619 = vmatprep.subr.bf16.mxu0 %v19053_v6  ;;  %11651 = vmatprep.subr.bf16.mxu1 %v19056_v7  ;;  %v11761_v6 = vld [vmem:[%s19737_s12 + $0x40] sm:$0xff] }
 0x668   : > { %v11765_v7 = vld [vmem:[%s19737_s12 + $0x60] sm:$0xff] }
 0x66a   : > { %10620 = vmatpush1.bf16.msra.mxu0 %v19051_v8  ;;  %11652 = vmatpush1.bf16.msra.mxu1 %v19054_v9  ;;  %v11762_v8 = vld [vmem:[%s19737_s12 + $0x48] sm:$0xff] }
 0x66b   : > { %10621 = vmatprep.subr.bf16.mxu0 %v19059_v10  ;;  %11653 = vmatprep.subr.bf16.mxu1 %v19062_v11  ;;  %v11766_v9 = vld [vmem:[%s19737_s12 + $0x68] sm:$0xff]  ;;  %v16122_v11 = vcombine.low %v11753_v62, %v11757_v63  ;;  %v11817_v63 = vld [vmem:[%s19737_s12 + $0x200] sm:$0xff] }
 0x66c   : > { %v19138_v10 = vld [vmem:[%s21727_s0 + $0xb8] ss:$188 sps:$4 sm:$0xff]  }
 0x66e   : > { %10622 = vmatpush1.bf16.msra.mxu0 %v19057_v12  ;;  %11654 = vmatpush1.bf16.msra.mxu1 %v19060_v13  ;;  %v16124_v12 = vcombine.low %v11754_v0, %v11758_v1  ;;  %v16131_v13 = vcombine.high %v11761_v6, %v11765_v7  ;;  %v11821_v0 = vld [vmem:[%s19737_s12 + $0x220] sm:$0xff]  ;;  %v11818_v1 = vld [vmem:[%s19737_s12 + $0x208] sm:$0xff] }
 0x66f   : > { %10623 = vmatprep.subr.bf16.mxu0 %v19065_v14  ;;  %11655 = vmatprep.subr.bf16.mxu1 %v19068_v15  ;;  %v16133_v14 = vcombine.high %v11762_v8, %v11766_v9  ;;  %v11769_v15 = vld [vmem:[%s19737_s12 + $0x80] sm:$0xff] }
 0x672   : > { %10624 = vmatpush1.bf16.msra.mxu0 %v19063_v16  ;;  %11656 = vmatpush1.bf16.msra.mxu1 %v19066_v17  ;;  %v11773_v16 = vld [vmem:[%s19737_s12 + $0xa0] sm:$0xff]  ;;  %v11770_v17 = vld [vmem:[%s19737_s12 + $0x88] sm:$0xff] }
 0x673   : > { %10625 = vmatprep.subr.bf16.mxu0 %v19071_v18  ;;  %11657 = vmatprep.subr.bf16.mxu1 %v19074_v19  ;;  %v11774_v18 = vld [vmem:[%s19737_s12 + $0xa8] sm:$0xff]  ;;  %v16130_v19 = vcombine.low %v11761_v6, %v11765_v7  ;;  %v11825_v7 = vld [vmem:[%s19737_s12 + $0x240] sm:$0xff] }
 0x676   : > { %10626 = vmatpush1.bf16.msra.mxu0 %v19069_v20  ;;  %11658 = vmatpush1.bf16.msra.mxu1 %v19072_v21  ;;  %v16132_v20 = vcombine.low %v11762_v8, %v11766_v9  ;;  %v16139_v21 = vcombine.high %v11769_v15, %v11773_v16  ;;  %v11829_v8 = vld [vmem:[%s19737_s12 + $0x260] sm:$0xff]  ;;  %v11826_v9 = vld [vmem:[%s19737_s12 + $0x248] sm:$0xff] }
 0x677   : > { %10627 = vmatprep.subr.bf16.mxu0 %v19077_v22  ;;  %11659 = vmatprep.subr.bf16.mxu1 %v19080_v23  ;;  %v16141_v22 = vcombine.high %v11770_v17, %v11774_v18  ;;  %v11777_v23 = vld [vmem:[%s19737_s12 + $0xc0] sm:$0xff] }
 0x67a   : > { %10628 = vmatpush1.bf16.msra.mxu0 %v19075_v24  ;;  %11660 = vmatpush1.bf16.msra.mxu1 %v19078_v25  ;;  %v11781_v24 = vld [vmem:[%s19737_s12 + $0xe0] sm:$0xff]  ;;  %v11778_v25 = vld [vmem:[%s19737_s12 + $0xc8] sm:$0xff] }
 0x67b   : > { %10629 = vmatprep.subr.bf16.mxu0 %v19083_v26  ;;  %11661 = vmatprep.subr.bf16.mxu1 %v19086_v27  ;;  %v11782_v26 = vld [vmem:[%s19737_s12 + $0xe8] sm:$0xff]  ;;  %v16138_v27 = vcombine.low %v11769_v15, %v11773_v16  ;;  %v11833_v15 = vld [vmem:[%s19737_s12 + $0x280] sm:$0xff] }
 0x67c   : > { %v11837_v16 = vld [vmem:[%s19737_s12 + $0x2a0] sm:$0xff] }
 0x67e   : > { %10630 = vmatpush1.bf16.msra.mxu0 %v19081_v28  ;;  %11662 = vmatpush1.bf16.msra.mxu1 %v19084_v29  ;;  %v16140_v28 = vcombine.low %v11770_v17, %v11774_v18  ;;  %v16147_v29 = vcombine.high %v11777_v23, %v11781_v24  ;;  %v11834_v17 = vld [vmem:[%s19737_s12 + $0x288] sm:$0xff] }
 0x67f   : > { %10631 = vmatprep.subr.bf16.mxu0 %v19089_v30  ;;  %11663 = vmatprep.subr.bf16.mxu1 %v19092_v31  ;;  %v16149_v30 = vcombine.high %v11778_v25, %v11782_v26  ;;  %v11785_v31 = vld [vmem:[%s19737_s12 + $0x100] sm:$0xff]  ;;  %v11838_v18 = vld [vmem:[%s19737_s12 + $0x2a8] sm:$0xff] }
 0x682   : > { %10632 = vmatpush1.bf16.msra.mxu0 %v19087_v32  ;;  %11664 = vmatpush1.bf16.msra.mxu1 %v19090_v33  ;;  %v11789_v32 = vld [vmem:[%s19737_s12 + $0x120] sm:$0xff]  ;;  %v11786_v33 = vld [vmem:[%s19737_s12 + $0x108] sm:$0xff] }
 0x683   : > { %10633 = vmatprep.subr.bf16.mxu0 %v19095_v34  ;;  %11665 = vmatprep.subr.bf16.mxu1 %v19098_v35  ;;  %v11790_v34 = vld [vmem:[%s19737_s12 + $0x128] sm:$0xff]  ;;  %v16146_v35 = vcombine.low %v11777_v23, %v11781_v24  ;;  %v11841_v23 = vld [vmem:[%s19737_s12 + $0x2c0] sm:$0xff] }
 0x684   : > { %v11845_v24 = vld [vmem:[%s19737_s12 + $0x2e0] sm:$0xff] }
 0x686   : > { %10634 = vmatpush1.bf16.msra.mxu0 %v19093_v36  ;;  %11666 = vmatpush1.bf16.msra.mxu1 %v19096_v37  ;;  %v16148_v36 = vcombine.low %v11778_v25, %v11782_v26  ;;  %v16155_v37 = vcombine.high %v11785_v31, %v11789_v32  ;;  %v11842_v25 = vld [vmem:[%s19737_s12 + $0x2c8] sm:$0xff] }
 0x687   : > { %10635 = vmatprep.subr.bf16.mxu0 %v19101_v38  ;;  %11667 = vmatprep.subr.bf16.mxu1 %v19104_v39  ;;  %v16157_v38 = vcombine.high %v11786_v33, %v11790_v34  ;;  %v11793_v39 = vld [vmem:[%s19737_s12 + $0x140] sm:$0xff]  ;;  %v11846_v26 = vld [vmem:[%s19737_s12 + $0x2e8] sm:$0xff] }
 0x68a   : > { %10636 = vmatpush1.bf16.msra.mxu0 %v19099_v40  ;;  %11668 = vmatpush1.bf16.msra.mxu1 %v19102_v41  ;;  %v11797_v40 = vld [vmem:[%s19737_s12 + $0x160] sm:$0xff]  ;;  %v11794_v41 = vld [vmem:[%s19737_s12 + $0x148] sm:$0xff] }
 0x68b   : > { %10637 = vmatprep.subr.bf16.mxu0 %v19107_v42  ;;  %11669 = vmatprep.subr.bf16.mxu1 %v19110_v43  ;;  %v11798_v42 = vld [vmem:[%s19737_s12 + $0x168] sm:$0xff]  ;;  %v16154_v43 = vcombine.low %v11785_v31, %v11789_v32  ;;  %v11849_v31 = vld [vmem:[%s19737_s12 + $0x300] sm:$0xff] }
 0x68c   : > { %v11853_v32 = vld [vmem:[%s19737_s12 + $0x320] sm:$0xff] }
 0x68e   : > { %10638 = vmatpush1.bf16.msra.mxu0 %v19105_v44  ;;  %11670 = vmatpush1.bf16.msra.mxu1 %v19108_v45  ;;  %v16156_v44 = vcombine.low %v11786_v33, %v11790_v34  ;;  %v16163_v45 = vcombine.high %v11793_v39, %v11797_v40  ;;  %v11850_v33 = vld [vmem:[%s19737_s12 + $0x308] sm:$0xff] }
 0x68f   : > { %10650 = vmatprep.subr.bf16.mxu0 %v19116_v46  ;;  %11682 = vmatprep.subr.bf16.mxu1 %v19119_v47  ;;  %v16165_v46 = vcombine.high %v11794_v41, %v11798_v42  ;;  %v11801_v47 = vld [vmem:[%s19737_s12 + $0x180] sm:$0xff]  ;;  %v11854_v34 = vld [vmem:[%s19737_s12 + $0x328] sm:$0xff] }
 0x691   : > { %10640 = vmatmul.mubr.bf16.vlgmr.msra.gmra.mrb[0].mxu0 %v19111_v48  ;;  %11672 = vmatmul.mubr.bf16.vlgmr.msra.gmra.mrb[0].mxu1 %v19111_v48  ;;  %v11805_v48 = vld [vmem:[%s19737_s12 + $0x1a0] sm:$0xff] }
 0x692   : > { %10651 = vmatpush1.bf16.msra.mxu0 %v19114_v49  ;;  %11683 = vmatpush1.bf16.msra.mxu1 %v19117_v50  ;;  %v11802_v49 = vld [vmem:[%s19737_s12 + $0x188] sm:$0xff] }
 0x693   : > { %10652 = vmatprep.subr.bf16.mxu0 %v19122_v51  ;;  %11684 = vmatprep.subr.bf16.mxu1 %v19125_v52  ;;  %v11806_v50 = vld [vmem:[%s19737_s12 + $0x1a8] sm:$0xff]  ;;  %v16162_v51 = vcombine.low %v11793_v39, %v11797_v40  ;;  %v16164_v52 = vcombine.low %v11794_v41, %v11798_v42  ;;  %v11857_v39 = vld [vmem:[%s19737_s12 + $0x340] sm:$0xff] }
 0x694   : > { %10682 = vmatprep.mubr.bf16.mxu0 %v19439_v57  ;;  %11714 = vmatprep.mubr.bf16.mxu1 %v19439_v57  ;;  %v11810_v57 = vld [vmem:[%s19737_s12 + $0x1c8] sm:$0xff]  ;;  %v11861_v40 = vld [vmem:[%s19737_s12 + $0x360] sm:$0xff] }
 0x695   : > { %v11858_v41 = vld [vmem:[%s19737_s12 + $0x348] sm:$0xff] }
 0x696   : > { %10653 = vmatpush1.bf16.msra.mxu0 %v19120_v53  ;;  %11685 = vmatpush1.bf16.msra.mxu1 %v19123_v54  ;;  %v16171_v53 = vcombine.high %v11801_v47, %v11805_v48  ;;  %v16173_v54 = vcombine.high %v11802_v49, %v11806_v50  ;;  %v11862_v42 = vld [vmem:[%s19737_s12 + $0x368] sm:$0xff] }
 0x697   : > { %10654 = vmatprep.subr.bf16.mxu0 %v19128_v55  ;;  %11686 = vmatprep.subr.bf16.mxu1 %v19131_v56  ;;  %v11809_v55 = vld [vmem:[%s19737_s12 + $0x1c0] sm:$0xff] }
 0x698   : > { %v11813_v56 = vld [vmem:[%s19737_s12 + $0x1e0] sm:$0xff] }
 0x69a   : > { %10655 = vmatpush1.bf16.msra.mxu0 %v19126_v58  ;;  %11687 = vmatpush1.bf16.msra.mxu1 %v19129_v59  ;;  %v11814_v58 = vld [vmem:[%s19737_s12 + $0x1e8] sm:$0xff]  ;;  %v16170_v59 = vcombine.low %v11801_v47, %v11805_v48  ;;  %v16226_v47 = vcombine.low %v11857_v39, %v11861_v40  ;;  %v16228_v48 = vcombine.low %v11858_v41, %v11862_v42 }
 0x69b   : > { %10656 = vmatprep.subr.bf16.mxu0 %v19134_v60  ;;  %11688 = vmatprep.subr.bf16.mxu1 %v19137_v61  ;;  %v16172_v60 = vcombine.low %v11802_v49, %v11806_v50  ;;  %v16179_v61 = vcombine.high %v11809_v55, %v11813_v56  ;;  %v16181_v62 = vcombine.high %v11810_v57, %v11814_v58  ;;  %v11865_v49 = vld [vmem:[%s19737_s12 + $0x380] sm:$0xff] }
 0x69c   : > { %v11869_v50 = vld [vmem:[%s19737_s12 + $0x3a0] sm:$0xff] }
 0x69e   : > { %10657 = vmatpush1.bf16.msra.mxu0 %v19132_v2  ;;  %11689 = vmatpush1.bf16.msra.mxu1 %v19135_v3  ;;  %v11822_v2 = vld [vmem:[%s19737_s12 + $0x228] sm:$0xff]  ;;  %v16178_v3 = vcombine.low %v11809_v55, %v11813_v56 }
 0x69f   : > { %13289 = vmatprep.subr.bf16.mxu0 %v16123_v4  ;;  %13375 = vmatprep.subr.bf16.mxu1 %v16125_v5  ;;  %v16180_v4 = vcombine.low %v11810_v57, %v11814_v58  ;;  %v16187_v5 = vcombine.high %v11817_v63, %v11821_v0  ;;  %v16189_v6 = vcombine.high %v11818_v1, %v11822_v2  ;;  %v11873_v57 = vld [vmem:[%s19737_s12 + $0x3c0] sm:$0xff] }
 0x6a0   : > { %v11877_v58 = vld [vmem:[%s19737_s12 + $0x3e0] sm:$0xff] }
 0x6a1   : > { %16120 = vmatmul.mubr.msk.bf16.vlgmr.msra.gmra.mrb[0].mxu0 %vm9657_vm0, %v19138_v10  ;;  %16121 = vmatmul.mubr.msk.bf16.vlgmr.msra.gmra.mrb[0].mxu1 %vm9657_vm0, %v19138_v10  ;;  %v11830_v10 = vld [vmem:[%s19737_s12 + $0x268] sm:$0xff] }
 0x6a2   : > { %13290 = vmatpush1.bf16.msra.mxu0 %v16122_v11  ;;  %13376 = vmatpush1.bf16.msra.mxu1 %v16124_v12  ;;  %v16186_v11 = vcombine.low %v11817_v63, %v11821_v0  ;;  %v16188_v12 = vcombine.low %v11818_v1, %v11822_v2  ;;  %v21443_v1 = vld [vmem:[%s19737_s12 + $0x400] sm:$0xff] }
 0x6a3   : > { %13291 = vmatprep.subr.bf16.mxu0 %v16131_v13  ;;  %13377 = vmatprep.subr.bf16.mxu1 %v16133_v14  ;;  %v16195_v13 = vcombine.high %v11825_v7, %v11829_v8  ;;  %v16197_v14 = vcombine.high %v11826_v9, %v11830_v10  ;;  %v21446_v2 = vld [vmem:[%s19737_s12 + $0x420] sm:$0xff] }
 0x6a6   : > { %13292 = vmatpush1.bf16.msra.mxu0 %v16130_v19  ;;  %13378 = vmatpush1.bf16.msra.mxu1 %v16132_v20  ;;  %v16194_v19 = vcombine.low %v11825_v7, %v11829_v8  ;;  %v16196_v20 = vcombine.low %v11826_v9, %v11830_v10  ;;  %v1962_v9 = vlaneseq }
 0x6a7   : > { %13293 = vmatprep.subr.bf16.mxu0 %v16139_v21  ;;  %13379 = vmatprep.subr.bf16.mxu1 %v16141_v22  ;;  %v16203_v21 = vcombine.high %v11833_v15, %v11837_v16  ;;  %v16205_v22 = vcombine.high %v11834_v17, %v11838_v18 }
 0x6a8   : > { %v21458_v10 = vshrl.u32 %v1962_v9, 7  ;;  %v11918_v9 = vld [vmem:[%s19737_s12 + $0x528] sm:$0xff] }
 0x6aa   : > { %13294 = vmatpush1.bf16.msra.mxu0 %v16138_v27  ;;  %13380 = vmatpush1.bf16.msra.mxu1 %v16140_v28  ;;  %v16202_v27 = vcombine.low %v11833_v15, %v11837_v16  ;;  %v16204_v28 = vcombine.low %v11834_v17, %v11838_v18  ;;  %v1976_v15 = vsub.s32 3, %v21458_v10 }
 0x6ab   : > { %13295 = vmatprep.subr.bf16.mxu0 %v16147_v29  ;;  %13381 = vmatprep.subr.bf16.mxu1 %v16149_v30  ;;  %v16211_v29 = vcombine.high %v11841_v23, %v11845_v24  ;;  %v16213_v30 = vcombine.high %v11842_v25, %v11846_v26 }
 0x6ae   : > { %13296 = vmatpush1.bf16.msra.mxu0 %v16146_v35  ;;  %13382 = vmatpush1.bf16.msra.mxu1 %v16148_v36  ;;  %v16210_v35 = vcombine.low %v11841_v23, %v11845_v24  ;;  %v16212_v36 = vcombine.low %v11842_v25, %v11846_v26 }
 0x6af   : > { %13297 = vmatprep.subr.bf16.mxu0 %v16155_v37  ;;  %13383 = vmatprep.subr.bf16.mxu1 %v16157_v38  ;;  %v16219_v37 = vcombine.high %v11849_v31, %v11853_v32  ;;  %v16221_v38 = vcombine.high %v11850_v33, %v11854_v34 }
 0x6b2   : > { %13298 = vmatpush1.bf16.msra.mxu0 %v16154_v43  ;;  %13384 = vmatpush1.bf16.msra.mxu1 %v16156_v44  ;;  %v16218_v43 = vcombine.low %v11849_v31, %v11853_v32  ;;  %v16220_v44 = vcombine.low %v11850_v33, %v11854_v34 }
 0x6b3   : > { %13299 = vmatprep.subr.bf16.mxu0 %v16163_v45  ;;  %13385 = vmatprep.subr.bf16.mxu1 %v16165_v46  ;;  %v16227_v45 = vcombine.high %v11857_v39, %v11861_v40  ;;  %v16229_v46 = vcombine.high %v11858_v41, %v11862_v42 }
 0x6b6   : > { %13300 = vmatpush1.bf16.msra.mxu0 %v16162_v51  ;;  %13386 = vmatpush1.bf16.msra.mxu1 %v16164_v52  ;;  %v11866_v51 = vld [vmem:[%s19737_s12 + $0x388] sm:$0xff]  ;;  %v16235_v52 = vcombine.high %v11865_v49, %v11869_v50 }
 0x6b7   : > { %13301 = vmatprep.subr.bf16.mxu0 %v16171_v53  ;;  %13387 = vmatprep.subr.bf16.mxu1 %v16173_v54  ;;  %v11870_v53 = vld [vmem:[%s19737_s12 + $0x3a8] sm:$0xff]  ;;  %v16234_v54 = vcombine.low %v11865_v49, %v11869_v50 }
 0x6b8   : > { %v16236_v55 = vcombine.low %v11866_v51, %v11870_v53  ;;  %v16237_v56 = vcombine.high %v11866_v51, %v11870_v53  ;;  %v11894_v49 = vld [vmem:[%s19737_s12 + $0x468] sm:$0xff] }
 0x6ba   : > { %13302 = vmatpush1.bf16.msra.mxu0 %v16170_v59  ;;  %13388 = vmatpush1.bf16.msra.mxu1 %v16172_v60  ;;  %v11874_v59 = vld [vmem:[%s19737_s12 + $0x3c8] sm:$0xff]  ;;  %v16243_v60 = vcombine.high %v11873_v57, %v11877_v58 }
 0x6bb   : > { %13303 = vmatprep.subr.bf16.mxu0 %v16179_v61  ;;  %13389 = vmatprep.subr.bf16.mxu1 %v16181_v62  ;;  %v11878_v61 = vld [vmem:[%s19737_s12 + $0x3e8] sm:$0xff]  ;;  %v16242_v62 = vcombine.low %v11873_v57, %v11877_v58 }
 0x6bc   : > { %v16244_v63 = vcombine.low %v11874_v59, %v11878_v61  ;;  %v16245_v0 = vcombine.high %v11874_v59, %v11878_v61  ;;  %v11902_v57 = vld [vmem:[%s19737_s12 + $0x4a8] sm:$0xff] }
 0x6be   : > { %13304 = vmatpush1.bf16.msra.mxu0 %v16178_v3  ;;  %13390 = vmatpush1.bf16.msra.mxu1 %v16180_v4  ;;  %v21449_v3 = vld [vmem:[%s19737_s12 + $0x408] sm:$0xff]  ;;  %v16251_v4 = vcombine.high %v21443_v1, %v21446_v2 }
 0x6bf   : > { %13305 = vmatprep.subr.bf16.mxu0 %v16187_v5  ;;  %13391 = vmatprep.subr.bf16.mxu1 %v16189_v6  ;;  %v11886_v5 = vld [vmem:[%s19737_s12 + $0x428] sm:$0xff]  ;;  %v16250_v6 = vcombine.low %v21443_v1, %v21446_v2 }
 0x6c0   : > { %v16252_v7 = vcombine.low %v21449_v3, %v11886_v5  ;;  %v16253_v8 = vcombine.high %v21449_v3, %v11886_v5  ;;  %v11910_v1 = vld [vmem:[%s19737_s12 + $0x4e8] sm:$0xff] }
 0x6c2   : > { %13306 = vmatpush1.bf16.msra.mxu0 %v16186_v11  ;;  %13392 = vmatpush1.bf16.msra.mxu1 %v16188_v12  ;;  %v1964_v11 = vsub.s32 0, %v21458_v10  ;;  %v1972_v12 = vsub.s32 2, %v21458_v10 }
 0x6c3   : > { %13307 = vmatprep.subr.bf16.mxu0 %v16195_v13  ;;  %13393 = vmatprep.subr.bf16.mxu1 %v16197_v14  ;;  %v1960_v13 = vld [vmem:[%s19731_s14] sm:$0xf]  ;;  %v1968_v14 = vsub.s32 1, %v21458_v10 }
 0x6c4   : > { %v1965_v16 = vrot.slane %v1960_v13, %v1964_v11  ;;  %v1973_v17 = vrot.slane %v1960_v13, %v1972_v12 }
 0x6c5   : > { %v1969_v18 = vrot.slane %v1960_v13, %v1968_v14 }
 0x6c6   : > { %13308 = vmatpush1.bf16.msra.mxu0 %v16194_v19  ;;  %13394 = vmatpush1.bf16.msra.mxu1 %v16196_v20  ;;  %v1977_v19 = vrot.slane %v1960_v13, %v1976_v15 }
 0x6c7   : > { %13309 = vmatprep.subr.bf16.mxu0 %v16203_v21  ;;  %13395 = vmatprep.subr.bf16.mxu1 %v16205_v22 }
 0x6ca   : > { %13310 = vmatpush1.bf16.msra.mxu0 %v16202_v27  ;;  %13396 = vmatpush1.bf16.msra.mxu1 %v16204_v28 }
 0x6cb   : > { %13311 = vmatprep.subr.bf16.mxu0 %v16211_v29  ;;  %13397 = vmatprep.subr.bf16.mxu1 %v16213_v30 }
 0x6ce   : > { %13312 = vmatpush1.bf16.msra.mxu0 %v16210_v35  ;;  %13398 = vmatpush1.bf16.msra.mxu1 %v16212_v36 }
 0x6cf   : > { %13313 = vmatprep.subr.bf16.mxu0 %v16219_v37  ;;  %13399 = vmatprep.subr.bf16.mxu1 %v16221_v38 }
 0x6d2   : > { %13314 = vmatpush1.bf16.msra.mxu0 %v16218_v43  ;;  %13400 = vmatpush1.bf16.msra.mxu1 %v16220_v44  ;;  %v11889_v44 = vld [vmem:[%s19737_s12 + $0x440] sm:$0xff] }
 0x6d3   : > { %13315 = vmatprep.subr.bf16.mxu0 %v16227_v45  ;;  %13401 = vmatprep.subr.bf16.mxu1 %v16229_v46 }
 0x6d6   : > { %13316 = vmatpush1.bf16.msra.mxu0 %v16226_v47  ;;  %13402 = vmatpush1.bf16.msra.mxu1 %v16228_v48  ;;  %v11893_v47 = vld [vmem:[%s19737_s12 + $0x460] sm:$0xff]  ;;  %v11890_v48 = vld [vmem:[%s19737_s12 + $0x448] sm:$0xff] }
 0x6d7   : > { %13317 = vmatprep.subr.bf16.mxu0 %v16235_v52  ;;  %13403 = vmatprep.subr.bf16.mxu1 %v16237_v56  ;;  %v11897_v52 = vld [vmem:[%s19737_s12 + $0x480] sm:$0xff]  ;;  %v16259_v53 = vcombine.high %v11889_v44, %v11893_v47  ;;  %v11898_v56 = vld [vmem:[%s19737_s12 + $0x488] sm:$0xff]  ;;  %v16258_v58 = vcombine.low %v11889_v44, %v11893_v47  ;;  %v16260_v59 = vcombine.low %v11890_v48, %v11894_v49 }
 0x6d8   : > { %v16269_v61 = vcombine.high %v11898_v56, %v11902_v57  ;;  %v16268_v3 = vcombine.low %v11898_v56, %v11902_v57  ;;  %v11949_v44 = vld [vmem:[%s19737_s12 + $0x620] sm:$0xff]  ;;  %v11946_v47 = vld [vmem:[%s19737_s12 + $0x608] sm:$0xff] }
 0x6d9   : > { %v11957_v56 = vld [vmem:[%s19737_s12 + $0x660] sm:$0xff]  ;;  %v11954_v57 = vld [vmem:[%s19737_s12 + $0x648] sm:$0xff] }
 0x6da   : > { %13318 = vmatpush1.bf16.msra.mxu0 %v16234_v54  ;;  %13404 = vmatpush1.bf16.msra.mxu1 %v16236_v55  ;;  %v16261_v54 = vcombine.high %v11890_v48, %v11894_v49  ;;  %v11901_v55 = vld [vmem:[%s19737_s12 + $0x4a0] sm:$0xff]  ;;  %v11950_v48 = vld [vmem:[%s19737_s12 + $0x628] sm:$0xff] }
 0x6db   : > { %13319 = vmatprep.subr.bf16.mxu0 %v16243_v60  ;;  %13405 = vmatprep.subr.bf16.mxu1 %v16245_v0  ;;  %v16267_v60 = vcombine.high %v11897_v52, %v11901_v55  ;;  %v11906_v0 = vld [vmem:[%s19737_s12 + $0x4c8] sm:$0xff]  ;;  %v16266_v2 = vcombine.low %v11897_v52, %v11901_v55  ;;  %v11953_v55 = vld [vmem:[%s19737_s12 + $0x640] sm:$0xff] }
 0x6dc   : > { %v16277_v5 = vcombine.high %v11906_v0, %v11910_v1 }
 0x6de   : > { %13320 = vmatpush1.bf16.msra.mxu0 %v16242_v62  ;;  %13406 = vmatpush1.bf16.msra.mxu1 %v16244_v63  ;;  %v11905_v62 = vld [vmem:[%s19737_s12 + $0x4c0] sm:$0xff] }
 0x6df   : > { %13332 = vmatprep.subr.bf16.mxu0 %v16251_v4  ;;  %13418 = vmatprep.subr.bf16.mxu1 %v16253_v8  ;;  %v11909_v63 = vld [vmem:[%s19737_s12 + $0x4e0] sm:$0xff]  ;;  %v11914_v8 = vld [vmem:[%s19737_s12 + $0x508] sm:$0xff] }
 0x6e0   : > { %v16275_v4 = vcombine.high %v11905_v62, %v11909_v63  ;;  %v16274_v13 = vcombine.low %v11905_v62, %v11909_v63  ;;  %v11961_v63 = vld [vmem:[%s19737_s12 + $0x680] sm:$0xff] }
 0x774   : > { %v10684_v20 = vpop.f32.mrb[0].mxu0  ;;  %v11716_v21 = vpop.f32.mrb[0].mxu1 }
 0x775   : > { %v16538_v22 = vadd.f32 %v10684_v20, %v1965_v16  ;;  %v16542_v23 = vadd.f32 %v11716_v21, %v1973_v17  ;;  %v10686_v24 = vpop.f32.mrb[1].mxu0  ;;  %v11718_v25 = vpop.f32.mrb[1].mxu1  ;;  %v11925_v20 = vld [vmem:[%s19737_s12 + $0x560] sm:$0xff]  ;;  %v11922_v21 = vld [vmem:[%s19737_s12 + $0x548] sm:$0xff] }
 0x776   : > { %v16539_v26 = vadd.f32 %v10686_v24, %v1969_v18  ;;  %v16543_v27 = vadd.f32 %v11718_v25, %v1977_v19  ;;  %v10688_v28 = vpop.f32.mrb[2].mxu0  ;;  %v11720_v29 = vpop.f32.mrb[2].mxu1  ;;  %v16284_v24 = vcombine.low %v11914_v8, %v11918_v9 }
 0x777   : > { %v16540_v30 = vadd.f32 %v10688_v28, %v1965_v16  ;;  %v16544_v31 = vadd.f32 %v11720_v29, %v1973_v17  ;;  %v10690_v32 = vpop.f32.mrb[3].mxu0  ;;  %v11722_v33 = vpop.f32.mrb[3].mxu1  ;;  %v11725_v36 = vmax.f32 %v16538_v22, 0.0  ;;  %v11727_v37 = vmax.f32 %v16542_v23, 0.0  ;;  %v11926_v22 = vld [vmem:[%s19737_s12 + $0x568] sm:$0xff]  ;;  %v11933_v28 = vld [vmem:[%s19737_s12 + $0x5a0] sm:$0xff] }
 0x778   : > { %v16541_v34 = vadd.f32 %v10690_v32, %v1969_v18  ;;  %v16545_v35 = vadd.f32 %v11722_v33, %v1977_v19  ;;  %v11726_v40 = vmax.f32 %v16539_v26, 0.0  ;;  %v11728_v41 = vmax.f32 %v16543_v27, 0.0  ;;  %v11921_v19 = vld [vmem:[%s19737_s12 + $0x540] sm:$0xff]  ;;  %v11930_v29 = vld [vmem:[%s19737_s12 + $0x588] sm:$0xff] }
 0x779   : > { %v11729_v38 = vmax.f32 %v16540_v30, 0.0  ;;  %v11731_v39 = vmax.f32 %v16544_v31, 0.0  ;;  %v16276_v16 = vcombine.low %v11906_v0, %v11910_v1  ;;  %v16285_v18 = vcombine.high %v11914_v8, %v11918_v9  ;;  %v11929_v27 = vld [vmem:[%s19737_s12 + $0x580] sm:$0xff]  ;;  %v11934_v30 = vld [vmem:[%s19737_s12 + $0x5a8] sm:$0xff] }
 0x77a   : > { %v11730_v42 = vmax.f32 %v16541_v34, 0.0  ;;  %v11732_v43 = vmax.f32 %v16545_v35, 0.0  ;;  %v16291_v25 = vcombine.high %v11921_v19, %v11925_v20  ;;  %v16293_v26 = vcombine.high %v11922_v21, %v11926_v22  ;;  %v11937_v35 = vld [vmem:[%s19737_s12 + $0x5c0] sm:$0xff]  ;;  %v11962_v1 = vld [vmem:[%s19737_s12 + $0x688] sm:$0xff] }
 0x77b   : > { %v21474_v45 = vpack.c.bf16 %v11729_v38, %v11725_v36  ;;  %v21476_v46 = vpack.c.bf16 %v11731_v39, %v11727_v37  ;;  %v16290_v31 = vcombine.low %v11921_v19, %v11925_v20  ;;  %v16292_v32 = vcombine.low %v11922_v21, %v11926_v22  ;;  %v11941_v36 = vld [vmem:[%s19737_s12 + $0x5e0] sm:$0xff]  ;;  %v11938_v37 = vld [vmem:[%s19737_s12 + $0x5c8] sm:$0xff] }
 0x77c   : > { %v21481_v50 = vpack.c.bf16 %v11730_v42, %v11726_v40  ;;  %v21483_v51 = vpack.c.bf16 %v11732_v43, %v11728_v41  ;;  %v16299_v33 = vcombine.high %v11929_v27, %v11933_v28  ;;  %v16301_v34 = vcombine.high %v11930_v29, %v11934_v30  ;;  %v11942_v38 = vld [vmem:[%s19737_s12 + $0x5e8] sm:$0xff]  ;;  %v11945_v43 = vld [vmem:[%s19737_s12 + $0x600] sm:$0xff] }
 0x77d   : > { %v16298_v39 = vcombine.low %v11929_v27, %v11933_v28  ;;  %v16300_v40 = vcombine.low %v11930_v29, %v11934_v30  ;;  %v16307_v41 = vcombine.high %v11937_v35, %v11941_v36  ;;  %v16309_v42 = vcombine.high %v11938_v37, %v11942_v38  ;;  %v11965_v0 = vld [vmem:[%s19737_s12 + $0x6a0] sm:$0xff]  ;;  %v11970_v9 = vld [vmem:[%s19737_s12 + $0x6c8] sm:$0xff] }
 0x77e   : > { %13321 = vmatprep.mubr.bf16.mxu0 %v21481_v50  ;;  %13407 = vmatprep.mubr.bf16.mxu1 %v21481_v50  ;;  %v16306_v49 = vcombine.low %v11937_v35, %v11941_v36  ;;  %v16308_v52 = vcombine.low %v11938_v37, %v11942_v38  ;;  %v11973_v8 = vld [vmem:[%s19737_s12 + $0x6e0] sm:$0xff]  ;;  %v11978_v22 = vld [vmem:[%s19737_s12 + $0x708] sm:$0xff] }
 0x77f   : > { %13322 = vmatmul.mubr.bf16.vlgmr.msra.gmra.mrb[4].mxu0 %v21474_v45  ;;  %13408 = vmatmul.mubr.bf16.vlgmr.msra.gmra.mrb[4].mxu1 %v21474_v45  ;;  %v11977_v20 = vld [vmem:[%s19737_s12 + $0x700] sm:$0xff]  ;;  %v11986_v30 = vld [vmem:[%s19737_s12 + $0x748] sm:$0xff] }
 0x780   : > { %13333 = vmatpush1.bf16.msra.mxu0 %v16250_v6  ;;  %13419 = vmatpush1.bf16.msra.mxu1 %v16252_v7  ;;  %v11913_v6 = vld [vmem:[%s19737_s12 + $0x500] sm:$0xff]  ;;  %v11994_v38 = vld [vmem:[%s19737_s12 + $0x788] sm:$0xff] }
 0x781   : > { %13364 = vmatprep.mubr.bf16.mxu0 %v21483_v51  ;;  %13450 = vmatprep.mubr.bf16.mxu1 %v21483_v51  ;;  %v11917_v7 = vld [vmem:[%s19737_s12 + $0x520] sm:$0xff] }
 0x782   : > { %13334 = vmatprep.subr.bf16.mxu0 %v16259_v53  ;;  %13420 = vmatprep.subr.bf16.mxu1 %v16261_v54  ;;  %v16283_v17 = vcombine.high %v11913_v6, %v11917_v7  ;;  %v16282_v23 = vcombine.low %v11913_v6, %v11917_v7  ;;  %v16315_v53 = vcombine.high %v11945_v43, %v11949_v44  ;;  %v11969_v7 = vld [vmem:[%s19737_s12 + $0x6c0] sm:$0xff] }
 0x783   : > { %v16317_v54 = vcombine.high %v11946_v47, %v11950_v48  ;;  %v11981_v21 = vld [vmem:[%s19737_s12 + $0x720] sm:$0xff] }
 0x784   : > { %13335 = vmatpush1.bf16.msra.mxu0 %v16258_v58  ;;  %13421 = vmatpush1.bf16.msra.mxu1 %v16260_v59  ;;  %v11958_v58 = vld [vmem:[%s19737_s12 + $0x668] sm:$0xff]  ;;  %v16314_v59 = vcombine.low %v11945_v43, %v11949_v44  ;;  %v11985_v28 = vld [vmem:[%s19737_s12 + $0x740] sm:$0xff] }
 0x785   : > { %13336 = vmatprep.subr.bf16.mxu0 %v16267_v60  ;;  %13422 = vmatprep.subr.bf16.mxu1 %v16269_v61  ;;  %v16316_v60 = vcombine.low %v11946_v47, %v11950_v48  ;;  %v16323_v61 = vcombine.high %v11953_v55, %v11957_v56  ;;  %v16325_v62 = vcombine.high %v11954_v57, %v11958_v58  ;;  %v11989_v29 = vld [vmem:[%s19737_s12 + $0x760] sm:$0xff]  ;;  %v12002_v48 = vld [vmem:[%s19737_s12 + $0x7c8] sm:$0xff] }
 0x786   : > { %v11993_v36 = vld [vmem:[%s19737_s12 + $0x780] sm:$0xff] }
 0x787   : > { %v11997_v37 = vld [vmem:[%s19737_s12 + $0x7a0] sm:$0xff] }
 0x788   : > { %13337 = vmatpush1.bf16.msra.mxu0 %v16266_v2  ;;  %13423 = vmatpush1.bf16.msra.mxu1 %v16268_v3  ;;  %v11966_v2 = vld [vmem:[%s19737_s12 + $0x6a8] sm:$0xff]  ;;  %v16322_v3 = vcombine.low %v11953_v55, %v11957_v56  ;;  %v12001_v44 = vld [vmem:[%s19737_s12 + $0x7c0] sm:$0xff]  ;;  %v11755_v56 = vld [vmem:[%s19737_s12 + $0x10] sm:$0xff] }
 0x789   : > { %13338 = vmatprep.subr.bf16.mxu0 %v16275_v4  ;;  %13424 = vmatprep.subr.bf16.mxu1 %v16277_v5  ;;  %v16324_v4 = vcombine.low %v11954_v57, %v11958_v58  ;;  %v16331_v5 = vcombine.high %v11961_v63, %v11965_v0  ;;  %v16333_v6 = vcombine.high %v11962_v1, %v11966_v2  ;;  %v12005_v47 = vld [vmem:[%s19737_s12 + $0x7e0] sm:$0xff]  ;;  %v11759_v57 = vld [vmem:[%s19737_s12 + $0x30] sm:$0xff]  ;;  %v11756_v58 = vld [vmem:[%s19737_s12 + $0x18] sm:$0xff] }
 0x78c   : > { %13339 = vmatpush1.bf16.msra.mxu0 %v16274_v13  ;;  %13425 = vmatpush1.bf16.msra.mxu1 %v16276_v16  ;;  %v11974_v13 = vld [vmem:[%s19737_s12 + $0x6e8] sm:$0xff]  ;;  %v16330_v16 = vcombine.low %v11961_v63, %v11965_v0  ;;  %v11763_v0 = vld [vmem:[%s19737_s12 + $0x50] sm:$0xff] }
 0x78d   : > { %13340 = vmatprep.subr.bf16.mxu0 %v16283_v17  ;;  %13426 = vmatprep.subr.bf16.mxu1 %v16285_v18  ;;  %v16332_v17 = vcombine.low %v11962_v1, %v11966_v2  ;;  %v16339_v18 = vcombine.high %v11969_v7, %v11973_v8  ;;  %v16341_v19 = vcombine.high %v11970_v9, %v11974_v13  ;;  %v11767_v1 = vld [vmem:[%s19737_s12 + $0x70] sm:$0xff]  ;;  %v11764_v2 = vld [vmem:[%s19737_s12 + $0x58] sm:$0xff] }
 0x790   : > { %13341 = vmatpush1.bf16.msra.mxu0 %v16282_v23  ;;  %13427 = vmatpush1.bf16.msra.mxu1 %v16284_v24  ;;  %v11982_v23 = vld [vmem:[%s19737_s12 + $0x728] sm:$0xff]  ;;  %v16338_v24 = vcombine.low %v11969_v7, %v11973_v8  ;;  %v11771_v8 = vld [vmem:[%s19737_s12 + $0x90] sm:$0xff] }
 0x791   : > { %13342 = vmatprep.subr.bf16.mxu0 %v16291_v25  ;;  %13428 = vmatprep.subr.bf16.mxu1 %v16293_v26  ;;  %v16340_v25 = vcombine.low %v11970_v9, %v11974_v13  ;;  %v16347_v26 = vcombine.high %v11977_v20, %v11981_v21  ;;  %v16349_v27 = vcombine.high %v11978_v22, %v11982_v23  ;;  %v11775_v9 = vld [vmem:[%s19737_s12 + $0xb0] sm:$0xff]  ;;  %v11772_v13 = vld [vmem:[%s19737_s12 + $0x98] sm:$0xff] }
 0x794   : > { %13343 = vmatpush1.bf16.msra.mxu0 %v16290_v31  ;;  %13429 = vmatpush1.bf16.msra.mxu1 %v16292_v32  ;;  %v11990_v31 = vld [vmem:[%s19737_s12 + $0x768] sm:$0xff]  ;;  %v16346_v32 = vcombine.low %v11977_v20, %v11981_v21  ;;  %v11779_v21 = vld [vmem:[%s19737_s12 + $0xd0] sm:$0xff] }
 0x795   : > { %13344 = vmatprep.subr.bf16.mxu0 %v16299_v33  ;;  %13430 = vmatprep.subr.bf16.mxu1 %v16301_v34  ;;  %v16348_v33 = vcombine.low %v11978_v22, %v11982_v23  ;;  %v16355_v34 = vcombine.high %v11985_v28, %v11989_v29  ;;  %v16357_v35 = vcombine.high %v11986_v30, %v11990_v31  ;;  %v11783_v22 = vld [vmem:[%s19737_s12 + $0xf0] sm:$0xff]  ;;  %v11780_v23 = vld [vmem:[%s19737_s12 + $0xd8] sm:$0xff] }
 0x798   : > { %13345 = vmatpush1.bf16.msra.mxu0 %v16298_v39  ;;  %13431 = vmatpush1.bf16.msra.mxu1 %v16300_v40  ;;  %v11998_v39 = vld [vmem:[%s19737_s12 + $0x7a8] sm:$0xff]  ;;  %v16354_v40 = vcombine.low %v11985_v28, %v11989_v29  ;;  %v11787_v28 = vld [vmem:[%s19737_s12 + $0x110] sm:$0xff] }
 0x799   : > { %13346 = vmatprep.subr.bf16.mxu0 %v16307_v41  ;;  %13432 = vmatprep.subr.bf16.mxu1 %v16309_v42  ;;  %v16356_v41 = vcombine.low %v11986_v30, %v11990_v31  ;;  %v16363_v42 = vcombine.high %v11993_v36, %v11997_v37  ;;  %v16365_v43 = vcombine.high %v11994_v38, %v11998_v39  ;;  %v11791_v29 = vld [vmem:[%s19737_s12 + $0x130] sm:$0xff]  ;;  %v11788_v30 = vld [vmem:[%s19737_s12 + $0x118] sm:$0xff] }
 0x79a   : > { %v11792_v31 = vld [vmem:[%s19737_s12 + $0x138] sm:$0xff] }
 0x79c   : > { %13347 = vmatpush1.bf16.msra.mxu0 %v16306_v49  ;;  %13433 = vmatpush1.bf16.msra.mxu1 %v16308_v52  ;;  %v12006_v49 = vld [vmem:[%s19737_s12 + $0x7e8] sm:$0xff]  ;;  %v16362_v52 = vcombine.low %v11993_v36, %v11997_v37  ;;  %v11795_v36 = vld [vmem:[%s19737_s12 + $0x150] sm:$0xff] }
 0x79d   : > { %13348 = vmatprep.subr.bf16.mxu0 %v16315_v53  ;;  %13434 = vmatprep.subr.bf16.mxu1 %v16317_v54  ;;  %v16364_v53 = vcombine.low %v11994_v38, %v11998_v39  ;;  %v16371_v54 = vcombine.high %v12001_v44, %v12005_v47  ;;  %v16373_v55 = vcombine.high %v12002_v48, %v12006_v49  ;;  %v11799_v37 = vld [vmem:[%s19737_s12 + $0x170] sm:$0xff]  ;;  %v11796_v38 = vld [vmem:[%s19737_s12 + $0x158] sm:$0xff] }
 0x79e   : > { %v11800_v39 = vld [vmem:[%s19737_s12 + $0x178] sm:$0xff] }
 0x7a0   : > { %13349 = vmatpush1.bf16.msra.mxu0 %v16314_v59  ;;  %13435 = vmatpush1.bf16.msra.mxu1 %v16316_v60  ;;  %v11760_v59 = vld [vmem:[%s19737_s12 + $0x38] sm:$0xff]  ;;  %v16370_v60 = vcombine.low %v12001_v44, %v12005_v47  ;;  %v11803_v44 = vld [vmem:[%s19737_s12 + $0x190] sm:$0xff] }
 0x7a1   : > { %13350 = vmatprep.subr.bf16.mxu0 %v16323_v61  ;;  %13436 = vmatprep.subr.bf16.mxu1 %v16325_v62  ;;  %v16372_v61 = vcombine.low %v12002_v48, %v12006_v49  ;;  %v16127_v62 = vcombine.high %v11755_v56, %v11759_v57  ;;  %v16129_v63 = vcombine.high %v11756_v58, %v11760_v59  ;;  %v11807_v47 = vld [vmem:[%s19737_s12 + $0x1b0] sm:$0xff]  ;;  %v11804_v48 = vld [vmem:[%s19737_s12 + $0x198] sm:$0xff] }
 0x7a2   : > { %v11808_v49 = vld [vmem:[%s19737_s12 + $0x1b8] sm:$0xff] }
 0x7a4   : > { %13351 = vmatpush1.bf16.msra.mxu0 %v16322_v3  ;;  %13437 = vmatpush1.bf16.msra.mxu1 %v16324_v4  ;;  %v11768_v3 = vld [vmem:[%s19737_s12 + $0x78] sm:$0xff]  ;;  %v16126_v4 = vcombine.low %v11755_v56, %v11759_v57  ;;  %v11811_v56 = vld [vmem:[%s19737_s12 + $0x1d0] sm:$0xff] }
 0x7a5   : > { %13352 = vmatprep.subr.bf16.mxu0 %v16331_v5  ;;  %13438 = vmatprep.subr.bf16.mxu1 %v16333_v6  ;;  %v16128_v5 = vcombine.low %v11756_v58, %v11760_v59  ;;  %v16135_v6 = vcombine.high %v11763_v0, %v11767_v1  ;;  %v16137_v7 = vcombine.high %v11764_v2, %v11768_v3  ;;  %v11815_v57 = vld [vmem:[%s19737_s12 + $0x1f0] sm:$0xff]  ;;  %v11812_v58 = vld [vmem:[%s19737_s12 + $0x1d8] sm:$0xff] }
 0x7a6   : > { %v11816_v59 = vld [vmem:[%s19737_s12 + $0x1f8] sm:$0xff] }
 0x7a8   : > { %13353 = vmatpush1.bf16.msra.mxu0 %v16330_v16  ;;  %13439 = vmatpush1.bf16.msra.mxu1 %v16332_v17  ;;  %v11776_v16 = vld [vmem:[%s19737_s12 + $0xb8] sm:$0xff]  ;;  %v16134_v17 = vcombine.low %v11763_v0, %v11767_v1  ;;  %v11819_v0 = vld [vmem:[%s19737_s12 + $0x210] sm:$0xff] }
 0x7a9   : > { %13354 = vmatprep.subr.bf16.mxu0 %v16339_v18  ;;  %13440 = vmatprep.subr.bf16.mxu1 %v16341_v19  ;;  %v16136_v18 = vcombine.low %v11764_v2, %v11768_v3  ;;  %v16143_v19 = vcombine.high %v11771_v8, %v11775_v9  ;;  %v16145_v20 = vcombine.high %v11772_v13, %v11776_v16  ;;  %v11823_v1 = vld [vmem:[%s19737_s12 + $0x230] sm:$0xff]  ;;  %v11820_v2 = vld [vmem:[%s19737_s12 + $0x218] sm:$0xff] }
 0x7aa   : > { %v11824_v3 = vld [vmem:[%s19737_s12 + $0x238] sm:$0xff] }
 0x7ac   : > { %13355 = vmatpush1.bf16.msra.mxu0 %v16338_v24  ;;  %13441 = vmatpush1.bf16.msra.mxu1 %v16340_v25  ;;  %v11784_v24 = vld [vmem:[%s19737_s12 + $0xf8] sm:$0xff]  ;;  %v16142_v25 = vcombine.low %v11771_v8, %v11775_v9  ;;  %v11827_v8 = vld [vmem:[%s19737_s12 + $0x250] sm:$0xff] }
 0x7ad   : > { %13356 = vmatprep.subr.bf16.mxu0 %v16347_v26  ;;  %13442 = vmatprep.subr.bf16.mxu1 %v16349_v27  ;;  %v16144_v26 = vcombine.low %v11772_v13, %v11776_v16  ;;  %v16153_v27 = vcombine.high %v11780_v23, %v11784_v24  ;;  %v11831_v9 = vld [vmem:[%s19737_s12 + $0x270] sm:$0xff]  ;;  %v11828_v13 = vld [vmem:[%s19737_s12 + $0x258] sm:$0xff] }
 0x7ae   : > { %v11832_v16 = vld [vmem:[%s19737_s12 + $0x278] sm:$0xff] }
 0x7b0   : > { %13357 = vmatpush1.bf16.msra.mxu0 %v16346_v32  ;;  %13443 = vmatpush1.bf16.msra.mxu1 %v16348_v33  ;;  %v16150_v32 = vcombine.low %v11779_v21, %v11783_v22  ;;  %v16152_v33 = vcombine.low %v11780_v23, %v11784_v24  ;;  %v11836_v23 = vld [vmem:[%s19737_s12 + $0x298] sm:$0xff] }
 0x7b1   : > { %13358 = vmatprep.subr.bf16.mxu0 %v16355_v34  ;;  %13444 = vmatprep.subr.bf16.mxu1 %v16357_v35  ;;  %v16159_v34 = vcombine.high %v11787_v28, %v11791_v29  ;;  %v16161_v35 = vcombine.high %v11788_v30, %v11792_v31  ;;  %v11840_v24 = vld [vmem:[%s19737_s12 + $0x2b8] sm:$0xff] }
 0x7b4   : > { %13359 = vmatpush1.bf16.msra.mxu0 %v16354_v40  ;;  %13445 = vmatpush1.bf16.msra.mxu1 %v16356_v41  ;;  %v16158_v40 = vcombine.low %v11787_v28, %v11791_v29  ;;  %v16160_v41 = vcombine.low %v11788_v30, %v11792_v31  ;;  %v11843_v28 = vld [vmem:[%s19737_s12 + $0x2d0] sm:$0xff]  ;;  %v11844_v30 = vld [vmem:[%s19737_s12 + $0x2d8] sm:$0xff] }
 0x7b5   : > { %13360 = vmatprep.subr.bf16.mxu0 %v16363_v42  ;;  %13446 = vmatprep.subr.bf16.mxu1 %v16365_v43  ;;  %v16167_v42 = vcombine.high %v11795_v36, %v11799_v37  ;;  %v16169_v43 = vcombine.high %v11796_v38, %v11800_v39  ;;  %v11847_v29 = vld [vmem:[%s19737_s12 + $0x2f0] sm:$0xff]  ;;  %v11848_v31 = vld [vmem:[%s19737_s12 + $0x2f8] sm:$0xff] }
 0x7b8   : > { %13361 = vmatpush1.bf16.msra.mxu0 %v16362_v52  ;;  %13447 = vmatpush1.bf16.msra.mxu1 %v16364_v53  ;;  %v16166_v52 = vcombine.low %v11795_v36, %v11799_v37  ;;  %v16168_v53 = vcombine.low %v11796_v38, %v11800_v39  ;;  %v11851_v36 = vld [vmem:[%s19737_s12 + $0x310] sm:$0xff]  ;;  %v11852_v38 = vld [vmem:[%s19737_s12 + $0x318] sm:$0xff] }
 0x7b9   : > { %13362 = vmatprep.subr.bf16.mxu0 %v16371_v54  ;;  %13448 = vmatprep.subr.bf16.mxu1 %v16373_v55  ;;  %v16175_v54 = vcombine.high %v11803_v44, %v11807_v47  ;;  %v16177_v55 = vcombine.high %v11804_v48, %v11808_v49  ;;  %v11855_v37 = vld [vmem:[%s19737_s12 + $0x330] sm:$0xff]  ;;  %v11856_v39 = vld [vmem:[%s19737_s12 + $0x338] sm:$0xff] }
 0x7bc   : > { %13363 = vmatpush1.bf16.msra.mxu0 %v16370_v60  ;;  %13449 = vmatpush1.bf16.msra.mxu1 %v16372_v61  ;;  %v16174_v60 = vcombine.low %v11803_v44, %v11807_v47  ;;  %v16176_v61 = vcombine.low %v11804_v48, %v11808_v49  ;;  %v11859_v44 = vld [vmem:[%s19737_s12 + $0x350] sm:$0xff]  ;;  %v11860_v48 = vld [vmem:[%s19737_s12 + $0x358] sm:$0xff] }
 0x7bd   : > { %13461 = vmatprep.subr.bf16.mxu0 %v16127_v62  ;;  %13547 = vmatprep.subr.bf16.mxu1 %v16129_v63  ;;  %v16183_v62 = vcombine.high %v11811_v56, %v11815_v57  ;;  %v16185_v63 = vcombine.high %v11812_v58, %v11816_v59  ;;  %v11863_v47 = vld [vmem:[%s19737_s12 + $0x370] sm:$0xff]  ;;  %v11864_v49 = vld [vmem:[%s19737_s12 + $0x378] sm:$0xff] }
 0x7bf   : > { %13365 = vmatmul.mubr.bf16.vlgmr.msra.gmra.mrb[4].mxu0 %v21476_v46  ;;  %13451 = vmatmul.mubr.bf16.vlgmr.msra.gmra.mrb[4].mxu1 %v21476_v46 }
 0x7c0   : > { %13462 = vmatpush1.bf16.msra.mxu0 %v16126_v4  ;;  %13493 = vmatprep.mubr.bf16.mxu0 %v21481_v50  ;;  %v16182_v4 = vcombine.low %v11811_v56, %v11815_v57  ;;  %v11867_v56 = vld [vmem:[%s19737_s12 + $0x390] sm:$0xff] }
 0x7c1   : > { %13548 = vmatpush1.bf16.msra.mxu1 %v16128_v5  ;;  %13579 = vmatprep.mubr.bf16.mxu1 %v21481_v50  ;;  %v16151_v50 = vcombine.high %v11779_v21, %v11783_v22  ;;  %v16184_v5 = vcombine.low %v11812_v58, %v11816_v59  ;;  %v11835_v21 = vld [vmem:[%s19737_s12 + $0x290] sm:$0xff]  ;;  %v11868_v58 = vld [vmem:[%s19737_s12 + $0x398] sm:$0xff] }
 0x7c2   : > { %13463 = vmatprep.subr.bf16.mxu0 %v16135_v6  ;;  %13549 = vmatprep.subr.bf16.mxu1 %v16137_v7  ;;  %v16191_v6 = vcombine.high %v11819_v0, %v11823_v1  ;;  %v16193_v7 = vcombine.high %v11820_v2, %v11824_v3  ;;  %v11839_v22 = vld [vmem:[%s19737_s12 + $0x2b0] sm:$0xff]  ;;  %v11872_v59 = vld [vmem:[%s19737_s12 + $0x3b8] sm:$0xff] }
 0x7c3   : > { %v11871_v57 = vld [vmem:[%s19737_s12 + $0x3b0] sm:$0xff] }
 0x7c4   : > { %13464 = vmatpush1.bf16.msra.mxu0 %v16134_v17  ;;  %v16190_v17 = vcombine.low %v11819_v0, %v11823_v1  ;;  %v11875_v0 = vld [vmem:[%s19737_s12 + $0x3d0] sm:$0xff] }
 0x7c5   : > { %13550 = vmatpush1.bf16.msra.mxu1 %v16136_v18  ;;  %13465 = vmatprep.subr.bf16.mxu0 %v16143_v19  ;;  %v16192_v18 = vcombine.low %v11820_v2, %v11824_v3  ;;  %v16199_v19 = vcombine.high %v11827_v8, %v11831_v9  ;;  %v11879_v1 = vld [vmem:[%s19737_s12 + $0x3f0] sm:$0xff]  ;;  %v11876_v2 = vld [vmem:[%s19737_s12 + $0x3d8] sm:$0xff] }
 0x7c6   : > { %13551 = vmatprep.subr.bf16.mxu1 %v16145_v20  ;;  %v16201_v20 = vcombine.high %v11828_v13, %v11832_v16  ;;  %v11880_v3 = vld [vmem:[%s19737_s12 + $0x3f8] sm:$0xff] }
 0x7c8   : > { %13466 = vmatpush1.bf16.msra.mxu0 %v16142_v25  ;;  %v16198_v25 = vcombine.low %v11827_v8, %v11831_v9  ;;  %v11883_v8 = vld [vmem:[%s19737_s12 + $0x410] sm:$0xff] }
 0x7c9   : > { %13552 = vmatpush1.bf16.msra.mxu1 %v16144_v26  ;;  %13467 = vmatprep.subr.bf16.mxu0 %v16151_v50  ;;  %v16200_v26 = vcombine.low %v11828_v13, %v11832_v16  ;;  %v16207_v50 = vcombine.high %v11835_v21, %v11839_v22  ;;  %v11887_v9 = vld [vmem:[%s19737_s12 + $0x430] sm:$0xff]  ;;  %v11884_v13 = vld [vmem:[%s19737_s12 + $0x418] sm:$0xff] }
 0x7ca   : > { %13553 = vmatprep.subr.bf16.mxu1 %v16153_v27  ;;  %v16209_v27 = vcombine.high %v11836_v23, %v11840_v24  ;;  %v11888_v16 = vld [vmem:[%s19737_s12 + $0x438] sm:$0xff] }
 0x7cc   : > { %13468 = vmatpush1.bf16.msra.mxu0 %v16150_v32  ;;  %v16206_v32 = vcombine.low %v11835_v21, %v11839_v22  ;;  %v11891_v21 = vld [vmem:[%s19737_s12 + $0x450] sm:$0xff] }
 0x7cd   : > { %13554 = vmatpush1.bf16.msra.mxu1 %v16152_v33  ;;  %13469 = vmatprep.subr.bf16.mxu0 %v16159_v34  ;;  %v16208_v33 = vcombine.low %v11836_v23, %v11840_v24  ;;  %v16215_v34 = vcombine.high %v11843_v28, %v11847_v29  ;;  %v11895_v22 = vld [vmem:[%s19737_s12 + $0x470] sm:$0xff]  ;;  %v16254_v23 = vcombine.low %v11883_v8, %v11887_v9  ;;  %v11892_v24 = vld [vmem:[%s19737_s12 + $0x458] sm:$0xff] }
 0x7ce   : > { %13555 = vmatprep.subr.bf16.mxu1 %v16161_v35  ;;  %v16217_v35 = vcombine.high %v11844_v30, %v11848_v31 }
 0x7d0   : > { %13470 = vmatpush1.bf16.msra.mxu0 %v16158_v40  ;;  %v16214_v40 = vcombine.low %v11843_v28, %v11847_v29  ;;  %v11903_v28 = vld [vmem:[%s19737_s12 + $0x4b0] sm:$0xff] }
 0x7d1   : > { %13556 = vmatpush1.bf16.msra.mxu1 %v16160_v41  ;;  %13471 = vmatprep.subr.bf16.mxu0 %v16167_v42  ;;  %v16216_v41 = vcombine.low %v11844_v30, %v11848_v31  ;;  %v16223_v42 = vcombine.high %v11851_v36, %v11855_v37  ;;  %v11900_v30 = vld [vmem:[%s19737_s12 + $0x498] sm:$0xff] }
 0x7d2   : > { %13557 = vmatprep.subr.bf16.mxu1 %v16169_v43  ;;  %v16225_v43 = vcombine.high %v11852_v38, %v11856_v39  ;;  %v11904_v31 = vld [vmem:[%s19737_s12 + $0x4b8] sm:$0xff] }
 0x7d4   : > { %13472 = vmatpush1.bf16.msra.mxu0 %v16166_v52  ;;  %v16222_v52 = vcombine.low %v11851_v36, %v11855_v37  ;;  %v11907_v36 = vld [vmem:[%s19737_s12 + $0x4d0] sm:$0xff] }
 0x7d5   : > { %13558 = vmatpush1.bf16.msra.mxu1 %v16168_v53  ;;  %13473 = vmatprep.subr.bf16.mxu0 %v16175_v54  ;;  %v16224_v53 = vcombine.low %v11852_v38, %v11856_v39  ;;  %v16231_v54 = vcombine.high %v11859_v44, %v11863_v47  ;;  %v11911_v37 = vld [vmem:[%s19737_s12 + $0x4f0] sm:$0xff]  ;;  %v11908_v38 = vld [vmem:[%s19737_s12 + $0x4d8] sm:$0xff] }
 0x7d6   : > { %13559 = vmatprep.subr.bf16.mxu1 %v16177_v55  ;;  %v16233_v55 = vcombine.high %v11860_v48, %v11864_v49 }
 0x7d8   : > { %13474 = vmatpush1.bf16.msra.mxu0 %v16174_v60  ;;  %v16230_v60 = vcombine.low %v11859_v44, %v11863_v47  ;;  %v11916_v44 = vld [vmem:[%s19737_s12 + $0x518] sm:$0xff] }
 0x7d9   : > { %13560 = vmatpush1.bf16.msra.mxu1 %v16176_v61  ;;  %13475 = vmatprep.subr.bf16.mxu0 %v16183_v62  ;;  %v16232_v61 = vcombine.low %v11860_v48, %v11864_v49  ;;  %v16239_v62 = vcombine.high %v11867_v56, %v11871_v57  ;;  %v11920_v47 = vld [vmem:[%s19737_s12 + $0x538] sm:$0xff]  ;;  %v16278_v48 = vcombine.low %v11907_v36, %v11911_v37 }
 0x7da   : > { %13561 = vmatprep.subr.bf16.mxu1 %v16185_v63  ;;  %v16241_v63 = vcombine.high %v11868_v58, %v11872_v59 }
 0x7dc   : > { %13476 = vmatpush1.bf16.msra.mxu0 %v16182_v4  ;;  %v16238_v4 = vcombine.low %v11867_v56, %v11871_v57  ;;  %v11924_v56 = vld [vmem:[%s19737_s12 + $0x558] sm:$0xff] }
 0x7dd   : > { %13562 = vmatpush1.bf16.msra.mxu1 %v16184_v5  ;;  %13477 = vmatprep.subr.bf16.mxu0 %v16191_v6  ;;  %v16240_v5 = vcombine.low %v11868_v58, %v11872_v59  ;;  %v16247_v6 = vcombine.high %v11875_v0, %v11879_v1  ;;  %v11928_v57 = vld [vmem:[%s19737_s12 + $0x578] sm:$0xff]  ;;  %v16288_v59 = vcombine.low %v11916_v44, %v11920_v47 }
 0x7de   : > { %13563 = vmatprep.subr.bf16.mxu1 %v16193_v7  ;;  %v16249_v7 = vcombine.high %v11876_v2, %v11880_v3 }
 0x7e0   : > { %13478 = vmatpush1.bf16.msra.mxu0 %v16190_v17  ;;  %v16246_v17 = vcombine.low %v11875_v0, %v11879_v1  ;;  %v11932_v0 = vld [vmem:[%s19737_s12 + $0x598] sm:$0xff] }
 0x7e1   : > { %13564 = vmatpush1.bf16.msra.mxu1 %v16192_v18  ;;  %13479 = vmatprep.subr.bf16.mxu0 %v16199_v19  ;;  %v16248_v18 = vcombine.low %v11876_v2, %v11880_v3  ;;  %v16255_v19 = vcombine.high %v11883_v8, %v11887_v9  ;;  %v11936_v1 = vld [vmem:[%s19737_s12 + $0x5b8] sm:$0xff]  ;;  %v16296_v3 = vcombine.low %v11924_v56, %v11928_v57 }
 0x7e2   : > { %13565 = vmatprep.subr.bf16.mxu1 %v16201_v20  ;;  %v16257_v20 = vcombine.high %v11884_v13, %v11888_v16  ;;  %v11940_v8 = vld [vmem:[%s19737_s12 + $0x5d8] sm:$0xff] }
 0x7e3   : > { %v11944_v9 = vld [vmem:[%s19737_s12 + $0x5f8] sm:$0xff] }
 0x7e4   : > { %13480 = vmatpush1.bf16.msra.mxu0 %v16198_v25  ;;  %v11896_v25 = vld [vmem:[%s19737_s12 + $0x478] sm:$0xff] }
 0x7e5   : > { %13566 = vmatpush1.bf16.msra.mxu1 %v16200_v26  ;;  %13481 = vmatprep.subr.bf16.mxu0 %v16207_v50  ;;  %v16256_v26 = vcombine.low %v11884_v13, %v11888_v16  ;;  %v16263_v50 = vcombine.high %v11891_v21, %v11895_v22  ;;  %v16265_v29 = vcombine.high %v11892_v24, %v11896_v25 }
 0x7e6   : > { %13567 = vmatprep.subr.bf16.mxu1 %v16209_v27  ;;  %v11899_v27 = vld [vmem:[%s19737_s12 + $0x490] sm:$0xff]  ;;  %v16304_v16 = vcombine.low %v11932_v0, %v11936_v1 }
 0x7e7   : > { %v16270_v39 = vcombine.low %v11899_v27, %v11903_v28 }
 0x7e8   : > { %13482 = vmatpush1.bf16.msra.mxu0 %v16206_v32  ;;  %v16262_v32 = vcombine.low %v11891_v21, %v11895_v22  ;;  %v11948_v21 = vld [vmem:[%s19737_s12 + $0x618] sm:$0xff] }
 0x7e9   : > { %13568 = vmatpush1.bf16.msra.mxu1 %v16208_v33  ;;  %13483 = vmatprep.subr.bf16.mxu0 %v16215_v34  ;;  %v16264_v33 = vcombine.low %v11892_v24, %v11896_v25  ;;  %v16271_v34 = vcombine.high %v11899_v27, %v11903_v28  ;;  %v11952_v22 = vld [vmem:[%s19737_s12 + $0x638] sm:$0xff]  ;;  %v16312_v24 = vcombine.low %v11940_v8, %v11944_v9  ;;  %v11959_v27 = vld [vmem:[%s19737_s12 + $0x670] sm:$0xff] }
 0x7ea   : > { %13569 = vmatprep.subr.bf16.mxu1 %v16217_v35  ;;  %v16273_v35 = vcombine.high %v11900_v30, %v11904_v31  ;;  %v11956_v28 = vld [vmem:[%s19737_s12 + $0x658] sm:$0xff] }
 0x7ec   : > { %13484 = vmatpush1.bf16.msra.mxu0 %v16214_v40  ;;  %v16272_v40 = vcombine.low %v11900_v30, %v11904_v31  ;;  %v16320_v31 = vcombine.low %v11948_v21, %v11952_v22 }
 0x7ed   : > { %13570 = vmatpush1.bf16.msra.mxu1 %v16216_v41  ;;  %13485 = vmatprep.subr.bf16.mxu0 %v16223_v42  ;;  %v16279_v41 = vcombine.high %v11907_v36, %v11911_v37  ;;  %v11915_v42 = vld [vmem:[%s19737_s12 + $0x510] sm:$0xff]  ;;  %v11964_v36 = vld [vmem:[%s19737_s12 + $0x698] sm:$0xff] }
 0x7ee   : > { %13571 = vmatprep.subr.bf16.mxu1 %v16225_v43  ;;  %v11919_v43 = vld [vmem:[%s19737_s12 + $0x530] sm:$0xff]  ;;  %v11968_v37 = vld [vmem:[%s19737_s12 + $0x6b8] sm:$0xff] }
 0x7ef   : > { %v16286_v58 = vcombine.low %v11915_v42, %v11919_v43 }
 0x7f0   : > { %13486 = vmatpush1.bf16.msra.mxu0 %v16222_v52  ;;  %v16287_v52 = vcombine.high %v11915_v42, %v11919_v43  ;;  %v11972_v42 = vld [vmem:[%s19737_s12 + $0x6d8] sm:$0xff] }
 0x7f1   : > { %13572 = vmatpush1.bf16.msra.mxu1 %v16224_v53  ;;  %13487 = vmatprep.subr.bf16.mxu0 %v16231_v54  ;;  %v16289_v53 = vcombine.high %v11916_v44, %v11920_v47  ;;  %v11923_v54 = vld [vmem:[%s19737_s12 + $0x550] sm:$0xff]  ;;  %v11976_v43 = vld [vmem:[%s19737_s12 + $0x6f8] sm:$0xff]  ;;  %v16336_v47 = vcombine.low %v11964_v36, %v11968_v37 }
 0x7f2   : > { %13573 = vmatprep.subr.bf16.mxu1 %v16233_v55  ;;  %v11927_v55 = vld [vmem:[%s19737_s12 + $0x570] sm:$0xff] }
 0x7f3   : > { %v16294_v2 = vcombine.low %v11923_v54, %v11927_v55 }
 0x7f4   : > { %13488 = vmatpush1.bf16.msra.mxu0 %v16230_v60  ;;  %v16295_v60 = vcombine.high %v11923_v54, %v11927_v55  ;;  %v11980_v54 = vld [vmem:[%s19737_s12 + $0x718] sm:$0xff] }
 0x7f5   : > { %13574 = vmatpush1.bf16.msra.mxu1 %v16232_v61  ;;  %13489 = vmatprep.subr.bf16.mxu0 %v16239_v62  ;;  %v16297_v61 = vcombine.high %v11924_v56, %v11928_v57  ;;  %v11931_v62 = vld [vmem:[%s19737_s12 + $0x590] sm:$0xff]  ;;  %v11984_v55 = vld [vmem:[%s19737_s12 + $0x738] sm:$0xff]  ;;  %v16344_v57 = vcombine.low %v11972_v42, %v11976_v43 }
 0x7f6   : > { %13575 = vmatprep.subr.bf16.mxu1 %v16241_v63  ;;  %v11935_v63 = vld [vmem:[%s19737_s12 + $0x5b0] sm:$0xff] }
 0x7f7   : > { %v16302_v13 = vcombine.low %v11931_v62, %v11935_v63 }
 0x7f8   : > { %13490 = vmatpush1.bf16.msra.mxu0 %v16238_v4  ;;  %v16303_v4 = vcombine.high %v11931_v62, %v11935_v63  ;;  %v11988_v62 = vld [vmem:[%s19737_s12 + $0x758] sm:$0xff] }
 0x7f9   : > { %13576 = vmatpush1.bf16.msra.mxu1 %v16240_v5  ;;  %13491 = vmatprep.subr.bf16.mxu0 %v16247_v6  ;;  %v16305_v5 = vcombine.high %v11932_v0, %v11936_v1  ;;  %v11939_v6 = vld [vmem:[%s19737_s12 + $0x5d0] sm:$0xff]  ;;  %v11992_v63 = vld [vmem:[%s19737_s12 + $0x778] sm:$0xff]  ;;  %v16352_v1 = vcombine.low %v11980_v54, %v11984_v55 }
 0x7fa   : > { %13577 = vmatprep.subr.bf16.mxu1 %v16249_v7  ;;  %v11943_v7 = vld [vmem:[%s19737_s12 + $0x5f0] sm:$0xff] }
 0x7fc   : > { %13492 = vmatpush1.bf16.msra.mxu0 %v16246_v17  ;;  %v16311_v17 = vcombine.high %v11939_v6, %v11943_v7 }
 0x7fd   : > { %13578 = vmatpush1.bf16.msra.mxu1 %v16248_v18  ;;  %13504 = vmatprep.subr.bf16.mxu0 %v16255_v19  ;;  %v16313_v18 = vcombine.high %v11940_v8, %v11944_v9  ;;  %v11947_v19 = vld [vmem:[%s19737_s12 + $0x610] sm:$0xff]  ;;  %v16360_v9 = vcombine.low %v11988_v62, %v11992_v63 }
 0x7fe   : > { %13590 = vmatprep.subr.bf16.mxu1 %v16257_v20  ;;  %v11951_v20 = vld [vmem:[%s19737_s12 + $0x630] sm:$0xff] }
 0x7ff   : > { %13494 = vmatmul.mubr.bf16.vlgmr.msra.gmra.mrb[8].mxu0 %v21474_v45  ;;  %v16319_v25 = vcombine.high %v11947_v19, %v11951_v20  ;;  %v16318_v30 = vcombine.low %v11947_v19, %v11951_v20  ;;  %v12004_v19 = vld [vmem:[%s19737_s12 + $0x7d8] sm:$0xff] }
 0x800   : > { %13580 = vmatmul.mubr.bf16.vlgmr.msra.gmra.mrb[8].mxu1 %v21474_v45  ;;  %13505 = vmatpush1.bf16.msra.mxu0 %v16254_v23  ;;  %v11912_v45 = vld [vmem:[%s19737_s12 + $0x4f8] sm:$0xff]  ;;  %v16310_v23 = vcombine.low %v11939_v6, %v11943_v7 }
 0x801   : > { %13536 = vmatprep.mubr.bf16.mxu0 %v21483_v51  ;;  %13591 = vmatpush1.bf16.msra.mxu1 %v16256_v26  ;;  %v16280_v49 = vcombine.low %v11908_v38, %v11912_v45  ;;  %v16321_v26 = vcombine.high %v11948_v21, %v11952_v22  ;;  %v11996_v6 = vld [vmem:[%s19737_s12 + $0x798] sm:$0xff] }
 0x802   : > { %13622 = vmatprep.mubr.bf16.mxu1 %v21483_v51  ;;  %13506 = vmatprep.subr.bf16.mxu0 %v16263_v50  ;;  %v16281_v51 = vcombine.high %v11908_v38, %v11912_v45  ;;  %v11955_v50 = vld [vmem:[%s19737_s12 + $0x650] sm:$0xff]  ;;  %v12000_v7 = vld [vmem:[%s19737_s12 + $0x7b8] sm:$0xff] }
 0x803   : > { %13592 = vmatprep.subr.bf16.mxu1 %v16265_v29  ;;  %v11960_v29 = vld [vmem:[%s19737_s12 + $0x678] sm:$0xff]  ;;  %v16326_v38 = vcombine.low %v11955_v50, %v11959_v27  ;;  %v16368_v22 = vcombine.low %v11996_v6, %v12000_v7 }
 0x804   : > { %13507 = vmatpush1.bf16.msra.mxu0 %v16262_v32  ;;  %v16327_v32 = vcombine.high %v11955_v50, %v11959_v27  ;;  %v16328_v45 = vcombine.low %v11956_v28, %v11960_v29  ;;  %v12008_v20 = vld [vmem:[%s19737_s12 + $0x7f8] sm:$0xff]  ;;  %v11735_v27 = vld [vmem:[#allocation2 + $0x10] sm:$0xff] }
 0x805   : > { %13593 = vmatpush1.bf16.msra.mxu1 %v16264_v33  ;;  %13508 = vmatprep.subr.bf16.mxu0 %v16271_v34  ;;  %v16329_v33 = vcombine.high %v11956_v28, %v11960_v29  ;;  %v11963_v34 = vld [vmem:[%s19737_s12 + $0x690] sm:$0xff]  ;;  %v11733_v50 = vld [vmem:[#allocation2] sm:$0xff]  ;;  %v11734_v28 = vld [vmem:[#allocation2 + $0x8] sm:$0xff] }
 0x806   : > { %13594 = vmatprep.subr.bf16.mxu1 %v16273_v35  ;;  %v11967_v35 = vld [vmem:[%s19737_s12 + $0x6b0] sm:$0xff] }
 0x807   : > { %v16334_v44 = vcombine.low %v11963_v34, %v11967_v35  ;;  %v11736_v29 = vld [vmem:[#allocation2 + $0x18] sm:$0xff] }
 0x808   : > { %13509 = vmatpush1.bf16.msra.mxu0 %v16270_v39  ;;  %v16335_v39 = vcombine.high %v11963_v34, %v11967_v35 }
 0x809   : > { %13595 = vmatpush1.bf16.msra.mxu1 %v16272_v40  ;;  %13510 = vmatprep.subr.bf16.mxu0 %v16279_v41  ;;  %v16337_v40 = vcombine.high %v11964_v36, %v11968_v37  ;;  %v11971_v41 = vld [vmem:[%s19737_s12 + $0x6d0] sm:$0xff] }
 0x80a   : > { %13596 = vmatprep.subr.bf16.mxu1 %v16281_v51  ;;  %v11975_v51 = vld [vmem:[%s19737_s12 + $0x6f0] sm:$0xff] }
 0x80b   : > { %v16342_v56 = vcombine.low %v11971_v41, %v11975_v51 }
 0x80c   : > { %13511 = vmatpush1.bf16.msra.mxu0 %v16278_v48  ;;  %v16343_v48 = vcombine.high %v11971_v41, %v11975_v51 }
 0x80d   : > { %13597 = vmatpush1.bf16.msra.mxu1 %v16280_v49  ;;  %13512 = vmatprep.subr.bf16.mxu0 %v16287_v52  ;;  %v16345_v49 = vcombine.high %v11972_v42, %v11976_v43  ;;  %v11979_v52 = vld [vmem:[%s19737_s12 + $0x710] sm:$0xff] }
 0x80e   : > { %13598 = vmatprep.subr.bf16.mxu1 %v16289_v53  ;;  %v11983_v53 = vld [vmem:[%s19737_s12 + $0x730] sm:$0xff] }
 0x80f   : > { %v16350_v0 = vcombine.low %v11979_v52, %v11983_v53 }
 0x810   : > { %13513 = vmatpush1.bf16.msra.mxu0 %v16286_v58  ;;  %v16351_v58 = vcombine.high %v11979_v52, %v11983_v53  ;;  %v11739_v52 = vld [vmem:[#allocation2 + $0x30] sm:$0xff]  ;;  %v11738_v53 = vld [vmem:[#allocation2 + $0x28] sm:$0xff] }
 0x811   : > { %13599 = vmatpush1.bf16.msra.mxu1 %v16288_v59  ;;  %13514 = vmatprep.subr.bf16.mxu0 %v16295_v60  ;;  %v16353_v59 = vcombine.high %v11980_v54, %v11984_v55  ;;  %v11987_v60 = vld [vmem:[%s19737_s12 + $0x750] sm:$0xff] }
 0x812   : > { %13600 = vmatprep.subr.bf16.mxu1 %v16297_v61  ;;  %v11991_v61 = vld [vmem:[%s19737_s12 + $0x770] sm:$0xff] }
 0x813   : > { %v16358_v8 = vcombine.low %v11987_v60, %v11991_v61  ;;  %v11740_v55 = vld [vmem:[#allocation2 + $0x38] sm:$0xff] }
 0x814   : > { %13515 = vmatpush1.bf16.msra.mxu0 %v16294_v2  ;;  %v16359_v2 = vcombine.high %v11987_v60, %v11991_v61  ;;  %v11747_v60 = vld [vmem:[#allocation2 + $0x70] sm:$0xff]  ;;  %v11746_v61 = vld [vmem:[#allocation2 + $0x68] sm:$0xff] }
 0x815   : > { %13601 = vmatpush1.bf16.msra.mxu1 %v16296_v3  ;;  %13516 = vmatprep.subr.bf16.mxu0 %v16303_v4  ;;  %v16361_v3 = vcombine.high %v11988_v62, %v11992_v63  ;;  %v11995_v4 = vld [vmem:[%s19737_s12 + $0x790] sm:$0xff] }
 0x816   : > { %13602 = vmatprep.subr.bf16.mxu1 %v16305_v5  ;;  %v11999_v5 = vld [vmem:[%s19737_s12 + $0x7b0] sm:$0xff] }
 0x817   : > { %v16366_v21 = vcombine.low %v11995_v4, %v11999_v5 }
 0x818   : > { %13517 = vmatpush1.bf16.msra.mxu0 %v16302_v13  ;;  %v16367_v13 = vcombine.high %v11995_v4, %v11999_v5 }
 0x819   : > { %13603 = vmatpush1.bf16.msra.mxu1 %v16304_v16  ;;  %13518 = vmatprep.subr.bf16.mxu0 %v16311_v17  ;;  %v16369_v16 = vcombine.high %v11996_v6, %v12000_v7  ;;  %v12003_v17 = vld [vmem:[%s19737_s12 + $0x7d0] sm:$0xff] }
 0x81a   : > { %13604 = vmatprep.subr.bf16.mxu1 %v16313_v18  ;;  %v12007_v18 = vld [vmem:[%s19737_s12 + $0x7f0] sm:$0xff] }
 0x81c   : > { %13519 = vmatpush1.bf16.msra.mxu0 %v16310_v23  ;;  %v16375_v23 = vcombine.high %v12003_v17, %v12007_v18 }
 0x81d   : > { %13605 = vmatpush1.bf16.msra.mxu1 %v16312_v24  ;;  %13520 = vmatprep.subr.bf16.mxu0 %v16319_v25  ;;  %v16377_v24 = vcombine.high %v12004_v19, %v12008_v20  ;;  %v16374_v25 = vcombine.low %v12003_v17, %v12007_v18  ;;  %v19140_v17 = vld [vmem:[#allocation10 + $0xc0] sm:$0xff] (!%p16378_p13)  }
 0x81e   : > { %13606 = vmatprep.subr.bf16.mxu1 %v16321_v26  ;;  %v16376_v26 = vcombine.low %v12004_v19, %v12008_v20  ;;  %v19141_v18 = vld [vmem:[#allocation10] sm:$0xff] (!%p16378_p13)   ;;  %v19143_v20 = vld [vmem:[#allocation10 + $0x48] sm:$0xff] (!%p16378_p13)  }
 0x81f   : > { %v19142_v19 = vld [vmem:[#allocation10 + $0x80] sm:$0xff] (!%p16378_p13)  }
 0x820   : > { %13521 = vmatpush1.bf16.msra.mxu0 %v16318_v30 }
 0x821   : > { %13607 = vmatpush1.bf16.msra.mxu1 %v16320_v31  ;;  %13522 = vmatprep.subr.bf16.mxu0 %v16327_v32  ;;  %v11741_v32 = vld [vmem:[#allocation2 + $0x40] sm:$0xff] }
 0x822   : > { %13608 = vmatprep.subr.bf16.mxu1 %v16329_v33  ;;  %v11743_v33 = vld [vmem:[#allocation2 + $0x50] sm:$0xff] }
 0x824   : > { %13523 = vmatpush1.bf16.msra.mxu0 %v16326_v38  ;;  %v11742_v38 = vld [vmem:[#allocation2 + $0x48] sm:$0xff] }
 0x825   : > { %13609 = vmatpush1.bf16.msra.mxu1 %v16328_v45  ;;  %13524 = vmatprep.subr.bf16.mxu0 %v16335_v39  ;;  %v11744_v45 = vld [vmem:[#allocation2 + $0x58] sm:$0xff] }
 0x826   : > { %13610 = vmatprep.subr.bf16.mxu1 %v16337_v40 }
 0x828   : > { %13525 = vmatpush1.bf16.msra.mxu0 %v16334_v44 }
 0x829   : > { %13611 = vmatpush1.bf16.msra.mxu1 %v16336_v47  ;;  %13526 = vmatprep.subr.bf16.mxu0 %v16343_v48 }
 0x82a   : > { %13612 = vmatprep.subr.bf16.mxu1 %v16345_v49  ;;  %v11737_v49 = vld [vmem:[#allocation2 + $0x20] sm:$0xff] }
 0x82c   : > { %13527 = vmatpush1.bf16.msra.mxu0 %v16342_v56  ;;  %v11745_v56 = vld [vmem:[#allocation2 + $0x60] sm:$0xff] }
 0x82d   : > { %13613 = vmatpush1.bf16.msra.mxu1 %v16344_v57  ;;  %13528 = vmatprep.subr.bf16.mxu0 %v16351_v58 }
 0x82e   : > { %13614 = vmatprep.subr.bf16.mxu1 %v16353_v59 }
 0x830   : > { %13529 = vmatpush1.bf16.msra.mxu0 %v16350_v0 }
 0x831   : > { %13615 = vmatpush1.bf16.msra.mxu1 %v16352_v1  ;;  %13530 = vmatprep.subr.bf16.mxu0 %v16359_v2  ;;  %v11748_v2 = vld [vmem:[#allocation2 + $0x78] sm:$0xff] }
 0x832   : > { %13616 = vmatprep.subr.bf16.mxu1 %v16361_v3 }
 0x834   : > { %13531 = vmatpush1.bf16.msra.mxu0 %v16358_v8 }
 0x835   : > { %13617 = vmatpush1.bf16.msra.mxu1 %v16360_v9  ;;  %13532 = vmatprep.subr.bf16.mxu0 %v16367_v13 }
 0x836   : > { %13618 = vmatprep.subr.bf16.mxu1 %v16369_v16  ;;  %v19139_v16 = vld [vmem:[#allocation10 + $0x40] sm:$0xff] (!%p16378_p13)  }
 0x838   : > { %13533 = vmatpush1.bf16.msra.mxu0 %v16366_v21  ;;  %v19144_v21 = vld [vmem:[#allocation10 + $0xc8] sm:$0xff] (!%p16378_p13)  }
 0x839   : > { %13619 = vmatpush1.bf16.msra.mxu1 %v16368_v22  ;;  %13534 = vmatprep.subr.bf16.mxu0 %v16375_v23  ;;  %v19145_v22 = vld [vmem:[#allocation10 + $0x8] sm:$0xff] (!%p16378_p13)  }
 0x83a   : > { %13620 = vmatprep.subr.bf16.mxu1 %v16377_v24  ;;  %v19146_v23 = vld [vmem:[#allocation10 + $0x88] sm:$0xff] (!%p16378_p13)   ;;  %v19147_v24 = vld [vmem:[#allocation10 + $0x50] sm:$0xff] (!%p16378_p13)  }
 0x83c   : > { %13535 = vmatpush1.bf16.msra.mxu0 %v16374_v25  ;;  %v19148_v25 = vld [vmem:[#allocation10 + $0xd0] sm:$0xff] (!%p16378_p13)  }
 0x83d   : > { %13621 = vmatpush1.bf16.msra.mxu1 %v16376_v26  ;;  %16450 = vmatprep.subr.bf16.mxu0 (!%p16378_p13), %v19139_v16  ;;  %v19149_v26 = vld [vmem:[#allocation10 + $0x10] sm:$0xff] (!%p16378_p13)  }
 0x83e   : > { %16472 = vmatprep.subr.bf16.mxu1 (!%p16378_p13), %v19140_v17 }
 0x83f   : > { %13537 = vmatmul.mubr.bf16.vlgmr.msra.gmra.mrb[8].mxu0 %v21476_v46 }
 0x840   : > { %13623 = vmatmul.mubr.bf16.vlgmr.msra.gmra.mrb[8].mxu1 %v21476_v46  ;;  %16451 = vmatpush3.bf16.msra.mxu0 (!%p16378_p13), %v19141_v18  ;;  %v19173_v18 = vld [vmem:[#allocation10 + $0x100] sm:$0xff] (!%p16378_p13)  }
 0x841   : > { %16473 = vmatpush3.bf16.msra.mxu1 (!%p16378_p13), %v19142_v19  ;;  %16452 = vmatprep.subr.bf16.mxu0 (!%p16378_p13), %v19143_v20 }
 0x842   : > { %16474 = vmatprep.subr.bf16.mxu1 (!%p16378_p13), %v19144_v21  ;;  %v19174_v21 = vld [vmem:[#allocation10 + $0x180] sm:$0xff] (!%p16378_p13)  }
 0x844   : > { %16453 = vmatpush3.bf16.msra.mxu0 (!%p16378_p13), %v19145_v22  ;;  %v19175_v22 = vld [vmem:[#allocation10 + $0x148] sm:$0xff] (!%p16378_p13)  }
 0x845   : > { %16475 = vmatpush3.bf16.msra.mxu1 (!%p16378_p13), %v19146_v23  ;;  %16454 = vmatprep.subr.bf16.mxu0 (!%p16378_p13), %v19147_v24  ;;  %v19176_v23 = vld [vmem:[#allocation10 + $0x1c8] sm:$0xff] (!%p16378_p13)  }
 0x846   : > { %16476 = vmatprep.subr.bf16.mxu1 (!%p16378_p13), %v19148_v25  ;;  %v19177_v24 = vld [vmem:[#allocation10 + $0x108] sm:$0xff] (!%p16378_p13)  }
 0x847   : > { %v19178_v25 = vld [vmem:[#allocation10 + $0x188] sm:$0xff] (!%p16378_p13)  }
 0x848   : > { %16455 = vmatpush3.bf16.msra.mxu0 (!%p16378_p13), %v19149_v26  ;;  %v19179_v26 = vld [vmem:[#allocation10 + $0x150] sm:$0xff] (!%p16378_p13)  }
 0x892   : > { %v13366_v30 = vpop.f32.mrb[4].mxu0  ;;  %v13452_v31 = vpop.f32.mrb[4].mxu1 }
 0x893   : > { %v13633_v34 = vadd.f32 %v13366_v30, %v11733_v50  ;;  %v13635_v35 = vadd.f32 %v13452_v31, %v11735_v27  ;;  %v13368_v36 = vpop.f32.mrb[5].mxu0  ;;  %v13454_v37 = vpop.f32.mrb[5].mxu1  ;;  %v19150_v50 = vld [vmem:[#allocation10 + $0x90] sm:$0xff] (!%p16378_p13)   ;;  %v19151_v27 = vld [vmem:[#allocation10 + $0x58] sm:$0xff] (!%p16378_p13)   ;;  %v19155_v31 = vld [vmem:[#allocation10 + $0x60] sm:$0xff] (!%p16378_p13)  }
 0x894   : > { %v13634_v39 = vadd.f32 %v13368_v36, %v11734_v28  ;;  %v13636_v40 = vadd.f32 %v13454_v37, %v11736_v29  ;;  %v13370_v41 = vpop.f32.mrb[6].mxu0  ;;  %v13456_v51 = vpop.f32.mrb[6].mxu1  ;;  %16477 = vmatpush3.bf16.msra.mxu1 (!%p16378_p13), %v19150_v50  ;;  %v19152_v28 = vld [vmem:[#allocation10 + $0xd8] sm:$0xff] (!%p16378_p13)   ;;  %16456 = vmatprep.subr.bf16.mxu0 (!%p16378_p13), %v19151_v27  ;;  %v19160_v36 = vld [vmem:[#allocation10 + $0xe8] sm:$0xff] (!%p16378_p13)   ;;  %v19180_v50 = vld [vmem:[#allocation10 + $0x1d0] sm:$0xff] (!%p16378_p13)  }
 0x895   : > { %13649 = vst [vmem:[#allocation2] sm:$0xff] %v13633_v34  ;;  %13651 = vst [vmem:[#allocation2 + $0x10] sm:$0xff] %v13635_v35  ;;  %v13641_v46 = vadd.f32 %v13370_v41, %v11741_v32  ;;  %v13643_v42 = vadd.f32 %v13456_v51, %v11743_v33  ;;  %v13372_v43 = vpop.f32.mrb[7].mxu0  ;;  %v13458_v44 = vpop.f32.mrb[7].mxu1  ;;  %v19153_v29 = vld [vmem:[#allocation10 + $0x18] sm:$0xff] (!%p16378_p13)   ;;  %16478 = vmatprep.subr.bf16.mxu1 (!%p16378_p13), %v19152_v28  ;;  %v19156_v32 = vld [vmem:[#allocation10 + $0xe0] sm:$0xff] (!%p16378_p13)  }
 0x896   : > { %13650 = vst [vmem:[#allocation2 + $0x8] sm:$0xff] %v13634_v39  ;;  %13652 = vst [vmem:[#allocation2 + $0x18] sm:$0xff] %v13636_v40  ;;  %v13642_v47 = vadd.f32 %v13372_v43, %v11742_v38  ;;  %v13644_v48 = vadd.f32 %v13458_v44, %v11744_v45  ;;  %v19154_v30 = vld [vmem:[#allocation10 + $0x98] sm:$0xff] (!%p16378_p13)   ;;  %16457 = vmatpush3.bf16.msra.mxu0 (!%p16378_p13), %v19153_v29  ;;  %v19157_v33 = vld [vmem:[#allocation10 + $0x20] sm:$0xff] (!%p16378_p13)  }
 0x897   : > { %13657 = vst [vmem:[#allocation2 + $0x40] sm:$0xff] %v13641_v46  ;;  %13659 = vst [vmem:[#allocation2 + $0x50] sm:$0xff] %v13643_v42  ;;  %16458 = vmatprep.subr.bf16.mxu0 (!%p16378_p13), %v19155_v31  ;;  %v19158_v34 = vld [vmem:[#allocation10 + $0xa0] sm:$0xff] (!%p16378_p13)   ;;  %v19159_v35 = vld [vmem:[#allocation10 + $0x68] sm:$0xff] (!%p16378_p13)  }
 0x898   : > { %13658 = vst [vmem:[#allocation2 + $0x48] sm:$0xff] %v13642_v47  ;;  %13660 = vst [vmem:[#allocation2 + $0x58] sm:$0xff] %v13644_v48  ;;  %16479 = vmatpush3.bf16.msra.mxu1 (!%p16378_p13), %v19154_v30  ;;  %v19161_v37 = vld [vmem:[#allocation10 + $0x28] sm:$0xff] (!%p16378_p13)   ;;  %v19163_v45 = vld [vmem:[#allocation10 + $0x70] sm:$0xff] (!%p16378_p13)  }
 0x899   : > { %16480 = vmatprep.subr.bf16.mxu1 (!%p16378_p13), %v19156_v32  ;;  %v19162_v38 = vld [vmem:[#allocation10 + $0xa8] sm:$0xff] (!%p16378_p13)   ;;  %v19164_v39 = vld [vmem:[#allocation10 + $0xf0] sm:$0xff] (!%p16378_p13)   ;;  %v19167_v51 = vld [vmem:[#allocation10 + $0x78] sm:$0xff] (!%p16378_p13)  }
 0x89a   : > { %16459 = vmatpush3.bf16.msra.mxu0 (!%p16378_p13), %v19157_v33  ;;  %v19165_v40 = vld [vmem:[#allocation10 + $0x30] sm:$0xff] (!%p16378_p13)   ;;  %v19168_v46 = vld [vmem:[#allocation10 + $0xf8] sm:$0xff] (!%p16378_p13)   ;;  %v19187_v33 = vld [vmem:[#allocation10 + $0x160] sm:$0xff] (!%p16378_p13)  }
 0x89b   : > { %16460 = vmatprep.subr.bf16.mxu0 (!%p16378_p13), %v19159_v35  ;;  %v19166_v41 = vld [vmem:[#allocation10 + $0xb0] sm:$0xff] (!%p16378_p13)   ;;  %v19169_v42 = vld [vmem:[#allocation10 + $0x38] sm:$0xff] (!%p16378_p13)   ;;  %v19189_v35 = vld [vmem:[#allocation10 + $0x120] sm:$0xff] (!%p16378_p13)  }
 0x89c   : > { %16481 = vmatpush3.bf16.msra.mxu1 (!%p16378_p13), %v19158_v34  ;;  %v19170_v43 = vld [vmem:[#allocation10 + $0xb8] sm:$0xff] (!%p16378_p13)   ;;  %v19181_v27 = vld [vmem:[#allocation10 + $0x110] sm:$0xff] (!%p16378_p13)   ;;  %v19188_v34 = vld [vmem:[#allocation10 + $0x1e0] sm:$0xff] (!%p16378_p13)  }
 0x89d   : > { %16482 = vmatprep.subr.bf16.mxu1 (!%p16378_p13), %v19160_v36  ;;  %v13670_v44 = vld [vmem:[#allocation2 + $0x8] sm:$0xff] (!%p16378_p13)  ;;  %v19182_v28 = vld [vmem:[#allocation10 + $0x190] sm:$0xff] (!%p16378_p13)   ;;  %v19190_v36 = vld [vmem:[#allocation10 + $0x1a0] sm:$0xff] (!%p16378_p13)  }
 0x89e   : > { %16461 = vmatpush3.bf16.msra.mxu0 (!%p16378_p13), %v19161_v37  ;;  %v21686_v48 = vld [vmem:[#allocation8] sm:$0xff] (!%p16378_p13)  ;;  %v19191_v37 = vld [vmem:[#allocation10 + $0x168] sm:$0xff] (!%p16378_p13)  }
 0x89f   : > { %16462 = vmatprep.subr.bf16.mxu0 (!%p16378_p13), %v19163_v45  ;;  %v13678_v47 = vld [vmem:[#allocation2 + $0x48] sm:$0xff] (!%p16378_p13)  ;;  %v19193_v45 = vld [vmem:[#allocation10 + $0x128] sm:$0xff] (!%p16378_p13)  }
 0x8a0   : > { %16483 = vmatpush3.bf16.msra.mxu1 (!%p16378_p13), %v19162_v38  ;;  %v19183_v29 = vld [vmem:[#allocation10 + $0x158] sm:$0xff] (!%p16378_p13)   ;;  %v19192_v38 = vld [vmem:[#allocation10 + $0x1e8] sm:$0xff] (!%p16378_p13)  }
 0x8a1   : > { %16484 = vmatprep.subr.bf16.mxu1 (!%p16378_p13), %v19164_v39  ;;  %v19184_v30 = vld [vmem:[#allocation10 + $0x1d8] sm:$0xff] (!%p16378_p13)   ;;  %v19194_v39 = vld [vmem:[#allocation10 + $0x1a8] sm:$0xff] (!%p16378_p13)  }
 0x8a2   : > { %16463 = vmatpush3.bf16.msra.mxu0 (!%p16378_p13), %v19165_v40  ;;  %v19185_v31 = vld [vmem:[#allocation10 + $0x118] sm:$0xff] (!%p16378_p13)   ;;  %v13709_v40 = vsub.s32 (!%p16378_p13), 5, %v21458_v10 }
 0x8a3   : > { %16464 = vmatprep.subr.bf16.mxu0 (!%p16378_p13), %v19167_v51  ;;  %v19186_v32 = vld [vmem:[#allocation10 + $0x198] sm:$0xff] (!%p16378_p13)   ;;  %v13717_v51 = vsub.s32 (!%p16378_p13), 7, %v21458_v10 }
 0x8a4   : > { %16485 = vmatpush3.bf16.msra.mxu1 (!%p16378_p13), %v19166_v41  ;;  %v19195_v41 = vld [vmem:[#allocation10 + $0x170] sm:$0xff] (!%p16378_p13)  }
 0x8a5   : > { %16486 = vmatprep.subr.bf16.mxu1 (!%p16378_p13), %v19168_v46  ;;  %v19196_v46 = vld [vmem:[#allocation10 + $0x1f0] sm:$0xff] (!%p16378_p13)  }
 0x8a6   : > { %16465 = vmatpush3.bf16.msra.mxu0 (!%p16378_p13), %v19169_v42  ;;  %v13705_v42 = vsub.s32 (!%p16378_p13), 4, %v21458_v10 }
 0x8a8   : > { %16487 = vmatpush3.bf16.msra.mxu1 (!%p16378_p13), %v19170_v43  ;;  %v19197_v43 = vld [vmem:[#allocation10 + $0x130] sm:$0xff] (!%p16378_p13)  }
 0x912   : > { %v13538_v54 = vpop.f32.mrb[8].mxu0 }
 0x913   : > { %v13637_v57 = vadd.f32 %v13538_v54, %v11737_v49  ;;  %v13624_v58 = vpop.f32.mrb[8].mxu1  ;;  %v13540_v59 = vpop.f32.mrb[9].mxu0  ;;  %13668 = sbr.rel (%p16378_p13) target bundleno = 2588 (0xa1c), region = 80  ;;  %v13694_v49 = vrot.slane (!%p16378_p13), %v21686_v48, %v1968_v14  ;;  %v13702_v54 = vrot.slane (!%p16378_p13), %v21686_v48, %v1976_v15 }
 0x914   : > { %v13639_v62 = vadd.f32 %v13624_v58, %v11739_v52  ;;  %v13638_v63 = vadd.f32 %v13540_v59, %v11738_v53  ;;  %v13626_v0 = vpop.f32.mrb[9].mxu1  ;;  %v13542_v1 = vpop.f32.mrb[10].mxu0  ;;  %v13672_v52 = vld [vmem:[#allocation2 + $0x18] sm:$0xff] (!%p16378_p13)  ;;  %v13677_v58 = vld [vmem:[#allocation2 + $0x40] sm:$0xff] (!%p16378_p13)  ;;  %v13671_v59 = vld [vmem:[#allocation2 + $0x10] sm:$0xff] (!%p16378_p13) }
 0x915   : > { %13653 = vst [vmem:[#allocation2 + $0x20] sm:$0xff] %v13637_v57  ;;  %v13640_v3 = vadd.f32 %v13626_v0, %v11740_v55  ;;  %v13645_v4 = vadd.f32 %v13542_v1, %v11745_v56  ;;  %v13628_v5 = vpop.f32.mrb[10].mxu1  ;;  %v13544_v6 = vpop.f32.mrb[11].mxu0  ;;  %v13680_v53 = vld [vmem:[#allocation2 + $0x58] sm:$0xff] (!%p16378_p13)  ;;  %v13669_v55 = vld [vmem:[#allocation2] sm:$0xff] (!%p16378_p13)  ;;  %v13690_v56 = vrot.slane (!%p16378_p13), %v21686_v48, %v1964_v11  ;;  %v13698_v57 = vrot.slane (!%p16378_p13), %v21686_v48, %v1972_v12  ;;  %v19171_v0 = vld [vmem:[#allocation10 + $0x140] sm:$0xff] (!%p16378_p13)  }
 0x916   : > { %13655 = vst [vmem:[#allocation2 + $0x30] sm:$0xff] %v13639_v62  ;;  %13654 = vst [vmem:[#allocation2 + $0x28] sm:$0xff] %v13638_v63  ;;  %v13647_v7 = vadd.f32 %v13628_v5, %v11747_v60  ;;  %v13646_v8 = vadd.f32 %v13544_v6, %v11746_v61  ;;  %v13630_v9 = vpop.f32.mrb[11].mxu1  ;;  %v13679_v60 = vld [vmem:[#allocation2 + $0x50] sm:$0xff] (!%p16378_p13)  ;;  %v13728_v61 = vadd.f32 (!%p16378_p13), %v13694_v49, %v13670_v44  ;;  %16494 = vmatprep.subr.bf16.mxu0 (!%p16378_p13), %v19171_v0 }
 0x917   : > { %13656 = vst [vmem:[#allocation2 + $0x38] sm:$0xff] %v13640_v3  ;;  %13661 = vst [vmem:[#allocation2 + $0x60] sm:$0xff] %v13645_v4  ;;  %v13648_v13 = vadd.f32 %v13630_v9, %v11748_v2  ;;  %v13736_v14 = vadd.f32 (!%p16378_p13), %v13694_v49, %v13678_v47  ;;  %v13730_v62 = vadd.f32 (!%p16378_p13), %v13702_v54, %v13672_v52  ;;  %v19172_v4 = vld [vmem:[#allocation10 + $0x1c0] sm:$0xff] (!%p16378_p13)   ;;  %v13713_v44 = vsub.s32 (!%p16378_p13), 6, %v21458_v10  ;;  %v19198_v47 = vld [vmem:[#allocation10 + $0x1b0] sm:$0xff] (!%p16378_p13)  }
 0x918   : > { %13663 = vst [vmem:[#allocation2 + $0x70] sm:$0xff] %v13647_v7  ;;  %13662 = vst [vmem:[#allocation2 + $0x68] sm:$0xff] %v13646_v8  ;;  %v13738_v63 = vadd.f32 (!%p16378_p13), %v13702_v54, %v13680_v53  ;;  %v13727_v1 = vadd.f32 (!%p16378_p13), %v13690_v56, %v13669_v55  ;;  %v13735_v2 = vadd.f32 (!%p16378_p13), %v13690_v56, %v13677_v58  ;;  %v13744_v5 = vmax.f32 (!%p16378_p13), %v13728_v61, 0.0  ;;  %v19199_v49 = vld [vmem:[#allocation10 + $0x178] sm:$0xff] (!%p16378_p13)  }
 0x919   : > { %13664 = vst [vmem:[#allocation2 + $0x78] sm:$0xff] %v13648_v13  ;;  %v13729_v15 = vadd.f32 (!%p16378_p13), %v13698_v57, %v13671_v59  ;;  %v13737_v3 = vadd.f32 (!%p16378_p13), %v13698_v57, %v13679_v60  ;;  %v13752_v6 = vmax.f32 (!%p16378_p13), %v13736_v14, 0.0  ;;  %v13746_v11 = vmax.f32 (!%p16378_p13), %v13730_v62, 0.0  ;;  %16516 = vmatprep.subr.bf16.mxu1 (!%p16378_p13), %v19172_v4  ;;  %v19200_v53 = vld [vmem:[#allocation10 + $0x1f8] sm:$0xff] (!%p16378_p13)  }
 0x91a   : > { %v13754_v7 = vmax.f32 %v13738_v63, 0.0  ;;  %v13743_v8 = vmax.f32 %v13727_v1, 0.0  ;;  %v13751_v12 = vmax.f32 %v13735_v2, 0.0  ;;  %v13710_v52 = vrot.slane %v21686_v48, %v13709_v40  ;;  %v19201_v56 = vld [vmem:[#allocation10 + $0x138] sm:$0xff]  }
 0x91b   : > { %v13745_v9 = vmax.f32 %v13729_v15, 0.0  ;;  %v13753_v13 = vmax.f32 %v13737_v3, 0.0  ;;  %v13760_v16 = vpack.c.bf16 %v13752_v6, %v13744_v5  ;;  %v13718_v54 = vrot.slane %v21686_v48, %v13717_v51  ;;  %v19202_v58 = vld [vmem:[#allocation10 + $0x1b8] sm:$0xff]  }
 0x91c   : > { %v13762_v17 = vpack.c.bf16 %v13754_v7, %v13746_v11  ;;  %v13759_v19 = vpack.c.bf16 %v13751_v12, %v13743_v8  ;;  %v13706_v55 = vrot.slane %v21686_v48, %v13705_v42  ;;  %v13714_v57 = vrot.slane %v21686_v48, %v13713_v44  ;;  %v13673_v63 = vld [vmem:[#allocation2 + $0x20] sm:$0xff] }
 0x91d   : > { %v13761_v20 = vpack.c.bf16 %v13753_v13, %v13745_v9  ;;  %14318 = vmatprep.mubr.bf16.mxu0 %v13760_v16  ;;  %v13674_v10 = vld [vmem:[#allocation2 + $0x28] sm:$0xff]  ;;  %v13675_v3 = vld [vmem:[#allocation2 + $0x30] sm:$0xff] }
 0x91e   : > { %14359 = vmatprep.mubr.bf16.mxu1 %v13762_v17  ;;  %14319 = vmatmul.mubr.bf16.vlgmr.msra.gmra.mrb[0].mxu0 %v13759_v19  ;;  %v13732_v60 = vadd.f32 %v13710_v52, %v13674_v10  ;;  %v13676_v14 = vld [vmem:[#allocation2 + $0x38] sm:$0xff]  ;;  %v13681_v2 = vld [vmem:[#allocation2 + $0x60] sm:$0xff]  ;;  %v13731_v15 = vadd.f32 %v13706_v55, %v13673_v63  ;;  %v13733_v11 = vadd.f32 %v13714_v57, %v13675_v3 }
 0x91f   : > { %14360 = vmatmul.mubr.bf16.vlgmr.msra.gmra.mrb[0].mxu1 %v13761_v20  ;;  %16495 = vmatpush3.bf16.msra.mxu0 %v19173_v18  ;;  %v13682_v59 = vld [vmem:[#allocation2 + $0x68] sm:$0xff]  ;;  %v13734_v0 = vadd.f32 %v13718_v54, %v13676_v14  ;;  %v13683_v4 = vld [vmem:[#allocation2 + $0x70] sm:$0xff]  ;;  %v13739_v6 = vadd.f32 %v13706_v55, %v13681_v2 }
 0x920   : > { %16517 = vmatpush3.bf16.msra.mxu1 %v19174_v21  ;;  %16496 = vmatprep.subr.bf16.mxu0 %v19175_v22  ;;  %v13740_v61 = vadd.f32 %v13710_v52, %v13682_v59  ;;  %v13684_v62 = vld [vmem:[#allocation2 + $0x78] sm:$0xff]  ;;  %v13748_v5 = vmax.f32 %v13732_v60, 0.0  ;;  %v13747_v12 = vmax.f32 %v13731_v15, 0.0  ;;  %v13741_v9 = vadd.f32 %v13714_v57, %v13683_v4 }
 0x921   : > { %16518 = vmatprep.subr.bf16.mxu1 %v19176_v23  ;;  %v13742_v1 = vadd.f32 %v13718_v54, %v13684_v62  ;;  %v13750_v7 = vmax.f32 %v13734_v0, 0.0  ;;  %v13755_v16 = vmax.f32 %v13739_v6, 0.0  ;;  %v13749_v17 = vmax.f32 %v13733_v11, 0.0 }
 0x922   : > { %v13756_v48 = vmax.f32 %v13740_v61, 0.0  ;;  %v13757_v19 = vmax.f32 %v13741_v9, 0.0 }
 0x923   : > { %16497 = vmatpush3.bf16.msra.mxu0 %v19177_v24  ;;  %v13758_v8 = vmax.f32 %v13742_v1, 0.0  ;;  %v13763_v20 = vpack.c.bf16 %v13755_v16, %v13747_v12  ;;  %v16379_v24 = vld [vmem:[#allocation11] ss:$0 sm:$0xff] }
 0x924   : > { %16519 = vmatpush3.bf16.msra.mxu1 %v19178_v25  ;;  %16498 = vmatprep.subr.bf16.mxu0 %v19179_v26  ;;  %v13764_v13 = vpack.c.bf16 %v13756_v48, %v13748_v5  ;;  %v13765_v21 = vpack.c.bf16 %v13757_v19, %v13749_v17 }
 0x925   : > { %16520 = vmatprep.subr.bf16.mxu1 %v19180_v50  ;;  %v13766_v18 = vpack.c.bf16 %v13758_v8, %v13750_v7 }
 0x926   : > { %14400 = vmatprep.mubr.bf16.mxu0 %v13764_v13 }
 0x927   : > { %16499 = vmatpush3.bf16.msra.mxu0 %v19181_v27  ;;  %14441 = vmatprep.mubr.bf16.mxu1 %v13766_v18 }
 0x928   : > { %16521 = vmatpush3.bf16.msra.mxu1 %v19182_v28  ;;  %16500 = vmatprep.subr.bf16.mxu0 %v19183_v29 }
 0x929   : > { %16522 = vmatprep.subr.bf16.mxu1 %v19184_v30 }
 0x92b   : > { %16501 = vmatpush3.bf16.msra.mxu0 %v19185_v31 }
 0x92c   : > { %16523 = vmatpush3.bf16.msra.mxu1 %v19186_v32  ;;  %16502 = vmatprep.subr.bf16.mxu0 %v19187_v33 }
 0x92d   : > { %16524 = vmatprep.subr.bf16.mxu1 %v19188_v34 }
 0x92f   : > { %16503 = vmatpush3.bf16.msra.mxu0 %v19189_v35 }
 0x930   : > { %16525 = vmatpush3.bf16.msra.mxu1 %v19190_v36  ;;  %16504 = vmatprep.subr.bf16.mxu0 %v19191_v37 }
 0x931   : > { %16526 = vmatprep.subr.bf16.mxu1 %v19192_v38 }
 0x933   : > { %16505 = vmatpush3.bf16.msra.mxu0 %v19193_v45 }
 0x934   : > { %16527 = vmatpush3.bf16.msra.mxu1 %v19194_v39  ;;  %16506 = vmatprep.subr.bf16.mxu0 %v19195_v41 }
 0x935   : > { %16528 = vmatprep.subr.bf16.mxu1 %v19196_v46 }
 0x937   : > { %16507 = vmatpush3.bf16.msra.mxu0 %v19197_v43 }
 0x938   : > { %16529 = vmatpush3.bf16.msra.mxu1 %v19198_v47  ;;  %16508 = vmatprep.subr.bf16.mxu0 %v19199_v49 }
 0x939   : > { %16530 = vmatprep.subr.bf16.mxu1 %v19200_v53 }
 0x93b   : > { %16509 = vmatpush3.bf16.msra.mxu0 %v19201_v56 }
 0x93c   : > { %16531 = vmatpush3.bf16.msra.mxu1 %v19202_v58 }
 0x93e   : > { %14401 = vmatmul.mubr.bf16.vlgmr.msra.gmra.mrb[4].mxu0 %v13763_v20 }
 0x93f   : > { %14442 = vmatmul.mubr.bf16.vlgmr.msra.gmra.mrb[4].mxu1 %v13765_v21 }
 0x9f1   : > { %v16466_v22 = vpop.f32.mrb[0].mxu0 }
 0x9f2   : > { %v16488_v23 = vpop.f32.mrb[0].mxu1  ;;  %v16467_v25 = vpop.f32.mrb[1].mxu0 }
 0x9f3   : > { %v16489_v26 = vpop.f32.mrb[1].mxu1  ;;  %v16468_v50 = vadd.f32 %v16467_v25, %v16466_v22  ;;  %v16469_v28 = vpop.f32.mrb[2].mxu0 }
 0x9f4   : > { %v16490_v27 = vadd.f32 %v16489_v26, %v16488_v23  ;;  %v16491_v29 = vpop.f32.mrb[2].mxu1  ;;  %v16470_v30 = vpop.f32.mrb[3].mxu0 }
 0x9f5   : > { %v16492_v31 = vpop.f32.mrb[3].mxu1  ;;  %v14321_v32 = vadd.f32 %v16468_v50, %v16379_v24  ;;  %v16471_v33 = vadd.f32 %v16470_v30, %v16469_v28 }
 0x9f6   : > { %v16493_v34 = vadd.f32 %v16492_v31, %v16491_v29 }
 0x9f7   : > { %v14362_v35 = vadd.f32 %v16490_v27, %v14321_v32  ;;  %v14324_v36 = vadd.f32 %v16471_v33, %v16379_v24 }
 0x9f9   : > { %v14365_v37 = vadd.f32 %v16493_v34, %v14324_v36 }
 0xa11   : > { %v16510_v38 = vpop.f32.mrb[4].mxu0 }
 0xa12   : > { %v16532_v45 = vpop.f32.mrb[4].mxu1  ;;  %v16511_v39 = vpop.f32.mrb[5].mxu0 }
 0xa13   : > { %v16512_v40 = vadd.f32 %v16511_v39, %v16510_v38  ;;  %v16533_v41 = vpop.f32.mrb[5].mxu1  ;;  %v16513_v51 = vpop.f32.mrb[6].mxu0 }
 0xa14   : > { %v16534_v46 = vadd.f32 %v16533_v41, %v16532_v45  ;;  %v16535_v42 = vpop.f32.mrb[6].mxu1  ;;  %v16514_v43 = vpop.f32.mrb[7].mxu0 }
 0xa15   : > { %v14403_v44 = vadd.f32 %v16512_v40, %v14362_v35  ;;  %v16515_v47 = vadd.f32 %v16514_v43, %v16513_v51  ;;  %v16536_v49 = vpop.f32.mrb[7].mxu1 }
 0xa16   : > { %v16537_v52 = vadd.f32 %v16536_v49, %v16535_v42 }
 0xa17   : > { %v14444_v53 = vadd.f32 %v16534_v46, %v14403_v44  ;;  %v14406_v54 = vadd.f32 %v16515_v47, %v14365_v37 }
 0xa19   : > { %14450 = vst [vmem:[%s21734_s7] sm:$0xff] %v14444_v53  ;;  %v14447_v55 = vadd.f32 %v16537_v52, %v14406_v54 }
 0xa1b   : > { %14451 = vst [vmem:[%s21734_s7 + $0x8] sm:$0xff] %v14447_v55 }
 0xa1c PF: > { %s21778_s27 = sld [smem:[#allocation18_spill]]  ;;  %s21779_s9 = sld [smem:[#allocation17_spill]] }
 0xa1d   : > { %s21780_s26 = sld [smem:[#allocation19_spill]]  ;;  %s21781_s24 = smov %s19415_s25 }
 0xa22   : > { %p22_p8 = scmp.ge.s32.totalorder %s21778_s27, 8   ;;  %s21782_s25 = smov %s21779_s9 }
 0xa24   :  { %24 = sbr.rel (!%p22_p8) target bundleno = 10 (0xa), region = 128 }
 0xa2b   :  { %14463 = vsyncpa [#allocation4], 1 }
 0xa2c   :  { %14465 = vsyncpa [#allocation4 + $0x1], 1 }
 0xa2d   :  { %14466 = vsyncpa [#allocation6], 1 }
 0xa2e   :  { %14468 = vsyncpa [#allocation6 + $0x1], 1 }
 0xa2f   :  { %14469 = vsyncpa [#allocation9], 1 }
 0xa30   :  { %14470 = vsyncpa [#allocation12], 1 }

</bundles_post_ra>
